<compile_context>
chip_gen: v7x
topology: tpu7x:2x2x1
jax: 0.10.0
libtpu: 0.0.40
codegen_flags: <defaults>
</compile_context>

<pallas_src>
import jax
import jax.numpy as jnp
from jax.experimental import pallas as pl
from jax.experimental.pallas import tpu as pltpu


def all_old_kernel(raw_x_ref, mask_ref, fp_ref,
                   w_renc_ref, w_tenc_ref,
                   w1_ref, b1_ref, w2_ref, b2_ref, w3_ref, b3_ref,
                   wc1_t_ref, wc1_r_ref, wc1_fp_ref, bc1_ref,
                   wc2_ref, bc2_ref,
                   y_ref):
    f32 = jnp.float32
    bf16 = jnp.bfloat16

    Bb, A, Fr = raw_x_ref.shape
    C = mask_ref.shape[1]
    H = w_renc_ref.shape[1]

    # --- GATencoder_raw stub: one MXU-filling 2-D matmul over (Bb*A) rows ---
    # TODO(synk): real GAT/GRU message passing not available in source.
    raw_x2 = raw_x_ref[...].reshape(Bb * A, Fr)                      # bf16
    raw_h2 = jnp.maximum(
        jnp.dot(raw_x2, w_renc_ref[...], preferred_element_type=f32), 0.0)
    raw_h = raw_h2.reshape(Bb, A, H)                                 # [Bb,A,H]
    x_r = jnp.mean(raw_h, axis=1)                                    # [Bb, H]

    # --- test_(): clique aggregation, unrolled over the (small) clique dim.
    # No [Bb, C, A, H] broadcast temp: each step is a [Bb, A, H] weighted
    # multiply + sublane reduction over atoms -> [Bb, H].
    mask = mask_ref[...].astype(f32)                                 # [Bb,C,A]
    clique_rows = []
    for c in range(C):
        w_c = mask[:, c, :]                                          # [Bb, A]
        clique_rows.append(jnp.sum(w_c[:, :, None] * raw_h, axis=1))  # [Bb, H]
    # Stack along rows (clique-major) -> single 2-D matmul for the encoder.
    clique_h2 = jnp.concatenate(clique_rows, axis=0)                 # [C*Bb,H]

    # --- GATencoder (tree) stub: 2-D matmul + ReLU + mean readout ---
    # TODO(synk): real tree GAT/GRU not available in source.
    tree_h2 = jnp.maximum(
        jnp.dot(clique_h2.astype(bf16), w_tenc_ref[...],
                preferred_element_type=f32), 0.0)                    # [C*Bb,H]
    # mean over cliques (order-invariant, so clique-major stacking is fine)
    x_t = jnp.mean(tree_h2.reshape(C, Bb, H), axis=0)                # [Bb, H]

    # --- dnn_ecfp: 512 -> 256 -> 128 -> H, dropout=identity (eval) ---
    fp = fp_ref[...]                                                 # bf16
    h1 = jnp.maximum(
        jnp.dot(fp, w1_ref[...], preferred_element_type=f32) + b1_ref[...],
        0.0)
    h2 = jnp.maximum(
        jnp.dot(h1.astype(bf16), w2_ref[...],
                preferred_element_type=f32) + b2_ref[...], 0.0)
    x_fp = jnp.dot(h2.astype(bf16), w3_ref[...],
                   preferred_element_type=f32) + b3_ref[...]         # [Bb, H]

    # --- classify: concat eliminated -> sum of three [H,32] dots ---
    hc = jnp.maximum(
        jnp.dot(x_t.astype(bf16), wc1_t_ref[...], preferred_element_type=f32)
        + jnp.dot(x_r.astype(bf16), wc1_r_ref[...], preferred_element_type=f32)
        + jnp.dot(x_fp.astype(bf16), wc1_fp_ref[...], preferred_element_type=f32)
        + bc1_ref[...], 0.0)                                         # [Bb, 32]

    # Lane-dense (128-wide) padded output; real columns sliced in the wrapper.
    y_ref[...] = (jnp.dot(hc.astype(bf16), wc2_ref[...],
                          preferred_element_type=f32) + bc2_ref[...])


def _round_up(x, m):
    return (x + m - 1) // m * m


def all_old_forward(raw_x, clique_mask, fp, params, *, b_blk=None,
                    vmem_limit_bytes=None):
    B, A, Fr = raw_x.shape
    C = clique_mask.shape[1]
    H = params['w_renc'].shape[1]
    n_out = params['wc2'].shape[1]
    OUT_PAD = 128

    # Batch block: default 256 (fills the 256-row MXU on v6e/v7x, amortizes the
    # ~0.35 us per-grid-step overhead). Keep >= 2 grid steps when the batch is
    # big enough so v7x's two TensorCores both get a share of the "parallel"
    # axis. Multiple of 8 (sublane).
    if b_blk is None:
        b_blk = 256
        half = _round_up((B + 1) // 2, 8)
        b_blk = min(b_blk, max(8, half))
    b_blk = max(8, _round_up(b_blk, 8))
    B_pad = _round_up(B, b_blk)

    # VMEM budget: derive from physical VMEM (64 MiB per TC on v7x, 128 MiB on
    # v5e/v6e), leaving headroom for compiler-internal scratch.
    if vmem_limit_bytes is None:
        try:
            phys = pltpu.get_tpu_info().vmem_capacity_bytes
        except Exception:
            phys = 64 * 1024 * 1024          # assume the smallest (v7x)
        vmem_limit_bytes = min(max(phys - 16 * 1024 * 1024,
                                   32 * 1024 * 1024),
                               96 * 1024 * 1024)

    bf16, f32 = jnp.bfloat16, jnp.float32

    # Streamed activations in bf16 (halves per-step DMA + input VMEM).
    # mask and fp are {0,1} -> exact; raw_x was already fed to bf16 matmuls.
    raw_x = raw_x.astype(bf16)
    clique_mask = clique_mask.astype(bf16)
    fp = fp.astype(bf16)

    pad = B_pad - B
    if pad:
        raw_x = jnp.pad(raw_x, ((0, pad), (0, 0), (0, 0)))
        clique_mask = jnp.pad(clique_mask, ((0, pad), (0, 0), (0, 0)))
        fp = jnp.pad(fp, ((0, pad), (0, 0)))

    # bf16 matmul operands (f32 accumulate in-kernel); biases stay f32.
    w_renc = params['w_renc'].astype(bf16)
    w_tenc = params['w_tenc'].astype(bf16)
    w1, b1 = params['w1'].astype(bf16), params['b1'].astype(f32)
    w2, b2 = params['w2'].astype(bf16), params['b2'].astype(f32)
    w3, b3 = params['w3'].astype(bf16), params['b3'].astype(f32)
    wc1 = params['wc1']
    wc1_t = wc1[:H].astype(bf16)
    wc1_r = wc1[H:2 * H].astype(bf16)
    wc1_fp = wc1[2 * H:].astype(bf16)
    bc1 = params['bc1'].astype(f32)
    # Pad the classifier head to 128 lane-dense output columns.
    wc2 = jnp.zeros((wc1.shape[1], OUT_PAD), bf16).at[:, :n_out].set(
        params['wc2'].astype(bf16))
    bc2 = jnp.zeros((1, OUT_PAD), f32).at[:, :n_out].set(
        params['bc2'].astype(f32))

    args = (raw_x, clique_mask, fp,
            w_renc, w_tenc, w1, b1, w2, b2, w3, b3,
            wc1_t, wc1_r, wc1_fp, bc1, wc2, bc2)

    def batch_spec(shape):
        nd = len(shape)
        return pl.BlockSpec((b_blk,) + tuple(shape[1:]),
                            lambda i, _nd=nd: (i,) + (0,) * (_nd - 1))

    def resident_spec(shape, single_buffer):
        nd = len(shape)
        if single_buffer:
            # Constant block index -> DMA'd once; single-buffer to save VMEM.
            return pl.BlockSpec(shape, lambda i, _nd=nd: (0,) * _nd,
                                pipeline_mode=pl.Buffered(1))
        return pl.BlockSpec(shape, lambda i, _nd=nd: (0,) * _nd)

    per_sample_flops = 2 * (A * Fr * H + C * A * H + C * H * H
                            + 512 * 256 + 256 * 128 + 128 * H
                            + 3 * H * 32 + 32 * OUT_PAD)
    weight_bytes = sum(int(a.size) * a.dtype.itemsize for a in args[3:])
    act_bytes = 2 * (raw_x.size + clique_mask.size + fp.size) \
        + 4 * B_pad * OUT_PAD
    cost = pl.CostEstimate(flops=int(per_sample_flops * B_pad),
                           transcendentals=0,
                           bytes_accessed=int(weight_bytes + act_bytes))

    def build(single_buffer_weights):
        in_specs = ([batch_spec(raw_x.shape), batch_spec(clique_mask.shape),
                     batch_spec(fp.shape)]
                    + [resident_spec(a.shape, single_buffer_weights)
                       for a in args[3:]])
        out_specs = pl.BlockSpec((b_blk, OUT_PAD), lambda i: (i, 0))
        return pl.pallas_call(
            all_old_kernel,
            out_shape=jax.ShapeDtypeStruct((B_pad, OUT_PAD), jnp.float32),
            grid=(B_pad // b_blk,),
            in_specs=in_specs,
            out_specs=out_specs,
            compiler_params=pltpu.CompilerParams(
                dimension_semantics=("parallel",),
                vmem_limit_bytes=int(vmem_limit_bytes)),
            cost_estimate=cost,
        )

    try:
        y_pad = build(True)(*args)
    except Exception:
        # pipeline_mode=pl.Buffered(1) not honored on this jax version/path;
        # fall back to default double-buffered weights (semantics identical).
        y_pad = build(False)(*args)
    return y_pad[:B, :n_out]


def all_old_reference(raw_x, clique_mask, fp, params):
    """Pure-JAX reference of the same (stubbed) forward pass, f32."""
    relu = lambda v: jnp.maximum(v, 0.0)
    raw_h = relu(jnp.einsum('baf,fh->bah', raw_x, params['w_renc']))
    x_r = raw_h.mean(axis=1)
    clique_h = jnp.einsum('bca,bah->bch', clique_mask, raw_h)
    tree_h = relu(jnp.einsum('bch,hk->bck', clique_h, params['w_tenc']))
    x_t = tree_h.mean(axis=1)
    h1 = relu(fp @ params['w1'] + params['b1'])
    h2 = relu(h1 @ params['w2'] + params['b2'])
    x_fp = h2 @ params['w3'] + params['b3']
    x = jnp.concatenate([x_t, x_r, x_fp], axis=-1)
    hc = relu(x @ params['wc1'] + params['bc1'])
    return hc @ params['wc2'] + params['bc2']


def make_params(key, hidden=32, fr=32, nums_task=3):
    ks = jax.random.split(key, 16)
    s = 0.05
    return {
        'w_renc': jax.random.normal(ks[0], (fr, hidden), jnp.float32) * s,
        'w_tenc': jax.random.normal(ks[1], (hidden, hidden), jnp.float32) * s,
        # dnn_ecfp: 512 -> 256 -> 128 -> hidden
        'w1': jax.random.normal(ks[2], (512, 256), jnp.float32) * s,
        'b1': jax.random.normal(ks[3], (1, 256), jnp.float32) * s,
        'w2': jax.random.normal(ks[4], (256, 128), jnp.float32) * s,
        'b2': jax.random.normal(ks[5], (1, 128), jnp.float32) * s,
        'w3': jax.random.normal(ks[6], (128, hidden), jnp.float32) * s,
        'b3': jax.random.normal(ks[7], (1, hidden), jnp.float32) * s,
        # classify: 3*hidden -> 32 -> 2*nums_task
        'wc1': jax.random.normal(ks[8], (3 * hidden, 32), jnp.float32) * s,
        'bc1': jax.random.normal(ks[9], (1, 32), jnp.float32) * s,
        'wc2': jax.random.normal(ks[10], (32, 2 * nums_task), jnp.float32) * s,
        'bc2': jax.random.normal(ks[11], (1, 2 * nums_task), jnp.float32) * s,
    }


if __name__ == "__main__":
    key = jax.random.PRNGKey(0)
    k_x, k_m, k_fp, k_p = jax.random.split(key, 4)

    B, A, Fr, C, H, NT = 2, 16, 32, 8, 32, 3

    # raw atom features per molecule
    raw_x = jax.random.normal(k_x, (B, A, Fr), jnp.float32)
    # clique membership mask (1.0 where atom a belongs to clique c)
    clique_mask = jax.random.bernoulli(k_m, 0.3, (B, C, A)).astype(jnp.float32)
    # ECFP fingerprint (512-bit, as floats)
    fp = jax.random.bernoulli(k_fp, 0.1, (B, 512)).astype(jnp.float32)

    params = make_params(k_p, hidden=H, fr=Fr, nums_task=NT)

    y = all_old_forward(raw_x, clique_mask, fp, params)
    jax.block_until_ready(y)
    assert y.shape == (B, 2 * NT), y.shape

    # Loose check vs pure-JAX reference (kernel uses bf16 matmul operands).
    y_ref = all_old_reference(raw_x, clique_mask, fp, params)
    max_err = float(jnp.max(jnp.abs(y - y_ref)))
    assert max_err < 5e-2, f"max abs error {max_err}"

    print("KERNEL_OK")
</pallas_src>

<mosaic_0001>
module attributes {stable_mosaic.version = 11 : i64} {
  func.func @all_old_kernel(%arg0: i32, %arg1: memref<8x16x32xbf16, #tpu.memory_space<vmem>>, %arg2: memref<8x8x16xbf16, #tpu.memory_space<vmem>>, %arg3: memref<8x512xbf16, #tpu.memory_space<vmem>>, %arg4: memref<32x32xbf16, #tpu.memory_space<vmem>>, %arg5: memref<32x32xbf16, #tpu.memory_space<vmem>>, %arg6: memref<512x256xbf16, #tpu.memory_space<vmem>>, %arg7: memref<1x256xf32, #tpu.memory_space<vmem>>, %arg8: memref<256x128xbf16, #tpu.memory_space<vmem>>, %arg9: memref<1x128xf32, #tpu.memory_space<vmem>>, %arg10: memref<128x32xbf16, #tpu.memory_space<vmem>>, %arg11: memref<1x32xf32, #tpu.memory_space<vmem>>, %arg12: memref<32x32xbf16, #tpu.memory_space<vmem>>, %arg13: memref<32x32xbf16, #tpu.memory_space<vmem>>, %arg14: memref<32x32xbf16, #tpu.memory_space<vmem>>, %arg15: memref<1x32xf32, #tpu.memory_space<vmem>>, %arg16: memref<32x128xbf16, #tpu.memory_space<vmem>>, %arg17: memref<1x128xf32, #tpu.memory_space<vmem>>, %arg18: memref<8x128xf32, #tpu.memory_space<vmem>>) attributes {dimension_semantics = [#tpu.dimension_semantics<parallel>], iteration_bounds = array<i64: 1>, scalar_prefetch = 0 : i64, scratch_operands = 0 : i64, tpu.core_type = #tpu.core_type<tc>, window_params = [{transform_indices = @transform_0, window_bounds = array<i64: 8, 16, 32>}, {transform_indices = @transform_1, window_bounds = array<i64: 8, 8, 16>}, {transform_indices = @transform_2, window_bounds = array<i64: 8, 512>}, {pipeline_mode = #tpu.pipeline_mode<synchronous>, transform_indices = @transform_3, window_bounds = array<i64: 32, 32>}, {pipeline_mode = #tpu.pipeline_mode<synchronous>, transform_indices = @transform_4, window_bounds = array<i64: 32, 32>}, {pipeline_mode = #tpu.pipeline_mode<synchronous>, transform_indices = @transform_5, window_bounds = array<i64: 512, 256>}, {pipeline_mode = #tpu.pipeline_mode<synchronous>, transform_indices = @transform_6, window_bounds = array<i64: 1, 256>}, {pipeline_mode = #tpu.pipeline_mode<synchronous>, transform_indices = @transform_7, window_bounds = array<i64: 256, 128>}, {pipeline_mode = #tpu.pipeline_mode<synchronous>, transform_indices = @transform_8, window_bounds = array<i64: 1, 128>}, {pipeline_mode = #tpu.pipeline_mode<synchronous>, transform_indices = @transform_9, window_bounds = array<i64: 128, 32>}, {pipeline_mode = #tpu.pipeline_mode<synchronous>, transform_indices = @transform_10, window_bounds = array<i64: 1, 32>}, {pipeline_mode = #tpu.pipeline_mode<synchronous>, transform_indices = @transform_11, window_bounds = array<i64: 32, 32>}, {pipeline_mode = #tpu.pipeline_mode<synchronous>, transform_indices = @transform_12, window_bounds = array<i64: 32, 32>}, {pipeline_mode = #tpu.pipeline_mode<synchronous>, transform_indices = @transform_13, window_bounds = array<i64: 32, 32>}, {pipeline_mode = #tpu.pipeline_mode<synchronous>, transform_indices = @transform_14, window_bounds = array<i64: 1, 32>}, {pipeline_mode = #tpu.pipeline_mode<synchronous>, transform_indices = @transform_15, window_bounds = array<i64: 32, 128>}, {pipeline_mode = #tpu.pipeline_mode<synchronous>, transform_indices = @transform_16, window_bounds = array<i64: 1, 128>}, {transform_indices = @transform_17, window_bounds = array<i64: 8, 128>}]} {
    %c0 = arith.constant 0 : index
    %c0_0 = arith.constant 0 : index
    %c0_1 = arith.constant 0 : index
    %0 = vector.load %arg1[%c0, %c0_0, %c0_1] : memref<8x16x32xbf16, #tpu.memory_space<vmem>>, vector<8x16x32xbf16>
    %1 = vector.shape_cast %0 : vector<8x16x32xbf16> to vector<128x32xbf16>
    %c0_2 = arith.constant 0 : index
    %c0_3 = arith.constant 0 : index
    %2 = vector.load %arg4[%c0_2, %c0_3] : memref<32x32xbf16, #tpu.memory_space<vmem>>, vector<32x32xbf16>
    %cst = arith.constant dense<0.000000e+00> : vector<128x32xf32>
    %3 = tpu.matmul %1, %2, %cst {dimension_numbers = #tpu.dot_dimension_numbers<[1], [0], [0], [1], [0, 0, 1, 1], [], []>} : vector<128x32xbf16>, vector<32x32xbf16>, vector<128x32xf32> -> vector<128x32xf32>
    %cst_4 = arith.constant 0.000000e+00 : f32
    %4 = vector.broadcast %cst_4 : f32 to vector<128x32xf32>
    %5 = arith.maximumf %3, %4 : vector<128x32xf32>
    %6 = vector.shape_cast %5 : vector<128x32xf32> to vector<8x16x32xf32>
    %cst_5 = arith.constant dense<0.000000e+00> : vector<8x32xf32>
    %7 = vector.multi_reduction <add>, %6, %cst_5 [1] : vector<8x16x32xf32> to vector<8x32xf32>
    %cst_6 = arith.constant 1.600000e+01 : f32
    %8 = vector.broadcast %cst_6 : f32 to vector<8x32xf32>
    %9 = arith.divf %7, %8 : vector<8x32xf32>
    %c0_7 = arith.constant 0 : index
    %c0_8 = arith.constant 0 : index
    %c0_9 = arith.constant 0 : index
    %10 = vector.load %arg2[%c0_7, %c0_8, %c0_9] : memref<8x8x16xbf16, #tpu.memory_space<vmem>>, vector<8x8x16xbf16>
    %11 = arith.extf %10 : vector<8x8x16xbf16> to vector<8x8x16xf32>
    %12 = vector.extract_strided_slice %11 {offsets = [0, 0, 0], sizes = [8, 1, 16], strides = [1, 1, 1]} : vector<8x8x16xf32> to vector<8x1x16xf32>
    %13 = vector.shape_cast %12 : vector<8x1x16xf32> to vector<8x16xf32>
    %14 = vector.shape_cast %13 : vector<8x16xf32> to vector<8x16x1xf32>
    %15 = vector.broadcast %14 : vector<8x16x1xf32> to vector<8x16x32xf32>
    %16 = arith.mulf %15, %6 : vector<8x16x32xf32>
    %cst_10 = arith.constant dense<0.000000e+00> : vector<8x32xf32>
    %17 = vector.multi_reduction <add>, %16, %cst_10 [1] : vector<8x16x32xf32> to vector<8x32xf32>
    %18 = vector.extract_strided_slice %11 {offsets = [0, 1, 0], sizes = [8, 1, 16], strides = [1, 1, 1]} : vector<8x8x16xf32> to vector<8x1x16xf32>
    %19 = vector.shape_cast %18 : vector<8x1x16xf32> to vector<8x16xf32>
    %20 = vector.shape_cast %19 : vector<8x16xf32> to vector<8x16x1xf32>
    %21 = vector.broadcast %20 : vector<8x16x1xf32> to vector<8x16x32xf32>
    %22 = arith.mulf %21, %6 : vector<8x16x32xf32>
    %cst_11 = arith.constant dense<0.000000e+00> : vector<8x32xf32>
    %23 = vector.multi_reduction <add>, %22, %cst_11 [1] : vector<8x16x32xf32> to vector<8x32xf32>
    %24 = vector.extract_strided_slice %11 {offsets = [0, 2, 0], sizes = [8, 1, 16], strides = [1, 1, 1]} : vector<8x8x16xf32> to vector<8x1x16xf32>
    %25 = vector.shape_cast %24 : vector<8x1x16xf32> to vector<8x16xf32>
    %26 = vector.shape_cast %25 : vector<8x16xf32> to vector<8x16x1xf32>
    %27 = vector.broadcast %26 : vector<8x16x1xf32> to vector<8x16x32xf32>
    %28 = arith.mulf %27, %6 : vector<8x16x32xf32>
    %cst_12 = arith.constant dense<0.000000e+00> : vector<8x32xf32>
    %29 = vector.multi_reduction <add>, %28, %cst_12 [1] : vector<8x16x32xf32> to vector<8x32xf32>
    %30 = vector.extract_strided_slice %11 {offsets = [0, 3, 0], sizes = [8, 1, 16], strides = [1, 1, 1]} : vector<8x8x16xf32> to vector<8x1x16xf32>
    %31 = vector.shape_cast %30 : vector<8x1x16xf32> to vector<8x16xf32>
    %32 = vector.shape_cast %31 : vector<8x16xf32> to vector<8x16x1xf32>
    %33 = vector.broadcast %32 : vector<8x16x1xf32> to vector<8x16x32xf32>
    %34 = arith.mulf %33, %6 : vector<8x16x32xf32>
    %cst_13 = arith.constant dense<0.000000e+00> : vector<8x32xf32>
    %35 = vector.multi_reduction <add>, %34, %cst_13 [1] : vector<8x16x32xf32> to vector<8x32xf32>
    %36 = vector.extract_strided_slice %11 {offsets = [0, 4, 0], sizes = [8, 1, 16], strides = [1, 1, 1]} : vector<8x8x16xf32> to vector<8x1x16xf32>
    %37 = vector.shape_cast %36 : vector<8x1x16xf32> to vector<8x16xf32>
    %38 = vector.shape_cast %37 : vector<8x16xf32> to vector<8x16x1xf32>
    %39 = vector.broadcast %38 : vector<8x16x1xf32> to vector<8x16x32xf32>
    %40 = arith.mulf %39, %6 : vector<8x16x32xf32>
    %cst_14 = arith.constant dense<0.000000e+00> : vector<8x32xf32>
    %41 = vector.multi_reduction <add>, %40, %cst_14 [1] : vector<8x16x32xf32> to vector<8x32xf32>
    %42 = vector.extract_strided_slice %11 {offsets = [0, 5, 0], sizes = [8, 1, 16], strides = [1, 1, 1]} : vector<8x8x16xf32> to vector<8x1x16xf32>
    %43 = vector.shape_cast %42 : vector<8x1x16xf32> to vector<8x16xf32>
    %44 = vector.shape_cast %43 : vector<8x16xf32> to vector<8x16x1xf32>
    %45 = vector.broadcast %44 : vector<8x16x1xf32> to vector<8x16x32xf32>
    %46 = arith.mulf %45, %6 : vector<8x16x32xf32>
    %cst_15 = arith.constant dense<0.000000e+00> : vector<8x32xf32>
    %47 = vector.multi_reduction <add>, %46, %cst_15 [1] : vector<8x16x32xf32> to vector<8x32xf32>
    %48 = vector.extract_strided_slice %11 {offsets = [0, 6, 0], sizes = [8, 1, 16], strides = [1, 1, 1]} : vector<8x8x16xf32> to vector<8x1x16xf32>
    %49 = vector.shape_cast %48 : vector<8x1x16xf32> to vector<8x16xf32>
    %50 = vector.shape_cast %49 : vector<8x16xf32> to vector<8x16x1xf32>
    %51 = vector.broadcast %50 : vector<8x16x1xf32> to vector<8x16x32xf32>
    %52 = arith.mulf %51, %6 : vector<8x16x32xf32>
    %cst_16 = arith.constant dense<0.000000e+00> : vector<8x32xf32>
    %53 = vector.multi_reduction <add>, %52, %cst_16 [1] : vector<8x16x32xf32> to vector<8x32xf32>
    %54 = vector.extract_strided_slice %11 {offsets = [0, 7, 0], sizes = [8, 1, 16], strides = [1, 1, 1]} : vector<8x8x16xf32> to vector<8x1x16xf32>
    %55 = vector.shape_cast %54 : vector<8x1x16xf32> to vector<8x16xf32>
    %56 = vector.shape_cast %55 : vector<8x16xf32> to vector<8x16x1xf32>
    %57 = vector.broadcast %56 : vector<8x16x1xf32> to vector<8x16x32xf32>
    %58 = arith.mulf %57, %6 : vector<8x16x32xf32>
    %cst_17 = arith.constant dense<0.000000e+00> : vector<8x32xf32>
    %59 = vector.multi_reduction <add>, %58, %cst_17 [1] : vector<8x16x32xf32> to vector<8x32xf32>
    %60 = tpu.concatenate %17, %23, %29, %35, %41, %47, %53, %59 in 0 : vector<8x32xf32>, vector<8x32xf32>, vector<8x32xf32>, vector<8x32xf32>, vector<8x32xf32>, vector<8x32xf32>, vector<8x32xf32>, vector<8x32xf32> -> vector<64x32xf32>
    %61 = arith.truncf %60 : vector<64x32xf32> to vector<64x32xbf16>
    %c0_18 = arith.constant 0 : index
    %c0_19 = arith.constant 0 : index
    %62 = vector.load %arg5[%c0_18, %c0_19] : memref<32x32xbf16, #tpu.memory_space<vmem>>, vector<32x32xbf16>
    %cst_20 = arith.constant dense<0.000000e+00> : vector<64x32xf32>
    %63 = tpu.matmul %61, %62, %cst_20 {dimension_numbers = #tpu.dot_dimension_numbers<[1], [0], [0], [1], [0, 0, 1, 1], [], []>} : vector<64x32xbf16>, vector<32x32xbf16>, vector<64x32xf32> -> vector<64x32xf32>
    %cst_21 = arith.constant 0.000000e+00 : f32
    %64 = vector.broadcast %cst_21 : f32 to vector<64x32xf32>
    %65 = arith.maximumf %63, %64 : vector<64x32xf32>
    %66 = vector.shape_cast %65 : vector<64x32xf32> to vector<8x8x32xf32>
    %cst_22 = arith.constant dense<0.000000e+00> : vector<8x32xf32>
    %67 = vector.multi_reduction <add>, %66, %cst_22 [0] : vector<8x8x32xf32> to vector<8x32xf32>
    %cst_23 = arith.constant 8.000000e+00 : f32
    %68 = vector.broadcast %cst_23 : f32 to vector<8x32xf32>
    %69 = arith.divf %67, %68 : vector<8x32xf32>
    %c0_24 = arith.constant 0 : index
    %c0_25 = arith.constant 0 : index
    %70 = vector.load %arg3[%c0_24, %c0_25] : memref<8x512xbf16, #tpu.memory_space<vmem>>, vector<8x512xbf16>
    %c0_26 = arith.constant 0 : index
    %c0_27 = arith.constant 0 : index
    %71 = vector.load %arg6[%c0_26, %c0_27] : memref<512x256xbf16, #tpu.memory_space<vmem>>, vector<512x256xbf16>
    %cst_28 = arith.constant dense<0.000000e+00> : vector<8x256xf32>
    %72 = tpu.matmul %70, %71, %cst_28 {dimension_numbers = #tpu.dot_dimension_numbers<[1], [0], [0], [1], [0, 0, 1, 1], [], []>} : vector<8x512xbf16>, vector<512x256xbf16>, vector<8x256xf32> -> vector<8x256xf32>
    %c0_29 = arith.constant 0 : index
    %c0_30 = arith.constant 0 : index
    %73 = vector.load %arg7[%c0_29, %c0_30] : memref<1x256xf32, #tpu.memory_space<vmem>>, vector<1x256xf32>
    %74 = vector.broadcast %73 : vector<1x256xf32> to vector<8x256xf32>
    %75 = arith.addf %72, %74 : vector<8x256xf32>
    %cst_31 = arith.constant 0.000000e+00 : f32
    %76 = vector.broadcast %cst_31 : f32 to vector<8x256xf32>
    %77 = arith.maximumf %75, %76 : vector<8x256xf32>
    %78 = arith.truncf %77 : vector<8x256xf32> to vector<8x256xbf16>
    %c0_32 = arith.constant 0 : index
    %c0_33 = arith.constant 0 : index
    %79 = vector.load %arg8[%c0_32, %c0_33] : memref<256x128xbf16, #tpu.memory_space<vmem>>, vector<256x128xbf16>
    %cst_34 = arith.constant dense<0.000000e+00> : vector<8x128xf32>
    %80 = tpu.matmul %78, %79, %cst_34 {dimension_numbers = #tpu.dot_dimension_numbers<[1], [0], [0], [1], [0, 0, 1, 1], [], []>} : vector<8x256xbf16>, vector<256x128xbf16>, vector<8x128xf32> -> vector<8x128xf32>
    %c0_35 = arith.constant 0 : index
    %c0_36 = arith.constant 0 : index
    %81 = vector.load %arg9[%c0_35, %c0_36] : memref<1x128xf32, #tpu.memory_space<vmem>>, vector<1x128xf32>
    %82 = vector.broadcast %81 : vector<1x128xf32> to vector<8x128xf32>
    %83 = arith.addf %80, %82 : vector<8x128xf32>
    %cst_37 = arith.constant 0.000000e+00 : f32
    %84 = vector.broadcast %cst_37 : f32 to vector<8x128xf32>
    %85 = arith.maximumf %83, %84 : vector<8x128xf32>
    %86 = arith.truncf %85 : vector<8x128xf32> to vector<8x128xbf16>
    %c0_38 = arith.constant 0 : index
    %c0_39 = arith.constant 0 : index
    %87 = vector.load %arg10[%c0_38, %c0_39] : memref<128x32xbf16, #tpu.memory_space<vmem>>, vector<128x32xbf16>
    %cst_40 = arith.constant dense<0.000000e+00> : vector<8x32xf32>
    %88 = tpu.matmul %86, %87, %cst_40 {dimension_numbers = #tpu.dot_dimension_numbers<[1], [0], [0], [1], [0, 0, 1, 1], [], []>} : vector<8x128xbf16>, vector<128x32xbf16>, vector<8x32xf32> -> vector<8x32xf32>
    %c0_41 = arith.constant 0 : index
    %c0_42 = arith.constant 0 : index
    %89 = vector.load %arg11[%c0_41, %c0_42] : memref<1x32xf32, #tpu.memory_space<vmem>>, vector<1x32xf32>
    %90 = vector.broadcast %89 : vector<1x32xf32> to vector<8x32xf32>
    %91 = arith.addf %88, %90 : vector<8x32xf32>
    %92 = arith.truncf %69 : vector<8x32xf32> to vector<8x32xbf16>
    %c0_43 = arith.constant 0 : index
    %c0_44 = arith.constant 0 : index
    %93 = vector.load %arg12[%c0_43, %c0_44] : memref<32x32xbf16, #tpu.memory_space<vmem>>, vector<32x32xbf16>
    %cst_45 = arith.constant dense<0.000000e+00> : vector<8x32xf32>
    %94 = tpu.matmul %92, %93, %cst_45 {dimension_numbers = #tpu.dot_dimension_numbers<[1], [0], [0], [1], [0, 0, 1, 1], [], []>} : vector<8x32xbf16>, vector<32x32xbf16>, vector<8x32xf32> -> vector<8x32xf32>
    %95 = arith.truncf %9 : vector<8x32xf32> to vector<8x32xbf16>
    %c0_46 = arith.constant 0 : index
    %c0_47 = arith.constant 0 : index
    %96 = vector.load %arg13[%c0_46, %c0_47] : memref<32x32xbf16, #tpu.memory_space<vmem>>, vector<32x32xbf16>
    %cst_48 = arith.constant dense<0.000000e+00> : vector<8x32xf32>
    %97 = tpu.matmul %95, %96, %cst_48 {dimension_numbers = #tpu.dot_dimension_numbers<[1], [0], [0], [1], [0, 0, 1, 1], [], []>} : vector<8x32xbf16>, vector<32x32xbf16>, vector<8x32xf32> -> vector<8x32xf32>
    %98 = arith.addf %94, %97 : vector<8x32xf32>
    %99 = arith.truncf %91 : vector<8x32xf32> to vector<8x32xbf16>
    %c0_49 = arith.constant 0 : index
    %c0_50 = arith.constant 0 : index
    %100 = vector.load %arg14[%c0_49, %c0_50] : memref<32x32xbf16, #tpu.memory_space<vmem>>, vector<32x32xbf16>
    %cst_51 = arith.constant dense<0.000000e+00> : vector<8x32xf32>
    %101 = tpu.matmul %99, %100, %cst_51 {dimension_numbers = #tpu.dot_dimension_numbers<[1], [0], [0], [1], [0, 0, 1, 1], [], []>} : vector<8x32xbf16>, vector<32x32xbf16>, vector<8x32xf32> -> vector<8x32xf32>
    %102 = arith.addf %98, %101 : vector<8x32xf32>
    %c0_52 = arith.constant 0 : index
    %c0_53 = arith.constant 0 : index
    %103 = vector.load %arg15[%c0_52, %c0_53] : memref<1x32xf32, #tpu.memory_space<vmem>>, vector<1x32xf32>
    %104 = vector.broadcast %103 : vector<1x32xf32> to vector<8x32xf32>
    %105 = arith.addf %102, %104 : vector<8x32xf32>
    %cst_54 = arith.constant 0.000000e+00 : f32
    %106 = vector.broadcast %cst_54 : f32 to vector<8x32xf32>
    %107 = arith.maximumf %105, %106 : vector<8x32xf32>
    %108 = arith.truncf %107 : vector<8x32xf32> to vector<8x32xbf16>
    %c0_55 = arith.constant 0 : index
    %c0_56 = arith.constant 0 : index
    %109 = vector.load %arg16[%c0_55, %c0_56] : memref<32x128xbf16, #tpu.memory_space<vmem>>, vector<32x128xbf16>
    %cst_57 = arith.constant dense<0.000000e+00> : vector<8x128xf32>
    %110 = tpu.matmul %108, %109, %cst_57 {dimension_numbers = #tpu.dot_dimension_numbers<[1], [0], [0], [1], [0, 0, 1, 1], [], []>} : vector<8x32xbf16>, vector<32x128xbf16>, vector<8x128xf32> -> vector<8x128xf32>
    %c0_58 = arith.constant 0 : index
    %c0_59 = arith.constant 0 : index
    %111 = vector.load %arg17[%c0_58, %c0_59] : memref<1x128xf32, #tpu.memory_space<vmem>>, vector<1x128xf32>
    %112 = vector.broadcast %111 : vector<1x128xf32> to vector<8x128xf32>
    %113 = arith.addf %110, %112 : vector<8x128xf32>
    %c0_60 = arith.constant 0 : index
    %c0_61 = arith.constant 0 : index
    %114 = vector.load %arg18[%c0_60, %c0_61] : memref<8x128xf32, #tpu.memory_space<vmem>>, vector<8x128xf32>
    tpu.vector_store %arg18[%c0_60, %c0_61], %113 {strides = array<i32>} : memref<8x128xf32, #tpu.memory_space<vmem>>, vector<8x128xf32>,
    return
  }
  func.func @transform_0(%arg0: i32) -> (i32, i32, i32) {
    %c0_i32 = arith.constant 0 : i32
    %c0_i32_0 = arith.constant 0 : i32
    %c0_i32_1 = arith.constant 0 : i32
    return %arg0, %c0_i32, %c0_i32_0 : i32, i32, i32
  }
  func.func @transform_1(%arg0: i32) -> (i32, i32, i32) {
    %c0_i32 = arith.constant 0 : i32
    %c0_i32_0 = arith.constant 0 : i32
    %c0_i32_1 = arith.constant 0 : i32
    return %arg0, %c0_i32, %c0_i32_0 : i32, i32, i32
  }
  func.func @transform_2(%arg0: i32) -> (i32, i32) {
    %c0_i32 = arith.constant 0 : i32
    %c0_i32_0 = arith.constant 0 : i32
    return %arg0, %c0_i32 : i32, i32
  }
  func.func @transform_3(%arg0: i32) -> (i32, i32) {
    %c0_i32 = arith.constant 0 : i32
    %c0_i32_0 = arith.constant 0 : i32
    %c0_i32_1 = arith.constant 0 : i32
    return %c0_i32, %c0_i32_0 : i32, i32
  }
  func.func @transform_4(%arg0: i32) -> (i32, i32) {
    %c0_i32 = arith.constant 0 : i32
    %c0_i32_0 = arith.constant 0 : i32
    %c0_i32_1 = arith.constant 0 : i32
    return %c0_i32, %c0_i32_0 : i32, i32
  }
  func.func @transform_5(%arg0: i32) -> (i32, i32) {
    %c0_i32 = arith.constant 0 : i32
    %c0_i32_0 = arith.constant 0 : i32
    %c0_i32_1 = arith.constant 0 : i32
    return %c0_i32, %c0_i32_0 : i32, i32
  }
  func.func @transform_6(%arg0: i32) -> (i32, i32) {
    %c0_i32 = arith.constant 0 : i32
    %c0_i32_0 = arith.constant 0 : i32
    %c0_i32_1 = arith.constant 0 : i32
    return %c0_i32, %c0_i32_0 : i32, i32
  }
  func.func @transform_7(%arg0: i32) -> (i32, i32) {
    %c0_i32 = arith.constant 0 : i32
    %c0_i32_0 = arith.constant 0 : i32
    %c0_i32_1 = arith.constant 0 : i32
    return %c0_i32, %c0_i32_0 : i32, i32
  }
  func.func @transform_8(%arg0: i32) -> (i32, i32) {
    %c0_i32 = arith.constant 0 : i32
    %c0_i32_0 = arith.constant 0 : i32
    %c0_i32_1 = arith.constant 0 : i32
    return %c0_i32, %c0_i32_0 : i32, i32
  }
  func.func @transform_9(%arg0: i32) -> (i32, i32) {
    %c0_i32 = arith.constant 0 : i32
    %c0_i32_0 = arith.constant 0 : i32
    %c0_i32_1 = arith.constant 0 : i32
    return %c0_i32, %c0_i32_0 : i32, i32
  }
  func.func @transform_10(%arg0: i32) -> (i32, i32) {
    %c0_i32 = arith.constant 0 : i32
    %c0_i32_0 = arith.constant 0 : i32
    %c0_i32_1 = arith.constant 0 : i32
    return %c0_i32, %c0_i32_0 : i32, i32
  }
  func.func @transform_11(%arg0: i32) -> (i32, i32) {
    %c0_i32 = arith.constant 0 : i32
    %c0_i32_0 = arith.constant 0 : i32
    %c0_i32_1 = arith.constant 0 : i32
    return %c0_i32, %c0_i32_0 : i32, i32
  }
  func.func @transform_12(%arg0: i32) -> (i32, i32) {
    %c0_i32 = arith.constant 0 : i32
    %c0_i32_0 = arith.constant 0 : i32
    %c0_i32_1 = arith.constant 0 : i32
    return %c0_i32, %c0_i32_0 : i32, i32
  }
  func.func @transform_13(%arg0: i32) -> (i32, i32) {
    %c0_i32 = arith.constant 0 : i32
    %c0_i32_0 = arith.constant 0 : i32
    %c0_i32_1 = arith.constant 0 : i32
    return %c0_i32, %c0_i32_0 : i32, i32
  }
  func.func @transform_14(%arg0: i32) -> (i32, i32) {
    %c0_i32 = arith.constant 0 : i32
    %c0_i32_0 = arith.constant 0 : i32
    %c0_i32_1 = arith.constant 0 : i32
    return %c0_i32, %c0_i32_0 : i32, i32
  }
  func.func @transform_15(%arg0: i32) -> (i32, i32) {
    %c0_i32 = arith.constant 0 : i32
    %c0_i32_0 = arith.constant 0 : i32
    %c0_i32_1 = arith.constant 0 : i32
    return %c0_i32, %c0_i32_0 : i32, i32
  }
  func.func @transform_16(%arg0: i32) -> (i32, i32) {
    %c0_i32 = arith.constant 0 : i32
    %c0_i32_0 = arith.constant 0 : i32
    %c0_i32_1 = arith.constant 0 : i32
    return %c0_i32, %c0_i32_0 : i32, i32
  }
  func.func @transform_17(%arg0: i32) -> (i32, i32) {
    %c0_i32 = arith.constant 0 : i32
    %c0_i32_0 = arith.constant 0 : i32
    return %arg0, %c0_i32 : i32, i32
  }
}

module attributes {stable_mosaic.version = 11 : i64} {
  func.func @all_old_kernel(%arg0: i32, %arg1: memref<8x16x32xbf16, #tpu.memory_space<vmem>>, %arg2: memref<8x8x16xbf16, #tpu.memory_space<vmem>>, %arg3: memref<8x512xbf16, #tpu.memory_space<vmem>>, %arg4: memref<32x32xbf16, #tpu.memory_space<vmem>>, %arg5: memref<32x32xbf16, #tpu.memory_space<vmem>>, %arg6: memref<512x256xbf16, #tpu.memory_space<vmem>>, %arg7: memref<1x256xf32, #tpu.memory_space<vmem>>, %arg8: memref<256x128xbf16, #tpu.memory_space<vmem>>, %arg9: memref<1x128xf32, #tpu.memory_space<vmem>>, %arg10: memref<128x32xbf16, #tpu.memory_space<vmem>>, %arg11: memref<1x32xf32, #tpu.memory_space<vmem>>, %arg12: memref<32x32xbf16, #tpu.memory_space<vmem>>, %arg13: memref<32x32xbf16, #tpu.memory_space<vmem>>, %arg14: memref<32x32xbf16, #tpu.memory_space<vmem>>, %arg15: memref<1x32xf32, #tpu.memory_space<vmem>>, %arg16: memref<32x128xbf16, #tpu.memory_space<vmem>>, %arg17: memref<1x128xf32, #tpu.memory_space<vmem>>, %arg18: memref<8x128xf32, #tpu.memory_space<vmem>>) attributes {dimension_semantics = [#tpu.dimension_semantics<parallel>], iteration_bounds = array<i64: 1>, scalar_prefetch = 0 : i64, scratch_operands = 0 : i64, tpu.core_type = #tpu.core_type<tc>, window_params = [{transform_indices = @transform_0, window_bounds = array<i64: 8, 16, 32>}, {transform_indices = @transform_1, window_bounds = array<i64: 8, 8, 16>}, {transform_indices = @transform_2, window_bounds = array<i64: 8, 512>}, {pipeline_mode = #tpu.pipeline_mode<synchronous>, transform_indices = @transform_3, window_bounds = array<i64: 32, 32>}, {pipeline_mode = #tpu.pipeline_mode<synchronous>, transform_indices = @transform_4, window_bounds = array<i64: 32, 32>}, {pipeline_mode = #tpu.pipeline_mode<synchronous>, transform_indices = @transform_5, window_bounds = array<i64: 512, 256>}, {pipeline_mode = #tpu.pipeline_mode<synchronous>, transform_indices = @transform_6, window_bounds = array<i64: 1, 256>}, {pipeline_mode = #tpu.pipeline_mode<synchronous>, transform_indices = @transform_7, window_bounds = array<i64: 256, 128>}, {pipeline_mode = #tpu.pipeline_mode<synchronous>, transform_indices = @transform_8, window_bounds = array<i64: 1, 128>}, {pipeline_mode = #tpu.pipeline_mode<synchronous>, transform_indices = @transform_9, window_bounds = array<i64: 128, 32>}, {pipeline_mode = #tpu.pipeline_mode<synchronous>, transform_indices = @transform_10, window_bounds = array<i64: 1, 32>}, {pipeline_mode = #tpu.pipeline_mode<synchronous>, transform_indices = @transform_11, window_bounds = array<i64: 32, 32>}, {pipeline_mode = #tpu.pipeline_mode<synchronous>, transform_indices = @transform_12, window_bounds = array<i64: 32, 32>}, {pipeline_mode = #tpu.pipeline_mode<synchronous>, transform_indices = @transform_13, window_bounds = array<i64: 32, 32>}, {pipeline_mode = #tpu.pipeline_mode<synchronous>, transform_indices = @transform_14, window_bounds = array<i64: 1, 32>}, {pipeline_mode = #tpu.pipeline_mode<synchronous>, transform_indices = @transform_15, window_bounds = array<i64: 32, 128>}, {pipeline_mode = #tpu.pipeline_mode<synchronous>, transform_indices = @transform_16, window_bounds = array<i64: 1, 128>}, {transform_indices = @transform_17, window_bounds = array<i64: 8, 128>}]} {
    %c0 = arith.constant 0 : index
    %c0_0 = arith.constant 0 : index
    %c0_1 = arith.constant 0 : index
    %0 = vector.load %arg1[%c0, %c0_0, %c0_1] : memref<8x16x32xbf16, #tpu.memory_space<vmem>>, vector<8x16x32xbf16>
    %1 = vector.shape_cast %0 : vector<8x16x32xbf16> to vector<128x32xbf16>
    %c0_2 = arith.constant 0 : index
    %c0_3 = arith.constant 0 : index
    %2 = vector.load %arg4[%c0_2, %c0_3] : memref<32x32xbf16, #tpu.memory_space<vmem>>, vector<32x32xbf16>
    %cst = arith.constant dense<0.000000e+00> : vector<128x32xf32>
    %3 = tpu.matmul %1, %2, %cst {dimension_numbers = #tpu.dot_dimension_numbers<[1], [0], [0], [1], [0, 0, 1, 1], [], []>} : vector<128x32xbf16>, vector<32x32xbf16>, vector<128x32xf32> -> vector<128x32xf32>
    %cst_4 = arith.constant 0.000000e+00 : f32
    %4 = vector.broadcast %cst_4 : f32 to vector<128x32xf32>
    %5 = arith.maximumf %3, %4 : vector<128x32xf32>
    %6 = vector.shape_cast %5 : vector<128x32xf32> to vector<8x16x32xf32>
    %cst_5 = arith.constant dense<0.000000e+00> : vector<8x32xf32>
    %7 = vector.multi_reduction <add>, %6, %cst_5 [1] : vector<8x16x32xf32> to vector<8x32xf32>
    %cst_6 = arith.constant 1.600000e+01 : f32
    %8 = vector.broadcast %cst_6 : f32 to vector<8x32xf32>
    %9 = arith.divf %7, %8 : vector<8x32xf32>
    %c0_7 = arith.constant 0 : index
    %c0_8 = arith.constant 0 : index
    %c0_9 = arith.constant 0 : index
    %10 = vector.load %arg2[%c0_7, %c0_8, %c0_9] : memref<8x8x16xbf16, #tpu.memory_space<vmem>>, vector<8x8x16xbf16>
    %11 = arith.extf %10 : vector<8x8x16xbf16> to vector<8x8x16xf32>
    %12 = vector.extract_strided_slice %11 {offsets = [0, 0, 0], sizes = [8, 1, 16], strides = [1, 1, 1]} : vector<8x8x16xf32> to vector<8x1x16xf32>
    %13 = vector.shape_cast %12 : vector<8x1x16xf32> to vector<8x16xf32>
    %14 = vector.shape_cast %13 : vector<8x16xf32> to vector<8x16x1xf32>
    %15 = vector.broadcast %14 : vector<8x16x1xf32> to vector<8x16x32xf32>
    %16 = arith.mulf %15, %6 : vector<8x16x32xf32>
    %cst_10 = arith.constant dense<0.000000e+00> : vector<8x32xf32>
    %17 = vector.multi_reduction <add>, %16, %cst_10 [1] : vector<8x16x32xf32> to vector<8x32xf32>
    %18 = vector.extract_strided_slice %11 {offsets = [0, 1, 0], sizes = [8, 1, 16], strides = [1, 1, 1]} : vector<8x8x16xf32> to vector<8x1x16xf32>
    %19 = vector.shape_cast %18 : vector<8x1x16xf32> to vector<8x16xf32>
    %20 = vector.shape_cast %19 : vector<8x16xf32> to vector<8x16x1xf32>
    %21 = vector.broadcast %20 : vector<8x16x1xf32> to vector<8x16x32xf32>
    %22 = arith.mulf %21, %6 : vector<8x16x32xf32>
    %cst_11 = arith.constant dense<0.000000e+00> : vector<8x32xf32>
    %23 = vector.multi_reduction <add>, %22, %cst_11 [1] : vector<8x16x32xf32> to vector<8x32xf32>
    %24 = vector.extract_strided_slice %11 {offsets = [0, 2, 0], sizes = [8, 1, 16], strides = [1, 1, 1]} : vector<8x8x16xf32> to vector<8x1x16xf32>
    %25 = vector.shape_cast %24 : vector<8x1x16xf32> to vector<8x16xf32>
    %26 = vector.shape_cast %25 : vector<8x16xf32> to vector<8x16x1xf32>
    %27 = vector.broadcast %26 : vector<8x16x1xf32> to vector<8x16x32xf32>
    %28 = arith.mulf %27, %6 : vector<8x16x32xf32>
    %cst_12 = arith.constant dense<0.000000e+00> : vector<8x32xf32>
    %29 = vector.multi_reduction <add>, %28, %cst_12 [1] : vector<8x16x32xf32> to vector<8x32xf32>
    %30 = vector.extract_strided_slice %11 {offsets = [0, 3, 0], sizes = [8, 1, 16], strides = [1, 1, 1]} : vector<8x8x16xf32> to vector<8x1x16xf32>
    %31 = vector.shape_cast %30 : vector<8x1x16xf32> to vector<8x16xf32>
    %32 = vector.shape_cast %31 : vector<8x16xf32> to vector<8x16x1xf32>
    %33 = vector.broadcast %32 : vector<8x16x1xf32> to vector<8x16x32xf32>
    %34 = arith.mulf %33, %6 : vector<8x16x32xf32>
    %cst_13 = arith.constant dense<0.000000e+00> : vector<8x32xf32>
    %35 = vector.multi_reduction <add>, %34, %cst_13 [1] : vector<8x16x32xf32> to vector<8x32xf32>
    %36 = vector.extract_strided_slice %11 {offsets = [0, 4, 0], sizes = [8, 1, 16], strides = [1, 1, 1]} : vector<8x8x16xf32> to vector<8x1x16xf32>
    %37 = vector.shape_cast %36 : vector<8x1x16xf32> to vector<8x16xf32>
    %38 = vector.shape_cast %37 : vector<8x16xf32> to vector<8x16x1xf32>
    %39 = vector.broadcast %38 : vector<8x16x1xf32> to vector<8x16x32xf32>
    %40 = arith.mulf %39, %6 : vector<8x16x32xf32>
    %cst_14 = arith.constant dense<0.000000e+00> : vector<8x32xf32>
    %41 = vector.multi_reduction <add>, %40, %cst_14 [1] : vector<8x16x32xf32> to vector<8x32xf32>
    %42 = vector.extract_strided_slice %11 {offsets = [0, 5, 0], sizes = [8, 1, 16], strides = [1, 1, 1]} : vector<8x8x16xf32> to vector<8x1x16xf32>
    %43 = vector.shape_cast %42 : vector<8x1x16xf32> to vector<8x16xf32>
    %44 = vector.shape_cast %43 : vector<8x16xf32> to vector<8x16x1xf32>
    %45 = vector.broadcast %44 : vector<8x16x1xf32> to vector<8x16x32xf32>
    %46 = arith.mulf %45, %6 : vector<8x16x32xf32>
    %cst_15 = arith.constant dense<0.000000e+00> : vector<8x32xf32>
    %47 = vector.multi_reduction <add>, %46, %cst_15 [1] : vector<8x16x32xf32> to vector<8x32xf32>
    %48 = vector.extract_strided_slice %11 {offsets = [0, 6, 0], sizes = [8, 1, 16], strides = [1, 1, 1]} : vector<8x8x16xf32> to vector<8x1x16xf32>
    %49 = vector.shape_cast %48 : vector<8x1x16xf32> to vector<8x16xf32>
    %50 = vector.shape_cast %49 : vector<8x16xf32> to vector<8x16x1xf32>
    %51 = vector.broadcast %50 : vector<8x16x1xf32> to vector<8x16x32xf32>
    %52 = arith.mulf %51, %6 : vector<8x16x32xf32>
    %cst_16 = arith.constant dense<0.000000e+00> : vector<8x32xf32>
    %53 = vector.multi_reduction <add>, %52, %cst_16 [1] : vector<8x16x32xf32> to vector<8x32xf32>
    %54 = vector.extract_strided_slice %11 {offsets = [0, 7, 0], sizes = [8, 1, 16], strides = [1, 1, 1]} : vector<8x8x16xf32> to vector<8x1x16xf32>
    %55 = vector.shape_cast %54 : vector<8x1x16xf32> to vector<8x16xf32>
    %56 = vector.shape_cast %55 : vector<8x16xf32> to vector<8x16x1xf32>
    %57 = vector.broadcast %56 : vector<8x16x1xf32> to vector<8x16x32xf32>
    %58 = arith.mulf %57, %6 : vector<8x16x32xf32>
    %cst_17 = arith.constant dense<0.000000e+00> : vector<8x32xf32>
    %59 = vector.multi_reduction <add>, %58, %cst_17 [1] : vector<8x16x32xf32> to vector<8x32xf32>
    %60 = tpu.concatenate %17, %23, %29, %35, %41, %47, %53, %59 in 0 : vector<8x32xf32>, vector<8x32xf32>, vector<8x32xf32>, vector<8x32xf32>, vector<8x32xf32>, vector<8x32xf32>, vector<8x32xf32>, vector<8x32xf32> -> vector<64x32xf32>
    %61 = arith.truncf %60 : vector<64x32xf32> to vector<64x32xbf16>
    %c0_18 = arith.constant 0 : index
    %c0_19 = arith.constant 0 : index
    %62 = vector.load %arg5[%c0_18, %c0_19] : memref<32x32xbf16, #tpu.memory_space<vmem>>, vector<32x32xbf16>
    %cst_20 = arith.constant dense<0.000000e+00> : vector<64x32xf32>
    %63 = tpu.matmul %61, %62, %cst_20 {dimension_numbers = #tpu.dot_dimension_numbers<[1], [0], [0], [1], [0, 0, 1, 1], [], []>} : vector<64x32xbf16>, vector<32x32xbf16>, vector<64x32xf32> -> vector<64x32xf32>
    %cst_21 = arith.constant 0.000000e+00 : f32
    %64 = vector.broadcast %cst_21 : f32 to vector<64x32xf32>
    %65 = arith.maximumf %63, %64 : vector<64x32xf32>
    %66 = vector.shape_cast %65 : vector<64x32xf32> to vector<8x8x32xf32>
    %cst_22 = arith.constant dense<0.000000e+00> : vector<8x32xf32>
    %67 = vector.multi_reduction <add>, %66, %cst_22 [0] : vector<8x8x32xf32> to vector<8x32xf32>
    %cst_23 = arith.constant 8.000000e+00 : f32
    %68 = vector.broadcast %cst_23 : f32 to vector<8x32xf32>
    %69 = arith.divf %67, %68 : vector<8x32xf32>
    %c0_24 = arith.constant 0 : index
    %c0_25 = arith.constant 0 : index
    %70 = vector.load %arg3[%c0_24, %c0_25] : memref<8x512xbf16, #tpu.memory_space<vmem>>, vector<8x512xbf16>
    %c0_26 = arith.constant 0 : index
    %c0_27 = arith.constant 0 : index
    %71 = vector.load %arg6[%c0_26, %c0_27] : memref<512x256xbf16, #tpu.memory_space<vmem>>, vector<512x256xbf16>
    %cst_28 = arith.constant dense<0.000000e+00> : vector<8x256xf32>
    %72 = tpu.matmul %70, %71, %cst_28 {dimension_numbers = #tpu.dot_dimension_numbers<[1], [0], [0], [1], [0, 0, 1, 1], [], []>} : vector<8x512xbf16>, vector<512x256xbf16>, vector<8x256xf32> -> vector<8x256xf32>
    %c0_29 = arith.constant 0 : index
    %c0_30 = arith.constant 0 : index
    %73 = vector.load %arg7[%c0_29, %c0_30] : memref<1x256xf32, #tpu.memory_space<vmem>>, vector<1x256xf32>
    %74 = vector.broadcast %73 : vector<1x256xf32> to vector<8x256xf32>
    %75 = arith.addf %72, %74 : vector<8x256xf32>
    %cst_31 = arith.constant 0.000000e+00 : f32
    %76 = vector.broadcast %cst_31 : f32 to vector<8x256xf32>
    %77 = arith.maximumf %75, %76 : vector<8x256xf32>
    %78 = arith.truncf %77 : vector<8x256xf32> to vector<8x256xbf16>
    %c0_32 = arith.constant 0 : index
    %c0_33 = arith.constant 0 : index
    %79 = vector.load %arg8[%c0_32, %c0_33] : memref<256x128xbf16, #tpu.memory_space<vmem>>, vector<256x128xbf16>
    %cst_34 = arith.constant dense<0.000000e+00> : vector<8x128xf32>
    %80 = tpu.matmul %78, %79, %cst_34 {dimension_numbers = #tpu.dot_dimension_numbers<[1], [0], [0], [1], [0, 0, 1, 1], [], []>} : vector<8x256xbf16>, vector<256x128xbf16>, vector<8x128xf32> -> vector<8x128xf32>
    %c0_35 = arith.constant 0 : index
    %c0_36 = arith.constant 0 : index
    %81 = vector.load %arg9[%c0_35, %c0_36] : memref<1x128xf32, #tpu.memory_space<vmem>>, vector<1x128xf32>
    %82 = vector.broadcast %81 : vector<1x128xf32> to vector<8x128xf32>
    %83 = arith.addf %80, %82 : vector<8x128xf32>
    %cst_37 = arith.constant 0.000000e+00 : f32
    %84 = vector.broadcast %cst_37 : f32 to vector<8x128xf32>
    %85 = arith.maximumf %83, %84 : vector<8x128xf32>
    %86 = arith.truncf %85 : vector<8x128xf32> to vector<8x128xbf16>
    %c0_38 = arith.constant 0 : index
    %c0_39 = arith.constant 0 : index
    %87 = vector.load %arg10[%c0_38, %c0_39] : memref<128x32xbf16, #tpu.memory_space<vmem>>, vector<128x32xbf16>
    %cst_40 = arith.constant dense<0.000000e+00> : vector<8x32xf32>
    %88 = tpu.matmul %86, %87, %cst_40 {dimension_numbers = #tpu.dot_dimension_numbers<[1], [0], [0], [1], [0, 0, 1, 1], [], []>} : vector<8x128xbf16>, vector<128x32xbf16>, vector<8x32xf32> -> vector<8x32xf32>
    %c0_41 = arith.constant 0 : index
    %c0_42 = arith.constant 0 : index
    %89 = vector.load %arg11[%c0_41, %c0_42] : memref<1x32xf32, #tpu.memory_space<vmem>>, vector<1x32xf32>
    %90 = vector.broadcast %89 : vector<1x32xf32> to vector<8x32xf32>
    %91 = arith.addf %88, %90 : vector<8x32xf32>
    %92 = arith.truncf %69 : vector<8x32xf32> to vector<8x32xbf16>
    %c0_43 = arith.constant 0 : index
    %c0_44 = arith.constant 0 : index
    %93 = vector.load %arg12[%c0_43, %c0_44] : memref<32x32xbf16, #tpu.memory_space<vmem>>, vector<32x32xbf16>
    %cst_45 = arith.constant dense<0.000000e+00> : vector<8x32xf32>
    %94 = tpu.matmul %92, %93, %cst_45 {dimension_numbers = #tpu.dot_dimension_numbers<[1], [0], [0], [1], [0, 0, 1, 1], [], []>} : vector<8x32xbf16>, vector<32x32xbf16>, vector<8x32xf32> -> vector<8x32xf32>
    %95 = arith.truncf %9 : vector<8x32xf32> to vector<8x32xbf16>
    %c0_46 = arith.constant 0 : index
    %c0_47 = arith.constant 0 : index
    %96 = vector.load %arg13[%c0_46, %c0_47] : memref<32x32xbf16, #tpu.memory_space<vmem>>, vector<32x32xbf16>
    %cst_48 = arith.constant dense<0.000000e+00> : vector<8x32xf32>
    %97 = tpu.matmul %95, %96, %cst_48 {dimension_numbers = #tpu.dot_dimension_numbers<[1], [0], [0], [1], [0, 0, 1, 1], [], []>} : vector<8x32xbf16>, vector<32x32xbf16>, vector<8x32xf32> -> vector<8x32xf32>
    %98 = arith.addf %94, %97 : vector<8x32xf32>
    %99 = arith.truncf %91 : vector<8x32xf32> to vector<8x32xbf16>
    %c0_49 = arith.constant 0 : index
    %c0_50 = arith.constant 0 : index
    %100 = vector.load %arg14[%c0_49, %c0_50] : memref<32x32xbf16, #tpu.memory_space<vmem>>, vector<32x32xbf16>
    %cst_51 = arith.constant dense<0.000000e+00> : vector<8x32xf32>
    %101 = tpu.matmul %99, %100, %cst_51 {dimension_numbers = #tpu.dot_dimension_numbers<[1], [0], [0], [1], [0, 0, 1, 1], [], []>} : vector<8x32xbf16>, vector<32x32xbf16>, vector<8x32xf32> -> vector<8x32xf32>
    %102 = arith.addf %98, %101 : vector<8x32xf32>
    %c0_52 = arith.constant 0 : index
    %c0_53 = arith.constant 0 : index
    %103 = vector.load %arg15[%c0_52, %c0_53] : memref<1x32xf32, #tpu.memory_space<vmem>>, vector<1x32xf32>
    %104 = vector.broadcast %103 : vector<1x32xf32> to vector<8x32xf32>
    %105 = arith.addf %102, %104 : vector<8x32xf32>
    %cst_54 = arith.constant 0.000000e+00 : f32
    %106 = vector.broadcast %cst_54 : f32 to vector<8x32xf32>
    %107 = arith.maximumf %105, %106 : vector<8x32xf32>
    %108 = arith.truncf %107 : vector<8x32xf32> to vector<8x32xbf16>
    %c0_55 = arith.constant 0 : index
    %c0_56 = arith.constant 0 : index
    %109 = vector.load %arg16[%c0_55, %c0_56] : memref<32x128xbf16, #tpu.memory_space<vmem>>, vector<32x128xbf16>
    %cst_57 = arith.constant dense<0.000000e+00> : vector<8x128xf32>
    %110 = tpu.matmul %108, %109, %cst_57 {dimension_numbers = #tpu.dot_dimension_numbers<[1], [0], [0], [1], [0, 0, 1, 1], [], []>} : vector<8x32xbf16>, vector<32x128xbf16>, vector<8x128xf32> -> vector<8x128xf32>
    %c0_58 = arith.constant 0 : index
    %c0_59 = arith.constant 0 : index
    %111 = vector.load %arg17[%c0_58, %c0_59] : memref<1x128xf32, #tpu.memory_space<vmem>>, vector<1x128xf32>
    %112 = vector.broadcast %111 : vector<1x128xf32> to vector<8x128xf32>
    %113 = arith.addf %110, %112 : vector<8x128xf32>
    %c0_60 = arith.constant 0 : index
    %c0_61 = arith.constant 0 : index
    %114 = vector.load %arg18[%c0_60, %c0_61] : memref<8x128xf32, #tpu.memory_space<vmem>>, vector<8x128xf32>
    tpu.vector_store %arg18[%c0_60, %c0_61], %113 {strides = array<i32>} : memref<8x128xf32, #tpu.memory_space<vmem>>, vector<8x128xf32>,
    return
  }
  func.func @transform_0(%arg0: i32) -> (i32, i32, i32) {
    %c0_i32 = arith.constant 0 : i32
    %c0_i32_0 = arith.constant 0 : i32
    %c0_i32_1 = arith.constant 0 : i32
    return %arg0, %c0_i32, %c0_i32_0 : i32, i32, i32
  }
  func.func @transform_1(%arg0: i32) -> (i32, i32, i32) {
    %c0_i32 = arith.constant 0 : i32
    %c0_i32_0 = arith.constant 0 : i32
    %c0_i32_1 = arith.constant 0 : i32
    return %arg0, %c0_i32, %c0_i32_0 : i32, i32, i32
  }
  func.func @transform_2(%arg0: i32) -> (i32, i32) {
    %c0_i32 = arith.constant 0 : i32
    %c0_i32_0 = arith.constant 0 : i32
    return %arg0, %c0_i32 : i32, i32
  }
  func.func @transform_3(%arg0: i32) -> (i32, i32) {
    %c0_i32 = arith.constant 0 : i32
    %c0_i32_0 = arith.constant 0 : i32
    %c0_i32_1 = arith.constant 0 : i32
    return %c0_i32, %c0_i32_0 : i32, i32
  }
  func.func @transform_4(%arg0: i32) -> (i32, i32) {
    %c0_i32 = arith.constant 0 : i32
    %c0_i32_0 = arith.constant 0 : i32
    %c0_i32_1 = arith.constant 0 : i32
    return %c0_i32, %c0_i32_0 : i32, i32
  }
  func.func @transform_5(%arg0: i32) -> (i32, i32) {
    %c0_i32 = arith.constant 0 : i32
    %c0_i32_0 = arith.constant 0 : i32
    %c0_i32_1 = arith.constant 0 : i32
    return %c0_i32, %c0_i32_0 : i32, i32
  }
  func.func @transform_6(%arg0: i32) -> (i32, i32) {
    %c0_i32 = arith.constant 0 : i32
    %c0_i32_0 = arith.constant 0 : i32
    %c0_i32_1 = arith.constant 0 : i32
    return %c0_i32, %c0_i32_0 : i32, i32
  }
  func.func @transform_7(%arg0: i32) -> (i32, i32) {
    %c0_i32 = arith.constant 0 : i32
    %c0_i32_0 = arith.constant 0 : i32
    %c0_i32_1 = arith.constant 0 : i32
    return %c0_i32, %c0_i32_0 : i32, i32
  }
  func.func @transform_8(%arg0: i32) -> (i32, i32) {
    %c0_i32 = arith.constant 0 : i32
    %c0_i32_0 = arith.constant 0 : i32
    %c0_i32_1 = arith.constant 0 : i32
    return %c0_i32, %c0_i32_0 : i32, i32
  }
  func.func @transform_9(%arg0: i32) -> (i32, i32) {
    %c0_i32 = arith.constant 0 : i32
    %c0_i32_0 = arith.constant 0 : i32
    %c0_i32_1 = arith.constant 0 : i32
    return %c0_i32, %c0_i32_0 : i32, i32
  }
  func.func @transform_10(%arg0: i32) -> (i32, i32) {
    %c0_i32 = arith.constant 0 : i32
    %c0_i32_0 = arith.constant 0 : i32
    %c0_i32_1 = arith.constant 0 : i32
    return %c0_i32, %c0_i32_0 : i32, i32
  }
  func.func @transform_11(%arg0: i32) -> (i32, i32) {
    %c0_i32 = arith.constant 0 : i32
    %c0_i32_0 = arith.constant 0 : i32
    %c0_i32_1 = arith.constant 0 : i32
    return %c0_i32, %c0_i32_0 : i32, i32
  }
  func.func @transform_12(%arg0: i32) -> (i32, i32) {
    %c0_i32 = arith.constant 0 : i32
    %c0_i32_0 = arith.constant 0 : i32
    %c0_i32_1 = arith.constant 0 : i32
    return %c0_i32, %c0_i32_0 : i32, i32
  }
  func.func @transform_13(%arg0: i32) -> (i32, i32) {
    %c0_i32 = arith.constant 0 : i32
    %c0_i32_0 = arith.constant 0 : i32
    %c0_i32_1 = arith.constant 0 : i32
    return %c0_i32, %c0_i32_0 : i32, i32
  }
  func.func @transform_14(%arg0: i32) -> (i32, i32) {
    %c0_i32 = arith.constant 0 : i32
    %c0_i32_0 = arith.constant 0 : i32
    %c0_i32_1 = arith.constant 0 : i32
    return %c0_i32, %c0_i32_0 : i32, i32
  }
  func.func @transform_15(%arg0: i32) -> (i32, i32) {
    %c0_i32 = arith.constant 0 : i32
    %c0_i32_0 = arith.constant 0 : i32
    %c0_i32_1 = arith.constant 0 : i32
    return %c0_i32, %c0_i32_0 : i32, i32
  }
  func.func @transform_16(%arg0: i32) -> (i32, i32) {
    %c0_i32 = arith.constant 0 : i32
    %c0_i32_0 = arith.constant 0 : i32
    %c0_i32_1 = arith.constant 0 : i32
    return %c0_i32, %c0_i32_0 : i32, i32
  }
  func.func @transform_17(%arg0: i32) -> (i32, i32) {
    %c0_i32 = arith.constant 0 : i32
    %c0_i32_0 = arith.constant 0 : i32
    return %arg0, %c0_i32 : i32, i32
  }
}

</mosaic_0001>

<bundles_post_ra>
// kernel: tpu_custom_call.1
= control target key start
LH: loop header
LB: loop body
LE: loop exit
PB: predicated region body
PF: predicated region fallthrough
CT: control target
= control target key end

     0   :  { %s5433_s0 = inlined_call_operand.vmem [shape: bf16[8,16,32], index: 0, kind: input, shape index: {}]   ;;  %s5434_s1 = inlined_call_operand.hbm [shape: bf16[8,8,16], index: 1, kind: input, shape index: {}]   ;;  %s5435_s2 = inlined_call_operand.vmem [shape: bf16[8,512], index: 2, kind: input, shape index: {}]   ;;  %s5436_s3 = inlined_call_operand.hbm [shape: bf16[32,32], index: 3, kind: input, shape index: {}]   ;;  %s5437_s4 = inlined_call_operand.hbm [shape: bf16[32,32], index: 4, kind: input, shape index: {}]   ;;  %s5438_s5 = inlined_call_operand.hbm [shape: bf16[512,256], index: 5, kind: input, shape index: {}]   ;;  %s5439_s6 = inlined_call_operand.hbm [shape: f32[1,256], index: 6, kind: input, shape index: {}]   ;;  %s5440_s7 = inlined_call_operand.hbm [shape: bf16[256,128], index: 7, kind: input, shape index: {}]   ;;  %s5441_s8 = inlined_call_operand.vmem [shape: f32[1,128], index: 8, kind: input, shape index: {}]   ;;  %s5442_s9 = inlined_call_operand.vmem [shape: bf16[128,32], index: 9, kind: input, shape index: {}]   ;;  %s5443_s10 = inlined_call_operand.hbm [shape: f32[1,32], index: 10, kind: input, shape index: {}]   ;;  %s5444_s11 = inlined_call_operand.vmem [shape: bf16[32,32], index: 11, kind: input, shape index: {}]   ;;  %s5445_s12 = inlined_call_operand.hbm [shape: bf16[32,32], index: 12, kind: input, shape index: {}]   ;;  %s5446_s13 = inlined_call_operand.vmem [shape: bf16[32,32], index: 13, kind: input, shape index: {}]   ;;  %s5447_s14 = inlined_call_operand.vmem [shape: f32[1,32], index: 14, kind: input, shape index: {}]   ;;  %s5448_s15 = inlined_call_operand.hbm [shape: bf16[32,128], index: 15, kind: input, shape index: {}]   ;;  %s5449_s16 = inlined_call_operand.vmem [shape: f32[1,128], index: 16, kind: input, shape index: {}]   ;;  %s5450_s17 = inlined_call_operand.hbm [shape: f32[8,128], index: 17, kind: output, shape index: {}]  }
   0x1   :  { %5480 = sst [smem:[#allocation67_spill]] %s5433_s0 }
   0x2   :  { %5481 = sst [smem:[#allocation68_spill]] %s5434_s1 }
   0x3   :  { %22 = vsyncpa [#allocation3], 0 }
   0x4   :  { %23 = vsyncpa [#allocation6], 0 }
   0x5   :  { %24 = vsyncpa [#allocation9], 0 }
   0x6   :  { %25 = vsyncpa [#allocation12], 0 }
   0x7   :  { %26 = vsyncpa [#allocation15], 0 }
   0x8   :  { %27 = vsyncpa [#allocation4], 0  ;;  %s3934_s24 = smov [#allocation5]   ;;  %s3935_s26 = smov [#allocation8]  }
   0x9   :  { %s49_s25 = sshll.u32 %s3934_s24, 4  ;;  %s73_s27 = sshll.u32 %s3935_s26, 4  ;;  %s50_s25 = int_to_ptr.vmem [resolvable:$true] %s49_s25  ;;  %s4040_s27 = int_to_ptr.vmem [resolvable:$true] %s73_s27 }
   0xa   :  { %s3702_s0 = scalar_lea.hbm %s5436_s3, 256 }
   0xb   :  { %p3703_p0 = scmp.ne.s32.totalorder %s5436_s3, %s3702_s0  ;;  %p3706_p1 = scmp.lt.u32.totalorder %s3702_s0, %s5436_s3 }
   0xd   :  { %p3708_p2 = pnand %p3706_p1, %p3703_p0 }
   0xf   :  { %3711 = shalt.err (!%p3708_p2)
}
  0x10   :  { %s3712_s20 = scalar_lea.vmem %s50_s25, 256  ;;  %p3717_p4 = scmp.lt.s32.totalorder %s50_s25, %s50_s25 }
  0x11   :  { %p3713_p3 = scmp.ne.s32.totalorder %s50_s25, %s3712_s20  ;;  %p3718_p5 = scmp.lt.s32.totalorder %s3712_s20, %s3712_s20 }
  0x13   :  { %p3719_p6 = por %p3718_p5, %p3717_p4 }
  0x15   :  { %p3720_p7 = pnand %p3719_p6, %p3713_p3 }
  0x17   :  { %3723 = shalt.err (!%p3720_p7)
}
  0x18   :  { %s5453_s21 = smov 64   ;;  %s5455_s22 = smov 4  }
  0x19   :  { %55 = dma.hbm_to_vmem [thread:$0]  %s5436_s3, 256, %s50_s25, [#allocation6], %s5453_s21, %s5453_s21, %s5455_s22  }
  0x1a   :  { %s3724_s29 = scalar_lea.hbm %s5438_s5, 8192 }
  0x1b   :  { %p3725_p8 = scmp.ne.s32.totalorder %s5438_s5, %s3724_s29  ;;  %p3728_p9 = scmp.lt.u32.totalorder %s3724_s29, %s5438_s5 }
  0x1d   :  { %p3730_p10 = pnand %p3728_p9, %p3725_p8 }
  0x1f   :  { %3733 = shalt.err (!%p3730_p10)
}
  0x20   :  { %s3734_s1 = scalar_lea.vmem %s4040_s27, 8192  ;;  %p3739_p12 = scmp.lt.s32.totalorder %s4040_s27, %s4040_s27 }
  0x21   :  { %p3735_p11 = scmp.ne.s32.totalorder %s4040_s27, %s3734_s1  ;;  %p3740_p13 = scmp.lt.s32.totalorder %s3734_s1, %s3734_s1 }
  0x23   :  { %p3741_p0 = por %p3740_p13, %p3739_p12 }
  0x25   :  { %p3742_p1 = pnand %p3741_p0, %p3735_p11 }
  0x27   :  { %3745 = shalt.err (!%p3742_p1)
}
  0x28   :  { %s3938_s3 = smov 128   ;;  %s3939_s25 = smov 8  }
  0x29   :  { %79 = dma.hbm_to_vmem [thread:$0]  %s5438_s5, 8192, %s4040_s27, [#allocation9], %s3938_s3, %s3938_s3, %s3939_s25  }
  0x2a   :  { %s3940_s24 = smov [#allocation11]   ;;  %s3941_s28 = smov [#allocation14]  }
  0x2b   :  { %s95_s26 = sshll.u32 %s3940_s24, 4  ;;  %s123_s29 = sshll.u32 %s3941_s28, 4  ;;  %s96_s26 = int_to_ptr.vmem [resolvable:$true] %s95_s26  ;;  %s4074_s29 = int_to_ptr.vmem [resolvable:$true] %s123_s29 }
  0x2c   :  { %s3746_s18 = scalar_lea.hbm %s5440_s7, 2048 }
  0x2d   :  { %p3747_p2 = scmp.ne.s32.totalorder %s5440_s7, %s3746_s18  ;;  %p3750_p3 = scmp.lt.u32.totalorder %s3746_s18, %s5440_s7 }
  0x2f   :  { %p3752_p4 = pnand %p3750_p3, %p3747_p2 }
  0x31   :  { %3755 = shalt.err (!%p3752_p4)
}
  0x32   :  { %s3756_s5 = scalar_lea.vmem %s96_s26, 2048  ;;  %p3761_p6 = scmp.lt.s32.totalorder %s96_s26, %s96_s26 }
  0x33   :  { %p3757_p5 = scmp.ne.s32.totalorder %s96_s26, %s3756_s5  ;;  %p3762_p7 = scmp.lt.s32.totalorder %s3756_s5, %s3756_s5 }
  0x35   :  { %p3763_p8 = por %p3762_p7, %p3761_p6 }
  0x37   :  { %p3764_p9 = pnand %p3763_p8, %p3757_p5 }
  0x39   :  { %3767 = shalt.err (!%p3764_p9)
}
  0x3a   :  { %s5482_s27 = smov 4   ;;  %s5483_s3 = smov 64  }
  0x3b   :  { %101 = dma.hbm_to_vmem [thread:$0]  %s5440_s7, 2048, %s96_s26, [#allocation12], %s5483_s3, %s5483_s3, %s5482_s27  }
  0x3c   :  { %s3768_s21 = scalar_lea.hbm %s5445_s12, 256 }
  0x3d   :  { %p3769_p10 = scmp.ne.s32.totalorder %s5445_s12, %s3768_s21  ;;  %p3772_p11 = scmp.lt.u32.totalorder %s3768_s21, %s5445_s12 }
  0x3f   :  { %p3774_p12 = pnand %p3772_p11, %p3769_p10 }
  0x41   :  { %3777 = shalt.err (!%p3774_p12)
}
  0x42   :  { %s3778_s18 = scalar_lea.vmem %s4074_s29, 256  ;;  %p3783_p0 = scmp.lt.s32.totalorder %s4074_s29, %s4074_s29 }
  0x43   :  { %p3779_p13 = scmp.ne.s32.totalorder %s4074_s29, %s3778_s18  ;;  %p3784_p1 = scmp.lt.s32.totalorder %s3778_s18, %s3778_s18 }
  0x45   :  { %p3785_p2 = por %p3784_p1, %p3783_p0 }
  0x47   :  { %p3786_p3 = pnand %p3785_p2, %p3779_p13 }
  0x49   :  { %3789 = shalt.err (!%p3786_p3)
}
  0x4a   :  { %129 = dma.hbm_to_vmem [thread:$0]  %s5445_s12, 256, %s4074_s29, [#allocation15], %s5483_s3, %s5483_s3, %s5482_s27  }
  0x4b   :  { %s3942_s19 = smov [#allocation2]   ;;  %s3943_s5 = smov [#allocation7]  }
  0x4c   :  { %s35_s1 = sshll.u32 %s3942_s19, 4  ;;  %s61_s25 = sshll.u32 %s3943_s5, 4  ;;  %s36_s1 = int_to_ptr.vmem [resolvable:$true] %s35_s1  ;;  %s4111_s25 = int_to_ptr.vmem [resolvable:$true] %s61_s25 }
  0x4d   :  { %s5484_s24 = sld [smem:[#allocation68_spill]] }
  0x53   :  { %s3790_s21 = scalar_lea.hbm %s5484_s24, 512 }
  0x54   :  { %p3791_p4 = scmp.ne.s32.totalorder %s5484_s24, %s3790_s21  ;;  %p3794_p5 = scmp.lt.u32.totalorder %s3790_s21, %s5484_s24 }
  0x56   :  { %p3796_p6 = pnand %p3794_p5, %p3791_p4 }
  0x58   :  { %3799 = shalt.err (!%p3796_p6)
}
  0x59   :  { %s3800_s12 = scalar_lea.vmem %s36_s1, 512  ;;  %p3805_p8 = scmp.lt.s32.totalorder %s36_s1, %s36_s1 }
  0x5a   :  { %p3801_p7 = scmp.ne.s32.totalorder %s36_s1, %s3800_s12  ;;  %p3806_p9 = scmp.lt.s32.totalorder %s3800_s12, %s3800_s12 }
  0x5c   :  { %p3807_p10 = por %p3806_p9, %p3805_p8 }
  0x5e   :  { %p3808_p11 = pnand %p3807_p10, %p3801_p7 }
  0x60   :  { %3811 = shalt.err (!%p3808_p11)
}
  0x61   :  { %41 = dma.hbm_to_vmem [thread:$0]  %s5484_s24, 512, %s36_s1, [#allocation3], %s5483_s3, %s5483_s3, %s5482_s27  }
  0x62   :  { %s3812_s19 = scalar_lea.hbm %s5437_s4, 256 }
  0x63   :  { %p3813_p12 = scmp.ne.s32.totalorder %s5437_s4, %s3812_s19  ;;  %p3816_p13 = scmp.lt.u32.totalorder %s3812_s19, %s5437_s4 }
  0x65   :  { %p3818_p0 = pnand %p3816_p13, %p3813_p12 }
  0x67   :  { %3821 = shalt.err (!%p3818_p0)
}
  0x68   :  { %s3822_s22 = scalar_lea.vmem %s4111_s25, 256  ;;  %p3827_p2 = scmp.lt.s32.totalorder %s4111_s25, %s4111_s25 }
  0x69   :  { %p3823_p1 = scmp.ne.s32.totalorder %s4111_s25, %s3822_s22  ;;  %p3828_p3 = scmp.lt.s32.totalorder %s3822_s22, %s3822_s22 }
  0x6b   :  { %p3829_p4 = por %p3828_p3, %p3827_p2 }
  0x6d   :  { %p3830_p5 = pnand %p3829_p4, %p3823_p1 }
  0x6f   :  { %3833 = shalt.err (!%p3830_p5)
}
  0x70   :  { %67 = dma.hbm_to_vmem [thread:$0]  %s5437_s4, 256, %s4111_s25, [#allocation6], %s5483_s3, %s5483_s3, %s5482_s27  }
  0x71   :  { %s3944_s28 = smov [#allocation10]   ;;  %s3945_s30 = smov [#allocation13]  }
  0x72   :  { %s86_s0 = sshll.u32 %s3944_s28, 4  ;;  %s112_s12 = sshll.u32 %s3945_s30, 4  ;;  %s87_s0 = int_to_ptr.vmem [resolvable:$true] %s86_s0  ;;  %s113_s12 = int_to_ptr.vmem [resolvable:$true] %s112_s12 }
  0x73   :  { %s3834_s7 = scalar_lea.hbm %s5439_s6, 32 }
  0x74   :  { %p3835_p6 = scmp.ne.s32.totalorder %s5439_s6, %s3834_s7  ;;  %p3838_p7 = scmp.lt.u32.totalorder %s3834_s7, %s5439_s6 }
  0x76   :  { %p3840_p8 = pnand %p3838_p7, %p3835_p6 }
  0x78   :  { %3843 = shalt.err (!%p3840_p8)
}
  0x79   :  { %s3844_s4 = scalar_lea.vmem %s87_s0, 32  ;;  %p3849_p10 = scmp.lt.s32.totalorder %s87_s0, %s87_s0 }
  0x7a   :  { %p3845_p9 = scmp.ne.s32.totalorder %s87_s0, %s3844_s4  ;;  %p3850_p11 = scmp.lt.s32.totalorder %s3844_s4, %s3844_s4 }
  0x7c   :  { %p3851_p12 = por %p3850_p11, %p3849_p10 }
  0x7e   :  { %p3852_p13 = pnand %p3851_p12, %p3845_p9 }
  0x80   :  { %3855 = shalt.err (!%p3852_p13)
}
  0x81   :  { %89 = dma.hbm_to_vmem [thread:$0]  %s5439_s6, 32, %s87_s0, [#allocation9]  }
  0x82   :  { %s3856_s1 = scalar_lea.hbm %s5443_s10, 16 }
  0x83   :  { %p3857_p0 = scmp.ne.s32.totalorder %s5443_s10, %s3856_s1  ;;  %p3860_p1 = scmp.lt.u32.totalorder %s3856_s1, %s5443_s10 }
  0x85   :  { %p3862_p2 = pnand %p3860_p1, %p3857_p0 }
  0x87   :  { %3865 = shalt.err (!%p3862_p2)
}
  0x88   :  { %s3866_s18 = scalar_lea.vmem %s113_s12, 16  ;;  %s3870_s7 = scalar_lea.vmem %s113_s12, 32 }
  0x89   :  { %p3867_p3 = scmp.ne.s32.totalorder %s113_s12, %s3866_s18  ;;  %p3871_p4 = scmp.lt.s32.totalorder %s113_s12, %s113_s12 }
  0x8a   :  { %p3872_p5 = scmp.lt.s32.totalorder %s3870_s7, %s3866_s18 }
  0x8c   :  { %p3873_p6 = por %p3872_p5, %p3871_p4 }
  0x8e   :  { %p3874_p7 = pnand %p3873_p6, %p3867_p3 }
  0x90   :  { %3877 = shalt.err (!%p3874_p7)
}
  0x91   :  { %115 = dma.hbm_to_vmem [thread:$0]  %s5443_s10, 16, %s113_s12, [#allocation12]  }
  0x92   :  { %s3946_s26 = smov [#allocation16]   ;;  %s3878_s4 = scalar_lea.hbm %s5448_s15, 256 }
  0x93   :  { %s139_s19 = sshll.u32 %s3946_s26, 4  ;;  %p3879_p8 = scmp.ne.s32.totalorder %s5448_s15, %s3878_s4  ;;  %s140_s19 = int_to_ptr.vmem [resolvable:$true] %s139_s19 }
  0x94   :  { %p3882_p9 = scmp.lt.u32.totalorder %s3878_s4, %s5448_s15 }
  0x96   :  { %p3884_p10 = pnand %p3882_p9, %p3879_p8 }
  0x98   :  { %3887 = shalt.err (!%p3884_p10)
}
  0x99   :  { %s3888_s1 = scalar_lea.vmem %s140_s19, 256  ;;  %p3893_p12 = scmp.lt.s32.totalorder %s140_s19, %s140_s19 }
  0x9a   :  { %p3889_p11 = scmp.ne.s32.totalorder %s140_s19, %s3888_s1  ;;  %p3894_p13 = scmp.lt.s32.totalorder %s3888_s1, %s3888_s1 }
  0x9c   :  { %p3895_p0 = por %p3894_p13, %p3893_p12 }
  0x9e   :  { %p3896_p1 = pnand %p3895_p0, %p3889_p11 }
  0xa0   :  { %3899 = shalt.err (!%p3896_p1)
}
  0xa1   :  { %145 = dma.hbm_to_vmem [thread:$0]  %s5448_s15, 256, %s140_s19, [#allocation15], %s5483_s3, %s5483_s3, %s5482_s27  }
  0xa2   :  { %3922 = dma.done.wait [#allocation3], 512  }
  0xa3   :  { %3923 = vsyncadd [#allocation3], 4294966784 }
  0xa4   :  { %3924 = dma.done.wait [#allocation6], 512  }
  0xa5   :  { %3925 = vsyncadd [#allocation6], 4294966784 }
  0xa6   :  { %3926 = dma.done.wait [#allocation9], 8224  }
  0xa7   :  { %3927 = vsyncadd [#allocation9], 4294959072 }
  0xa8   :  { %3928 = dma.done.wait [#allocation12], 2064  }
  0xa9   :  { %3929 = vsyncadd [#allocation12], 4294965232 }
  0xaa   :  { %3930 = dma.done.wait [#allocation15], 512  }
  0xab   :  { %3931 = vsyncadd [#allocation15], 4294966784  ;;  %v483_v0 = vlaneseq  ;;  %v3558_v2 = vld [vmem:[#allocation5] sm:$0xff]   ;;  %v3559_v7 = vld [vmem:[#allocation5 + $0x8] sm:$0xff]   ;;  %vm248_vm0 = vcmask 261120   ;;  %s5486_s3 = sld [smem:[#allocation67_spill]] }
  0xac   :  { %v3375_v4 = vld [vmem:[#allocation2] sm:$0xff]   ;;  %3452 = vmatprep.subr.bf16.mxu0 %v3558_v2  ;;  %v3567_v16 = vld [vmem:[#allocation8 + $0x14] ss:$8 sps:$4 sm:$0xff]   ;;  %v4216_v18 = vld [vmem:[#allocation2 + $0x8] sm:$0xff]   ;;  %vm1899_vm1 = vcmask 1041409   ;;  %vm1901_vm2 = vcmask 1042434  }
  0xad   :  { %v4187_v1 = vshrl.u32 %v483_v0, 7  ;;  %v4192_v5 = vunpack.c.h.bf16 %v3375_v4  ;;  %v4194_v6 = vunpack.c.l.bf16 %v3375_v4  ;;  %3453 = vmatpush3.bf16.msra.mxu0 %v3558_v2  ;;  %v3564_v11 = vld [vmem:[#allocation8 + $0x4] ss:$8 sps:$4 sm:$0xff]   ;;  %v3562_v14 = vld [vmem:[#allocation8] ss:$8 sps:$4 sm:$0xff]   ;;  %v4222_v22 = vunpack.c.l.bf16 %v4216_v18  ;;  %v3391_v60 = vld [vmem:[#allocation2 + $0x10] sm:$0xff]  }
  0xae   :  { %3454 = vmatprep.subr.bf16.mxu0 %v3559_v7  ;;  %v3565_v19 = vld [vmem:[#allocation8 + $0x10] ss:$8 sps:$4 sm:$0xff]   ;;  %v3572_v20 = vld [vmem:[#allocation8 + $0x24] ss:$8 sps:$4 sm:$0xff]   ;;  %v3570_v24 = vld [vmem:[#allocation8 + $0x20] ss:$8 sps:$4 sm:$0xff]   ;;  %v4270_v50 = vunpack.c.h.bf16 %v4216_v18  ;;  %v4280_v2 = vunpack.c.l.bf16 %v3391_v60 }
  0xaf   :  { %v4190_v3 = vsub.s32 0, %v4187_v1  ;;  %v4208_v13 = vsub.s32 1, %v4187_v1  ;;  %v3575_v26 = vld [vmem:[#allocation8 + $0x34] ss:$8 sps:$4 sm:$0xff]   ;;  %v3573_v28 = vld [vmem:[#allocation8 + $0x30] ss:$8 sps:$4 sm:$0xff]  }
  0xb0   :  { %v3580_v29 = vld [vmem:[#allocation8 + $0x44] ss:$8 sps:$4 sm:$0xff]   ;;  %v4240_v32 = vsub.s32 2, %v4187_v1  ;;  %v3578_v33 = vld [vmem:[#allocation8 + $0x40] ss:$8 sps:$4 sm:$0xff]   ;;  %v4252_v40 = vsub.s32 3, %v4187_v1 }
  0xb1   :  { %5485 = vst [vmem:[#allocation24_spill] sm:$0xff] %v4190_v3  ;;  %v3560_v8 = vld [vmem:[%s5486_s3] sm:$0xff]   ;;  %v497_v9 = vrot.slane %v4192_v5, %v4190_v3  ;;  %v486_v10 = vrot.slane %v4194_v6, %v4190_v3  ;;  %v3561_v12 = vld [vmem:[%s5486_s3 + $0x8] sm:$0xff]   ;;  %5487 = vst [vmem:[#allocation25_spill] sm:$0xff] %v4208_v13  ;;  %3455 = vmatpush3.bf16.msra.mxu0 %v3559_v7  ;;  %v662_v17 = vrot.slane %v4194_v6, %v4208_v13  ;;  %vm1903_vm3 = vcmask 1043459   ;;  %s3949_s12 = smov [#allocation17]  }
  0xb2   :  { %3456 = vmatprep.mubr.msk.bf16.mxu0 %vm248_vm0, %v3560_v8  ;;  %2560 = vmatprep.subr.bf16.mxu0 %v3564_v11  ;;  %v3568_v15 = vld [vmem:[%s5486_s3 + $0x10] sm:$0xff]   ;;  %v673_v21 = vrot.slane %v4192_v5, %v4208_v13  ;;  %v3569_v23 = vld [vmem:[%s5486_s3 + $0x18] sm:$0xff]   ;;  %v3576_v25 = vld [vmem:[%s5486_s3 + $0x20] sm:$0xff]   ;;  %v508_v27 = vrot.slane %v4222_v22, %v4190_v3  ;;  %v684_v30 = vrot.slane %v4222_v22, %v4208_v13  ;;  %vm1905_vm4 = vcmask 1044484   ;;  %s3229_s15 = sshll.u32 %s3949_s12, 4  ;;  %s3230_s15 = int_to_ptr.vmem [resolvable:$true] %s3229_s15 }
  0xb3   :  { %499 = vbcast.lane.b32.xlu1 %v497_v9, 256  ;;  %488 = vbcast.lane.b32.xlu0 %v486_v10, 256  ;;  %v3577_v31 = vld [vmem:[%s5486_s3 + $0x28] sm:$0xff]   ;;  %v3584_v34 = vld [vmem:[%s5486_s3 + $0x30] sm:$0xff]   ;;  %v838_v36 = vrot.slane %v4194_v6, %v4240_v32  ;;  %v849_v39 = vrot.slane %v4192_v5, %v4240_v32  ;;  %v3585_v41 = vld [vmem:[%s5486_s3 + $0x38] sm:$0xff]   ;;  %v1014_v46 = vrot.slane %v4194_v6, %v4252_v40  ;;  %vm1907_vm5 = vcmask 1045509   ;;  %p3905_p3 = scmp.lt.s32.totalorder %s3230_s15, %s3230_s15 }
  0xb4   :  { %3457 = vmatmul.mubr.msk.bf16.vlgmr.msra.gmra.mrb[0].mxu0 %vm248_vm0, %v3561_v12  ;;  %v3583_v35 = vld [vmem:[#allocation8 + $0x54] ss:$8 sps:$4 sm:$0xff]   ;;  %v3581_v37 = vld [vmem:[#allocation8 + $0x50] ss:$8 sps:$4 sm:$0xff]   ;;  %v3588_v38 = vld [vmem:[#allocation8 + $0x64] ss:$8 sps:$4 sm:$0xff]   ;;  %v1025_v49 = vrot.slane %v4192_v5, %v4252_v40  ;;  %v519_v53 = vrot.slane %v4270_v50, %v4190_v3  ;;  %v695_v56 = vrot.slane %v4270_v50, %v4208_v13  ;;  %v860_v59 = vrot.slane %v4222_v22, %v4240_v32 }
  0xb5   :  { %2561 = vmatpush1.bf16.msra.mxu0 %v3562_v14  ;;  %3460 = vmatprep.mubr.msk.bf16.mxu0 %vm248_vm0, %v3568_v15  ;;  %v3586_v42 = vld [vmem:[#allocation8 + $0x60] ss:$8 sps:$4 sm:$0xff]   ;;  %v3591_v44 = vld [vmem:[#allocation8 + $0x74] ss:$8 sps:$4 sm:$0xff]   ;;  %v3589_v47 = vld [vmem:[#allocation8 + $0x70] ss:$8 sps:$4 sm:$0xff]   ;;  %v1036_v63 = vrot.slane %v4222_v22, %v4252_v40  ;;  %v530_v7 = vrot.slane %v4280_v2, %v4190_v3  ;;  %v871_v14 = vrot.slane %v4270_v50, %v4240_v32 }
  0xb6   :  { %2562 = vmatprep.subr.bf16.mxu0 %v3567_v16  ;;  %v4260_v43 = vld [vmem:[%s5435_s2] sm:$0xff]  ;;  %v3597_v52 = vld [vmem:[#allocation8 + $0x94] ss:$8 sps:$4 sm:$0xff]   ;;  %v3595_v54 = vld [vmem:[#allocation8 + $0x90] ss:$8 sps:$4 sm:$0xff]   ;;  %v1047_v18 = vrot.slane %v4270_v50, %v4252_v40  ;;  %vm1909_vm6 = vcmask 1046534  }
  0xb7   :  { %503 = vbcast.lane.b32.xlu1 %v497_v9, 264  ;;  %492 = vbcast.lane.b32.xlu0 %v486_v10, 264  ;;  %v3267_v45 = vcombine.high %v4260_v43, %v4260_v43  ;;  %v3594_v48 = vld [vmem:[#allocation8 + $0x84] ss:$8 sps:$4 sm:$0xff]   ;;  %v3592_v51 = vld [vmem:[#allocation8 + $0x80] ss:$8 sps:$4 sm:$0xff]   ;;  %v706_v10 = vrot.slane %v4280_v2, %v4208_v13 }
  0xb8   :  { %v3600_v55 = vld [vmem:[#allocation8 + $0xa4] ss:$8 sps:$4 sm:$0xff]   ;;  %v3598_v57 = vld [vmem:[#allocation8 + $0xa0] ss:$8 sps:$4 sm:$0xff]   ;;  %v3603_v58 = vld [vmem:[#allocation8 + $0xb4] ss:$8 sps:$4 sm:$0xff]  }
  0xb9   :  { %2563 = vmatpush1.bf16.msra.mxu0 %v3565_v19  ;;  %v3601_v61 = vld [vmem:[#allocation8 + $0xb0] ss:$8 sps:$4 sm:$0xff]   ;;  %v3606_v62 = vld [vmem:[#allocation8 + $0xc4] ss:$8 sps:$4 sm:$0xff]   ;;  %v3604_v0 = vld [vmem:[#allocation8 + $0xc0] ss:$8 sps:$4 sm:$0xff]  }
  0xba   :  { %2564 = vmatprep.subr.bf16.mxu0 %v3572_v20  ;;  %v3609_v4 = vld [vmem:[#allocation8 + $0xd4] ss:$8 sps:$4 sm:$0xff]   ;;  %v3607_v8 = vld [vmem:[#allocation8 + $0xd0] ss:$8 sps:$4 sm:$0xff]   ;;  %v3612_v9 = vld [vmem:[#allocation8 + $0xe4] ss:$8 sps:$4 sm:$0xff]   ;;  %v4295_v20 = vunpack.c.h.bf16 %v3391_v60 }
  0xbb   :  { %668 = vbcast.lane.b32.xlu1 %v662_v17, 264  ;;  %664 = vbcast.lane.b32.xlu0 %v662_v17, 256  ;;  %v3610_v11 = vld [vmem:[#allocation8 + $0xe0] ss:$8 sps:$4 sm:$0xff]   ;;  %v3615_v12 = vld [vmem:[#allocation8 + $0xf4] ss:$8 sps:$4 sm:$0xff]  }
  0xbc   :  { %3461 = vmatmul.mubr.msk.bf16.gmra.mrb[4].mxu0 %vm248_vm0, %v3569_v23  ;;  %v3613_v15 = vld [vmem:[#allocation8 + $0xf0] ss:$8 sps:$4 sm:$0xff]   ;;  %v3620_v16 = vld [vmem:[#allocation8 + $0x104] ss:$8 sps:$4 sm:$0xff]   ;;  %v3618_v19 = vld [vmem:[#allocation8 + $0x100] ss:$8 sps:$4 sm:$0xff]  }
  0xbd   :  { %2565 = vmatpush1.bf16.msra.mxu0 %v3570_v24  ;;  %3464 = vmatprep.mubr.msk.bf16.mxu0 %vm248_vm0, %v3576_v25  ;;  %v4291_v17 = vld [vmem:[%s5435_s2 + $0x8] sm:$0xff]  ;;  %v3623_v23 = vld [vmem:[#allocation8 + $0x114] ss:$8 sps:$4 sm:$0xff]   ;;  %v541_v25 = vrot.slane %v4295_v20, %v4190_v3  ;;  %vm1911_vm7 = vcmask 1047559   ;;  %vm3948_vm8 = vmmov 0  }
  0xbe   :  { %2566 = vmatprep.subr.bf16.mxu0 %v3575_v26  ;;  %v3269_v24 = vcombine.high %v4291_v17, %v4291_v17  ;;  %v3621_v26 = vld [vmem:[#allocation8 + $0x110] ss:$8 sps:$4 sm:$0xff]   ;;  %v3653_v60 = vld [vmem:[#allocation8 + $0x1b4] ss:$8 sps:$4 sm:$0xff]  }
  0xbf   :  { %679 = vbcast.lane.b32.xlu1 %v673_v21, 264  ;;  %675 = vbcast.lane.b32.xlu0 %v673_v21, 256  ;;  %v3266_v21 = vcombine.low %v4260_v43, %v4260_v43  ;;  %v3638_v43 = vld [vmem:[#allocation8 + $0x164] ss:$8 sps:$4 sm:$0xff]  }
  0xc1   :  { %2567 = vmatpush1.bf16.msra.mxu0 %v3573_v28  ;;  %v717_v28 = vrot.slane %v4295_v20, %v4208_v13 }
  0xc2   :  { %2568 = vmatprep.subr.bf16.mxu0 %v3580_v29  ;;  %v3624_v29 = vld [vmem:[#allocation8 + $0x120] ss:$8 sps:$4 sm:$0xff]  }
  0xc3   :  { %514 = vbcast.lane.b32.xlu1 %v508_v27, 264  ;;  %510 = vbcast.lane.b32.xlu0 %v508_v27, 256  ;;  %v3626_v27 = vld [vmem:[#allocation8 + $0x124] ss:$8 sps:$4 sm:$0xff]  }
  0xc4   :  { %3465 = vmatmul.mubr.msk.bf16.gmra.mrb[8].mxu0 %vm248_vm0, %v3577_v31  ;;  %v882_v31 = vrot.slane %v4280_v2, %v4240_v32 }
  0xc5   :  { %2569 = vmatpush1.bf16.msra.mxu0 %v3578_v33  ;;  %3468 = vmatprep.mubr.msk.bf16.mxu0 %vm248_vm0, %v3584_v34  ;;  %v3392_v33 = vld [vmem:[#allocation2 + $0x18] sm:$0xff]  }
  0xc6   :  { %2570 = vmatprep.subr.bf16.mxu0 %v3583_v35  ;;  %v3627_v34 = vld [vmem:[#allocation8 + $0x130] ss:$8 sps:$4 sm:$0xff]   ;;  %v3632_v35 = vld [vmem:[#allocation8 + $0x144] ss:$8 sps:$4 sm:$0xff]  }
  0xc7   :  { %690 = vbcast.lane.b32.xlu1 %v684_v30, 264  ;;  %686 = vbcast.lane.b32.xlu0 %v684_v30, 256  ;;  %v3629_v30 = vld [vmem:[#allocation8 + $0x134] ss:$8 sps:$4 sm:$0xff]  }
  0xc9   :  { %2571 = vmatpush1.bf16.msra.mxu0 %v3581_v37  ;;  %v4309_v37 = vunpack.c.l.bf16 %v3392_v33 }
  0xca   :  { %2572 = vmatprep.subr.bf16.mxu0 %v3588_v38  ;;  %v3630_v38 = vld [vmem:[#allocation8 + $0x140] ss:$8 sps:$4 sm:$0xff]  }
  0xcb   :  { %844 = vbcast.lane.b32.xlu1 %v838_v36, 264  ;;  %840 = vbcast.lane.b32.xlu0 %v838_v36, 256  ;;  %v1058_v36 = vrot.slane %v4280_v2, %v4252_v40 }
  0xcc   :  { %3469 = vmatmul.mubr.msk.bf16.gmra.mrb[12].mxu0 %vm248_vm0, %v3585_v41  ;;  %v552_v41 = vrot.slane %v4309_v37, %v4190_v3 }
  0xcd   :  { %2573 = vmatpush1.bf16.msra.mxu0 %v3586_v42  ;;  %2592 = vmatprep.mubr.bf16.mxu0 %v3267_v45  ;;  %v3633_v42 = vld [vmem:[#allocation8 + $0x150] ss:$8 sps:$4 sm:$0xff]   ;;  %v3636_v45 = vld [vmem:[#allocation8 + $0x160] ss:$8 sps:$4 sm:$0xff]  }
  0xce   :  { %2574 = vmatprep.subr.bf16.mxu0 %v3591_v44  ;;  %v728_v44 = vrot.slane %v4309_v37, %v4208_v13 }
  0xcf   :  { %855 = vbcast.lane.b32.xlu1 %v849_v39, 264  ;;  %851 = vbcast.lane.b32.xlu0 %v849_v39, 256  ;;  %v3635_v39 = vld [vmem:[#allocation8 + $0x154] ss:$8 sps:$4 sm:$0xff]  }
  0xd1   :  { %2575 = vmatpush1.bf16.msra.mxu0 %v3589_v47  ;;  %v893_v47 = vrot.slane %v4295_v20, %v4240_v32 }
  0xd2   :  { %2576 = vmatprep.subr.bf16.mxu0 %v3594_v48  ;;  %v3639_v48 = vld [vmem:[#allocation8 + $0x170] ss:$8 sps:$4 sm:$0xff]  }
  0xd3   :  { %1020 = vbcast.lane.b32.xlu1 %v1014_v46, 264  ;;  %1016 = vbcast.lane.b32.xlu0 %v1014_v46, 256  ;;  %v3641_v46 = vld [vmem:[#allocation8 + $0x174] ss:$8 sps:$4 sm:$0xff]  }
  0xd5   :  { %2577 = vmatpush1.bf16.msra.mxu0 %v3592_v51  ;;  %v1069_v51 = vrot.slane %v4295_v20, %v4252_v40 }
  0xd6   :  { %2578 = vmatprep.subr.bf16.mxu0 %v3597_v52  ;;  %v4319_v52 = vunpack.c.h.bf16 %v3392_v33  ;;  %v3668_v33 = vld [vmem:[#allocation7] sm:$0xff]  }
  0xd7   :  { %1031 = vbcast.lane.b32.xlu1 %v1025_v49, 264  ;;  %1027 = vbcast.lane.b32.xlu0 %v1025_v49, 256  ;;  %v3644_v49 = vld [vmem:[#allocation8 + $0x184] ss:$8 sps:$4 sm:$0xff]  }
  0xd8   :  { %3472 = vmatprep.subr.bf16.mxu1 %v3668_v33 }
  0xd9   :  { %2579 = vmatpush1.bf16.msra.mxu0 %v3595_v54  ;;  %v3647_v54 = vld [vmem:[#allocation8 + $0x194] ss:$8 sps:$4 sm:$0xff]   ;;  %3473 = vmatpush3.bf16.msra.mxu1 %v3668_v33 }
  0xda   :  { %2580 = vmatprep.subr.bf16.mxu0 %v3600_v55  ;;  %v563_v55 = vrot.slane %v4319_v52, %v4190_v3 }
  0xdb   :  { %525 = vbcast.lane.b32.xlu1 %v519_v53, 264  ;;  %521 = vbcast.lane.b32.xlu0 %v519_v53, 256  ;;  %v3642_v53 = vld [vmem:[#allocation8 + $0x180] ss:$8 sps:$4 sm:$0xff]  }
  0xdd   :  { %2581 = vmatpush1.bf16.msra.mxu0 %v3598_v57  ;;  %v3650_v57 = vld [vmem:[#allocation8 + $0x1a4] ss:$8 sps:$4 sm:$0xff]  }
  0xde   :  { %2582 = vmatprep.subr.bf16.mxu0 %v3603_v58  ;;  %v739_v58 = vrot.slane %v4319_v52, %v4208_v13 }
  0xdf   :  { %701 = vbcast.lane.b32.xlu1 %v695_v56, 264  ;;  %697 = vbcast.lane.b32.xlu0 %v695_v56, 256  ;;  %v3645_v56 = vld [vmem:[#allocation8 + $0x190] ss:$8 sps:$4 sm:$0xff]  }
  0xe1   :  { %2583 = vmatpush1.bf16.msra.mxu0 %v3601_v61  ;;  %v904_v61 = vrot.slane %v4309_v37, %v4240_v32 }
  0xe2   :  { %2584 = vmatprep.subr.bf16.mxu0 %v3606_v62  ;;  %v3651_v62 = vld [vmem:[#allocation8 + $0x1b0] ss:$8 sps:$4 sm:$0xff]  }
  0xe3   :  { %866 = vbcast.lane.b32.xlu1 %v860_v59, 264  ;;  %862 = vbcast.lane.b32.xlu0 %v860_v59, 256  ;;  %v3648_v59 = vld [vmem:[#allocation8 + $0x1a0] ss:$8 sps:$4 sm:$0xff]  }
  0xe5   :  { %2585 = vmatpush1.bf16.msra.mxu0 %v3604_v0  ;;  %v1080_v0 = vrot.slane %v4309_v37, %v4252_v40 }
  0xe6   :  { %2586 = vmatprep.subr.bf16.mxu0 %v3609_v4 }
  0xe7   :  { %1042 = vbcast.lane.b32.xlu1 %v1036_v63, 264  ;;  %1038 = vbcast.lane.b32.xlu0 %v1036_v63, 256  ;;  %v3656_v63 = vld [vmem:[#allocation8 + $0x1c4] ss:$8 sps:$4 sm:$0xff]  }
  0xe9   :  { %2587 = vmatpush1.bf16.msra.mxu0 %v3607_v8  ;;  %v3654_v8 = vld [vmem:[#allocation8 + $0x1c0] ss:$8 sps:$4 sm:$0xff]  }
  0xea   :  { %2588 = vmatprep.subr.bf16.mxu0 %v3612_v9  ;;  %v3659_v9 = vld [vmem:[#allocation8 + $0x1d4] ss:$8 sps:$4 sm:$0xff]  }
  0xeb   :  { %536 = vbcast.lane.b32.xlu1 %v530_v7, 264  ;;  %532 = vbcast.lane.b32.xlu0 %v530_v7, 256 }
  0xed   :  { %2589 = vmatpush1.bf16.msra.mxu0 %v3610_v11 }
  0xee   :  { %2590 = vmatprep.subr.bf16.mxu0 %v3615_v12 }
  0xef   :  { %712 = vbcast.lane.b32.xlu1 %v706_v10, 264  ;;  %708 = vbcast.lane.b32.xlu0 %v706_v10, 256  ;;  %v915_v10 = vrot.slane %v4319_v52, %v4240_v32  ;;  %v3660_v32 = vld [vmem:[#allocation8 + $0x1e0] ss:$8 sps:$4 sm:$0xff]  }
  0xf1   :  { %2591 = vmatpush1.bf16.msra.mxu0 %v3613_v15  ;;  %v3662_v15 = vld [vmem:[#allocation8 + $0x1e4] ss:$8 sps:$4 sm:$0xff]  }
  0xf2   :  { %2601 = vmatprep.subr.bf16.mxu0 %v3620_v16  ;;  %v1091_v16 = vrot.slane %v4319_v52, %v4252_v40  ;;  %v3663_v40 = vld [vmem:[#allocation8 + $0x1f0] ss:$8 sps:$4 sm:$0xff]  }
  0xf3   :  { %877 = vbcast.lane.b32.xlu1 %v871_v14, 264  ;;  %873 = vbcast.lane.b32.xlu0 %v871_v14, 256  ;;  %v3657_v14 = vld [vmem:[#allocation8 + $0x1d0] ss:$8 sps:$4 sm:$0xff]  }
  0xf4   :  { %2593 = vmatmul.mubr.bf16.vlgmr.msra.gmra.mrb[16].mxu0 %v3266_v21 }
  0xf5   :  { %2602 = vmatpush1.bf16.msra.mxu0 %v3618_v19  ;;  %2633 = vmatprep.mubr.bf16.mxu0 %v3269_v24 }
  0xf6   :  { %2603 = vmatprep.subr.bf16.mxu0 %v3623_v23  ;;  %v3665_v23 = vld [vmem:[#allocation8 + $0x1f4] ss:$8 sps:$4 sm:$0xff]  }
  0xf7   :  { %1053 = vbcast.lane.b32.xlu1 %v1047_v18, 264  ;;  %1049 = vbcast.lane.b32.xlu0 %v1047_v18, 256  ;;  %v4342_v18 = vsub.s32 4, %v4187_v1 }
  0xf9   :  { %2604 = vmatpush1.bf16.msra.mxu0 %v3621_v26  ;;  %v1190_v24 = vrot.slane %v4194_v6, %v4342_v18 }
  0xfa   :  { %2605 = vmatprep.subr.bf16.mxu0 %v3626_v27  ;;  %v1201_v27 = vrot.slane %v4192_v5, %v4342_v18 }
  0xfb   :  { %547 = vbcast.lane.b32.xlu1 %v541_v25, 264  ;;  %543 = vbcast.lane.b32.xlu0 %v541_v25, 256 }
  0xfd   :  { %2606 = vmatpush1.bf16.msra.mxu0 %v3624_v29  ;;  %v3268_v29 = vcombine.low %v4291_v17, %v4291_v17 }
  0xfe   :  { %2607 = vmatprep.subr.bf16.mxu0 %v3629_v30 }
  0xff   :  { %723 = vbcast.lane.b32.xlu1 %v717_v28, 264  ;;  %719 = vbcast.lane.b32.xlu0 %v717_v28, 256  ;;  %v4357_v28 = vsub.s32 5, %v4187_v1 }
 0x101   :  { %2608 = vmatpush1.bf16.msra.mxu0 %v3627_v34  ;;  %v1366_v34 = vrot.slane %v4194_v6, %v4357_v28  ;;  %v1377_v17 = vrot.slane %v4192_v5, %v4357_v28 }
 0x102   :  { %2609 = vmatprep.subr.bf16.mxu0 %v3632_v35 }
 0x103   :  { %888 = vbcast.lane.b32.xlu1 %v882_v31, 264  ;;  %884 = vbcast.lane.b32.xlu0 %v882_v31, 256 }
 0x105   :  { %2610 = vmatpush1.bf16.msra.mxu0 %v3630_v38  ;;  %v3669_v38 = vld [vmem:[#allocation7 + $0x8] sm:$0xff]  }
 0x106   :  { %2611 = vmatprep.subr.bf16.mxu0 %v3635_v39  ;;  %3474 = vmatprep.subr.bf16.mxu1 %v3669_v38 }
 0x107   :  { %1064 = vbcast.lane.b32.xlu1 %v1058_v36, 264  ;;  %1060 = vbcast.lane.b32.xlu0 %v1058_v36, 256 }
 0x108   :  { %3475 = vmatpush3.bf16.msra.mxu1 %v3669_v38 }
 0x109   :  { %2612 = vmatpush1.bf16.msra.mxu0 %v3633_v42  ;;  %v1212_v42 = vrot.slane %v4222_v22, %v4342_v18 }
 0x10a   :  { %2613 = vmatprep.subr.bf16.mxu0 %v3638_v43 }
 0x10b   :  { %558 = vbcast.lane.b32.xlu1 %v552_v41, 264  ;;  %554 = vbcast.lane.b32.xlu0 %v552_v41, 256 }
 0x10d   :  { %2614 = vmatpush1.bf16.msra.mxu0 %v3636_v45  ;;  %v1388_v45 = vrot.slane %v4222_v22, %v4357_v28 }
 0x10e   :  { %2615 = vmatprep.subr.bf16.mxu0 %v3641_v46  ;;  %v4386_v46 = vsub.s32 6, %v4187_v1 }
 0x10f   :  { %734 = vbcast.lane.b32.xlu1 %v728_v44, 264  ;;  %730 = vbcast.lane.b32.xlu0 %v728_v44, 256 }
 0x111   :  { %2616 = vmatpush1.bf16.msra.mxu0 %v3639_v48 }
 0x112   :  { %2617 = vmatprep.subr.bf16.mxu0 %v3644_v49  ;;  %v1542_v49 = vrot.slane %v4194_v6, %v4386_v46 }
 0x113   :  { %899 = vbcast.lane.b32.xlu1 %v893_v47, 264  ;;  %895 = vbcast.lane.b32.xlu0 %v893_v47, 256 }
 0x115   :  { %2618 = vmatpush1.bf16.msra.mxu0 %v3642_v53 }
 0x116   :  { %2619 = vmatprep.subr.bf16.mxu0 %v3647_v54  ;;  %v1553_v54 = vrot.slane %v4192_v5, %v4386_v46 }
 0x117   :  { %1075 = vbcast.lane.b32.xlu1 %v1069_v51, 264  ;;  %1071 = vbcast.lane.b32.xlu0 %v1069_v51, 256 }
 0x119   :  { %2620 = vmatpush1.bf16.msra.mxu0 %v3645_v56 }
 0x11a   :  { %2621 = vmatprep.subr.bf16.mxu0 %v3650_v57 }
 0x11b   :  { %569 = vbcast.lane.b32.xlu1 %v563_v55, 264  ;;  %565 = vbcast.lane.b32.xlu0 %v563_v55, 256  ;;  %v4401_v55 = vsub.s32 7, %v4187_v1 }
 0x11d   :  { %2622 = vmatpush1.bf16.msra.mxu0 %v3648_v59 }
 0x11e   :  { %2623 = vmatprep.subr.bf16.mxu0 %v3653_v60 }
 0x11f   :  { %745 = vbcast.lane.b32.xlu1 %v739_v58, 264  ;;  %741 = vbcast.lane.b32.xlu0 %v739_v58, 256  ;;  %v1718_v58 = vrot.slane %v4194_v6, %v4401_v55 }
 0x121   :  { %2624 = vmatpush1.bf16.msra.mxu0 %v3651_v62 }
 0x122   :  { %2625 = vmatprep.subr.bf16.mxu0 %v3656_v63  ;;  %v1223_v63 = vrot.slane %v4270_v50, %v4342_v18 }
 0x123   :  { %910 = vbcast.lane.b32.xlu1 %v904_v61, 264  ;;  %906 = vbcast.lane.b32.xlu0 %v904_v61, 256  ;;  %v1729_v61 = vrot.slane %v4192_v5, %v4401_v55 }
 0x125   :  { %v4329_v4 = vpop.permute.xlu1 %499  ;;  %v4331_v7 = vpop.permute.xlu0 %488  ;;  %2626 = vmatpush1.bf16.msra.mxu0 %v3654_v8  ;;  %v1399_v8 = vrot.slane %v4270_v50, %v4357_v28 }
 0x126   :  { %2627 = vmatprep.subr.bf16.mxu0 %v3659_v9 }
 0x127   :  { %1086 = vbcast.lane.b32.xlu1 %v1080_v0, 264  ;;  %1082 = vbcast.lane.b32.xlu0 %v1080_v0, 256 }
 0x129   :  { %v4335_v11 = vpop.permute.xlu1 %503  ;;  %v4337_v12 = vpop.permute.xlu0 %492  ;;  %2628 = vmatpush1.bf16.msra.mxu0 %v3657_v14 }
 0x12a   :  { %2629 = vmatprep.subr.bf16.mxu0 %v3662_v15 }
 0x12b   :  { %921 = vbcast.lane.b32.xlu1 %v915_v10, 264  ;;  %917 = vbcast.lane.b32.xlu0 %v915_v10, 256  ;;  %v1564_v10 = vrot.slane %v4222_v22, %v4386_v46 }
 0x12d   :  { %v4344_v19 = vpop.permute.xlu1 %668  ;;  %v4346_v21 = vpop.permute.xlu0 %664  ;;  %2630 = vmatpush1.bf16.msra.mxu0 %v3660_v32 }
 0x12e   :  { %2631 = vmatprep.subr.bf16.mxu0 %v3665_v23 }
 0x12f   :  { %1097 = vbcast.lane.b32.xlu1 %v1091_v16, 264  ;;  %1093 = vbcast.lane.b32.xlu0 %v1091_v16, 256  ;;  %v1740_v16 = vrot.slane %v4222_v22, %v4401_v55 }
 0x131   :  { %v4350_v25 = vpop.permute.xlu1 %679  ;;  %v4352_v26 = vpop.permute.xlu0 %675  ;;  %2632 = vmatpush1.bf16.msra.mxu0 %v3663_v40 }
 0x133   :  { %1196 = vbcast.lane.b32.xlu1 %v1190_v24, 264  ;;  %1192 = vbcast.lane.b32.xlu0 %v1190_v24, 256  ;;  %v1234_v24 = vrot.slane %v4280_v2, %v4342_v18 }
 0x134   :  { %2634 = vmatmul.mubr.bf16.vlgmr.msra.gmra.mrb[16].mxu0 %v3268_v29  ;;  %v1410_v29 = vrot.slane %v4280_v2, %v4357_v28 }
 0x135   :  { %v4361_v30 = vpop.permute.xlu1 %514  ;;  %v4363_v31 = vpop.permute.xlu0 %510 }
 0x137   :  { %1207 = vbcast.lane.b32.xlu1 %v1201_v27, 264  ;;  %1203 = vbcast.lane.b32.xlu0 %v1201_v27, 256 }
 0x139   :  { %v4367_v35 = vpop.permute.xlu1 %690  ;;  %v4369_v36 = vpop.permute.xlu0 %686 }
 0x13b   :  { %1372 = vbcast.lane.b32.xlu1 %v1366_v34, 264  ;;  %1368 = vbcast.lane.b32.xlu0 %v1366_v34, 256  ;;  %v1575_v34 = vrot.slane %v4270_v50, %v4386_v46 }
 0x13d   :  { %v4373_v39 = vpop.permute.xlu1 %844  ;;  %v4375_v41 = vpop.permute.xlu0 %840 }
 0x13f   :  { %1383 = vbcast.lane.b32.xlu1 %v1377_v17, 264  ;;  %1379 = vbcast.lane.b32.xlu0 %v1377_v17, 256 }
 0x141   :  { %v4379_v43 = vpop.permute.xlu1 %855  ;;  %v4381_v44 = vpop.permute.xlu0 %851 }
 0x143   :  { %1218 = vbcast.lane.b32.xlu1 %v1212_v42, 264  ;;  %1214 = vbcast.lane.b32.xlu0 %v1212_v42, 256  ;;  %v1751_v42 = vrot.slane %v4270_v50, %v4401_v55 }
 0x145   :  { %v4388_v47 = vpop.permute.xlu1 %1020  ;;  %v4390_v48 = vpop.permute.xlu0 %1016 }
 0x146   :  { %5488 = vst [vmem:[#allocation26_spill] sm:$0xff] %v4388_v47 }
 0x147   :  { %1394 = vbcast.lane.b32.xlu1 %v1388_v45, 264  ;;  %1390 = vbcast.lane.b32.xlu0 %v1388_v45, 256 }
 0x149   :  { %v4394_v51 = vpop.permute.xlu1 %1031  ;;  %v4396_v53 = vpop.permute.xlu0 %1027 }
 0x14a   :  { %5489 = vst [vmem:[#allocation27_spill] sm:$0xff] %v4394_v51 }
 0x14b   :  { %1548 = vbcast.lane.b32.xlu1 %v1542_v49, 264  ;;  %1544 = vbcast.lane.b32.xlu0 %v1542_v49, 256 }
 0x14d   :  { %v4403_v56 = vpop.permute.xlu1 %525  ;;  %v4405_v57 = vpop.permute.xlu0 %521 }
 0x14f   :  { %1559 = vbcast.lane.b32.xlu1 %v1553_v54, 264  ;;  %1555 = vbcast.lane.b32.xlu0 %v1553_v54, 256  ;;  %v1245_v54 = vrot.slane %v4295_v20, %v4342_v18 }
 0x151   :  { %v4409_v59 = vpop.permute.xlu1 %701  ;;  %v4411_v60 = vpop.permute.xlu0 %697 }
 0x153   :  { %1724 = vbcast.lane.b32.xlu1 %v1718_v58, 264  ;;  %1720 = vbcast.lane.b32.xlu0 %v1718_v58, 256 }
 0x155   :  { %v4415_v1 = vpop.permute.xlu1 %866  ;;  %v4417_v62 = vpop.permute.xlu0 %862 }
 0x157   :  { %1735 = vbcast.lane.b32.xlu1 %v1729_v61, 264  ;;  %1731 = vbcast.lane.b32.xlu0 %v1729_v61, 256 }
 0x159   :  { %v4421_v0 = vpop.permute.xlu1 %1042  ;;  %v4423_v6 = vpop.permute.xlu0 %1038 }
 0x15a   :  { %5490 = vst [vmem:[#allocation28_spill] sm:$0xff] %v4421_v0  ;;  %5491 = vst [vmem:[#allocation29_spill] sm:$0xff] %v4423_v6 }
 0x15b   :  { %1229 = vbcast.lane.b32.xlu1 %v1223_v63, 264  ;;  %1225 = vbcast.lane.b32.xlu0 %v1223_v63, 256  ;;  %v1421_v63 = vrot.slane %v4295_v20, %v4357_v28 }
 0x15d   :  { %v4427_v9 = vpop.permute.xlu1 %536  ;;  %v4429_v5 = vpop.permute.xlu0 %532 }
 0x15f   :  { %1405 = vbcast.lane.b32.xlu1 %v1399_v8, 264  ;;  %1401 = vbcast.lane.b32.xlu0 %v1399_v8, 256 }
 0x161   :  { %v4433_v14 = vpop.permute.xlu1 %712  ;;  %v4435_v15 = vpop.permute.xlu0 %708 }
 0x163   :  { %1570 = vbcast.lane.b32.xlu1 %v1564_v10, 264  ;;  %1566 = vbcast.lane.b32.xlu0 %v1564_v10, 256  ;;  %v1586_v10 = vrot.slane %v4280_v2, %v4386_v46 }
 0x165   :  { %v4439_v32 = vpop.permute.xlu1 %877  ;;  %v4441_v23 = vpop.permute.xlu0 %873 }
 0x167   :  { %1746 = vbcast.lane.b32.xlu1 %v1740_v16, 264  ;;  %1742 = vbcast.lane.b32.xlu0 %v1740_v16, 256 }
 0x169   :  { %v4445_v40 = vpop.permute.xlu1 %1053  ;;  %v4447_v27 = vpop.permute.xlu0 %1049 }
 0x16a   :  { %5492 = vst [vmem:[#allocation30_spill] sm:$0xff] %v4445_v40  ;;  %5493 = vst [vmem:[#allocation31_spill] sm:$0xff] %v4447_v27 }
 0x16b   :  { %1240 = vbcast.lane.b32.xlu1 %v1234_v24, 264  ;;  %1236 = vbcast.lane.b32.xlu0 %v1234_v24, 256 }
 0x16d   :  { %v4451_v33 = vpop.permute.xlu1 %547  ;;  %v4453_v22 = vpop.permute.xlu0 %543 }
 0x16f   :  { %1416 = vbcast.lane.b32.xlu1 %v1410_v29, 264  ;;  %1412 = vbcast.lane.b32.xlu0 %v1410_v29, 256  ;;  %v1762_v29 = vrot.slane %v4280_v2, %v4401_v55  ;;  %v1597_v2 = vrot.slane %v4295_v20, %v4386_v46 }
 0x171   :  { %v4457_v38 = vpop.permute.xlu1 %723  ;;  %v4459_v17 = vpop.permute.xlu0 %719 }
 0x173   :  { %1581 = vbcast.lane.b32.xlu1 %v1575_v34, 264  ;;  %1577 = vbcast.lane.b32.xlu0 %v1575_v34, 256 }
 0x175   :  { %v4463_v45 = vpop.permute.xlu1 %888  ;;  %v4465_v49 = vpop.permute.xlu0 %884 }
 0x176   :  { %5494 = vst [vmem:[#allocation32_spill] sm:$0xff] %v4463_v45 }
 0x177   :  { %1757 = vbcast.lane.b32.xlu1 %v1751_v42, 264  ;;  %1753 = vbcast.lane.b32.xlu0 %v1751_v42, 256 }
 0x179   :  { %v4469_v58 = vpop.permute.xlu1 %1064  ;;  %v4471_v61 = vpop.permute.xlu0 %1060 }
 0x17a   :  { %5495 = vst [vmem:[#allocation33_spill] sm:$0xff] %v4469_v58  ;;  %5496 = vst [vmem:[#allocation34_spill] sm:$0xff] %v4471_v61  ;;  %v1773_v58 = vrot.slane %v4295_v20, %v4401_v55 }
 0x17b   :  { %1251 = vbcast.lane.b32.xlu1 %v1245_v54, 264  ;;  %1247 = vbcast.lane.b32.xlu0 %v1245_v54, 256  ;;  %v1256_v54 = vrot.slane %v4309_v37, %v4342_v18 }
 0x17d   :  { %v4475_v8 = vpop.permute.xlu1 %558  ;;  %v4477_v50 = vpop.permute.xlu0 %554 }
 0x17f   :  { %1427 = vbcast.lane.b32.xlu1 %v1421_v63, 264  ;;  %1423 = vbcast.lane.b32.xlu0 %v1421_v63, 256 }
 0x181   :  { %v4481_v16 = vpop.permute.xlu1 %734  ;;  %v4483_v24 = vpop.permute.xlu0 %730 }
 0x183   :  { %1592 = vbcast.lane.b32.xlu1 %v1586_v10, 264  ;;  %1588 = vbcast.lane.b32.xlu0 %v1586_v10, 256  ;;  %v1432_v10 = vrot.slane %v4309_v37, %v4357_v28 }
 0x185   :  { %v4487_v34 = vpop.permute.xlu1 %899  ;;  %v4489_v42 = vpop.permute.xlu0 %895 }
 0x186   :  { %5497 = vst [vmem:[#allocation35_spill] sm:$0xff] %v4487_v34  ;;  %5498 = vst [vmem:[#allocation36_spill] sm:$0xff] %v4489_v42 }
 0x187   :  { %1768 = vbcast.lane.b32.xlu1 %v1762_v29, 264  ;;  %1764 = vbcast.lane.b32.xlu0 %v1762_v29, 256  ;;  %v3458_v13 = vpop.f32.mrb[0].mxu0 }
 0x188   :  { %v4503_v29 = vmax.f32 %v3458_v13, 0.0  ;;  %v307_v61 = vpop.f32.mrb[1].mxu0  ;;  %v4525_v13 = vrot.slane %v4309_v37, %v4401_v55 }
 0x189   :  { %v4493_v63 = vpop.permute.xlu1 %1075  ;;  %v4495_v3 = vpop.permute.xlu0 %1071  ;;  %v4521_v20 = vmax.f32 %v307_v61, 0.0 }
 0x18a   :  { %5499 = vst [vmem:[#allocation37_spill] sm:$0xff] %v4493_v63  ;;  %5500 = vst [vmem:[#allocation38_spill] sm:$0xff] %v4495_v3  ;;  %v4507_v63 = vrot.slane %v4319_v52, %v4342_v18  ;;  %v4515_v3 = vrot.slane %v4309_v37, %v4386_v46  ;;  %v4529_v18 = vrot.slane %v4319_v52, %v4386_v46  ;;  %v3459_v0 = vpop.f32.mrb[2].mxu0 }
 0x18b   :  { %1262 = vbcast.lane.b32.xlu1 %v1256_v54, 264  ;;  %1258 = vbcast.lane.b32.xlu0 %v1256_v54, 256  ;;  %v4511_v54 = vrot.slane %v4319_v52, %v4357_v28  ;;  %v4533_v28 = vrot.slane %v4319_v52, %v4401_v55  ;;  %v573_v6 = vmul.f32 %v4329_v4, %v4503_v29  ;;  %v4545_v46 = vmax.f32 %v3459_v0, 0.0  ;;  %v310_v52 = vpop.f32.mrb[3].mxu0 }
 0x18c   :  { %v749_v61 = vmul.f32 %v4352_v26, %v4503_v29  ;;  %v925_v51 = vmul.f32 %v4381_v44, %v4503_v29  ;;  %v4543_v37 = vmul.f32 %v4396_v53, %v4503_v29  ;;  %v571_v55 = vmul.f32 %v4331_v7, %v4521_v20 }
 0x18d   :  { %v4517_v40 = vpop.permute.xlu1 %569  ;;  %v4519_v27 = vpop.permute.xlu0 %565  ;;  %v747_v4 = vmul.f32 %v4346_v21, %v4521_v20  ;;  %v923_v26 = vmul.f32 %v4375_v41, %v4521_v20  ;;  %v4553_v47 = vmax.f32 %v310_v52, 0.0  ;;  %v596_v44 = vsel %vm248_vm0, %v573_v6, 0.0 }
 0x18e   :  { %5501 = vst [vmem:[#allocation39_spill] sm:$0xff] %v4543_v37  ;;  %v772_v53 = vsel %vm248_vm0, %v749_v61, 0.0  ;;  %v4558_v0 = vsel %vm248_vm0, %v925_v51, 0.0  ;;  %v574_v7 = vmul.f32 %v4335_v11, %v4545_v46  ;;  %v587_v21 = vsel %vm248_vm0, %v571_v55, 0.0 }
 0x18f   :  { %1438 = vbcast.lane.b32.xlu1 %v1432_v10, 264  ;;  %1434 = vbcast.lane.b32.xlu0 %v1432_v10, 256  ;;  %5502 = vst [vmem:[#allocation40_spill] sm:$0xff] %v4558_v0  ;;  %v750_v41 = vmul.f32 %v4350_v25, %v4545_v46  ;;  %v763_v52 = vsel %vm248_vm0, %v747_v4, 0.0  ;;  %v572_v6 = vmul.f32 %v4337_v12, %v4553_v47  ;;  %v3462_v55 = vpop.f32.mrb[4].mxu0  ;;  %v4585_v12 = vsel %vm248_vm0, %v923_v26, 0.0 }
 0x190   :  { %v748_v51 = vmul.f32 %v4344_v19, %v4553_v47  ;;  %v4576_v61 = vmul.f32 %v4373_v39, %v4553_v47  ;;  %v4580_v11 = vmul.f32 %v4379_v43, %v4545_v46  ;;  %v597_v25 = vsel %vm248_vm0, %v574_v7, 0.0  ;;  %5505 = vst [vmem:[#allocation43_spill] sm:$0xff] %v4585_v12  ;;  %v323_v0 = vpop.f32.mrb[5].mxu0 }
 0x191   :  { %v4560_v10 = vpop.permute.xlu1 %745  ;;  %v4562_v37 = vpop.permute.xlu0 %741  ;;  %v773_v4 = vsel %vm248_vm0, %v750_v41, 0.0  ;;  %v4589_v19 = vmul.f32 %v4390_v48, %v4521_v20  ;;  %v4591_v39 = vmax.f32 %v3462_v55, 0.0  ;;  %v588_v43 = vsel %vm248_vm0, %v572_v6, 0.0 }
 0x192   :  { %5503 = vst [vmem:[#allocation41_spill] sm:$0xff] %v4576_v61  ;;  %5504 = vst [vmem:[#allocation42_spill] sm:$0xff] %v4580_v11  ;;  %v598_v11 = vadd.f32 %v597_v25, %v596_v44  ;;  %v4599_v41 = vmax.f32 %v323_v0, 0.0  ;;  %v589_v26 = vadd.f32 %v588_v43, %v587_v21  ;;  %v4601_v34 = vadd.f32 %v773_v4, %v772_v53  ;;  %v3463_v48 = vpop.f32.mrb[6].mxu0 }
 0x193   :  { %1603 = vbcast.lane.b32.xlu1 %v1597_v2, 264  ;;  %1599 = vbcast.lane.b32.xlu0 %v1597_v2, 256  ;;  %5506 = vst [vmem:[#allocation44_spill] sm:$0xff] %v4589_v19  ;;  %5507 = vst [vmem:[#allocation45_spill] sm:$0xff] %v4591_v39  ;;  %v764_v2 = vsel %vm248_vm0, %v748_v51, 0.0  ;;  %v577_v55 = vmul.f32 %v4405_v57, %v4591_v39  ;;  %v4607_v44 = vmul.f32 %v4411_v60, %v4591_v39  ;;  %v326_v0 = vpop.f32.mrb[7].mxu0 }
 0x194   :  { %v765_v12 = vadd.f32 %v764_v2, %v763_v52  ;;  %v599_v19 = vrot.slane %v598_v11, 4  ;;  %v4611_v6 = vmul.f32 %v4441_v23, %v4591_v39  ;;  %v4613_v51 = vmax.f32 %v3463_v48, 0.0 }
 0x195   :  { %v4595_v61 = vpop.permute.xlu1 %910  ;;  %v4597_v7 = vpop.permute.xlu0 %906  ;;  %v575_v53 = vmul.f32 %v4363_v31, %v4599_v41  ;;  %v590_v21 = vrot.slane %v589_v26, 4  ;;  %v4619_v57 = vmul.f32 %v4369_v36, %v4599_v41  ;;  %v4621_v52 = vmax.f32 %v326_v0, 0.0 }
 0x196   :  { %5508 = vst [vmem:[#allocation46_spill] sm:$0xff] %v4595_v61  ;;  %5509 = vst [vmem:[#allocation47_spill] sm:$0xff] %v4597_v7  ;;  %v600_v60 = vadd.f32 %v599_v19, %v598_v11  ;;  %v614_v25 = vsel %vm248_vm0, %v577_v55, 0.0  ;;  %v766_v23 = vrot.slane %v765_v12, 4  ;;  %v4633_v36 = vmul.f32 %v4409_v59, %v4613_v51 }
 0x197   :  { %5510 = vst [vmem:[#allocation48_spill] sm:$0xff] %v4611_v6  ;;  %1779 = vbcast.lane.b32.xlu1 %v1773_v58, 264  ;;  %1775 = vbcast.lane.b32.xlu0 %v1773_v58, 256  ;;  %v578_v58 = vmul.f32 %v4403_v56, %v4613_v51  ;;  %v591_v2 = vadd.f32 %v590_v21, %v589_v26  ;;  %v605_v31 = vsel %vm248_vm0, %v575_v53, 0.0  ;;  %v3466_v56 = vpop.f32.mrb[8].mxu0 }
 0x198   :  { %v576_v11 = vmul.f32 %v4361_v30, %v4621_v52  ;;  %v601_v19 = vrot.slane %v600_v60, 2  ;;  %v4639_v48 = vmul.f32 %v4367_v35, %v4621_v52  ;;  %v767_v55 = vadd.f32 %v766_v23, %v765_v12  ;;  %v339_v21 = vpop.f32.mrb[9].mxu0 }
 0x199   :  { %v4624_v4 = vpop.permute.xlu1 %1086  ;;  %v4626_v43 = vpop.permute.xlu0 %1082  ;;  %v592_v26 = vrot.slane %v591_v2, 2  ;;  %v615_v0 = vsel %vm248_vm0, %v578_v58, 0.0  ;;  %v4647_v53 = vmul.f32 %v4417_v62, %v4599_v41  ;;  %v4649_v30 = vmax.f32 %v3466_v56, 0.0 }
 0x19a   :  { %5511 = vst [vmem:[#allocation49_spill] sm:$0xff] %v4624_v4  ;;  %5512 = vst [vmem:[#allocation50_spill] sm:$0xff] %v4626_v43  ;;  %v602_v35 = vadd.f32 %v601_v19, %v600_v60  ;;  %v606_v12 = vsel %vm248_vm0, %v576_v11, 0.0  ;;  %v616_v23 = vadd.f32 %v615_v0, %v614_v25  ;;  %v4656_v43 = vmax.f32 %v339_v21, 0.0  ;;  %v3467_v6 = vpop.f32.mrb[10].mxu0 }
 0x19b   :  { %1273 = vbcast.lane.b32.xlu1 %v4507_v63, 264  ;;  %1269 = vbcast.lane.b32.xlu0 %v4507_v63, 256  ;;  %5513 = vst [vmem:[#allocation51_spill] sm:$0xff] %v4647_v53  ;;  %5514 = vst [vmem:[#allocation52_spill] sm:$0xff] %v4649_v30  ;;  %v593_v58 = vadd.f32 %v592_v26, %v591_v2  ;;  %v607_v39 = vadd.f32 %v606_v12, %v605_v31  ;;  %v768_v59 = vrot.slane %v767_v55, 2  ;;  %v342_v11 = vpop.f32.mrb[11].mxu0 }
 0x19c   :  { %5517 = vst [vmem:[#allocation55_spill] sm:$0xff] %v4656_v43  ;;  %v581_v62 = vmul.f32 %v4453_v22, %v4649_v30  ;;  %v603_v56 = vrot.slane %v602_v35, 1  ;;  %v617_v53 = vrot.slane %v616_v23, 4  ;;  %v4662_v60 = vmul.f32 %v4459_v17, %v4649_v30 }
 0x19d   :  { %v4652_v4 = vpop.permute.xlu1 %921  ;;  %v4654_v63 = vpop.permute.xlu0 %917  ;;  %v4664_v25 = vmax.f32 %v3467_v6, 0.0  ;;  %v579_v2 = vmul.f32 %v4429_v5, %v4656_v43  ;;  %v594_v31 = vrot.slane %v593_v58, 1  ;;  %v608_v19 = vrot.slane %v607_v39, 4 }
 0x19e   :  { %5515 = vst [vmem:[#allocation53_spill] sm:$0xff] %v4652_v4  ;;  %5516 = vst [vmem:[#allocation54_spill] sm:$0xff] %v4654_v63  ;;  %v4670_v26 = vmax.f32 %v342_v11, 0.0  ;;  %v4672_v22 = vadd.f32 %v603_v56, %v602_v35  ;;  %v618_v0 = vadd.f32 %v617_v53, %v616_v23  ;;  %v632_v17 = vsel %vm248_vm0, %v581_v62, 0.0 }
 0x19f   :  { %5518 = vst [vmem:[#allocation56_spill] sm:$0xff] %v4664_v25  ;;  %1449 = vbcast.lane.b32.xlu1 %v4511_v54, 264  ;;  %1445 = vbcast.lane.b32.xlu0 %v4511_v54, 256  ;;  %v582_v54 = vmul.f32 %v4451_v33, %v4664_v25  ;;  %v4681_v12 = vadd.f32 %v594_v31, %v593_v58  ;;  %v623_v5 = vsel %vm248_vm0, %v579_v2, 0.0  ;;  %v3470_v33 = vpop.f32.mrb[12].mxu0 }
 0x1a0   :  { %5519 = vst [vmem:[#allocation57_spill] sm:$0xff] %v4670_v26  ;;  %v609_v4 = vadd.f32 %v608_v19, %v607_v39  ;;  %v580_v11 = vmul.f32 %v4427_v9, %v4670_v26  ;;  %v619_v35 = vrot.slane %v618_v0, 2  ;;  %v4688_v53 = vmul.f32 %v4435_v15, %v4656_v43  ;;  %v355_v56 = vpop.f32.mrb[13].mxu0 }
 0x1a1   :  { %v4675_v21 = vpop.permute.xlu1 %1097  ;;  %v4677_v6 = vpop.permute.xlu0 %1093  ;;  %v4692_v23 = vmul.f32 %v4433_v14, %v4670_v26  ;;  %v633_v58 = vsel %vm248_vm0, %v582_v54, 0.0  ;;  %v4699_v9 = vmul.f32 %v4457_v38, %v4664_v25  ;;  %v4701_v62 = vadd.f32 %v768_v59, %v767_v55 }
 0x1a2   :  { %5520 = vst [vmem:[#allocation58_spill] sm:$0xff] %v4675_v21  ;;  %5521 = vst [vmem:[#allocation59_spill] sm:$0xff] %v4677_v6  ;;  %v610_v39 = vrot.slane %v609_v4, 2  ;;  %v4703_v15 = vmax.f32 %v3470_v33, 0.0  ;;  %v620_v2 = vadd.f32 %v619_v35, %v618_v0  ;;  %v624_v14 = vsel %vm248_vm0, %v580_v11, 0.0  ;;  %v3471_v59 = vpop.f32.mrb[14].mxu0 }
 0x1a3   :  { %1614 = vbcast.lane.b32.xlu1 %v4515_v3, 264  ;;  %1610 = vbcast.lane.b32.xlu0 %v4515_v3, 256  ;;  %v634_v31 = vadd.f32 %v633_v58, %v632_v17  ;;  %v4706_v3 = vmax.f32 %v355_v56, 0.0  ;;  %v625_v63 = vadd.f32 %v624_v14, %v623_v5  ;;  %v4713_v35 = vmax.f32 %v3471_v59, 0.0  ;;  %v358_v17 = vpop.f32.mrb[15].mxu0 }
 0x1a4   :  { %5522 = vst [vmem:[#allocation60_spill] sm:$0xff] %v4703_v15  ;;  %v611_v6 = vadd.f32 %v610_v39, %v609_v4  ;;  %v585_v33 = vmul.f32 %v4519_v27, %v4703_v15  ;;  %v621_v0 = vrot.slane %v620_v2, 1  ;;  %v4721_v58 = vmax.f32 %v358_v17, 0.0 }
 0x1a5   :  { %v1197_v19 = vpop.permute.xlu1 %1196  ;;  %v1193_v21 = vpop.permute.xlu0 %1192  ;;  %5523 = vst [vmem:[#allocation61_spill] sm:$0xff] %v4706_v3  ;;  %5524 = vst [vmem:[#allocation62_spill] sm:$0xff] %v4713_v35  ;;  %v583_v4 = vmul.f32 %v4477_v50, %v4706_v3  ;;  %v626_v11 = vrot.slane %v625_v63, 4 }
 0x1a6   :  { %v1276_v38 = vmul.f32 %v1197_v19, %v4553_v47  ;;  %v1275_v55 = vmul.f32 %v1193_v21, %v4521_v20  ;;  %v612_v5 = vrot.slane %v611_v6, 1  ;;  %5525 = vst [vmem:[#allocation63_spill] sm:$0xff] %v4721_v58  ;;  %v4723_v27 = vadd.f32 %v621_v0, %v620_v2 }
 0x1a7   :  { %1790 = vbcast.lane.b32.xlu1 %v4525_v13, 264  ;;  %1786 = vbcast.lane.b32.xlu0 %v4525_v13, 256  ;;  %v586_v13 = vmul.f32 %v4517_v40, %v4713_v35  ;;  %v627_v54 = vadd.f32 %v626_v11, %v625_v63  ;;  %v641_v0 = vsel %vm248_vm0, %v583_v4, 0.0  ;;  %v650_v40 = vsel %vm248_vm0, %v585_v33, 0.0 }
 0x1a8   :  { %v1292_v39 = vsel %vm248_vm0, %v1276_v38, 0.0  ;;  %v1291_v21 = vsel %vm248_vm0, %v1275_v55, 0.0  ;;  %v4727_v59 = vadd.f32 %v612_v5, %v611_v6  ;;  %v584_v38 = vmul.f32 %v4475_v8, %v4721_v58 }
 0x1a9   :  { %v1293_v56 = vadd.f32 %v1292_v39, %v1291_v21  ;;  %v1208_v14 = vpop.permute.xlu1 %1207  ;;  %v1204_v19 = vpop.permute.xlu0 %1203  ;;  %v635_v55 = vrot.slane %v634_v31, 4  ;;  %v628_v2 = vrot.slane %v627_v54, 2  ;;  %v651_v33 = vsel %vm248_vm0, %v586_v13, 0.0 }
 0x1aa   :  { %v1278_v50 = vmul.f32 %v1208_v14, %v4545_v46  ;;  %v1277_v61 = vmul.f32 %v1204_v19, %v4503_v29  ;;  %v642_v11 = vsel %vm248_vm0, %v584_v38, 0.0 }
 0x1ab   :  { %v1294_v17 = vrot.slane %v1293_v56, 4  ;;  %1625 = vbcast.lane.b32.xlu1 %v4529_v18, 264  ;;  %1621 = vbcast.lane.b32.xlu0 %v4529_v18, 256  ;;  %v636_v5 = vadd.f32 %v635_v55, %v634_v31  ;;  %v629_v19 = vadd.f32 %v628_v2, %v627_v54  ;;  %v643_v7 = vadd.f32 %v642_v11, %v641_v0 }
 0x1ac   :  { %v1301_v63 = vsel %vm248_vm0, %v1278_v50, 0.0  ;;  %v1300_v6 = vsel %vm248_vm0, %v1277_v61, 0.0  ;;  %v652_v55 = vadd.f32 %v651_v33, %v650_v40 }
 0x1ad   :  { %v1295_v39 = vadd.f32 %v1294_v17, %v1293_v56  ;;  %v1302_v8 = vadd.f32 %v1301_v63, %v1300_v6  ;;  %v1373_v21 = vpop.permute.xlu1 %1372  ;;  %v1369_v14 = vpop.permute.xlu0 %1368  ;;  %v637_v4 = vrot.slane %v636_v5, 2  ;;  %v630_v61 = vrot.slane %v629_v19, 1 }
 0x1ae   :  { %v1452_v18 = vmul.f32 %v1373_v21, %v4553_v47  ;;  %v1451_v25 = vmul.f32 %v1369_v14, %v4521_v20  ;;  %v644_v31 = vrot.slane %v643_v7, 4 }
 0x1af   :  { %v1296_v42 = vrot.slane %v1295_v39, 2  ;;  %v1303_v50 = vrot.slane %v1302_v8, 4  ;;  %1801 = vbcast.lane.b32.xlu1 %v4533_v28, 264  ;;  %1797 = vbcast.lane.b32.xlu0 %v4533_v28, 256  ;;  %v638_v38 = vadd.f32 %v637_v4, %v636_v5  ;;  %v4747_v13 = vadd.f32 %v630_v61, %v629_v19 }
 0x1b0   :  { %v1468_v56 = vsel %vm248_vm0, %v1452_v18, 0.0  ;;  %v1467_v54 = vsel %vm248_vm0, %v1451_v25, 0.0  ;;  %v645_v14 = vadd.f32 %v644_v31, %v643_v7  ;;  %v653_v25 = vrot.slane %v652_v55, 4 }
 0x1b1   :  { %v1297_v17 = vadd.f32 %v1296_v42, %v1295_v39  ;;  %v1304_v2 = vadd.f32 %v1303_v50, %v1302_v8  ;;  %v1469_v0 = vadd.f32 %v1468_v56, %v1467_v54  ;;  %v1384_v63 = vpop.permute.xlu1 %1383  ;;  %v1380_v6 = vpop.permute.xlu0 %1379  ;;  %v639_v21 = vrot.slane %v638_v38, 1 }
 0x1b2   :  { %v1454_v11 = vmul.f32 %v1384_v63, %v4545_v46  ;;  %v1453_v28 = vmul.f32 %v1380_v6, %v4503_v29  ;;  %v646_v39 = vrot.slane %v645_v14, 2  ;;  %v654_v54 = vadd.f32 %v653_v25, %v652_v55 }
 0x1b3   :  { %v1298_v30 = vrot.slane %v1297_v17, 1  ;;  %v1305_v18 = vrot.slane %v1304_v2, 2  ;;  %v1470_v45 = vrot.slane %v1469_v0, 4  ;;  %v4753_v5 = vadd.f32 %v639_v21, %v638_v38 }
 0x1b4   :  { %v1477_v40 = vsel %vm248_vm0, %v1454_v11, 0.0  ;;  %v1476_v42 = vsel %vm248_vm0, %v1453_v28, 0.0  ;;  %v647_v31 = vadd.f32 %v646_v39, %v645_v14  ;;  %v4759_v38 = vmul.f32 %v4483_v24, %v4706_v3 }
 0x1b5   :  { %v1299_v8 = vadd.f32 %v1298_v30, %v1297_v17  ;;  %v1306_v19 = vadd.f32 %v1305_v18, %v1304_v2  ;;  %v1471_v4 = vadd.f32 %v1470_v45, %v1469_v0  ;;  %v1478_v33 = vadd.f32 %v1477_v40, %v1476_v42  ;;  %v1219_v50 = vpop.permute.xlu1 %1218  ;;  %v1215_v61 = vpop.permute.xlu0 %1214 }
 0x1b6   :  { %v1280_v56 = vmul.f32 %v1219_v50, %v4621_v52  ;;  %v1279_v7 = vmul.f32 %v1215_v61, %v4599_v41  ;;  %v648_v17 = vrot.slane %v647_v31, 1  ;;  %v655_v2 = vrot.slane %v654_v54, 2 }
 0x1b7   :  { %v1307_v63 = vrot.slane %v1306_v19, 1  ;;  %v1472_v6 = vrot.slane %v1471_v4, 2  ;;  %v1479_v11 = vrot.slane %v1478_v33, 4 }
 0x1b8   :  { %v1310_v30 = vsel %vm248_vm0, %v1280_v56, 0.0  ;;  %v1309_v45 = vsel %vm248_vm0, %v1279_v7, 0.0  ;;  %v4765_v42 = vadd.f32 %v648_v17, %v647_v31  ;;  %v656_v24 = vadd.f32 %v655_v2, %v654_v54 }
 0x1b9   :  { %v1308_v0 = vadd.f32 %v1307_v63, %v1306_v19  ;;  %v1473_v28 = vadd.f32 %v1472_v6, %v1471_v4  ;;  %v1480_v21 = vadd.f32 %v1479_v11, %v1478_v33  ;;  %v1311_v18 = vadd.f32 %v1310_v30, %v1309_v45  ;;  %v1395_v40 = vpop.permute.xlu1 %1394  ;;  %v1391_v14 = vpop.permute.xlu0 %1390 }
 0x1ba   :  { %v1456_v55 = vmul.f32 %v1395_v40, %v4621_v52  ;;  %v1455_v25 = vmul.f32 %v1391_v14, %v4599_v41  ;;  %v657_v4 = vrot.slane %v656_v24, 1  ;;  %v4772_v33 = vmul.f32 %v4481_v16, %v4721_v58 }
 0x1bb   :  { %v1970_v39 = vsel %vm1899_vm1, %v1308_v0, %v1299_v8  ;;  %v1474_v50 = vrot.slane %v1473_v28, 1  ;;  %v1481_v61 = vrot.slane %v1480_v21, 2  ;;  %v1312_v56 = vrot.slane %v1311_v18, 4 }
 0x1bc   :  { %v1486_v7 = vsel %vm248_vm0, %v1456_v55, 0.0  ;;  %v1485_v19 = vsel %vm248_vm0, %v1455_v25, 0.0  ;;  %v4776_v17 = vadd.f32 %v657_v4, %v656_v24  ;;  %v4780_v2 = vmul.f32 %v4562_v37, %v4703_v15 }
 0x1bd   :  { %v1475_v63 = vadd.f32 %v1474_v50, %v1473_v28  ;;  %v1482_v6 = vadd.f32 %v1481_v61, %v1480_v21  ;;  %v1313_v11 = vadd.f32 %v1312_v56, %v1311_v18  ;;  %v1487_v31 = vadd.f32 %v1486_v7, %v1485_v19  ;;  %v1549_v30 = vpop.permute.xlu1 %1548  ;;  %v1545_v54 = vpop.permute.xlu0 %1544 }
 0x1be   :  { %v1628_v8 = vmul.f32 %v1549_v30, %v4553_v47  ;;  %v1627_v45 = vmul.f32 %v1545_v54, %v4521_v20  ;;  %v4784_v28 = vmul.f32 %v4560_v10, %v4713_v35  ;;  %v5526_v14 = vrot.slane %v4701_v62, 1 }
 0x1bf   :  { %v1483_v0 = vrot.slane %v1482_v6, 1  ;;  %v1314_v16 = vrot.slane %v1313_v11, 2  ;;  %v1488_v40 = vrot.slane %v1487_v31, 4  ;;  %v5527_v37 = vrot.slane %v4601_v34, 4 }
 0x1c0   :  { %v1644_v21 = vsel %vm248_vm0, %v1628_v8, 0.0  ;;  %v1643_v18 = vsel %vm248_vm0, %v1627_v45, 0.0  ;;  %v4791_v55 = vadd.f32 %v5526_v14, %v4701_v62  ;;  %v781_v4 = vsel %vm248_vm0, %v4619_v57, 0.0 }
 0x1c1   :  { %v776_v25 = vadd.f32 %v5527_v37, %v4601_v34  ;;  %v1484_v24 = vadd.f32 %v1483_v0, %v1482_v6  ;;  %v1315_v50 = vadd.f32 %v1314_v16, %v1313_v11  ;;  %v1489_v61 = vadd.f32 %v1488_v40, %v1487_v31  ;;  %v4796_v7 = vpop.permute.xlu1 %1559  ;;  %v4798_v10 = vpop.permute.xlu0 %1555 }
 0x1c2   :  { %v1645_v56 = vadd.f32 %v1644_v21, %v1643_v18  ;;  %v782_v62 = vsel %vm248_vm0, %v4639_v48, 0.0  ;;  %v790_v30 = vsel %vm248_vm0, %v4607_v44, 0.0  ;;  %v791_v45 = vsel %vm248_vm0, %v4633_v36, 0.0 }
 0x1c3   :  { %v777_v19 = vrot.slane %v776_v25, 2  ;;  %v1986_v34 = vsel %vm1899_vm1, %v1484_v24, %v1475_v63  ;;  %v1316_v6 = vrot.slane %v1315_v50, 1  ;;  %v1490_v11 = vrot.slane %v1489_v61, 2 }
 0x1c4   :  { %v1646_v31 = vrot.slane %v1645_v56, 4  ;;  %v783_v8 = vadd.f32 %v782_v62, %v781_v4  ;;  %v799_v0 = vsel %vm248_vm0, %v4688_v53, 0.0  ;;  %v792_v48 = vadd.f32 %v791_v45, %v790_v30 }
 0x1c5   :  { %v778_v54 = vadd.f32 %v777_v19, %v776_v25  ;;  %v1317_v57 = vadd.f32 %v1316_v6, %v1315_v50  ;;  %v1491_v16 = vadd.f32 %v1490_v11, %v1489_v61  ;;  %v4811_v21 = vpop.permute.xlu1 %1724  ;;  %v4813_v44 = vpop.permute.xlu0 %1720  ;;  %v800_v14 = vsel %vm248_vm0, %v4692_v23, 0.0 }
 0x1c6   :  { %v1647_v40 = vadd.f32 %v1646_v31, %v1645_v56  ;;  %v784_v18 = vrot.slane %v783_v8, 4  ;;  %v808_v37 = vsel %vm248_vm0, %v4662_v60, 0.0  ;;  %v793_v24 = vrot.slane %v792_v48, 4 }
 0x1c7   :  { %v779_v63 = vrot.slane %v778_v54, 1  ;;  %v4820_v36 = vsel %vm1901_vm2, %v1317_v57, %v1970_v39  ;;  %v1492_v53 = vrot.slane %v1491_v16, 1  ;;  %v801_v56 = vadd.f32 %v800_v14, %v799_v0 }
 0x1c8   :  { %5528 = vst [vmem:[#allocation64_spill] sm:$0xff] %v4820_v36  ;;  %v1648_v25 = vrot.slane %v1647_v40, 2  ;;  %v785_v61 = vadd.f32 %v784_v18, %v783_v8  ;;  %v809_v19 = vsel %vm248_vm0, %v4699_v9, 0.0  ;;  %v794_v23 = vadd.f32 %v793_v24, %v792_v48 }
 0x1c9   :  { %v780_v50 = vadd.f32 %v779_v63, %v778_v54  ;;  %v1493_v4 = vadd.f32 %v1492_v53, %v1491_v16  ;;  %v810_v30 = vadd.f32 %v809_v19, %v808_v37  ;;  %v4824_v60 = vpop.permute.xlu1 %1735  ;;  %v4826_v39 = vpop.permute.xlu0 %1731  ;;  %v802_v11 = vrot.slane %v801_v56, 4 }
 0x1ca   :  { %v1649_v62 = vadd.f32 %v1648_v25, %v1647_v40  ;;  %v786_v6 = vrot.slane %v785_v61, 2  ;;  %v817_v31 = vsel %vm248_vm0, %v4759_v38, 0.0  ;;  %v818_v54 = vsel %vm248_vm0, %v4772_v33, 0.0 }
 0x1cb   :  { %v4833_v9 = vsel %vm1901_vm2, %v1493_v4, %v1986_v34  ;;  %v795_v45 = vrot.slane %v794_v23, 2  ;;  %v811_v0 = vrot.slane %v810_v30, 4  ;;  %v803_v16 = vadd.f32 %v802_v11, %v801_v56 }
 0x1cc   :  { %5529 = vst [vmem:[#allocation65_spill] sm:$0xff] %v4833_v9  ;;  %v1650_v8 = vrot.slane %v1649_v62, 1  ;;  %v787_v57 = vadd.f32 %v786_v6, %v785_v61  ;;  %v819_v40 = vadd.f32 %v818_v54, %v817_v31  ;;  %v826_v48 = vsel %vm248_vm0, %v4780_v2, 0.0 }
 0x1cd   :  { %v796_v38 = vadd.f32 %v795_v45, %v794_v23  ;;  %v812_v18 = vadd.f32 %v811_v0, %v810_v30  ;;  %v827_v33 = vsel %vm248_vm0, %v4784_v28, 0.0  ;;  %v4841_v14 = vpop.permute.xlu1 %1229  ;;  %v4843_v34 = vpop.permute.xlu0 %1225  ;;  %v804_v53 = vrot.slane %v803_v16, 2 }
 0x1ce   :  { %v4837_v63 = vadd.f32 %v1650_v8, %v1649_v62  ;;  %v788_v37 = vrot.slane %v787_v57, 1  ;;  %v820_v25 = vrot.slane %v819_v40, 4  ;;  %v828_v24 = vadd.f32 %v827_v33, %v826_v48 }
 0x1cf   :  { %v797_v61 = vrot.slane %v796_v38, 1  ;;  %v813_v56 = vrot.slane %v812_v18, 2  ;;  %v1900_v2 = vsel %vm1899_vm1, %v4672_v22, %v4681_v12  ;;  %v1922_v19 = vsel %vm1899_vm1, %v780_v50, %v4791_v55 }
 0x1d0   :  { %5530 = vst [vmem:[#allocation66_spill] sm:$0xff] %v4837_v63  ;;  %v789_v4 = vadd.f32 %v788_v37, %v787_v57  ;;  %v805_v62 = vadd.f32 %v804_v53, %v803_v16  ;;  %v821_v28 = vadd.f32 %v820_v25, %v819_v40  ;;  %v829_v23 = vrot.slane %v828_v24, 4 }
 0x1d1   :  { %v798_v30 = vadd.f32 %v797_v61, %v796_v38  ;;  %v814_v6 = vadd.f32 %v813_v56, %v812_v18  ;;  %v1902_v11 = vsel %vm1901_vm2, %v4727_v59, %v1900_v2  ;;  %v928_v31 = vmul.f32 %v4415_v1, %v4621_v52  ;;  %v4854_v54 = vpop.permute.xlu1 %1405  ;;  %v4856_v8 = vpop.permute.xlu0 %1401  ;;  %v3670_v38 = vld [vmem:[#allocation11 + $0x40] sm:$0xff]   ;;  %v5532_v2 = vld [vmem:[#allocation52_spill] sm:$0xff] }
 0x1d2   :  { %v806_v22 = vrot.slane %v805_v62, 1  ;;  %v822_v12 = vrot.slane %v821_v28, 2  ;;  %v830_v45 = vadd.f32 %v829_v23, %v828_v24  ;;  %v1904_v55 = vsel %vm1903_vm3, %v4723_v27, %v1902_v11  ;;  %3409 = vmatprep.subr.bf16.mxu1 %v3670_v38 }
 0x1d3   :  { %v815_v50 = vrot.slane %v814_v6, 1  ;;  %v1906_v0 = vsel %vm1905_vm4, %v4747_v13, %v1904_v55  ;;  %v1923_v57 = vsel %vm1901_vm2, %v789_v4, %v1922_v19  ;;  %v930_v59 = vmul.f32 %v4439_v32, %v4613_v51  ;;  %v5533_v19 = vld [vmem:[#allocation36_spill] sm:$0xff]  ;;  %v5539_v55 = vld [vmem:[#allocation53_spill] sm:$0xff] }
 0x1d4   :  { %v807_v1 = vadd.f32 %v806_v22, %v805_v62  ;;  %v823_v16 = vadd.f32 %v822_v12, %v821_v28  ;;  %v831_v40 = vrot.slane %v830_v45, 2  ;;  %v1908_v48 = vsel %vm1907_vm5, %v4753_v5, %v1906_v0  ;;  %v5534_v4 = vld [vmem:[#allocation56_spill] sm:$0xff]  ;;  %v5535_v62 = vld [vmem:[#allocation35_spill] sm:$0xff]  ;;  %v5538_v12 = vld [vmem:[#allocation54_spill] sm:$0xff] }
 0x1d5   :  { %v816_v18 = vadd.f32 %v815_v50, %v814_v6  ;;  %v1910_v27 = vsel %vm1909_vm6, %v4765_v42, %v1908_v48  ;;  %v1924_v33 = vsel %vm1903_vm3, %v798_v30, %v1923_v57  ;;  %v931_v13 = vmul.f32 %v4465_v49, %v4656_v43  ;;  %v4872_v37 = vpop.permute.xlu1 %1570  ;;  %v4874_v53 = vpop.permute.xlu0 %1566  ;;  %v5531_v42 = vld [vmem:[#allocation32_spill] sm:$0xff]  ;;  %v5536_v6 = vld [vmem:[#allocation47_spill] sm:$0xff]  ;;  %v5540_v0 = vld [vmem:[#allocation41_spill] sm:$0xff] }
 0x1d6   :  { %v824_v32 = vrot.slane %v823_v16, 1  ;;  %v832_v25 = vadd.f32 %v831_v40, %v830_v45  ;;  %v1912_v24 = vsel %vm1911_vm7, %v4776_v17, %v1910_v27  ;;  %v1925_v5 = vsel %vm1905_vm4, %v807_v1, %v1924_v33  ;;  %v5537_v17 = vld [vmem:[#allocation46_spill] sm:$0xff]  ;;  %v5542_v27 = vld [vmem:[#allocation43_spill] sm:$0xff] }
 0x1d7   :  { %v1926_v61 = vsel %vm1907_vm5, %v816_v18, %v1925_v5  ;;  %v932_v56 = vmul.f32 %v5531_v42, %v4670_v26  ;;  %v933_v49 = vmul.f32 %v5533_v19, %v5532_v2  ;;  %v934_v28 = vmul.f32 %v5535_v62, %v5534_v4  ;;  %v5541_v1 = vld [vmem:[#allocation42_spill] sm:$0xff]  ;;  %v5544_v42 = vld [vmem:[#allocation51_spill] sm:$0xff] }
 0x1d8   :  { %v825_v23 = vadd.f32 %v824_v32, %v823_v16  ;;  %v833_v30 = vrot.slane %v832_v25, 1  ;;  %v935_v11 = vmul.f32 %v5536_v6, %v4706_v3  ;;  %v936_v22 = vmul.f32 %v5537_v17, %v4721_v58  ;;  %v5543_v32 = vld [vmem:[#allocation40_spill] sm:$0xff] }
 0x1d9   :  { %v937_v45 = vmul.f32 %v5538_v12, %v4703_v15  ;;  %v938_v50 = vmul.f32 %v5539_v55, %v4713_v35  ;;  %v940_v57 = vsel %vm248_vm0, %v5540_v0, 0.0  ;;  %v949_v40 = vsel %vm248_vm0, %v5541_v1, 0.0  ;;  %v4898_v16 = vpop.permute.xlu1 %1746  ;;  %v4900_v48 = vpop.permute.xlu0 %1742  ;;  %v5545_v6 = vld [vmem:[#allocation48_spill] sm:$0xff] }
 0x1da   :  { %v834_v38 = vadd.f32 %v833_v30, %v832_v25  ;;  %v1927_v18 = vsel %vm1909_vm6, %v825_v23, %v1926_v61  ;;  %v941_v33 = vadd.f32 %v940_v57, %v5542_v27  ;;  %v950_v5 = vadd.f32 %v949_v40, %v5543_v32 }
 0x1db   :  { %v957_v19 = vsel %vm248_vm0, %v5544_v42, 0.0  ;;  %v958_v62 = vsel %vm248_vm0, %v928_v31, 0.0  ;;  %v966_v17 = vsel %vm248_vm0, %v5545_v6, 0.0  ;;  %v967_v12 = vsel %vm248_vm0, %v930_v59, 0.0 }
 0x1dc   :  { %v1928_v55 = vsel %vm1911_vm7, %v834_v38, %v1927_v18  ;;  %v942_v0 = vrot.slane %v941_v33, 4  ;;  %v951_v25 = vrot.slane %v950_v5, 4  ;;  %v959_v30 = vadd.f32 %v958_v62, %v957_v19 }
 0x1dd   :  { %v2026_v61 = vpack.c.bf16 %v1928_v55, %v1912_v24  ;;  %v968_v23 = vadd.f32 %v967_v12, %v966_v17  ;;  %v975_v57 = vsel %vm248_vm0, %v931_v13, 0.0  ;;  %v976_v1 = vsel %vm248_vm0, %v932_v56, 0.0  ;;  %v4914_v40 = vpop.permute.xlu1 %1240  ;;  %v4916_v27 = vpop.permute.xlu0 %1236 }
 0x1de   :  { %5546 = vst [vmem:[#allocation32_spill] sm:$0xff] %v4914_v40  ;;  %5547 = vst [vmem:[#allocation36_spill] sm:$0xff] %v4916_v27  ;;  %v943_v31 = vadd.f32 %v942_v0, %v941_v33  ;;  %v952_v32 = vadd.f32 %v951_v25, %v950_v5  ;;  %v960_v42 = vrot.slane %v959_v30, 4  ;;  %v977_v6 = vadd.f32 %v976_v1, %v975_v57 }
 0x1df   :  { %3476 = vmatprep.mubr.msk.bf16.mxu1 %vm248_vm0, %v2026_v61  ;;  %v969_v59 = vrot.slane %v968_v23, 4  ;;  %v984_v38 = vsel %vm248_vm0, %v933_v49, 0.0  ;;  %v985_v24 = vsel %vm248_vm0, %v934_v28, 0.0  ;;  %v993_v18 = vsel %vm248_vm0, %v935_v11, 0.0 }
 0x1e0   :  { %v944_v13 = vrot.slane %v943_v31, 2  ;;  %v953_v19 = vrot.slane %v952_v32, 2  ;;  %v961_v56 = vadd.f32 %v960_v42, %v959_v30  ;;  %v978_v62 = vrot.slane %v977_v6, 4 }
 0x1e1   :  { %v970_v17 = vadd.f32 %v969_v59, %v968_v23  ;;  %v986_v12 = vadd.f32 %v985_v24, %v984_v38  ;;  %v994_v33 = vsel %vm248_vm0, %v936_v22, 0.0  ;;  %v1002_v5 = vsel %vm248_vm0, %v937_v45, 0.0  ;;  %v4925_v11 = vpop.permute.xlu1 %1416  ;;  %v4927_v9 = vpop.permute.xlu0 %1412 }
 0x1e2   :  { %v945_v55 = vadd.f32 %v944_v13, %v943_v31  ;;  %v954_v0 = vadd.f32 %v953_v19, %v952_v32  ;;  %v962_v25 = vrot.slane %v961_v56, 2  ;;  %v979_v61 = vadd.f32 %v978_v62, %v977_v6  ;;  %5548 = vst [vmem:[#allocation35_spill] sm:$0xff] %v4925_v11  ;;  %5549 = vst [vmem:[#allocation47_spill] sm:$0xff] %v4927_v9 }
 0x1e3   :  { %v971_v57 = vrot.slane %v970_v17, 2  ;;  %v987_v49 = vrot.slane %v986_v12, 4  ;;  %v995_v1 = vadd.f32 %v994_v33, %v993_v18  ;;  %v1003_v28 = vsel %vm248_vm0, %v938_v50, 0.0 }
 0x1e4   :  { %v946_v30 = vrot.slane %v945_v55, 1  ;;  %v955_v23 = vrot.slane %v954_v0, 1  ;;  %v963_v42 = vadd.f32 %v962_v25, %v961_v56  ;;  %v980_v59 = vrot.slane %v979_v61, 2  ;;  %v5550_v56 = vld [vmem:[#allocation26_spill] sm:$0xff] }
 0x1e5   :  { %v972_v22 = vadd.f32 %v971_v57, %v970_v17  ;;  %v988_v38 = vadd.f32 %v987_v49, %v986_v12  ;;  %v996_v45 = vrot.slane %v995_v1, 4  ;;  %v1004_v31 = vadd.f32 %v1003_v28, %v1002_v5  ;;  %v5551_v17 = vld [vmem:[#allocation27_spill] sm:$0xff]  ;;  %v4941_v49 = vpop.permute.xlu1 %1581  ;;  %v5554_v28 = vld [vmem:[#allocation29_spill] sm:$0xff] }
 0x1e6   :  { %v4929_v32 = vadd.f32 %v946_v30, %v945_v55  ;;  %v4931_v6 = vadd.f32 %v955_v23, %v954_v0  ;;  %v964_v24 = vrot.slane %v963_v42, 1  ;;  %v981_v18 = vadd.f32 %v980_v59, %v979_v61  ;;  %5552 = vst [vmem:[#allocation46_spill] sm:$0xff] %v4941_v49  ;;  %v4943_v61 = vpop.permute.xlu0 %1577  ;;  %v5555_v23 = vld [vmem:[#allocation28_spill] sm:$0xff]  ;;  %v5556_v59 = vld [vmem:[#allocation45_spill] sm:$0xff] }
 0x1e7   :  { %v973_v13 = vrot.slane %v972_v22, 1  ;;  %v989_v50 = vrot.slane %v988_v38, 2  ;;  %v997_v19 = vadd.f32 %v996_v45, %v995_v1  ;;  %v1005_v62 = vrot.slane %v1004_v31, 4  ;;  %5553 = vst [vmem:[#allocation54_spill] sm:$0xff] %v4943_v61  ;;  %v5557_v45 = vld [vmem:[#allocation31_spill] sm:$0xff] }
 0x1e8   :  { %v4933_v33 = vadd.f32 %v964_v24, %v963_v42  ;;  %v982_v36 = vrot.slane %v981_v18, 1  ;;  %v1100_v25 = vmul.f32 %v5550_v56, %v4553_v47  ;;  %v1102_v12 = vmul.f32 %v5551_v17, %v4545_v46  ;;  %v5561_v17 = vld [vmem:[#allocation38_spill] sm:$0xff] }
 0x1e9   :  { %v4939_v5 = vadd.f32 %v973_v13, %v972_v22  ;;  %v990_v55 = vadd.f32 %v989_v50, %v988_v38  ;;  %v998_v0 = vrot.slane %v997_v19, 2  ;;  %v1006_v57 = vadd.f32 %v1005_v62, %v1004_v31  ;;  %v5558_v31 = vld [vmem:[#allocation30_spill] sm:$0xff] }
 0x1ea   :  { %v4945_v1 = vadd.f32 %v982_v36, %v981_v18  ;;  %v1103_v30 = vmul.f32 %v5554_v28, %v4599_v41  ;;  %v1104_v42 = vmul.f32 %v5555_v23, %v4621_v52  ;;  %v1105_v24 = vmul.f32 %v5557_v45, %v5556_v59  ;;  %v5559_v62 = vld [vmem:[#allocation34_spill] sm:$0xff]  ;;  %v5560_v36 = vld [vmem:[#allocation33_spill] sm:$0xff] }
 0x1eb   :  { %v991_v22 = vrot.slane %v990_v55, 1  ;;  %v999_v13 = vadd.f32 %v998_v0, %v997_v19  ;;  %v1007_v38 = vrot.slane %v1006_v57, 2  ;;  %v1106_v50 = vmul.f32 %v5558_v31, %v4613_v51  ;;  %v5562_v23 = vld [vmem:[#allocation37_spill] sm:$0xff]  ;;  %v5563_v0 = vld [vmem:[#allocation50_spill] sm:$0xff] }
 0x1ec   :  { %v1107_v56 = vmul.f32 %v5559_v62, %v4656_v43  ;;  %v1108_v18 = vmul.f32 %v5560_v36, %v4670_v26  ;;  %v1109_v28 = vmul.f32 %v5561_v17, %v5532_v2  ;;  %v1110_v61 = vmul.f32 %v5562_v23, %v5534_v4  ;;  %v5564_v31 = vld [vmem:[#allocation49_spill] sm:$0xff]  ;;  %v5565_v62 = vld [vmem:[#allocation59_spill] sm:$0xff]  ;;  %v5566_v36 = vld [vmem:[#allocation58_spill] sm:$0xff] }
 0x1ed   :  { %v4963_v49 = vadd.f32 %v991_v22, %v990_v55  ;;  %v1000_v45 = vrot.slane %v999_v13, 1  ;;  %v1008_v19 = vadd.f32 %v1007_v38, %v1006_v57  ;;  %v1111_v9 = vmul.f32 %v5563_v0, %v4706_v3  ;;  %v5567_v17 = vld [vmem:[#allocation44_spill] sm:$0xff]  ;;  %v5568_v22 = vld [vmem:[#allocation39_spill] sm:$0xff]  ;;  %v4980_v0 = vpop.permute.xlu1 %1757 }
 0x1ee   :  { %v1112_v11 = vmul.f32 %v5564_v31, %v4721_v58  ;;  %v1113_v27 = vmul.f32 %v5565_v62, %v4703_v15  ;;  %v1114_v43 = vmul.f32 %v5566_v36, %v4713_v35  ;;  %v1115_v2 = vsel %vm248_vm0, %v5567_v17, 0.0  ;;  %5569 = vst [vmem:[#allocation53_spill] sm:$0xff] %v4980_v0  ;;  %v4982_v31 = vpop.permute.xlu0 %1753 }
 0x1ef   :  { %v4975_v23 = vadd.f32 %v1000_v45, %v999_v13  ;;  %v1009_v55 = vrot.slane %v1008_v19, 1  ;;  %v1116_v57 = vsel %vm248_vm0, %v1100_v25, 0.0  ;;  %v1124_v38 = vsel %vm248_vm0, %v5568_v22, 0.0  ;;  %5570 = vst [vmem:[#allocation41_spill] sm:$0xff] %v4982_v31 }
 0x1f0   :  { %v1117_v3 = vadd.f32 %v1116_v57, %v1115_v2  ;;  %v1125_v62 = vsel %vm248_vm0, %v1102_v12, 0.0  ;;  %v1133_v36 = vsel %vm248_vm0, %v1103_v30, 0.0  ;;  %v1134_v15 = vsel %vm248_vm0, %v1104_v42, 0.0 }
 0x1f1   :  { %v4987_v17 = vadd.f32 %v1009_v55, %v1008_v19  ;;  %v1126_v13 = vadd.f32 %v1125_v62, %v1124_v38  ;;  %v1135_v45 = vadd.f32 %v1134_v15, %v1133_v36  ;;  %v1142_v25 = vsel %vm248_vm0, %v1105_v24, 0.0 }
 0x1f2   :  { %v1118_v35 = vrot.slane %v1117_v3, 4  ;;  %v1143_v22 = vsel %vm248_vm0, %v1106_v50, 0.0  ;;  %v1151_v58 = vsel %vm248_vm0, %v1107_v56, 0.0  ;;  %v1152_v4 = vsel %vm248_vm0, %v1108_v18, 0.0  ;;  %v4996_v50 = vpop.permute.xlu1 %1251  ;;  %v4998_v56 = vpop.permute.xlu0 %1247 }
 0x1f3   :  { %v1127_v2 = vrot.slane %v1126_v13, 4  ;;  %v1136_v57 = vrot.slane %v1135_v45, 4  ;;  %v1144_v12 = vadd.f32 %v1143_v22, %v1142_v25  ;;  %v1153_v31 = vadd.f32 %v1152_v4, %v1151_v58  ;;  %5571 = vst [vmem:[#allocation42_spill] sm:$0xff] %v4996_v50  ;;  %5572 = vst [vmem:[#allocation43_spill] sm:$0xff] %v4998_v56 }
 0x1f4   :  { %v1119_v30 = vadd.f32 %v1118_v35, %v1117_v3  ;;  %v1160_v42 = vsel %vm248_vm0, %v1109_v28, 0.0  ;;  %v1161_v19 = vsel %vm248_vm0, %v1110_v61, 0.0  ;;  %v1169_v15 = vsel %vm248_vm0, %v1111_v9, 0.0 }
 0x1f5   :  { %v1128_v55 = vadd.f32 %v1127_v2, %v1126_v13  ;;  %v1137_v24 = vadd.f32 %v1136_v57, %v1135_v45  ;;  %v1145_v38 = vrot.slane %v1144_v12, 4  ;;  %v1154_v62 = vrot.slane %v1153_v31, 4 }
 0x1f6   :  { %v1120_v18 = vrot.slane %v1119_v30, 2  ;;  %v1162_v36 = vadd.f32 %v1161_v19, %v1160_v42  ;;  %v1170_v25 = vsel %vm248_vm0, %v1112_v11, 0.0  ;;  %v1178_v3 = vsel %vm248_vm0, %v1113_v27, 0.0  ;;  %v5003_v26 = vpop.permute.xlu1 %1427 }
 0x1f7   :  { %v1129_v35 = vrot.slane %v1128_v55, 2  ;;  %v1138_v58 = vrot.slane %v1137_v24, 2  ;;  %v1146_v4 = vadd.f32 %v1145_v38, %v1144_v12  ;;  %v1155_v61 = vadd.f32 %v1154_v62, %v1153_v31  ;;  %v5005_v31 = vpop.permute.xlu0 %1423 }
 0x1f8   :  { %v1121_v28 = vadd.f32 %v1120_v18, %v1119_v30  ;;  %v1163_v9 = vrot.slane %v1162_v36, 4  ;;  %v1171_v13 = vadd.f32 %v1170_v25, %v1169_v15  ;;  %v1179_v45 = vsel %vm248_vm0, %v1114_v43, 0.0 }
 0x1f9   :  { %v1130_v22 = vadd.f32 %v1129_v35, %v1128_v55  ;;  %v1139_v2 = vadd.f32 %v1138_v58, %v1137_v24  ;;  %v1147_v57 = vrot.slane %v1146_v4, 2  ;;  %v1156_v50 = vrot.slane %v1155_v61, 2 }
 0x1fa   :  { %v1122_v56 = vrot.slane %v1121_v28, 1  ;;  %v1164_v0 = vadd.f32 %v1163_v9, %v1162_v36  ;;  %v1172_v42 = vrot.slane %v1171_v13, 4  ;;  %v1180_v19 = vadd.f32 %v1179_v45, %v1178_v3 }
 0x1fb   :  { %v1131_v11 = vrot.slane %v1130_v22, 1  ;;  %v1140_v63 = vrot.slane %v1139_v2, 1  ;;  %v1148_v27 = vadd.f32 %v1147_v57, %v1146_v4  ;;  %v1157_v40 = vadd.f32 %v1156_v50, %v1155_v61 }
 0x1fc   :  { %v1123_v12 = vadd.f32 %v1122_v56, %v1121_v28  ;;  %v1165_v30 = vrot.slane %v1164_v0, 2  ;;  %v1173_v15 = vadd.f32 %v1172_v42, %v1171_v13  ;;  %v1181_v43 = vrot.slane %v1180_v19, 4 }
 0x1fd   :  { %v1132_v55 = vadd.f32 %v1131_v11, %v1130_v22  ;;  %v1141_v24 = vadd.f32 %v1140_v63, %v1139_v2  ;;  %v1149_v38 = vrot.slane %v1148_v27, 1  ;;  %v1158_v62 = vrot.slane %v1157_v40, 1 }
 0x1fe   :  { %v1166_v18 = vadd.f32 %v1165_v30, %v1164_v0  ;;  %v1174_v36 = vrot.slane %v1173_v15, 2  ;;  %v1182_v25 = vadd.f32 %v1181_v43, %v1180_v19  ;;  %v1938_v3 = vsel %vm1899_vm1, %v4931_v6, %v4929_v32  ;;  %v5022_v6 = vpop.permute.xlu1 %1592 }
 0x1ff   :  { %v1150_v50 = vadd.f32 %v1149_v38, %v1148_v27  ;;  %v1159_v35 = vadd.f32 %v1158_v62, %v1157_v40  ;;  %v1939_v58 = vsel %vm1901_vm2, %v4933_v33, %v1938_v3  ;;  %v1954_v56 = vsel %vm1899_vm1, %v1132_v55, %v1123_v12  ;;  %v5024_v33 = vpop.permute.xlu0 %1588 }
 0x200   :  { %v1167_v4 = vrot.slane %v1166_v18, 1  ;;  %v1175_v61 = vadd.f32 %v1174_v36, %v1173_v15  ;;  %v1183_v28 = vrot.slane %v1182_v25, 2  ;;  %v1940_v63 = vsel %vm1903_vm3, %v4939_v5, %v1939_v58 }
 0x201   :  { %v1941_v0 = vsel %vm1905_vm4, %v4945_v1, %v1940_v63  ;;  %v1955_v9 = vsel %vm1901_vm2, %v1141_v24, %v1954_v56  ;;  %v1630_v32 = vmul.f32 %v4796_v7, %v4545_v46  ;;  %v1629_v40 = vmul.f32 %v4798_v10, %v4503_v29  ;;  %v3672_v56 = vld [vmem:[#allocation11 + $0x48] sm:$0xff]  }
 0x202   :  { %v1168_v13 = vadd.f32 %v1167_v4, %v1166_v18  ;;  %v1176_v45 = vrot.slane %v1175_v61, 1  ;;  %v1184_v22 = vadd.f32 %v1183_v28, %v1182_v25  ;;  %v1942_v5 = vsel %vm1907_vm5, %v4963_v49, %v1941_v0  ;;  %v5050_v62 = vpop.permute.xlu1 %1768 }
 0x203   :  { %v1943_v1 = vsel %vm1909_vm6, %v4975_v23, %v1942_v5  ;;  %v1956_v2 = vsel %vm1903_vm3, %v1150_v50, %v1955_v9  ;;  %v1653_v7 = vsel %vm248_vm0, %v1630_v32, 0.0  ;;  %v1652_v57 = vsel %vm248_vm0, %v1629_v40, 0.0 }
 0x204   :  { %v1177_v10 = vadd.f32 %v1176_v45, %v1175_v61  ;;  %v1185_v42 = vrot.slane %v1184_v22, 1  ;;  %v1944_v19 = vsel %vm1911_vm7, %v4987_v17, %v1943_v1  ;;  %v1957_v11 = vsel %vm1905_vm4, %v1159_v35, %v1956_v2 }
 0x205   :  { %v1958_v27 = vsel %vm1907_vm5, %v1168_v13, %v1957_v11  ;;  %v1654_v12 = vadd.f32 %v1653_v7, %v1652_v57  ;;  %v1804_v49 = vmul.f32 %v4811_v21, %v4553_v47  ;;  %v1803_v23 = vmul.f32 %v4813_v44, %v4521_v20  ;;  %v5052_v44 = vpop.permute.xlu0 %1764  ;;  %v3674_v57 = vld [vmem:[#allocation11 + $0x50] sm:$0xff]  }
 0x206   :  { %v1186_v30 = vadd.f32 %v1185_v42, %v1184_v22  ;;  %v1959_v15 = vsel %vm1909_vm6, %v1177_v10, %v1958_v27  ;;  %v1806_v43 = vmul.f32 %v4824_v60, %v4545_v46  ;;  %v1805_v17 = vmul.f32 %v4826_v39, %v4503_v29  ;;  %v3671_v39 = vld [vmem:[#allocation11] sm:$0xff]   ;;  %v3673_v22 = vld [vmem:[#allocation11 + $0x8] sm:$0xff]   ;;  %v5076_v7 = vpop.permute.xlu1 %1262 }
 0x207   :  { %v1655_v55 = vrot.slane %v1654_v12, 4  ;;  %v1820_v24 = vsel %vm248_vm0, %v1804_v49, 0.0  ;;  %v1819_v38 = vsel %vm248_vm0, %v1803_v23, 0.0  ;;  %v1282_v21 = vmul.f32 %v4841_v14, %v4613_v51  ;;  %v5069_v40 = vpop.f32.mrb[16].mxu0 }
 0x208   :  { %v1960_v18 = vsel %vm1911_vm7, %v1186_v30, %v1959_v15  ;;  %v1821_v36 = vadd.f32 %v1820_v24, %v1819_v38  ;;  %v1829_v60 = vsel %vm248_vm0, %v1806_v43, 0.0  ;;  %v1828_v25 = vsel %vm248_vm0, %v1805_v17, 0.0  ;;  %v3675_v38 = vld [vmem:[#allocation11 + $0x10] sm:$0xff]  }
 0x209   :  { %v2027_v3 = vpack.c.bf16 %v1960_v18, %v1944_v19  ;;  %v1656_v50 = vadd.f32 %v1655_v55, %v1654_v12  ;;  %v1830_v35 = vadd.f32 %v1829_v60, %v1828_v25  ;;  %v1319_v58 = vsel %vm248_vm0, %v1282_v21, 0.0 }
 0x20a   :  { %v1822_v4 = vrot.slane %v1821_v36, 4  ;;  %v1281_v14 = vmul.f32 %v4843_v34, %v5556_v59  ;;  %v1458_v61 = vmul.f32 %v4854_v54, %v4613_v51  ;;  %v1457_v28 = vmul.f32 %v4856_v8, %v5556_v59  ;;  %v5074_v8 = vpop.f32.mrb[17].mxu0 }
 0x20b   :  { %3477 = vmatmul.mubr.msk.bf16.vlgmr.msra.gmra.mrb[0].mxu1 %vm248_vm0, %v2027_v3  ;;  %v1657_v63 = vrot.slane %v1656_v50, 2  ;;  %v1831_v0 = vrot.slane %v1830_v35, 4  ;;  %v1632_v9 = vmul.f32 %v4872_v37, %v4621_v52  ;;  %v1631_v32 = vmul.f32 %v4874_v53, %v4599_v41  ;;  %v5078_v53 = vpop.permute.xlu0 %1258  ;;  %v2639_v27 = vpop.f32.mrb[18].mxu0 }
 0x20c   :  { %v1823_v13 = vadd.f32 %v1822_v4, %v1821_v36  ;;  %v1318_v34 = vsel %vm248_vm0, %v1281_v14, 0.0  ;;  %v1495_v54 = vsel %vm248_vm0, %v1458_v61, 0.0  ;;  %v1494_v45 = vsel %vm248_vm0, %v1457_v28, 0.0  ;;  %3410 = vmatpush3.bf16.msra.mxu1 %v3671_v39  ;;  %v2640_v15 = vpop.f32.mrb[19].mxu0  ;;  %v5092_v28 = vpop.permute.xlu1 %1438 }
 0x20d   :  { %v1658_v5 = vadd.f32 %v1657_v63, %v1656_v50  ;;  %v1832_v1 = vadd.f32 %v1831_v0, %v1830_v35  ;;  %v1320_v2 = vadd.f32 %v1319_v58, %v1318_v34  ;;  %v1496_v37 = vadd.f32 %v1495_v54, %v1494_v45  ;;  %3411 = vmatprep.subr.bf16.mxu1 %v3672_v56  ;;  %v5573_v50 = vld [vmem:[#allocation57_spill] sm:$0xff]  ;;  %v5574_v35 = vld [vmem:[#allocation32_spill] sm:$0xff]  ;;  %v5575_v56 = vld [vmem:[#allocation66_spill] sm:$0xff] }
 0x20e   :  { %v1824_v10 = vrot.slane %v1823_v13, 2  ;;  %v1662_v42 = vsel %vm248_vm0, %v1632_v9, 0.0  ;;  %v1661_v19 = vsel %vm248_vm0, %v1631_v32, 0.0  ;;  %v1808_v11 = vmul.f32 %v4898_v16, %v4621_v52  ;;  %v3676_v16 = vld [vmem:[#allocation11 + $0x58] sm:$0xff]  }
 0x20f   :  { %v1659_v12 = vrot.slane %v1658_v5, 1  ;;  %v1833_v49 = vrot.slane %v1832_v1, 2  ;;  %v1321_v23 = vrot.slane %v1320_v2, 4  ;;  %v1497_v30 = vrot.slane %v1496_v37, 4  ;;  %v5094_v63 = vpop.permute.xlu0 %1434  ;;  %v3677_v34 = vld [vmem:[#allocation11 + $0x18] sm:$0xff]  }
 0x210   :  { %v1825_v43 = vadd.f32 %v1824_v10, %v1823_v13  ;;  %v1663_v17 = vadd.f32 %v1662_v42, %v1661_v19  ;;  %v1838_v55 = vsel %vm248_vm0, %v1808_v11, 0.0  ;;  %v1807_v24 = vmul.f32 %v4900_v48, %v4599_v41  ;;  %3412 = vmatpush3.bf16.msra.mxu1 %v3673_v22  ;;  %v5578_v42 = vld [vmem:[#allocation35_spill] sm:$0xff] }
 0x211   :  { %v1660_v21 = vadd.f32 %v1659_v12, %v1658_v5  ;;  %v1834_v18 = vadd.f32 %v1833_v49, %v1832_v1  ;;  %v1322_v36 = vadd.f32 %v1321_v23, %v1320_v2  ;;  %v1498_v60 = vadd.f32 %v1497_v30, %v1496_v37  ;;  %3413 = vmatprep.subr.bf16.mxu1 %v3674_v57  ;;  %v5576_v5 = vld [vmem:[#allocation55_spill] sm:$0xff]  ;;  %v5577_v1 = vld [vmem:[#allocation36_spill] sm:$0xff] }
 0x212   :  { %v1826_v25 = vrot.slane %v1825_v43, 1  ;;  %v1664_v39 = vrot.slane %v1663_v17, 4  ;;  %v1837_v3 = vsel %vm248_vm0, %v1807_v24, 0.0  ;;  %v1284_v58 = vmul.f32 %v5574_v35, %v5573_v50  ;;  %v3678_v37 = vld [vmem:[#allocation11 + $0x60] sm:$0xff]  }
 0x213   :  { %v2002_v4 = vsel %vm1899_vm1, %v1660_v21, %v5575_v56  ;;  %v1835_v14 = vrot.slane %v1834_v18, 1  ;;  %v1323_v48 = vrot.slane %v1322_v36, 2  ;;  %v1499_v61 = vrot.slane %v1498_v60, 2  ;;  %v5579_v11 = vld [vmem:[#allocation47_spill] sm:$0xff] }
 0x214   :  { %v1827_v0 = vadd.f32 %v1826_v25, %v1825_v43  ;;  %v1665_v9 = vadd.f32 %v1664_v39, %v1663_v17  ;;  %v1839_v32 = vadd.f32 %v1838_v55, %v1837_v3  ;;  %v1328_v13 = vsel %vm248_vm0, %v1284_v58, 0.0  ;;  %3414 = vmatpush3.bf16.msra.mxu1 %v3675_v38  ;;  %v3679_v24 = vld [vmem:[#allocation11 + $0x20] sm:$0xff]   ;;  %v5111_v25 = vpop.permute.xlu0 %1599  ;;  %v3680_v39 = vld [vmem:[#allocation11 + $0x68] sm:$0xff]  }
 0x215   :  { %v1836_v54 = vadd.f32 %v1835_v14, %v1834_v18  ;;  %v1324_v45 = vadd.f32 %v1323_v48, %v1322_v36  ;;  %v1500_v22 = vadd.f32 %v1499_v61, %v1498_v60  ;;  %v1283_v2 = vmul.f32 %v5577_v1, %v5576_v5  ;;  %3415 = vmatprep.subr.bf16.mxu1 %v3676_v16  ;;  %v5580_v36 = vld [vmem:[#allocation46_spill] sm:$0xff]  ;;  %v5109_v16 = vpop.permute.xlu1 %1603  ;;  %v5581_v14 = vld [vmem:[#allocation64_spill] sm:$0xff]  ;;  %v5582_v61 = vld [vmem:[#allocation65_spill] sm:$0xff] }
 0x216   :  { %v1666_v57 = vrot.slane %v1665_v9, 2  ;;  %v1840_v10 = vrot.slane %v1839_v32, 4  ;;  %v1460_v19 = vmul.f32 %v5578_v42, %v5573_v50  ;;  %v1459_v27 = vmul.f32 %v5579_v11, %v5576_v5  ;;  %v5586_v42 = vld [vmem:[#allocation56_spill] sm:$0xff] }
 0x217   :  { %v2018_v12 = vsel %vm1899_vm1, %v1836_v54, %v1827_v0  ;;  %v1325_v49 = vrot.slane %v1324_v45, 1  ;;  %v1501_v23 = vrot.slane %v1500_v22, 1  ;;  %v1327_v30 = vsel %vm248_vm0, %v1283_v2, 0.0  ;;  %v5584_v2 = vld [vmem:[#allocation53_spill] sm:$0xff] }
 0x218   :  { %v1667_v15 = vadd.f32 %v1666_v57, %v1665_v9  ;;  %v1841_v43 = vadd.f32 %v1840_v10, %v1839_v32  ;;  %v1329_v17 = vadd.f32 %v1328_v13, %v1327_v30  ;;  %v1504_v55 = vsel %vm248_vm0, %v1460_v19, 0.0  ;;  %3416 = vmatpush3.bf16.msra.mxu1 %v3677_v34  ;;  %v5583_v9 = vld [vmem:[#allocation54_spill] sm:$0xff]  ;;  %v5585_v57 = vld [vmem:[#allocation41_spill] sm:$0xff] }
 0x219   :  { %v1326_v38 = vadd.f32 %v1325_v49, %v1324_v45  ;;  %v1502_v21 = vadd.f32 %v1501_v23, %v1500_v22  ;;  %v1503_v18 = vsel %vm248_vm0, %v1459_v27, 0.0  ;;  %v1634_v60 = vmul.f32 %v5580_v36, %v4613_v51  ;;  %3417 = vmatprep.subr.bf16.mxu1 %v3678_v37  ;;  %v3681_v22 = vld [vmem:[#allocation11 + $0x28] sm:$0xff]   ;;  %v5587_v19 = vld [vmem:[#allocation42_spill] sm:$0xff]  ;;  %v3682_v27 = vld [vmem:[#allocation11 + $0x70] sm:$0xff]  }
 0x21a   :  { %v1668_v3 = vrot.slane %v1667_v15, 1  ;;  %v1842_v35 = vrot.slane %v1841_v43, 2  ;;  %v1330_v58 = vrot.slane %v1329_v17, 4  ;;  %v1505_v56 = vadd.f32 %v1504_v55, %v1503_v18  ;;  %v3683_v18 = vld [vmem:[#allocation11 + $0x30] sm:$0xff]  }
 0x21b   :  { %v5115_v48 = vsel %vm1903_vm3, %v1326_v38, %v5581_v14  ;;  %v5119_v0 = vsel %vm1903_vm3, %v1502_v21, %v5582_v61  ;;  %v1633_v32 = vmul.f32 %v5583_v9, %v5556_v59  ;;  %v1671_v45 = vsel %vm248_vm0, %v1634_v60, 0.0  ;;  %v5588_v60 = vld [vmem:[#allocation52_spill] sm:$0xff] }
 0x21c   :  { %v1669_v13 = vadd.f32 %v1668_v3, %v1667_v15  ;;  %v1843_v34 = vadd.f32 %v1842_v35, %v1841_v43  ;;  %v1331_v54 = vadd.f32 %v1330_v58, %v1329_v17  ;;  %3418 = vmatpush3.bf16.msra.mxu1 %v3679_v24  ;;  %v1810_v37 = vmul.f32 %v5584_v2, %v4613_v51  ;;  %v5134_v43 = vpop.permute.xlu1 %1779  ;;  %v5136_v17 = vpop.permute.xlu0 %1775  ;;  %v3684_v58 = vld [vmem:[#allocation11 + $0x78] sm:$0xff]  }
 0x21d   :  { %v1670_v1 = vsel %vm248_vm0, %v1633_v32, 0.0  ;;  %v1809_v10 = vmul.f32 %v5585_v57, %v5556_v59  ;;  %v1286_v11 = vmul.f32 %v5587_v19, %v5586_v42  ;;  %3419 = vmatprep.subr.bf16.mxu1 %v3680_v39  ;;  %v1506_v30 = vrot.slane %v1505_v56, 4 }
 0x21e   :  { %v5132_v49 = vsel %vm1901_vm2, %v1669_v13, %v2002_v4  ;;  %v1844_v23 = vrot.slane %v1843_v34, 1  ;;  %v1332_v15 = vrot.slane %v1331_v54, 2  ;;  %v1672_v24 = vadd.f32 %v1671_v45, %v1670_v1  ;;  %v5589_v4 = vld [vmem:[#allocation43_spill] sm:$0xff] }
 0x21f   :  { %v1847_v38 = vsel %vm248_vm0, %v1810_v37, 0.0  ;;  %v1846_v21 = vsel %vm248_vm0, %v1809_v10, 0.0  ;;  %v1337_v36 = vsel %vm248_vm0, %v1286_v11, 0.0  ;;  %v1285_v39 = vmul.f32 %v5589_v4, %v5588_v60 }
 0x220   :  { %v1845_v55 = vadd.f32 %v1844_v23, %v1843_v34  ;;  %3420 = vmatpush3.bf16.msra.mxu1 %v3681_v22  ;;  %v1462_v3 = vmul.f32 %v5003_v26, %v5586_v42  ;;  %v1461_v35 = vmul.f32 %v5005_v31, %v5588_v60  ;;  %v1507_v61 = vadd.f32 %v1506_v30, %v1505_v56  ;;  %v3685_v26 = vld [vmem:[#allocation11 + $0x38] sm:$0xff]   ;;  %v5157_v2 = vpop.permute.xlu1 %1273  ;;  %v5159_v56 = vpop.permute.xlu0 %1269 }
 0x221   :  { %3421 = vmatprep.subr.bf16.mxu1 %v3682_v27  ;;  %v1336_v9 = vsel %vm248_vm0, %v1285_v39, 0.0  ;;  %v1333_v34 = vadd.f32 %v1332_v15, %v1331_v54  ;;  %v1848_v45 = vadd.f32 %v1847_v38, %v1846_v21  ;;  %v1673_v1 = vrot.slane %v1672_v24, 4  ;;  %v5590_v38 = vld [vmem:[#allocation63_spill] sm:$0xff] }
 0x222   :  { %v5148_v14 = vsel %vm1901_vm2, %v1845_v55, %v2018_v12  ;;  %v1513_v32 = vsel %vm248_vm0, %v1462_v3, 0.0  ;;  %v1512_v13 = vsel %vm248_vm0, %v1461_v35, 0.0  ;;  %v1338_v22 = vadd.f32 %v1337_v36, %v1336_v9 }
 0x223   :  { %v1636_v31 = vmul.f32 %v5022_v6, %v5573_v50  ;;  %v1635_v12 = vmul.f32 %v5024_v33, %v5576_v5  ;;  %v1508_v37 = vrot.slane %v1507_v61, 2  ;;  %v1514_v57 = vadd.f32 %v1513_v32, %v1512_v13 }
 0x224   :  { %3422 = vmatpush3.bf16.msra.mxu1 %v3683_v18  ;;  %v1339_v10 = vrot.slane %v1338_v22, 4  ;;  %v1334_v11 = vrot.slane %v1333_v34, 1  ;;  %v1849_v27 = vrot.slane %v1848_v45, 4  ;;  %v1674_v23 = vadd.f32 %v1673_v1, %v1672_v24  ;;  %v5171_v39 = vpop.permute.xlu1 %1449  ;;  %v5173_v24 = vpop.permute.xlu0 %1445 }
 0x225   :  { %3423 = vmatprep.subr.bf16.mxu1 %v3684_v58  ;;  %v1680_v54 = vsel %vm248_vm0, %v1636_v31, 0.0  ;;  %v1679_v19 = vsel %vm248_vm0, %v1635_v12, 0.0  ;;  %v1812_v6 = vmul.f32 %v5050_v62, %v5573_v50  ;;  %v1811_v33 = vmul.f32 %v5052_v44, %v5576_v5 }
 0x226   :  { %v1509_v30 = vadd.f32 %v1508_v37, %v1507_v61  ;;  %v1515_v15 = vrot.slane %v1514_v57, 4  ;;  %v1681_v55 = vadd.f32 %v1680_v54, %v1679_v19  ;;  %v1288_v21 = vmul.f32 %v5076_v7, %v5590_v38  ;;  %v5591_v61 = vld [vmem:[#allocation61_spill] sm:$0xff] }
 0x227   :  { %v1340_v18 = vadd.f32 %v1339_v10, %v1338_v22  ;;  %v1856_v36 = vsel %vm248_vm0, %v1812_v6, 0.0  ;;  %v1855_v4 = vsel %vm248_vm0, %v1811_v33, 0.0  ;;  %v1335_v3 = vadd.f32 %v1334_v11, %v1333_v34 }
 0x228   :  { %3424 = vmatpush3.bf16.msra.mxu1 %v3685_v26  ;;  %v1850_v62 = vadd.f32 %v1849_v27, %v1848_v45  ;;  %v1857_v35 = vadd.f32 %v1856_v36, %v1855_v4  ;;  %v1675_v58 = vrot.slane %v1674_v23, 2  ;;  %v1346_v44 = vsel %vm248_vm0, %v1288_v21, 0.0  ;;  %v1615_v19 = vpop.permute.xlu1 %1614 }
 0x229   :  { %v1287_v9 = vmul.f32 %v5078_v53, %v5591_v61  ;;  %v1510_v32 = vrot.slane %v1509_v30, 1  ;;  %v1516_v7 = vadd.f32 %v1515_v15, %v1514_v57  ;;  %v1682_v13 = vrot.slane %v1681_v55, 4 }
 0x22a   :  { %v1341_v22 = vrot.slane %v1340_v18, 2  ;;  %v1464_v1 = vmul.f32 %v5092_v28, %v5590_v38  ;;  %v1463_v34 = vmul.f32 %v5094_v63, %v5591_v61  ;;  %v5185_v45 = vsel %vm1905_vm4, %v1335_v3, %v5115_v48  ;;  %v5191_v28 = vpop.permute.xlu0 %1610 }
 0x22b   :  { %v1345_v26 = vsel %vm248_vm0, %v1287_v9, 0.0  ;;  %v1851_v31 = vrot.slane %v1850_v62, 2  ;;  %v1858_v12 = vrot.slane %v1857_v35, 4  ;;  %v1676_v53 = vadd.f32 %v1675_v58, %v1674_v23 }
 0x22c   :  { %v1347_v37 = vadd.f32 %v1346_v44, %v1345_v26  ;;  %v1522_v57 = vsel %vm248_vm0, %v1464_v1, 0.0  ;;  %v1521_v10 = vsel %vm248_vm0, %v1463_v34, 0.0  ;;  %v1638_v54 = vmul.f32 %v5109_v16, %v5586_v42  ;;  %v1791_v1 = vpop.permute.xlu1 %1790 }
 0x22d   :  { %v1517_v11 = vrot.slane %v1516_v7, 2  ;;  %v1683_v63 = vadd.f32 %v1682_v13, %v1681_v55  ;;  %v1523_v6 = vadd.f32 %v1522_v57, %v1521_v10  ;;  %v1342_v48 = vadd.f32 %v1341_v22, %v1340_v18 }
 0x22e   :  { %v1348_v27 = vrot.slane %v1347_v37, 4  ;;  %v1637_v33 = vmul.f32 %v5111_v25, %v5588_v60  ;;  %v1814_v23 = vmul.f32 %v5134_v43, %v5586_v42  ;;  %v1813_v15 = vmul.f32 %v5136_v17, %v5588_v60  ;;  %v1787_v34 = vpop.permute.xlu0 %1786 }
 0x22f   :  { %v1859_v21 = vadd.f32 %v1858_v12, %v1857_v35  ;;  %v1524_v16 = vrot.slane %v1523_v6, 4  ;;  %v1689_v4 = vsel %vm248_vm0, %v1638_v54, 0.0  ;;  %v1511_v3 = vadd.f32 %v1510_v32, %v1509_v30  ;;  %v5592_v35 = vld [vmem:[#allocation62_spill] sm:$0xff] }
 0x230   :  { %v1349_v36 = vadd.f32 %v1348_v27, %v1347_v37  ;;  %v1688_v55 = vsel %vm248_vm0, %v1637_v33, 0.0  ;;  %v1865_v58 = vsel %vm248_vm0, %v1814_v23, 0.0  ;;  %v1864_v18 = vsel %vm248_vm0, %v1813_v15, 0.0  ;;  %v5593_v37 = vld [vmem:[#allocation60_spill] sm:$0xff] }
 0x231   :  { %v1518_v44 = vadd.f32 %v1517_v11, %v1516_v7  ;;  %v1684_v25 = vrot.slane %v1683_v63, 2  ;;  %v1525_v13 = vadd.f32 %v1524_v16, %v1523_v6  ;;  %v5203_v43 = vadd.f32 %v1851_v31, %v1850_v62 }
 0x232   :  { %v1350_v9 = vrot.slane %v1349_v36, 2  ;;  %v1690_v22 = vadd.f32 %v1689_v4, %v1688_v55  ;;  %v1866_v17 = vadd.f32 %v1865_v58, %v1864_v18  ;;  %v1290_v26 = vmul.f32 %v5157_v2, %v5592_v35  ;;  %v1626_v58 = vpop.permute.xlu1 %1625  ;;  %v1622_v18 = vpop.permute.xlu0 %1621 }
 0x233   :  { %v1677_v30 = vrot.slane %v1676_v53, 1  ;;  %v1343_v32 = vrot.slane %v1342_v48, 1  ;;  %v1860_v12 = vrot.slane %v1859_v21, 2  ;;  %v1289_v57 = vmul.f32 %v5159_v56, %v5593_v37 }
 0x234   :  { %v1351_v10 = vadd.f32 %v1350_v9, %v1349_v36  ;;  %v1526_v7 = vrot.slane %v1525_v13, 2  ;;  %v1691_v54 = vrot.slane %v1690_v22, 4  ;;  %v1355_v11 = vsel %vm248_vm0, %v1290_v26, 0.0  ;;  %v5233_v26 = vld [vmem:[#allocation10] sm:$0x3] }
 0x235   :  { %v5212_v62 = vsel %vm1905_vm4, %v1511_v3, %v5119_v0  ;;  %v1519_v31 = vrot.slane %v1518_v44, 1  ;;  %v5214_v27 = vadd.f32 %v1684_v25, %v1683_v63  ;;  %v1354_v2 = vsel %vm248_vm0, %v1289_v57, 0.0 }
 0x236   :  { %v1692_v33 = vadd.f32 %v1691_v54, %v1690_v22  ;;  %v1867_v23 = vrot.slane %v1866_v17, 4  ;;  %v1356_v15 = vadd.f32 %v1355_v11, %v1354_v2  ;;  %v5218_v56 = vadd.f32 %v1677_v30, %v1676_v53  ;;  %v5594_v54 = vld [vmem:[#allocation25_spill] sm:$0xff] }
 0x237   :  { %v5220_v36 = vadd.f32 %v1343_v32, %v1342_v48  ;;  %v5222_v16 = vadd.f32 %v1860_v12, %v1859_v21  ;;  %v1466_v0 = vmul.f32 %v5171_v39, %v5592_v35  ;;  %v1352_v4 = vrot.slane %v1351_v10, 1 }
 0x238   :  { %v1527_v3 = vadd.f32 %v1526_v7, %v1525_v13  ;;  %v1357_v63 = vrot.slane %v1356_v15, 4  ;;  %v1465_v55 = vmul.f32 %v5173_v24, %v5593_v37  ;;  %v5228_v25 = vadd.f32 %v1519_v31, %v1518_v44 }
 0x239   :  { %v1531_v48 = vsel %vm248_vm0, %v1466_v0, 0.0  ;;  %v1640_v21 = vmul.f32 %v1615_v19, %v5590_v38  ;;  %v1693_v9 = vrot.slane %v1692_v33, 2  ;;  %v1868_v22 = vadd.f32 %v1867_v23, %v1866_v17 }
 0x23a   :  { %v1358_v39 = vadd.f32 %v1357_v63, %v1356_v15  ;;  %v1530_v13 = vsel %vm248_vm0, %v1465_v55, 0.0  ;;  %v1639_v44 = vmul.f32 %v5191_v28, %v5591_v61  ;;  %v1353_v12 = vadd.f32 %v1352_v4, %v1351_v10  ;;  %v1802_v55 = vpop.permute.xlu1 %1801 }
 0x23b   :  { %v1532_v24 = vadd.f32 %v1531_v48, %v1530_v13  ;;  %v1698_v32 = vsel %vm248_vm0, %v1640_v21, 0.0  ;;  %v1528_v57 = vrot.slane %v1527_v3, 1  ;;  %v1816_v19 = vmul.f32 %v1791_v1, %v5590_v38  ;;  %v1798_v48 = vpop.permute.xlu0 %1797 }
 0x23c   :  { %v1359_v7 = vrot.slane %v1358_v39, 2  ;;  %v1697_v31 = vsel %vm248_vm0, %v1639_v44, 0.0  ;;  %v1815_v2 = vmul.f32 %v1787_v34, %v5591_v61  ;;  %v1694_v23 = vadd.f32 %v1693_v9, %v1692_v33 }
 0x23d   :  { %v1533_v11 = vrot.slane %v1532_v24, 4  ;;  %v1869_v15 = vrot.slane %v1868_v22, 2  ;;  %v1699_v63 = vadd.f32 %v1698_v32, %v1697_v31  ;;  %v1874_v10 = vsel %vm248_vm0, %v1816_v19, 0.0 }
 0x23e   :  { %v1360_v0 = vadd.f32 %v1359_v7, %v1358_v39  ;;  %v1873_v4 = vsel %vm248_vm0, %v1815_v2, 0.0  ;;  %v1642_v1 = vmul.f32 %v1626_v58, %v5592_v35  ;;  %v1641_v44 = vmul.f32 %v1622_v18, %v5593_v37 }
 0x23f   :  { %v1534_v28 = vadd.f32 %v1533_v11, %v1532_v24  ;;  %v1700_v13 = vrot.slane %v1699_v63, 4  ;;  %v1875_v17 = vadd.f32 %v1874_v10, %v1873_v4  ;;  %v1818_v33 = vmul.f32 %v1802_v55, %v5592_v35 }
 0x240   :  { %v1361_v21 = vrot.slane %v1360_v0, 1  ;;  %v1707_v34 = vsel %vm248_vm0, %v1642_v1, 0.0  ;;  %v1817_v9 = vmul.f32 %v1798_v48, %v5593_v37  ;;  %v1870_v39 = vadd.f32 %v1869_v15, %v1868_v22 }
 0x241   :  { %v1535_v30 = vrot.slane %v1534_v28, 2  ;;  %v1701_v24 = vadd.f32 %v1700_v13, %v1699_v63  ;;  %v1876_v32 = vrot.slane %v1875_v17, 4  ;;  %v1706_v7 = vsel %vm248_vm0, %v1641_v44, 0.0 }
 0x242   :  { %v1708_v11 = vadd.f32 %v1707_v34, %v1706_v7  ;;  %v1883_v58 = vsel %vm248_vm0, %v1818_v33, 0.0  ;;  %v1882_v31 = vsel %vm248_vm0, %v1817_v9, 0.0  ;;  %v1529_v2 = vadd.f32 %v1528_v57, %v1527_v3 }
 0x243   :  { %v1536_v19 = vadd.f32 %v1535_v30, %v1534_v28  ;;  %v1702_v18 = vrot.slane %v1701_v24, 2  ;;  %v1877_v10 = vadd.f32 %v1876_v32, %v1875_v17  ;;  %v1884_v4 = vadd.f32 %v1883_v58, %v1882_v31 }
 0x244   :  { %v1695_v1 = vrot.slane %v1694_v23, 1  ;;  %v1362_v53 = vadd.f32 %v1361_v21, %v1360_v0  ;;  %v1709_v6 = vrot.slane %v1708_v11, 4  ;;  %v1871_v48 = vrot.slane %v1870_v39, 1 }
 0x245   :  { %v1537_v55 = vrot.slane %v1536_v19, 1  ;;  %v1703_v22 = vadd.f32 %v1702_v18, %v1701_v24  ;;  %v1878_v15 = vrot.slane %v1877_v10, 2  ;;  %v1885_v63 = vrot.slane %v1884_v4, 4 }
 0x246   :  { %v1710_v44 = vadd.f32 %v1709_v6, %v1708_v11  ;;  %v1974_v30 = vsel %vm1907_vm5, %v5220_v36, %v5185_v45  ;;  %v1990_v3 = vsel %vm1907_vm5, %v5228_v25, %v5212_v62  ;;  %v5595_v9 = vrot.slane %v5203_v43, 1 }
 0x247   :  { %v1538_v13 = vadd.f32 %v1537_v55, %v1536_v19  ;;  %v1879_v57 = vadd.f32 %v1878_v15, %v1877_v10  ;;  %v1886_v17 = vadd.f32 %v1885_v63, %v1884_v4  ;;  %v1975_v0 = vsel %vm1909_vm6, %v1353_v12, %v1974_v30  ;;  %v5599_v4 = vld [vmem:[#allocation24_spill] sm:$0xff] }
 0x248   :  { %v1991_v28 = vsel %vm1909_vm6, %v1529_v2, %v1990_v3  ;;  %v1704_v21 = vrot.slane %v1703_v22, 1  ;;  %v1711_v34 = vrot.slane %v1710_v44, 2  ;;  %v1976_v33 = vsel %vm1911_vm7, %v1362_v53, %v1975_v0  ;;  %v3688_v0 = vld [vmem:[%s5442_s9 + $0x10] sm:$0xff]  }
 0x249   :  { %v1992_v6 = vsel %vm1911_vm7, %v1538_v13, %v1991_v28  ;;  %v1854_v45 = vadd.f32 %v5595_v9, %v5203_v43  ;;  %v1880_v36 = vrot.slane %v1879_v57, 1  ;;  %v1887_v24 = vrot.slane %v1886_v17, 2  ;;  %v3689_v28 = vld [vmem:[%s5442_s9 + $0x18] sm:$0xff]  }
 0x24a   :  { %v2028_v32 = vpack.c.bf16 %v1992_v6, %v1976_v33  ;;  %v5596_v62 = vrot.slane %v5214_v27, 1  ;;  %v5597_v12 = vrot.slane %v5222_v16, 1  ;;  %v1712_v19 = vadd.f32 %v1711_v34, %v1710_v44  ;;  %v3691_v34 = vld [vmem:[%s5442_s9 + $0x28] sm:$0xff]   ;;  %v3692_v33 = vld [vmem:[%s5442_s9 + $0x30] sm:$0xff]   ;;  %v3693_v6 = vld [vmem:[%s5442_s9 + $0x38] sm:$0xff]  }
 0x24b   :  { %v1696_v11 = vadd.f32 %v1695_v1, %v1694_v23  ;;  %v1872_v53 = vadd.f32 %v1871_v48, %v1870_v39  ;;  %v5598_v58 = vrot.slane %v5233_v26, %v5594_v54  ;;  %v1888_v43 = vadd.f32 %v1887_v24, %v1886_v17 }
 0x24c   :  { %v1687_v25 = vadd.f32 %v5596_v62, %v5214_v27  ;;  %v1863_v7 = vadd.f32 %v5597_v12, %v5222_v16  ;;  %3480 = vmatprep.mubr.msk.bf16.mxu1 %vm248_vm0, %v2028_v32  ;;  %v1705_v2 = vadd.f32 %v1704_v21, %v1703_v22  ;;  %v1881_v18 = vadd.f32 %v1880_v36, %v1879_v57  ;;  %v3686_v57 = vld [vmem:[%s5442_s9] sm:$0xff]  }
 0x24d   :  { %v3537_v31 = vadd.f32 %v5074_v8, %v5598_v58  ;;  %v1713_v10 = vrot.slane %v1712_v19, 1  ;;  %v2004_v27 = vsel %vm1903_vm3, %v5218_v56, %v5132_v49  ;;  %v2020_v16 = vsel %vm1903_vm3, %v1854_v45, %v5148_v14  ;;  %v3690_v21 = vld [vmem:[%s5442_s9 + $0x20] sm:$0xff]  }
 0x24e   :  { %v1889_v23 = vrot.slane %v1888_v43, 1  ;;  %v2005_v39 = vsel %vm1905_vm4, %v1687_v25, %v2004_v27  ;;  %v2021_v54 = vsel %vm1905_vm4, %v1863_v7, %v2020_v16  ;;  %v2219_v8 = vrot.slane %v5233_v26, %v5599_v4 }
 0x24f   :  { %v1714_v1 = vadd.f32 %v1713_v10, %v1712_v19  ;;  %v2643_v55 = vmax.f32 %v3537_v31, 0.0  ;;  %v2006_v22 = vsel %vm1907_vm5, %v1696_v11, %v2005_v39  ;;  %v2022_v15 = vsel %vm1907_vm5, %v1872_v53, %v2021_v54 }
 0x250   :  { %v1890_v48 = vadd.f32 %v1889_v23, %v1888_v43  ;;  %v2007_v49 = vsel %vm1909_vm6, %v1705_v2, %v2006_v22  ;;  %v2023_v56 = vsel %vm1909_vm6, %v1881_v18, %v2022_v15  ;;  %v3536_v13 = vadd.f32 %v5069_v40, %v2219_v8  ;;  %v3687_v40 = vld [vmem:[%s5442_s9 + $0x8] sm:$0xff]  }
 0x251   :  { %v2008_v14 = vsel %vm1911_vm7, %v1714_v1, %v2007_v49  ;;  %v2645_v30 = vpack.c.bf16 %v2643_v55, %v2643_v55  ;;  %v3947_v17 = vmov 0.0   ;;  %v386_v2 = vsel %vm248_vm0, %v4521_v20, 0.0 }
 0x252   :  { %v2024_v63 = vsel %vm1911_vm7, %v1890_v48, %v2023_v56  ;;  %v2642_v26 = vmax.f32 %v3536_v13, 0.0  ;;  %3484 = vmatprep.subr.bf16.mxu1 %v3947_v17  ;;  %v387_v18 = vsel %vm248_vm0, %v4553_v47, 0.0  ;;  %v395_v10 = vsel %vm248_vm0, %v4503_v29, 0.0 }
 0x253   :  { %v2029_v44 = vpack.c.bf16 %v2024_v63, %v2008_v14  ;;  %v396_v27 = vsel %vm248_vm0, %v4545_v46, 0.0  ;;  %v388_v16 = vadd.f32 %v387_v18, %v386_v2  ;;  %v404_v39 = vsel %vm248_vm0, %v4599_v41, 0.0 }
 0x254   :  { %v2644_v3 = vpack.c.bf16 %v2642_v26, %v2642_v26  ;;  %v397_v23 = vadd.f32 %v396_v27, %v395_v10  ;;  %v405_v54 = vsel %vm248_vm0, %v4621_v52, 0.0  ;;  %v413_v20 = vsel %vm248_vm0, %v5556_v59, 0.0 }
 0x255   :  { %3481 = vmatmul.mubr.msk.bf16.gmra.mrb[4].mxu1 %vm248_vm0, %v2029_v44  ;;  %v389_v4 = vrot.slane %v388_v16, 4  ;;  %v406_v8 = vadd.f32 %v405_v54, %v404_v39  ;;  %v414_v47 = vsel %vm248_vm0, %v4613_v51, 0.0  ;;  %v422_v46 = vsel %vm248_vm0, %v5576_v5, 0.0 }
 0x256   :  { %2813 = vmatprep.mubr.bf16.mxu1 %v2645_v30  ;;  %v398_v29 = vrot.slane %v397_v23, 4  ;;  %v415_v1 = vadd.f32 %v414_v47, %v413_v20  ;;  %v423_v55 = vsel %vm248_vm0, %v5573_v50, 0.0  ;;  %v431_v15 = vsel %vm248_vm0, %v5588_v60, 0.0 }
 0x257   :  { %v390_v41 = vadd.f32 %v389_v4, %v388_v16  ;;  %v407_v48 = vrot.slane %v406_v8, 4  ;;  %v424_v52 = vadd.f32 %v423_v55, %v422_v46  ;;  %v432_v59 = vsel %vm248_vm0, %v5586_v42, 0.0 }
 0x258   :  { %v399_v22 = vadd.f32 %v398_v29, %v397_v23  ;;  %v416_v49 = vrot.slane %v415_v1, 4  ;;  %v433_v63 = vadd.f32 %v432_v59, %v431_v15  ;;  %v440_v5 = vsel %vm248_vm0, %v5591_v61, 0.0 }
 0x259   :  { %v391_v51 = vrot.slane %v390_v41, 2  ;;  %v408_v56 = vadd.f32 %v407_v48, %v406_v8  ;;  %v441_v50 = vsel %vm248_vm0, %v5590_v38, 0.0  ;;  %v425_v13 = vrot.slane %v424_v52, 4 }
 0x25a   :  { %v400_v14 = vrot.slane %v399_v22, 2  ;;  %v417_v44 = vadd.f32 %v416_v49, %v415_v1  ;;  %v442_v26 = vadd.f32 %v441_v50, %v440_v5  ;;  %v449_v60 = vsel %vm248_vm0, %v5593_v37, 0.0 }
 0x25b   :  { %v409_v30 = vrot.slane %v408_v56, 2  ;;  %v450_v42 = vsel %vm248_vm0, %v5592_v35, 0.0 }
 0x25d   :  { %2814 = vmatmul.mubr.bf16.vlgmr.msra.gmra.mrb[8].mxu1 %v2644_v3  ;;  %v392_v3 = vadd.f32 %v391_v51, %v390_v41  ;;  %v410_v61 = vadd.f32 %v409_v30, %v408_v56 }
 0x25e   :  { %3485 = vmatpush3.bf16.msra.mxu1 %v3686_v57  ;;  %3500 = vmatprep.mubr.msk.bf16.mxu1 %vm3948_vm8, %v3947_v17  ;;  %v401_v57 = vadd.f32 %v400_v14, %v399_v22 }
 0x25f   :  { %3486 = vmatprep.subr.bf16.mxu1 %v3947_v17 }
 0x260   :  { %v402_v38 = vrot.slane %v401_v57, 1 }
 0x262   :  { %3487 = vmatpush3.bf16.msra.mxu1 %v3687_v40  ;;  %v434_v40 = vrot.slane %v433_v63, 4 }
 0x263   :  { %3488 = vmatprep.subr.bf16.mxu1 %v3947_v17 }
 0x266   :  { %3489 = vmatpush3.bf16.msra.mxu1 %v3688_v0  ;;  %v426_v0 = vadd.f32 %v425_v13, %v424_v52 }
 0x267   :  { %3490 = vmatprep.subr.bf16.mxu1 %v3947_v17 }
 0x26a   :  { %3491 = vmatpush3.bf16.msra.mxu1 %v3689_v28  ;;  %v418_v28 = vrot.slane %v417_v44, 2 }
 0x26b   :  { %3492 = vmatprep.subr.bf16.mxu1 %v3947_v17 }
 0x26e   :  { %3493 = vmatpush3.bf16.msra.mxu1 %v3690_v21  ;;  %v451_v21 = vadd.f32 %v450_v42, %v449_v60 }
 0x26f   :  { %3494 = vmatprep.subr.bf16.mxu1 %v3947_v17 }
 0x272   :  { %3495 = vmatpush3.bf16.msra.mxu1 %v3691_v34  ;;  %v443_v34 = vrot.slane %v442_v26, 4 }
 0x273   :  { %3496 = vmatprep.subr.bf16.mxu1 %v3947_v17 }
 0x276   :  { %3497 = vmatpush3.bf16.msra.mxu1 %v3692_v33  ;;  %v393_v33 = vrot.slane %v392_v3, 1 }
 0x277   :  { %3498 = vmatprep.subr.bf16.mxu1 %v3947_v17 }
 0x278   :  { %v394_v37 = vadd.f32 %v393_v33, %v392_v3 }
 0x27a   :  { %3499 = vmatpush3.bf16.msra.mxu1 %v3693_v6  ;;  %v435_v6 = vadd.f32 %v434_v40, %v433_v63 }
 0x27b   :  { %3504 = vmatprep.subr.bf16.mxu1 %v3947_v17 }
 0x2de   :  { %v3478_v9 = vpop.f32.mrb[0].mxu1 }
 0x2df   :  { %v2092_v45 = vpop.f32.mrb[1].mxu1  ;;  %v2125_v62 = vmax.f32 %v3478_v9, 0.0  ;;  %v427_v9 = vrot.slane %v426_v0, 2 }
 0x2e0   :  { %v2123_v36 = vmax.f32 %v2092_v45, 0.0  ;;  %v3479_v24 = vpop.f32.mrb[2].mxu1  ;;  %v419_v45 = vadd.f32 %v418_v28, %v417_v44 }
 0x2e1   :  { %v2095_v32 = vpop.f32.mrb[3].mxu1  ;;  %v2126_v7 = vmax.f32 %v3479_v24, 0.0  ;;  %v2134_v53 = vsel %vm248_vm0, %v2125_v62, 0.0  ;;  %v411_v24 = vrot.slane %v410_v61, 1  ;;  %v403_v62 = vadd.f32 %v402_v38, %v401_v57 }
 0x2e2   :  { %v2124_v25 = vmax.f32 %v2095_v32, 0.0  ;;  %v2131_v12 = vsel %vm248_vm0, %v2123_v36, 0.0  ;;  %v452_v36 = vrot.slane %v451_v21, 4  ;;  %v444_v32 = vadd.f32 %v443_v34, %v442_v26 }
 0x2e3   :  { %v2136_v31 = vsel %vm248_vm0, %v2126_v7, 0.0  ;;  %v428_v35 = vadd.f32 %v427_v9, %v426_v0 }
 0x2e4   :  { %v2132_v19 = vsel %vm248_vm0, %v2124_v25, 0.0  ;;  %v436_v25 = vrot.slane %v435_v6, 2  ;;  %v453_v7 = vadd.f32 %v452_v36, %v451_v21 }
 0x2e5   :  { %v2133_v11 = vadd.f32 %v2132_v19, %v2131_v12  ;;  %v420_v12 = vrot.slane %v419_v45, 1  ;;  %v412_v19 = vadd.f32 %v411_v24, %v410_v61  ;;  %v429_v2 = vrot.slane %v428_v35, 1 }
 0x2e6   :  { %v454_v10 = vrot.slane %v453_v7, 2 }
 0x2e7   :  { %v2135_v58 = vadd.f32 %v2134_v53, %v2133_v11  ;;  %v445_v11 = vrot.slane %v444_v32, 2  ;;  %v437_v53 = vadd.f32 %v436_v25, %v435_v6  ;;  %v421_v18 = vadd.f32 %v420_v12, %v419_v45  ;;  %v3334_v6 = vld [vmem:[%s5441_s8] ss:$0 sm:$0xff] }
 0x2e8   :  { %v461_v16 = vmul.f32 0.0625, %v412_v19  ;;  %v430_v4 = vadd.f32 %v429_v2, %v428_v35  ;;  %v455_v8 = vadd.f32 %v454_v10, %v453_v7 }
 0x2e9   :  { %v5335_v43 = vadd.f32 %v2136_v31, %v2135_v58  ;;  %v459_v58 = vmul.f32 0.0625, %v394_v37  ;;  %v460_v31 = vmul.f32 0.0625, %v403_v62  ;;  %v446_v27 = vadd.f32 %v445_v11, %v444_v32 }
 0x2ea   :  { %v438_v23 = vrot.slane %v437_v53, 1  ;;  %v462_v20 = vmul.f32 0.0625, %v421_v18  ;;  %v2941_v29 = vpack.c.bf16 %v461_v16, %v461_v16  ;;  %v463_v48 = vmul.f32 0.0625, %v430_v4 }
 0x2eb   :  { %v2939_v39 = vpack.c.bf16 %v459_v58, %v459_v58  ;;  %v2940_v54 = vpack.c.bf16 %v460_v31, %v460_v31  ;;  %v447_v47 = vrot.slane %v446_v27, 1  ;;  %v456_v52 = vrot.slane %v455_v8, 1  ;;  %v3694_v58 = vld [vmem:[#allocation14] sm:$0xff]  }
 0x2ec   :  { %v439_v1 = vadd.f32 %v438_v23, %v437_v53  ;;  %v2942_v15 = vpack.c.bf16 %v462_v20, %v462_v20  ;;  %v2961_v56 = vunpack.c.l.b16 %v2941_v29  ;;  %v2943_v30 = vpack.c.bf16 %v463_v48, %v463_v48  ;;  %v3696_v23 = vld [vmem:[%s5444_s11] sm:$0xff]  }
 0x2ed   :  { %v2959_v46 = vunpack.c.l.b16 %v2939_v39  ;;  %v2960_v55 = vunpack.c.l.b16 %v2940_v54  ;;  %v448_v51 = vadd.f32 %v447_v47, %v446_v27  ;;  %v457_v60 = vadd.f32 %v456_v52, %v455_v8  ;;  %v3695_v27 = vld [vmem:[#allocation14 + $0x8] sm:$0xff]   ;;  %v3698_v8 = vld [vmem:[%s5446_s13] sm:$0xff]  }
 0x2ee   :  { %v464_v63 = vmul.f32 0.0625, %v439_v1  ;;  %v2962_v42 = vunpack.c.l.b16 %v2942_v15  ;;  %v2963_v33 = vunpack.c.l.b16 %v2943_v30  ;;  %v3697_v54 = vld [vmem:[%s5444_s11 + $0x8] sm:$0xff]   ;;  %v3351_v29 = vld [vmem:[#allocation13] ss:$0 sm:$0xff]  ;;  %v3369_v30 = vld [vmem:[%s5447_s14] ss:$0 sm:$0xff] }
 0x2ef   :  { %v2967_v5 = vsel %vm1899_vm1, %v2960_v55, %v2959_v46  ;;  %v465_v40 = vmul.f32 0.0625, %v448_v51  ;;  %v466_v9 = vmul.f32 0.0625, %v457_v60  ;;  %v3699_v47 = vld [vmem:[%s5446_s13 + $0x8] sm:$0xff]   ;;  %s3900_s14 = scalar_lea.vmem %s3230_s15, 128 }
 0x2f0   :  { %v2968_v0 = vsel %vm1901_vm2, %v2961_v56, %v2967_v5  ;;  %v2944_v21 = vpack.c.bf16 %v464_v63, %v464_v63  ;;  %p3901_p2 = scmp.ne.s32.totalorder %s3230_s15, %s3900_s14  ;;  %p3906_p4 = scmp.lt.s32.totalorder %s3900_s14, %s3900_s14 }
 0x2f1   :  { %v2969_v45 = vsel %vm1903_vm3, %v2962_v42, %v2968_v0  ;;  %v2945_v37 = vpack.c.bf16 %v465_v40, %v465_v40  ;;  %v2946_v19 = vpack.c.bf16 %v466_v9, %v466_v9 }
 0x2f2   :  { %v2964_v35 = vunpack.c.l.b16 %v2944_v21  ;;  %v2970_v7 = vsel %vm1905_vm4, %v2963_v33, %v2969_v45  ;;  %p3907_p5 = por %p3906_p4, %p3905_p3 }
 0x2f3   :  { %v2965_v53 = vunpack.c.l.b16 %v2945_v37  ;;  %v2966_v18 = vunpack.c.l.b16 %v2946_v19 }
 0x2f4   :  { %v2971_v31 = vsel %vm1907_vm5, %v2964_v35, %v2970_v7  ;;  %p3908_p6 = pnand %p3907_p5, %p3901_p2 }
 0x2f5   :  { %v2972_v10 = vsel %vm1909_vm6, %v2965_v53, %v2971_v31 }
 0x2f6   :  { %v2973_v16 = vsel %vm1911_vm7, %v2966_v18, %v2972_v10 }
 0x2f7   :  { %v2974_v39 = vpack.c.b16 %v2973_v16, %v2973_v16 }
 0x328   :  { %v3482_v41 = vpop.f32.mrb[4].mxu1 }
 0x329   :  { %v2108_v22 = vpop.f32.mrb[5].mxu1  ;;  %v2129_v50 = vmax.f32 %v3482_v41, 0.0 }
 0x32a   :  { %v2127_v59 = vmax.f32 %v2108_v22, 0.0  ;;  %v3483_v49 = vpop.f32.mrb[6].mxu1 }
 0x32b   :  { %v2111_v14 = vpop.f32.mrb[7].mxu1  ;;  %v2130_v3 = vmax.f32 %v3483_v49, 0.0  ;;  %v2142_v61 = vsel %vm248_vm0, %v2129_v50, 0.0  ;;  %v3700_v50 = vld [vmem:[#allocation16] sm:$0xff]  }
 0x32c   :  { %v2138_v13 = vsel %vm248_vm0, %v2127_v59, 0.0  ;;  %v2128_v44 = vmax.f32 %v2111_v14, 0.0 }
 0x32d   :  { %v2139_v26 = vadd.f32 %v2138_v13, %v5335_v43  ;;  %v2144_v36 = vsel %vm248_vm0, %v2130_v3, 0.0  ;;  %v3701_v13 = vld [vmem:[#allocation16 + $0x8] sm:$0xff]  }
 0x32e   :  { %v2140_v57 = vsel %vm248_vm0, %v2128_v44, 0.0 }
 0x32f   :  { %v2141_v28 = vadd.f32 %v2140_v57, %v2139_v26 }
 0x330   :  { %v3425_v34 = vpop.f32.mrb[8].mxu1 }
 0x331   :  { %v2143_v38 = vadd.f32 %v2142_v61, %v2141_v28  ;;  %v3426_v43 = vpop.f32.mrb[9].mxu1  ;;  %v3370_v28 = vld [vmem:[%s5449_s16] ss:$0 sm:$0xff] }
 0x332   :  { %v3427_v24 = vadd.f32 %v3426_v43, %v3425_v34  ;;  %v3428_v32 = vpop.f32.mrb[10].mxu1 }
 0x333   :  { %v2145_v62 = vadd.f32 %v2144_v36, %v2143_v38  ;;  %v3429_v25 = vpop.f32.mrb[11].mxu1 }
 0x334   :  { %v2816_v12 = vadd.f32 %v3427_v24, %v3334_v6 }
 0x335   :  { %v2147_v4 = vmul.f32 0.125, %v2145_v62 }
 0x336   :  { %v2821_v11 = vmax.f32 %v2816_v12, 0.0 }
 0x337   :  { %v2934_v20 = vpack.c.bf16 %v2147_v4, %v2147_v4 }
 0x338   :  { %v2822_v2 = vpack.c.bf16 %v2821_v11, %v2821_v11 }
 0x33a   :  { %3501 = vmatmul.mubr.bf16.vlgmr.msra.gmra.mrb[12].mxu1 %v2822_v2 }
 0x33b   :  { %3505 = vmatpush3.bf16.msra.mxu1 %v3694_v58  ;;  %3508 = vmatprep.mubr.msk.bf16.mxu1 %vm3948_vm8, %v3947_v17 }
 0x33c   :  { %3506 = vmatprep.subr.bf16.mxu1 %v3947_v17 }
 0x33f   :  { %3507 = vmatpush3.bf16.msra.mxu1 %v3695_v27 }
 0x340   :  { %3512 = vmatprep.subr.bf16.mxu1 %v3947_v17 }
 0x342   :  { %3509 = vmatmul.mubr.msk.bf16.vlgmr.msra.gmra.mrb[16].mxu1 %vm248_vm0, %v2974_v39 }
 0x343   :  { %3513 = vmatpush3.bf16.msra.mxu1 %v3696_v23  ;;  %3516 = vmatprep.mubr.msk.bf16.mxu1 %vm3948_vm8, %v3947_v17 }
 0x344   :  { %3514 = vmatprep.subr.bf16.mxu1 %v3947_v17 }
 0x347   :  { %3515 = vmatpush3.bf16.msra.mxu1 %v3697_v54 }
 0x348   :  { %3520 = vmatprep.subr.bf16.mxu1 %v3947_v17 }
 0x34a   :  { %3517 = vmatmul.mubr.msk.bf16.vlgmr.msra.gmra.mrb[20].mxu1 %vm248_vm0, %v2934_v20 }
 0x34b   :  { %3521 = vmatpush3.bf16.msra.mxu1 %v3698_v8  ;;  %3524 = vmatprep.mubr.msk.bf16.mxu1 %vm3948_vm8, %v3947_v17 }
 0x34c   :  { %3522 = vmatprep.subr.bf16.mxu1 %v3947_v17 }
 0x34f   :  { %3523 = vmatpush3.bf16.msra.mxu1 %v3699_v47 }
 0x350   :  { %3528 = vmatprep.subr.bf16.mxu1 %v3947_v17 }
 0x40d   :  { %v2928_v1 = vpop.f32.mrb[12].mxu1 }
 0x40e   :  { %v2929_v46 = vadd.f32 %v3351_v29, %v2928_v1  ;;  %v3502_v55 = vpop.f32.mrb[13].mxu1 }
 0x40f   :  { %v2931_v41 = vpop.f32.mrb[14].mxu1 }
 0x410   :  { %v3085_v48 = vpack.c.bf16 %v2929_v46, %v2929_v46  ;;  %v3503_v22 = vpop.f32.mrb[15].mxu1 }
 0x412   :  { %3525 = vmatmul.mubr.msk.bf16.vlgmr.msra.gmra.mrb[24].mxu1 %vm248_vm0, %v3085_v48 }
 0x413   :  { %3532 = vmatprep.mubr.msk.bf16.mxu1 %vm3948_vm8, %v3947_v17  ;;  %3529 = vmatpush3.bf16.msra.mxu1 %v3700_v50 }
 0x414   :  { %3530 = vmatprep.subr.bf16.mxu1 %v3947_v17 }
 0x415   :  { %v3024_v52 = vpop.f32.mrb[16].mxu1 }
 0x416   :  { %v3510_v15 = vpop.f32.mrb[17].mxu1 }
 0x417   :  { %v3027_v59 = vpop.f32.mrb[18].mxu1  ;;  %3531 = vmatpush3.bf16.msra.mxu1 %v3701_v13 }
 0x418   :  { %v3511_v49 = vpop.f32.mrb[19].mxu1 }
 0x41d   :  { %v3079_v51 = vpop.f32.mrb[20].mxu1 }
 0x41e   :  { %v3080_v56 = vadd.f32 %v3079_v51, %v3024_v52  ;;  %v3518_v14 = vpop.f32.mrb[21].mxu1 }
 0x41f   :  { %v3082_v63 = vpop.f32.mrb[22].mxu1 }
 0x420   :  { %v3519_v5 = vpop.f32.mrb[23].mxu1 }
 0x4e5   :  { %v3139_v44 = vpop.f32.mrb[24].mxu1 }
 0x4e6   :  { %v3145_v26 = vadd.f32 %v3139_v44, %v3080_v56  ;;  %v3526_v60 = vpop.f32.mrb[25].mxu1 }
 0x4e7   :  { %v3142_v42 = vpop.f32.mrb[26].mxu1 }
 0x4e8   :  { %v3153_v3 = vadd.f32 %v3369_v30, %v3145_v26  ;;  %v3527_v57 = vpop.f32.mrb[27].mxu1 }
 0x4ea   :  { %v3154_v40 = vmax.f32 %v3153_v3, 0.0 }
 0x4ec   :  { %v3155_v0 = vpack.c.bf16 %v3154_v40, %v3154_v40 }
 0x4ee   :  { %3533 = vmatmul.mubr.msk.bf16.vlgmr.msra.gmra.mrb[28].mxu1 %vm248_vm0, %v3155_v0 }
 0x5c1   :  { %v3216_v17 = vpop.f32.mrb[28].mxu1 }
 0x5c2   :  { %v3217_v21 = vadd.f32 %v3370_v28, %v3216_v17  ;;  %v3534_v61 = vpop.f32.mrb[29].mxu1 }
 0x5c3   :  { %v3219_v34 = vpop.f32.mrb[30].mxu1 }
 0x5c4   :  { %3222 = vst [vmem:[#allocation17] sm:$0xff] %v3217_v21  ;;  %v3535_v33 = vpop.f32.mrb[31].mxu1 }
 0x5c5   :  { %3911 = shalt.err (!%p3908_p6)
}
 0x5c6   :  { %s3912_s16 = scalar_lea.hbm %s5450_s17, 128 }
 0x5c7   :  { %p3913_p7 = scmp.ne.s32.totalorder %s5450_s17, %s3912_s16  ;;  %p3916_p8 = scmp.lt.u32.totalorder %s3912_s16, %s5450_s17 }
 0x5c9   :  { %p3918_p9 = pnand %p3916_p8, %p3913_p7 }
 0x5cb   :  { %3921 = shalt.err (!%p3918_p9)
}
 0x5cc   :  { %3232 = dma.vmem_to_hbm [thread:$0]  %s3230_s15, 128, %s5450_s17, [#allocation4]  }
 0x5cd   :  { %3932 = dma.done.wait [#allocation4], 128  }
 0x5ce   :  { %3933 = vsyncadd [#allocation4], 4294967168 }
 0x5cf   :  { %3236 = vsyncpa [#allocation3], 1 }
 0x5d0   :  { %3237 = vsyncpa [#allocation6], 1 }
 0x5d1   :  { %3238 = vsyncpa [#allocation9], 1 }
 0x5d2   :  { %3239 = vsyncpa [#allocation12], 1 }
 0x5d3   :  { %3240 = vsyncpa [#allocation15], 1 }
 0x5d4   :  { %3241 = vsyncpa [#allocation4], 1 }

// kernel: tpu_custom_call.1
= control target key start
LH: loop header
LB: loop body
LE: loop exit
PB: predicated region body
PF: predicated region fallthrough
CT: control target
= control target key end

     0   :  { %s5433_s0 = inlined_call_operand.vmem [shape: bf16[8,16,32], index: 0, kind: input, shape index: {}]   ;;  %s5434_s1 = inlined_call_operand.hbm [shape: bf16[8,8,16], index: 1, kind: input, shape index: {}]   ;;  %s5435_s2 = inlined_call_operand.vmem [shape: bf16[8,512], index: 2, kind: input, shape index: {}]   ;;  %s5436_s3 = inlined_call_operand.hbm [shape: bf16[32,32], index: 3, kind: input, shape index: {}]   ;;  %s5437_s4 = inlined_call_operand.hbm [shape: bf16[32,32], index: 4, kind: input, shape index: {}]   ;;  %s5438_s5 = inlined_call_operand.hbm [shape: bf16[512,256], index: 5, kind: input, shape index: {}]   ;;  %s5439_s6 = inlined_call_operand.hbm [shape: f32[1,256], index: 6, kind: input, shape index: {}]   ;;  %s5440_s7 = inlined_call_operand.hbm [shape: bf16[256,128], index: 7, kind: input, shape index: {}]   ;;  %s5441_s8 = inlined_call_operand.vmem [shape: f32[1,128], index: 8, kind: input, shape index: {}]   ;;  %s5442_s9 = inlined_call_operand.vmem [shape: bf16[128,32], index: 9, kind: input, shape index: {}]   ;;  %s5443_s10 = inlined_call_operand.hbm [shape: f32[1,32], index: 10, kind: input, shape index: {}]   ;;  %s5444_s11 = inlined_call_operand.vmem [shape: bf16[32,32], index: 11, kind: input, shape index: {}]   ;;  %s5445_s12 = inlined_call_operand.hbm [shape: bf16[32,32], index: 12, kind: input, shape index: {}]   ;;  %s5446_s13 = inlined_call_operand.vmem [shape: bf16[32,32], index: 13, kind: input, shape index: {}]   ;;  %s5447_s14 = inlined_call_operand.vmem [shape: f32[1,32], index: 14, kind: input, shape index: {}]   ;;  %s5448_s15 = inlined_call_operand.hbm [shape: bf16[32,128], index: 15, kind: input, shape index: {}]   ;;  %s5449_s16 = inlined_call_operand.vmem [shape: f32[1,128], index: 16, kind: input, shape index: {}]   ;;  %s5450_s17 = inlined_call_operand.hbm [shape: f32[8,128], index: 17, kind: output, shape index: {}]  }
   0x1   :  { %5480 = sst [smem:[#allocation67_spill]] %s5433_s0 }
   0x2   :  { %5481 = sst [smem:[#allocation68_spill]] %s5434_s1 }
   0x3   :  { %22 = vsyncpa [#allocation3], 0 }
   0x4   :  { %23 = vsyncpa [#allocation6], 0 }
   0x5   :  { %24 = vsyncpa [#allocation9], 0 }
   0x6   :  { %25 = vsyncpa [#allocation12], 0 }
   0x7   :  { %26 = vsyncpa [#allocation15], 0 }
   0x8   :  { %27 = vsyncpa [#allocation4], 0  ;;  %s3934_s24 = smov [#allocation5]   ;;  %s3935_s26 = smov [#allocation8]  }
   0x9   :  { %s49_s25 = sshll.u32 %s3934_s24, 4  ;;  %s73_s27 = sshll.u32 %s3935_s26, 4  ;;  %s50_s25 = int_to_ptr.vmem [resolvable:$true] %s49_s25  ;;  %s4040_s27 = int_to_ptr.vmem [resolvable:$true] %s73_s27 }
   0xa   :  { %s3702_s0 = scalar_lea.hbm %s5436_s3, 256 }
   0xb   :  { %p3703_p0 = scmp.ne.s32.totalorder %s5436_s3, %s3702_s0  ;;  %p3706_p1 = scmp.lt.u32.totalorder %s3702_s0, %s5436_s3 }
   0xd   :  { %p3708_p2 = pnand %p3706_p1, %p3703_p0 }
   0xf   :  { %3711 = shalt.err (!%p3708_p2)
}
  0x10   :  { %s3712_s20 = scalar_lea.vmem %s50_s25, 256  ;;  %p3717_p4 = scmp.lt.s32.totalorder %s50_s25, %s50_s25 }
  0x11   :  { %p3713_p3 = scmp.ne.s32.totalorder %s50_s25, %s3712_s20  ;;  %p3718_p5 = scmp.lt.s32.totalorder %s3712_s20, %s3712_s20 }
  0x13   :  { %p3719_p6 = por %p3718_p5, %p3717_p4 }
  0x15   :  { %p3720_p7 = pnand %p3719_p6, %p3713_p3 }
  0x17   :  { %3723 = shalt.err (!%p3720_p7)
}
  0x18   :  { %s5453_s21 = smov 64   ;;  %s5455_s22 = smov 4  }
  0x19   :  { %55 = dma.hbm_to_vmem [thread:$0]  %s5436_s3, 256, %s50_s25, [#allocation6], %s5453_s21, %s5453_s21, %s5455_s22  }
  0x1a   :  { %s3724_s29 = scalar_lea.hbm %s5438_s5, 8192 }
  0x1b   :  { %p3725_p8 = scmp.ne.s32.totalorder %s5438_s5, %s3724_s29  ;;  %p3728_p9 = scmp.lt.u32.totalorder %s3724_s29, %s5438_s5 }
  0x1d   :  { %p3730_p10 = pnand %p3728_p9, %p3725_p8 }
  0x1f   :  { %3733 = shalt.err (!%p3730_p10)
}
  0x20   :  { %s3734_s1 = scalar_lea.vmem %s4040_s27, 8192  ;;  %p3739_p12 = scmp.lt.s32.totalorder %s4040_s27, %s4040_s27 }
  0x21   :  { %p3735_p11 = scmp.ne.s32.totalorder %s4040_s27, %s3734_s1  ;;  %p3740_p13 = scmp.lt.s32.totalorder %s3734_s1, %s3734_s1 }
  0x23   :  { %p3741_p0 = por %p3740_p13, %p3739_p12 }
  0x25   :  { %p3742_p1 = pnand %p3741_p0, %p3735_p11 }
  0x27   :  { %3745 = shalt.err (!%p3742_p1)
}
  0x28   :  { %s3938_s3 = smov 128   ;;  %s3939_s25 = smov 8  }
  0x29   :  { %79 = dma.hbm_to_vmem [thread:$0]  %s5438_s5, 8192, %s4040_s27, [#allocation9], %s3938_s3, %s3938_s3, %s3939_s25  }
  0x2a   :  { %s3940_s24 = smov [#allocation11]   ;;  %s3941_s28 = smov [#allocation14]  }
  0x2b   :  { %s95_s26 = sshll.u32 %s3940_s24, 4  ;;  %s123_s29 = sshll.u32 %s3941_s28, 4  ;;  %s96_s26 = int_to_ptr.vmem [resolvable:$true] %s95_s26  ;;  %s4074_s29 = int_to_ptr.vmem [resolvable:$true] %s123_s29 }
  0x2c   :  { %s3746_s18 = scalar_lea.hbm %s5440_s7, 2048 }
  0x2d   :  { %p3747_p2 = scmp.ne.s32.totalorder %s5440_s7, %s3746_s18  ;;  %p3750_p3 = scmp.lt.u32.totalorder %s3746_s18, %s5440_s7 }
  0x2f   :  { %p3752_p4 = pnand %p3750_p3, %p3747_p2 }
  0x31   :  { %3755 = shalt.err (!%p3752_p4)
}
  0x32   :  { %s3756_s5 = scalar_lea.vmem %s96_s26, 2048  ;;  %p3761_p6 = scmp.lt.s32.totalorder %s96_s26, %s96_s26 }
  0x33   :  { %p3757_p5 = scmp.ne.s32.totalorder %s96_s26, %s3756_s5  ;;  %p3762_p7 = scmp.lt.s32.totalorder %s3756_s5, %s3756_s5 }
  0x35   :  { %p3763_p8 = por %p3762_p7, %p3761_p6 }
  0x37   :  { %p3764_p9 = pnand %p3763_p8, %p3757_p5 }
  0x39   :  { %3767 = shalt.err (!%p3764_p9)
}
  0x3a   :  { %s5482_s27 = smov 4   ;;  %s5483_s3 = smov 64  }
  0x3b   :  { %101 = dma.hbm_to_vmem [thread:$0]  %s5440_s7, 2048, %s96_s26, [#allocation12], %s5483_s3, %s5483_s3, %s5482_s27  }
  0x3c   :  { %s3768_s21 = scalar_lea.hbm %s5445_s12, 256 }
  0x3d   :  { %p3769_p10 = scmp.ne.s32.totalorder %s5445_s12, %s3768_s21  ;;  %p3772_p11 = scmp.lt.u32.totalorder %s3768_s21, %s5445_s12 }
  0x3f   :  { %p3774_p12 = pnand %p3772_p11, %p3769_p10 }
  0x41   :  { %3777 = shalt.err (!%p3774_p12)
}
  0x42   :  { %s3778_s18 = scalar_lea.vmem %s4074_s29, 256  ;;  %p3783_p0 = scmp.lt.s32.totalorder %s4074_s29, %s4074_s29 }
  0x43   :  { %p3779_p13 = scmp.ne.s32.totalorder %s4074_s29, %s3778_s18  ;;  %p3784_p1 = scmp.lt.s32.totalorder %s3778_s18, %s3778_s18 }
  0x45   :  { %p3785_p2 = por %p3784_p1, %p3783_p0 }
  0x47   :  { %p3786_p3 = pnand %p3785_p2, %p3779_p13 }
  0x49   :  { %3789 = shalt.err (!%p3786_p3)
}
  0x4a   :  { %129 = dma.hbm_to_vmem [thread:$0]  %s5445_s12, 256, %s4074_s29, [#allocation15], %s5483_s3, %s5483_s3, %s5482_s27  }
  0x4b   :  { %s3942_s19 = smov [#allocation2]   ;;  %s3943_s5 = smov [#allocation7]  }
  0x4c   :  { %s35_s1 = sshll.u32 %s3942_s19, 4  ;;  %s61_s25 = sshll.u32 %s3943_s5, 4  ;;  %s36_s1 = int_to_ptr.vmem [resolvable:$true] %s35_s1  ;;  %s4111_s25 = int_to_ptr.vmem [resolvable:$true] %s61_s25 }
  0x4d   :  { %s5484_s24 = sld [smem:[#allocation68_spill]] }
  0x53   :  { %s3790_s21 = scalar_lea.hbm %s5484_s24, 512 }
  0x54   :  { %p3791_p4 = scmp.ne.s32.totalorder %s5484_s24, %s3790_s21  ;;  %p3794_p5 = scmp.lt.u32.totalorder %s3790_s21, %s5484_s24 }
  0x56   :  { %p3796_p6 = pnand %p3794_p5, %p3791_p4 }
  0x58   :  { %3799 = shalt.err (!%p3796_p6)
}
  0x59   :  { %s3800_s12 = scalar_lea.vmem %s36_s1, 512  ;;  %p3805_p8 = scmp.lt.s32.totalorder %s36_s1, %s36_s1 }
  0x5a   :  { %p3801_p7 = scmp.ne.s32.totalorder %s36_s1, %s3800_s12  ;;  %p3806_p9 = scmp.lt.s32.totalorder %s3800_s12, %s3800_s12 }
  0x5c   :  { %p3807_p10 = por %p3806_p9, %p3805_p8 }
  0x5e   :  { %p3808_p11 = pnand %p3807_p10, %p3801_p7 }
  0x60   :  { %3811 = shalt.err (!%p3808_p11)
}
  0x61   :  { %41 = dma.hbm_to_vmem [thread:$0]  %s5484_s24, 512, %s36_s1, [#allocation3], %s5483_s3, %s5483_s3, %s5482_s27  }
  0x62   :  { %s3812_s19 = scalar_lea.hbm %s5437_s4, 256 }
  0x63   :  { %p3813_p12 = scmp.ne.s32.totalorder %s5437_s4, %s3812_s19  ;;  %p3816_p13 = scmp.lt.u32.totalorder %s3812_s19, %s5437_s4 }
  0x65   :  { %p3818_p0 = pnand %p3816_p13, %p3813_p12 }
  0x67   :  { %3821 = shalt.err (!%p3818_p0)
}
  0x68   :  { %s3822_s22 = scalar_lea.vmem %s4111_s25, 256  ;;  %p3827_p2 = scmp.lt.s32.totalorder %s4111_s25, %s4111_s25 }
  0x69   :  { %p3823_p1 = scmp.ne.s32.totalorder %s4111_s25, %s3822_s22  ;;  %p3828_p3 = scmp.lt.s32.totalorder %s3822_s22, %s3822_s22 }
  0x6b   :  { %p3829_p4 = por %p3828_p3, %p3827_p2 }
  0x6d   :  { %p3830_p5 = pnand %p3829_p4, %p3823_p1 }
  0x6f   :  { %3833 = shalt.err (!%p3830_p5)
}
  0x70   :  { %67 = dma.hbm_to_vmem [thread:$0]  %s5437_s4, 256, %s4111_s25, [#allocation6], %s5483_s3, %s5483_s3, %s5482_s27  }
  0x71   :  { %s3944_s28 = smov [#allocation10]   ;;  %s3945_s30 = smov [#allocation13]  }
  0x72   :  { %s86_s0 = sshll.u32 %s3944_s28, 4  ;;  %s112_s12 = sshll.u32 %s3945_s30, 4  ;;  %s87_s0 = int_to_ptr.vmem [resolvable:$true] %s86_s0  ;;  %s113_s12 = int_to_ptr.vmem [resolvable:$true] %s112_s12 }
  0x73   :  { %s3834_s7 = scalar_lea.hbm %s5439_s6, 32 }
  0x74   :  { %p3835_p6 = scmp.ne.s32.totalorder %s5439_s6, %s3834_s7  ;;  %p3838_p7 = scmp.lt.u32.totalorder %s3834_s7, %s5439_s6 }
  0x76   :  { %p3840_p8 = pnand %p3838_p7, %p3835_p6 }
  0x78   :  { %3843 = shalt.err (!%p3840_p8)
}
  0x79   :  { %s3844_s4 = scalar_lea.vmem %s87_s0, 32  ;;  %p3849_p10 = scmp.lt.s32.totalorder %s87_s0, %s87_s0 }
  0x7a   :  { %p3845_p9 = scmp.ne.s32.totalorder %s87_s0, %s3844_s4  ;;  %p3850_p11 = scmp.lt.s32.totalorder %s3844_s4, %s3844_s4 }
  0x7c   :  { %p3851_p12 = por %p3850_p11, %p3849_p10 }
  0x7e   :  { %p3852_p13 = pnand %p3851_p12, %p3845_p9 }
  0x80   :  { %3855 = shalt.err (!%p3852_p13)
}
  0x81   :  { %89 = dma.hbm_to_vmem [thread:$0]  %s5439_s6, 32, %s87_s0, [#allocation9]  }
  0x82   :  { %s3856_s1 = scalar_lea.hbm %s5443_s10, 16 }
  0x83   :  { %p3857_p0 = scmp.ne.s32.totalorder %s5443_s10, %s3856_s1  ;;  %p3860_p1 = scmp.lt.u32.totalorder %s3856_s1, %s5443_s10 }
  0x85   :  { %p3862_p2 = pnand %p3860_p1, %p3857_p0 }
  0x87   :  { %3865 = shalt.err (!%p3862_p2)
}
  0x88   :  { %s3866_s18 = scalar_lea.vmem %s113_s12, 16  ;;  %s3870_s7 = scalar_lea.vmem %s113_s12, 32 }
  0x89   :  { %p3867_p3 = scmp.ne.s32.totalorder %s113_s12, %s3866_s18  ;;  %p3871_p4 = scmp.lt.s32.totalorder %s113_s12, %s113_s12 }
  0x8a   :  { %p3872_p5 = scmp.lt.s32.totalorder %s3870_s7, %s3866_s18 }
  0x8c   :  { %p3873_p6 = por %p3872_p5, %p3871_p4 }
  0x8e   :  { %p3874_p7 = pnand %p3873_p6, %p3867_p3 }
  0x90   :  { %3877 = shalt.err (!%p3874_p7)
}
  0x91   :  { %115 = dma.hbm_to_vmem [thread:$0]  %s5443_s10, 16, %s113_s12, [#allocation12]  }
  0x92   :  { %s3946_s26 = smov [#allocation16]   ;;  %s3878_s4 = scalar_lea.hbm %s5448_s15, 256 }
  0x93   :  { %s139_s19 = sshll.u32 %s3946_s26, 4  ;;  %p3879_p8 = scmp.ne.s32.totalorder %s5448_s15, %s3878_s4  ;;  %s140_s19 = int_to_ptr.vmem [resolvable:$true] %s139_s19 }
  0x94   :  { %p3882_p9 = scmp.lt.u32.totalorder %s3878_s4, %s5448_s15 }
  0x96   :  { %p3884_p10 = pnand %p3882_p9, %p3879_p8 }
  0x98   :  { %3887 = shalt.err (!%p3884_p10)
}
  0x99   :  { %s3888_s1 = scalar_lea.vmem %s140_s19, 256  ;;  %p3893_p12 = scmp.lt.s32.totalorder %s140_s19, %s140_s19 }
  0x9a   :  { %p3889_p11 = scmp.ne.s32.totalorder %s140_s19, %s3888_s1  ;;  %p3894_p13 = scmp.lt.s32.totalorder %s3888_s1, %s3888_s1 }
  0x9c   :  { %p3895_p0 = por %p3894_p13, %p3893_p12 }
  0x9e   :  { %p3896_p1 = pnand %p3895_p0, %p3889_p11 }
  0xa0   :  { %3899 = shalt.err (!%p3896_p1)
}
  0xa1   :  { %145 = dma.hbm_to_vmem [thread:$0]  %s5448_s15, 256, %s140_s19, [#allocation15], %s5483_s3, %s5483_s3, %s5482_s27  }
  0xa2   :  { %3922 = dma.done.wait [#allocation3], 512  }
  0xa3   :  { %3923 = vsyncadd [#allocation3], 4294966784 }
  0xa4   :  { %3924 = dma.done.wait [#allocation6], 512  }
  0xa5   :  { %3925 = vsyncadd [#allocation6], 4294966784 }
  0xa6   :  { %3926 = dma.done.wait [#allocation9], 8224  }
  0xa7   :  { %3927 = vsyncadd [#allocation9], 4294959072 }
  0xa8   :  { %3928 = dma.done.wait [#allocation12], 2064  }
  0xa9   :  { %3929 = vsyncadd [#allocation12], 4294965232 }
  0xaa   :  { %3930 = dma.done.wait [#allocation15], 512  }
  0xab   :  { %3931 = vsyncadd [#allocation15], 4294966784  ;;  %v483_v0 = vlaneseq  ;;  %v3558_v2 = vld [vmem:[#allocation5] sm:$0xff]   ;;  %v3559_v7 = vld [vmem:[#allocation5 + $0x8] sm:$0xff]   ;;  %vm248_vm0 = vcmask 261120   ;;  %s5486_s3 = sld [smem:[#allocation67_spill]] }
  0xac   :  { %v3375_v4 = vld [vmem:[#allocation2] sm:$0xff]   ;;  %3452 = vmatprep.subr.bf16.mxu0 %v3558_v2  ;;  %v3567_v16 = vld [vmem:[#allocation8 + $0x14] ss:$8 sps:$4 sm:$0xff]   ;;  %v4216_v18 = vld [vmem:[#allocation2 + $0x8] sm:$0xff]   ;;  %vm1899_vm1 = vcmask 1041409   ;;  %vm1901_vm2 = vcmask 1042434  }
  0xad   :  { %v4187_v1 = vshrl.u32 %v483_v0, 7  ;;  %v4192_v5 = vunpack.c.h.bf16 %v3375_v4  ;;  %v4194_v6 = vunpack.c.l.bf16 %v3375_v4  ;;  %3453 = vmatpush3.bf16.msra.mxu0 %v3558_v2  ;;  %v3564_v11 = vld [vmem:[#allocation8 + $0x4] ss:$8 sps:$4 sm:$0xff]   ;;  %v3562_v14 = vld [vmem:[#allocation8] ss:$8 sps:$4 sm:$0xff]   ;;  %v4222_v22 = vunpack.c.l.bf16 %v4216_v18  ;;  %v3391_v60 = vld [vmem:[#allocation2 + $0x10] sm:$0xff]  }
  0xae   :  { %3454 = vmatprep.subr.bf16.mxu0 %v3559_v7  ;;  %v3565_v19 = vld [vmem:[#allocation8 + $0x10] ss:$8 sps:$4 sm:$0xff]   ;;  %v3572_v20 = vld [vmem:[#allocation8 + $0x24] ss:$8 sps:$4 sm:$0xff]   ;;  %v3570_v24 = vld [vmem:[#allocation8 + $0x20] ss:$8 sps:$4 sm:$0xff]   ;;  %v4270_v50 = vunpack.c.h.bf16 %v4216_v18  ;;  %v4280_v2 = vunpack.c.l.bf16 %v3391_v60 }
  0xaf   :  { %v4190_v3 = vsub.s32 0, %v4187_v1  ;;  %v4208_v13 = vsub.s32 1, %v4187_v1  ;;  %v3575_v26 = vld [vmem:[#allocation8 + $0x34] ss:$8 sps:$4 sm:$0xff]   ;;  %v3573_v28 = vld [vmem:[#allocation8 + $0x30] ss:$8 sps:$4 sm:$0xff]  }
  0xb0   :  { %v3580_v29 = vld [vmem:[#allocation8 + $0x44] ss:$8 sps:$4 sm:$0xff]   ;;  %v4240_v32 = vsub.s32 2, %v4187_v1  ;;  %v3578_v33 = vld [vmem:[#allocation8 + $0x40] ss:$8 sps:$4 sm:$0xff]   ;;  %v4252_v40 = vsub.s32 3, %v4187_v1 }
  0xb1   :  { %5485 = vst [vmem:[#allocation24_spill] sm:$0xff] %v4190_v3  ;;  %v3560_v8 = vld [vmem:[%s5486_s3] sm:$0xff]   ;;  %v497_v9 = vrot.slane %v4192_v5, %v4190_v3  ;;  %v486_v10 = vrot.slane %v4194_v6, %v4190_v3  ;;  %v3561_v12 = vld [vmem:[%s5486_s3 + $0x8] sm:$0xff]   ;;  %5487 = vst [vmem:[#allocation25_spill] sm:$0xff] %v4208_v13  ;;  %3455 = vmatpush3.bf16.msra.mxu0 %v3559_v7  ;;  %v662_v17 = vrot.slane %v4194_v6, %v4208_v13  ;;  %vm1903_vm3 = vcmask 1043459   ;;  %s3949_s12 = smov [#allocation17]  }
  0xb2   :  { %3456 = vmatprep.mubr.msk.bf16.mxu0 %vm248_vm0, %v3560_v8  ;;  %2560 = vmatprep.subr.bf16.mxu0 %v3564_v11  ;;  %v3568_v15 = vld [vmem:[%s5486_s3 + $0x10] sm:$0xff]   ;;  %v673_v21 = vrot.slane %v4192_v5, %v4208_v13  ;;  %v3569_v23 = vld [vmem:[%s5486_s3 + $0x18] sm:$0xff]   ;;  %v3576_v25 = vld [vmem:[%s5486_s3 + $0x20] sm:$0xff]   ;;  %v508_v27 = vrot.slane %v4222_v22, %v4190_v3  ;;  %v684_v30 = vrot.slane %v4222_v22, %v4208_v13  ;;  %vm1905_vm4 = vcmask 1044484   ;;  %s3229_s15 = sshll.u32 %s3949_s12, 4  ;;  %s3230_s15 = int_to_ptr.vmem [resolvable:$true] %s3229_s15 }
  0xb3   :  { %499 = vbcast.lane.b32.xlu1 %v497_v9, 256  ;;  %488 = vbcast.lane.b32.xlu0 %v486_v10, 256  ;;  %v3577_v31 = vld [vmem:[%s5486_s3 + $0x28] sm:$0xff]   ;;  %v3584_v34 = vld [vmem:[%s5486_s3 + $0x30] sm:$0xff]   ;;  %v838_v36 = vrot.slane %v4194_v6, %v4240_v32  ;;  %v849_v39 = vrot.slane %v4192_v5, %v4240_v32  ;;  %v3585_v41 = vld [vmem:[%s5486_s3 + $0x38] sm:$0xff]   ;;  %v1014_v46 = vrot.slane %v4194_v6, %v4252_v40  ;;  %vm1907_vm5 = vcmask 1045509   ;;  %p3905_p3 = scmp.lt.s32.totalorder %s3230_s15, %s3230_s15 }
  0xb4   :  { %3457 = vmatmul.mubr.msk.bf16.vlgmr.msra.gmra.mrb[0].mxu0 %vm248_vm0, %v3561_v12  ;;  %v3583_v35 = vld [vmem:[#allocation8 + $0x54] ss:$8 sps:$4 sm:$0xff]   ;;  %v3581_v37 = vld [vmem:[#allocation8 + $0x50] ss:$8 sps:$4 sm:$0xff]   ;;  %v3588_v38 = vld [vmem:[#allocation8 + $0x64] ss:$8 sps:$4 sm:$0xff]   ;;  %v1025_v49 = vrot.slane %v4192_v5, %v4252_v40  ;;  %v519_v53 = vrot.slane %v4270_v50, %v4190_v3  ;;  %v695_v56 = vrot.slane %v4270_v50, %v4208_v13  ;;  %v860_v59 = vrot.slane %v4222_v22, %v4240_v32 }
  0xb5   :  { %2561 = vmatpush1.bf16.msra.mxu0 %v3562_v14  ;;  %3460 = vmatprep.mubr.msk.bf16.mxu0 %vm248_vm0, %v3568_v15  ;;  %v3586_v42 = vld [vmem:[#allocation8 + $0x60] ss:$8 sps:$4 sm:$0xff]   ;;  %v3591_v44 = vld [vmem:[#allocation8 + $0x74] ss:$8 sps:$4 sm:$0xff]   ;;  %v3589_v47 = vld [vmem:[#allocation8 + $0x70] ss:$8 sps:$4 sm:$0xff]   ;;  %v1036_v63 = vrot.slane %v4222_v22, %v4252_v40  ;;  %v530_v7 = vrot.slane %v4280_v2, %v4190_v3  ;;  %v871_v14 = vrot.slane %v4270_v50, %v4240_v32 }
  0xb6   :  { %2562 = vmatprep.subr.bf16.mxu0 %v3567_v16  ;;  %v4260_v43 = vld [vmem:[%s5435_s2] sm:$0xff]  ;;  %v3597_v52 = vld [vmem:[#allocation8 + $0x94] ss:$8 sps:$4 sm:$0xff]   ;;  %v3595_v54 = vld [vmem:[#allocation8 + $0x90] ss:$8 sps:$4 sm:$0xff]   ;;  %v1047_v18 = vrot.slane %v4270_v50, %v4252_v40  ;;  %vm1909_vm6 = vcmask 1046534  }
  0xb7   :  { %503 = vbcast.lane.b32.xlu1 %v497_v9, 264  ;;  %492 = vbcast.lane.b32.xlu0 %v486_v10, 264  ;;  %v3267_v45 = vcombine.high %v4260_v43, %v4260_v43  ;;  %v3594_v48 = vld [vmem:[#allocation8 + $0x84] ss:$8 sps:$4 sm:$0xff]   ;;  %v3592_v51 = vld [vmem:[#allocation8 + $0x80] ss:$8 sps:$4 sm:$0xff]   ;;  %v706_v10 = vrot.slane %v4280_v2, %v4208_v13 }
  0xb8   :  { %v3600_v55 = vld [vmem:[#allocation8 + $0xa4] ss:$8 sps:$4 sm:$0xff]   ;;  %v3598_v57 = vld [vmem:[#allocation8 + $0xa0] ss:$8 sps:$4 sm:$0xff]   ;;  %v3603_v58 = vld [vmem:[#allocation8 + $0xb4] ss:$8 sps:$4 sm:$0xff]  }
  0xb9   :  { %2563 = vmatpush1.bf16.msra.mxu0 %v3565_v19  ;;  %v3601_v61 = vld [vmem:[#allocation8 + $0xb0] ss:$8 sps:$4 sm:$0xff]   ;;  %v3606_v62 = vld [vmem:[#allocation8 + $0xc4] ss:$8 sps:$4 sm:$0xff]   ;;  %v3604_v0 = vld [vmem:[#allocation8 + $0xc0] ss:$8 sps:$4 sm:$0xff]  }
  0xba   :  { %2564 = vmatprep.subr.bf16.mxu0 %v3572_v20  ;;  %v3609_v4 = vld [vmem:[#allocation8 + $0xd4] ss:$8 sps:$4 sm:$0xff]   ;;  %v3607_v8 = vld [vmem:[#allocation8 + $0xd0] ss:$8 sps:$4 sm:$0xff]   ;;  %v3612_v9 = vld [vmem:[#allocation8 + $0xe4] ss:$8 sps:$4 sm:$0xff]   ;;  %v4295_v20 = vunpack.c.h.bf16 %v3391_v60 }
  0xbb   :  { %668 = vbcast.lane.b32.xlu1 %v662_v17, 264  ;;  %664 = vbcast.lane.b32.xlu0 %v662_v17, 256  ;;  %v3610_v11 = vld [vmem:[#allocation8 + $0xe0] ss:$8 sps:$4 sm:$0xff]   ;;  %v3615_v12 = vld [vmem:[#allocation8 + $0xf4] ss:$8 sps:$4 sm:$0xff]  }
  0xbc   :  { %3461 = vmatmul.mubr.msk.bf16.gmra.mrb[4].mxu0 %vm248_vm0, %v3569_v23  ;;  %v3613_v15 = vld [vmem:[#allocation8 + $0xf0] ss:$8 sps:$4 sm:$0xff]   ;;  %v3620_v16 = vld [vmem:[#allocation8 + $0x104] ss:$8 sps:$4 sm:$0xff]   ;;  %v3618_v19 = vld [vmem:[#allocation8 + $0x100] ss:$8 sps:$4 sm:$0xff]  }
  0xbd   :  { %2565 = vmatpush1.bf16.msra.mxu0 %v3570_v24  ;;  %3464 = vmatprep.mubr.msk.bf16.mxu0 %vm248_vm0, %v3576_v25  ;;  %v4291_v17 = vld [vmem:[%s5435_s2 + $0x8] sm:$0xff]  ;;  %v3623_v23 = vld [vmem:[#allocation8 + $0x114] ss:$8 sps:$4 sm:$0xff]   ;;  %v541_v25 = vrot.slane %v4295_v20, %v4190_v3  ;;  %vm1911_vm7 = vcmask 1047559   ;;  %vm3948_vm8 = vmmov 0  }
  0xbe   :  { %2566 = vmatprep.subr.bf16.mxu0 %v3575_v26  ;;  %v3269_v24 = vcombine.high %v4291_v17, %v4291_v17  ;;  %v3621_v26 = vld [vmem:[#allocation8 + $0x110] ss:$8 sps:$4 sm:$0xff]   ;;  %v3653_v60 = vld [vmem:[#allocation8 + $0x1b4] ss:$8 sps:$4 sm:$0xff]  }
  0xbf   :  { %679 = vbcast.lane.b32.xlu1 %v673_v21, 264  ;;  %675 = vbcast.lane.b32.xlu0 %v673_v21, 256  ;;  %v3266_v21 = vcombine.low %v4260_v43, %v4260_v43  ;;  %v3638_v43 = vld [vmem:[#allocation8 + $0x164] ss:$8 sps:$4 sm:$0xff]  }
  0xc1   :  { %2567 = vmatpush1.bf16.msra.mxu0 %v3573_v28  ;;  %v717_v28 = vrot.slane %v4295_v20, %v4208_v13 }
  0xc2   :  { %2568 = vmatprep.subr.bf16.mxu0 %v3580_v29  ;;  %v3624_v29 = vld [vmem:[#allocation8 + $0x120] ss:$8 sps:$4 sm:$0xff]  }
  0xc3   :  { %514 = vbcast.lane.b32.xlu1 %v508_v27, 264  ;;  %510 = vbcast.lane.b32.xlu0 %v508_v27, 256  ;;  %v3626_v27 = vld [vmem:[#allocation8 + $0x124] ss:$8 sps:$4 sm:$0xff]  }
  0xc4   :  { %3465 = vmatmul.mubr.msk.bf16.gmra.mrb[8].mxu0 %vm248_vm0, %v3577_v31  ;;  %v882_v31 = vrot.slane %v4280_v2, %v4240_v32 }
  0xc5   :  { %2569 = vmatpush1.bf16.msra.mxu0 %v3578_v33  ;;  %3468 = vmatprep.mubr.msk.bf16.mxu0 %vm248_vm0, %v3584_v34  ;;  %v3392_v33 = vld [vmem:[#allocation2 + $0x18] sm:$0xff]  }
  0xc6   :  { %2570 = vmatprep.subr.bf16.mxu0 %v3583_v35  ;;  %v3627_v34 = vld [vmem:[#allocation8 + $0x130] ss:$8 sps:$4 sm:$0xff]   ;;  %v3632_v35 = vld [vmem:[#allocation8 + $0x144] ss:$8 sps:$4 sm:$0xff]  }
  0xc7   :  { %690 = vbcast.lane.b32.xlu1 %v684_v30, 264  ;;  %686 = vbcast.lane.b32.xlu0 %v684_v30, 256  ;;  %v3629_v30 = vld [vmem:[#allocation8 + $0x134] ss:$8 sps:$4 sm:$0xff]  }
  0xc9   :  { %2571 = vmatpush1.bf16.msra.mxu0 %v3581_v37  ;;  %v4309_v37 = vunpack.c.l.bf16 %v3392_v33 }
  0xca   :  { %2572 = vmatprep.subr.bf16.mxu0 %v3588_v38  ;;  %v3630_v38 = vld [vmem:[#allocation8 + $0x140] ss:$8 sps:$4 sm:$0xff]  }
  0xcb   :  { %844 = vbcast.lane.b32.xlu1 %v838_v36, 264  ;;  %840 = vbcast.lane.b32.xlu0 %v838_v36, 256  ;;  %v1058_v36 = vrot.slane %v4280_v2, %v4252_v40 }
  0xcc   :  { %3469 = vmatmul.mubr.msk.bf16.gmra.mrb[12].mxu0 %vm248_vm0, %v3585_v41  ;;  %v552_v41 = vrot.slane %v4309_v37, %v4190_v3 }
  0xcd   :  { %2573 = vmatpush1.bf16.msra.mxu0 %v3586_v42  ;;  %2592 = vmatprep.mubr.bf16.mxu0 %v3267_v45  ;;  %v3633_v42 = vld [vmem:[#allocation8 + $0x150] ss:$8 sps:$4 sm:$0xff]   ;;  %v3636_v45 = vld [vmem:[#allocation8 + $0x160] ss:$8 sps:$4 sm:$0xff]  }
  0xce   :  { %2574 = vmatprep.subr.bf16.mxu0 %v3591_v44  ;;  %v728_v44 = vrot.slane %v4309_v37, %v4208_v13 }
  0xcf   :  { %855 = vbcast.lane.b32.xlu1 %v849_v39, 264  ;;  %851 = vbcast.lane.b32.xlu0 %v849_v39, 256  ;;  %v3635_v39 = vld [vmem:[#allocation8 + $0x154] ss:$8 sps:$4 sm:$0xff]  }
  0xd1   :  { %2575 = vmatpush1.bf16.msra.mxu0 %v3589_v47  ;;  %v893_v47 = vrot.slane %v4295_v20, %v4240_v32 }
  0xd2   :  { %2576 = vmatprep.subr.bf16.mxu0 %v3594_v48  ;;  %v3639_v48 = vld [vmem:[#allocation8 + $0x170] ss:$8 sps:$4 sm:$0xff]  }
  0xd3   :  { %1020 = vbcast.lane.b32.xlu1 %v1014_v46, 264  ;;  %1016 = vbcast.lane.b32.xlu0 %v1014_v46, 256  ;;  %v3641_v46 = vld [vmem:[#allocation8 + $0x174] ss:$8 sps:$4 sm:$0xff]  }
  0xd5   :  { %2577 = vmatpush1.bf16.msra.mxu0 %v3592_v51  ;;  %v1069_v51 = vrot.slane %v4295_v20, %v4252_v40 }
  0xd6   :  { %2578 = vmatprep.subr.bf16.mxu0 %v3597_v52  ;;  %v4319_v52 = vunpack.c.h.bf16 %v3392_v33  ;;  %v3668_v33 = vld [vmem:[#allocation7] sm:$0xff]  }
  0xd7   :  { %1031 = vbcast.lane.b32.xlu1 %v1025_v49, 264  ;;  %1027 = vbcast.lane.b32.xlu0 %v1025_v49, 256  ;;  %v3644_v49 = vld [vmem:[#allocation8 + $0x184] ss:$8 sps:$4 sm:$0xff]  }
  0xd8   :  { %3472 = vmatprep.subr.bf16.mxu1 %v3668_v33 }
  0xd9   :  { %2579 = vmatpush1.bf16.msra.mxu0 %v3595_v54  ;;  %v3647_v54 = vld [vmem:[#allocation8 + $0x194] ss:$8 sps:$4 sm:$0xff]   ;;  %3473 = vmatpush3.bf16.msra.mxu1 %v3668_v33 }
  0xda   :  { %2580 = vmatprep.subr.bf16.mxu0 %v3600_v55  ;;  %v563_v55 = vrot.slane %v4319_v52, %v4190_v3 }
  0xdb   :  { %525 = vbcast.lane.b32.xlu1 %v519_v53, 264  ;;  %521 = vbcast.lane.b32.xlu0 %v519_v53, 256  ;;  %v3642_v53 = vld [vmem:[#allocation8 + $0x180] ss:$8 sps:$4 sm:$0xff]  }
  0xdd   :  { %2581 = vmatpush1.bf16.msra.mxu0 %v3598_v57  ;;  %v3650_v57 = vld [vmem:[#allocation8 + $0x1a4] ss:$8 sps:$4 sm:$0xff]  }
  0xde   :  { %2582 = vmatprep.subr.bf16.mxu0 %v3603_v58  ;;  %v739_v58 = vrot.slane %v4319_v52, %v4208_v13 }
  0xdf   :  { %701 = vbcast.lane.b32.xlu1 %v695_v56, 264  ;;  %697 = vbcast.lane.b32.xlu0 %v695_v56, 256  ;;  %v3645_v56 = vld [vmem:[#allocation8 + $0x190] ss:$8 sps:$4 sm:$0xff]  }
  0xe1   :  { %2583 = vmatpush1.bf16.msra.mxu0 %v3601_v61  ;;  %v904_v61 = vrot.slane %v4309_v37, %v4240_v32 }
  0xe2   :  { %2584 = vmatprep.subr.bf16.mxu0 %v3606_v62  ;;  %v3651_v62 = vld [vmem:[#allocation8 + $0x1b0] ss:$8 sps:$4 sm:$0xff]  }
  0xe3   :  { %866 = vbcast.lane.b32.xlu1 %v860_v59, 264  ;;  %862 = vbcast.lane.b32.xlu0 %v860_v59, 256  ;;  %v3648_v59 = vld [vmem:[#allocation8 + $0x1a0] ss:$8 sps:$4 sm:$0xff]  }
  0xe5   :  { %2585 = vmatpush1.bf16.msra.mxu0 %v3604_v0  ;;  %v1080_v0 = vrot.slane %v4309_v37, %v4252_v40 }
  0xe6   :  { %2586 = vmatprep.subr.bf16.mxu0 %v3609_v4 }
  0xe7   :  { %1042 = vbcast.lane.b32.xlu1 %v1036_v63, 264  ;;  %1038 = vbcast.lane.b32.xlu0 %v1036_v63, 256  ;;  %v3656_v63 = vld [vmem:[#allocation8 + $0x1c4] ss:$8 sps:$4 sm:$0xff]  }
  0xe9   :  { %2587 = vmatpush1.bf16.msra.mxu0 %v3607_v8  ;;  %v3654_v8 = vld [vmem:[#allocation8 + $0x1c0] ss:$8 sps:$4 sm:$0xff]  }
  0xea   :  { %2588 = vmatprep.subr.bf16.mxu0 %v3612_v9  ;;  %v3659_v9 = vld [vmem:[#allocation8 + $0x1d4] ss:$8 sps:$4 sm:$0xff]  }
  0xeb   :  { %536 = vbcast.lane.b32.xlu1 %v530_v7, 264  ;;  %532 = vbcast.lane.b32.xlu0 %v530_v7, 256 }
  0xed   :  { %2589 = vmatpush1.bf16.msra.mxu0 %v3610_v11 }
  0xee   :  { %2590 = vmatprep.subr.bf16.mxu0 %v3615_v12 }
  0xef   :  { %712 = vbcast.lane.b32.xlu1 %v706_v10, 264  ;;  %708 = vbcast.lane.b32.xlu0 %v706_v10, 256  ;;  %v915_v10 = vrot.slane %v4319_v52, %v4240_v32  ;;  %v3660_v32 = vld [vmem:[#allocation8 + $0x1e0] ss:$8 sps:$4 sm:$0xff]  }
  0xf1   :  { %2591 = vmatpush1.bf16.msra.mxu0 %v3613_v15  ;;  %v3662_v15 = vld [vmem:[#allocation8 + $0x1e4] ss:$8 sps:$4 sm:$0xff]  }
  0xf2   :  { %2601 = vmatprep.subr.bf16.mxu0 %v3620_v16  ;;  %v1091_v16 = vrot.slane %v4319_v52, %v4252_v40  ;;  %v3663_v40 = vld [vmem:[#allocation8 + $0x1f0] ss:$8 sps:$4 sm:$0xff]  }
  0xf3   :  { %877 = vbcast.lane.b32.xlu1 %v871_v14, 264  ;;  %873 = vbcast.lane.b32.xlu0 %v871_v14, 256  ;;  %v3657_v14 = vld [vmem:[#allocation8 + $0x1d0] ss:$8 sps:$4 sm:$0xff]  }
  0xf4   :  { %2593 = vmatmul.mubr.bf16.vlgmr.msra.gmra.mrb[16].mxu0 %v3266_v21 }
  0xf5   :  { %2602 = vmatpush1.bf16.msra.mxu0 %v3618_v19  ;;  %2633 = vmatprep.mubr.bf16.mxu0 %v3269_v24 }
  0xf6   :  { %2603 = vmatprep.subr.bf16.mxu0 %v3623_v23  ;;  %v3665_v23 = vld [vmem:[#allocation8 + $0x1f4] ss:$8 sps:$4 sm:$0xff]  }
  0xf7   :  { %1053 = vbcast.lane.b32.xlu1 %v1047_v18, 264  ;;  %1049 = vbcast.lane.b32.xlu0 %v1047_v18, 256  ;;  %v4342_v18 = vsub.s32 4, %v4187_v1 }
  0xf9   :  { %2604 = vmatpush1.bf16.msra.mxu0 %v3621_v26  ;;  %v1190_v24 = vrot.slane %v4194_v6, %v4342_v18 }
  0xfa   :  { %2605 = vmatprep.subr.bf16.mxu0 %v3626_v27  ;;  %v1201_v27 = vrot.slane %v4192_v5, %v4342_v18 }
  0xfb   :  { %547 = vbcast.lane.b32.xlu1 %v541_v25, 264  ;;  %543 = vbcast.lane.b32.xlu0 %v541_v25, 256 }
  0xfd   :  { %2606 = vmatpush1.bf16.msra.mxu0 %v3624_v29  ;;  %v3268_v29 = vcombine.low %v4291_v17, %v4291_v17 }
  0xfe   :  { %2607 = vmatprep.subr.bf16.mxu0 %v3629_v30 }
  0xff   :  { %723 = vbcast.lane.b32.xlu1 %v717_v28, 264  ;;  %719 = vbcast.lane.b32.xlu0 %v717_v28, 256  ;;  %v4357_v28 = vsub.s32 5, %v4187_v1 }
 0x101   :  { %2608 = vmatpush1.bf16.msra.mxu0 %v3627_v34  ;;  %v1366_v34 = vrot.slane %v4194_v6, %v4357_v28  ;;  %v1377_v17 = vrot.slane %v4192_v5, %v4357_v28 }
 0x102   :  { %2609 = vmatprep.subr.bf16.mxu0 %v3632_v35 }
 0x103   :  { %888 = vbcast.lane.b32.xlu1 %v882_v31, 264  ;;  %884 = vbcast.lane.b32.xlu0 %v882_v31, 256 }
 0x105   :  { %2610 = vmatpush1.bf16.msra.mxu0 %v3630_v38  ;;  %v3669_v38 = vld [vmem:[#allocation7 + $0x8] sm:$0xff]  }
 0x106   :  { %2611 = vmatprep.subr.bf16.mxu0 %v3635_v39  ;;  %3474 = vmatprep.subr.bf16.mxu1 %v3669_v38 }
 0x107   :  { %1064 = vbcast.lane.b32.xlu1 %v1058_v36, 264  ;;  %1060 = vbcast.lane.b32.xlu0 %v1058_v36, 256 }
 0x108   :  { %3475 = vmatpush3.bf16.msra.mxu1 %v3669_v38 }
 0x109   :  { %2612 = vmatpush1.bf16.msra.mxu0 %v3633_v42  ;;  %v1212_v42 = vrot.slane %v4222_v22, %v4342_v18 }
 0x10a   :  { %2613 = vmatprep.subr.bf16.mxu0 %v3638_v43 }
 0x10b   :  { %558 = vbcast.lane.b32.xlu1 %v552_v41, 264  ;;  %554 = vbcast.lane.b32.xlu0 %v552_v41, 256 }
 0x10d   :  { %2614 = vmatpush1.bf16.msra.mxu0 %v3636_v45  ;;  %v1388_v45 = vrot.slane %v4222_v22, %v4357_v28 }
 0x10e   :  { %2615 = vmatprep.subr.bf16.mxu0 %v3641_v46  ;;  %v4386_v46 = vsub.s32 6, %v4187_v1 }
 0x10f   :  { %734 = vbcast.lane.b32.xlu1 %v728_v44, 264  ;;  %730 = vbcast.lane.b32.xlu0 %v728_v44, 256 }
 0x111   :  { %2616 = vmatpush1.bf16.msra.mxu0 %v3639_v48 }
 0x112   :  { %2617 = vmatprep.subr.bf16.mxu0 %v3644_v49  ;;  %v1542_v49 = vrot.slane %v4194_v6, %v4386_v46 }
 0x113   :  { %899 = vbcast.lane.b32.xlu1 %v893_v47, 264  ;;  %895 = vbcast.lane.b32.xlu0 %v893_v47, 256 }
 0x115   :  { %2618 = vmatpush1.bf16.msra.mxu0 %v3642_v53 }
 0x116   :  { %2619 = vmatprep.subr.bf16.mxu0 %v3647_v54  ;;  %v1553_v54 = vrot.slane %v4192_v5, %v4386_v46 }
 0x117   :  { %1075 = vbcast.lane.b32.xlu1 %v1069_v51, 264  ;;  %1071 = vbcast.lane.b32.xlu0 %v1069_v51, 256 }
 0x119   :  { %2620 = vmatpush1.bf16.msra.mxu0 %v3645_v56 }
 0x11a   :  { %2621 = vmatprep.subr.bf16.mxu0 %v3650_v57 }
 0x11b   :  { %569 = vbcast.lane.b32.xlu1 %v563_v55, 264  ;;  %565 = vbcast.lane.b32.xlu0 %v563_v55, 256  ;;  %v4401_v55 = vsub.s32 7, %v4187_v1 }
 0x11d   :  { %2622 = vmatpush1.bf16.msra.mxu0 %v3648_v59 }
 0x11e   :  { %2623 = vmatprep.subr.bf16.mxu0 %v3653_v60 }
 0x11f   :  { %745 = vbcast.lane.b32.xlu1 %v739_v58, 264  ;;  %741 = vbcast.lane.b32.xlu0 %v739_v58, 256  ;;  %v1718_v58 = vrot.slane %v4194_v6, %v4401_v55 }
 0x121   :  { %2624 = vmatpush1.bf16.msra.mxu0 %v3651_v62 }
 0x122   :  { %2625 = vmatprep.subr.bf16.mxu0 %v3656_v63  ;;  %v1223_v63 = vrot.slane %v4270_v50, %v4342_v18 }
 0x123   :  { %910 = vbcast.lane.b32.xlu1 %v904_v61, 264  ;;  %906 = vbcast.lane.b32.xlu0 %v904_v61, 256  ;;  %v1729_v61 = vrot.slane %v4192_v5, %v4401_v55 }
 0x125   :  { %v4329_v4 = vpop.permute.xlu1 %499  ;;  %v4331_v7 = vpop.permute.xlu0 %488  ;;  %2626 = vmatpush1.bf16.msra.mxu0 %v3654_v8  ;;  %v1399_v8 = vrot.slane %v4270_v50, %v4357_v28 }
 0x126   :  { %2627 = vmatprep.subr.bf16.mxu0 %v3659_v9 }
 0x127   :  { %1086 = vbcast.lane.b32.xlu1 %v1080_v0, 264  ;;  %1082 = vbcast.lane.b32.xlu0 %v1080_v0, 256 }
 0x129   :  { %v4335_v11 = vpop.permute.xlu1 %503  ;;  %v4337_v12 = vpop.permute.xlu0 %492  ;;  %2628 = vmatpush1.bf16.msra.mxu0 %v3657_v14 }
 0x12a   :  { %2629 = vmatprep.subr.bf16.mxu0 %v3662_v15 }
 0x12b   :  { %921 = vbcast.lane.b32.xlu1 %v915_v10, 264  ;;  %917 = vbcast.lane.b32.xlu0 %v915_v10, 256  ;;  %v1564_v10 = vrot.slane %v4222_v22, %v4386_v46 }
 0x12d   :  { %v4344_v19 = vpop.permute.xlu1 %668  ;;  %v4346_v21 = vpop.permute.xlu0 %664  ;;  %2630 = vmatpush1.bf16.msra.mxu0 %v3660_v32 }
 0x12e   :  { %2631 = vmatprep.subr.bf16.mxu0 %v3665_v23 }
 0x12f   :  { %1097 = vbcast.lane.b32.xlu1 %v1091_v16, 264  ;;  %1093 = vbcast.lane.b32.xlu0 %v1091_v16, 256  ;;  %v1740_v16 = vrot.slane %v4222_v22, %v4401_v55 }
 0x131   :  { %v4350_v25 = vpop.permute.xlu1 %679  ;;  %v4352_v26 = vpop.permute.xlu0 %675  ;;  %2632 = vmatpush1.bf16.msra.mxu0 %v3663_v40 }
 0x133   :  { %1196 = vbcast.lane.b32.xlu1 %v1190_v24, 264  ;;  %1192 = vbcast.lane.b32.xlu0 %v1190_v24, 256  ;;  %v1234_v24 = vrot.slane %v4280_v2, %v4342_v18 }
 0x134   :  { %2634 = vmatmul.mubr.bf16.vlgmr.msra.gmra.mrb[16].mxu0 %v3268_v29  ;;  %v1410_v29 = vrot.slane %v4280_v2, %v4357_v28 }
 0x135   :  { %v4361_v30 = vpop.permute.xlu1 %514  ;;  %v4363_v31 = vpop.permute.xlu0 %510 }
 0x137   :  { %1207 = vbcast.lane.b32.xlu1 %v1201_v27, 264  ;;  %1203 = vbcast.lane.b32.xlu0 %v1201_v27, 256 }
 0x139   :  { %v4367_v35 = vpop.permute.xlu1 %690  ;;  %v4369_v36 = vpop.permute.xlu0 %686 }
 0x13b   :  { %1372 = vbcast.lane.b32.xlu1 %v1366_v34, 264  ;;  %1368 = vbcast.lane.b32.xlu0 %v1366_v34, 256  ;;  %v1575_v34 = vrot.slane %v4270_v50, %v4386_v46 }
 0x13d   :  { %v4373_v39 = vpop.permute.xlu1 %844  ;;  %v4375_v41 = vpop.permute.xlu0 %840 }
 0x13f   :  { %1383 = vbcast.lane.b32.xlu1 %v1377_v17, 264  ;;  %1379 = vbcast.lane.b32.xlu0 %v1377_v17, 256 }
 0x141   :  { %v4379_v43 = vpop.permute.xlu1 %855  ;;  %v4381_v44 = vpop.permute.xlu0 %851 }
 0x143   :  { %1218 = vbcast.lane.b32.xlu1 %v1212_v42, 264  ;;  %1214 = vbcast.lane.b32.xlu0 %v1212_v42, 256  ;;  %v1751_v42 = vrot.slane %v4270_v50, %v4401_v55 }
 0x145   :  { %v4388_v47 = vpop.permute.xlu1 %1020  ;;  %v4390_v48 = vpop.permute.xlu0 %1016 }
 0x146   :  { %5488 = vst [vmem:[#allocation26_spill] sm:$0xff] %v4388_v47 }
 0x147   :  { %1394 = vbcast.lane.b32.xlu1 %v1388_v45, 264  ;;  %1390 = vbcast.lane.b32.xlu0 %v1388_v45, 256 }
 0x149   :  { %v4394_v51 = vpop.permute.xlu1 %1031  ;;  %v4396_v53 = vpop.permute.xlu0 %1027 }
 0x14a   :  { %5489 = vst [vmem:[#allocation27_spill] sm:$0xff] %v4394_v51 }
 0x14b   :  { %1548 = vbcast.lane.b32.xlu1 %v1542_v49, 264  ;;  %1544 = vbcast.lane.b32.xlu0 %v1542_v49, 256 }
 0x14d   :  { %v4403_v56 = vpop.permute.xlu1 %525  ;;  %v4405_v57 = vpop.permute.xlu0 %521 }
 0x14f   :  { %1559 = vbcast.lane.b32.xlu1 %v1553_v54, 264  ;;  %1555 = vbcast.lane.b32.xlu0 %v1553_v54, 256  ;;  %v1245_v54 = vrot.slane %v4295_v20, %v4342_v18 }
 0x151   :  { %v4409_v59 = vpop.permute.xlu1 %701  ;;  %v4411_v60 = vpop.permute.xlu0 %697 }
 0x153   :  { %1724 = vbcast.lane.b32.xlu1 %v1718_v58, 264  ;;  %1720 = vbcast.lane.b32.xlu0 %v1718_v58, 256 }
 0x155   :  { %v4415_v1 = vpop.permute.xlu1 %866  ;;  %v4417_v62 = vpop.permute.xlu0 %862 }
 0x157   :  { %1735 = vbcast.lane.b32.xlu1 %v1729_v61, 264  ;;  %1731 = vbcast.lane.b32.xlu0 %v1729_v61, 256 }
 0x159   :  { %v4421_v0 = vpop.permute.xlu1 %1042  ;;  %v4423_v6 = vpop.permute.xlu0 %1038 }
 0x15a   :  { %5490 = vst [vmem:[#allocation28_spill] sm:$0xff] %v4421_v0  ;;  %5491 = vst [vmem:[#allocation29_spill] sm:$0xff] %v4423_v6 }
 0x15b   :  { %1229 = vbcast.lane.b32.xlu1 %v1223_v63, 264  ;;  %1225 = vbcast.lane.b32.xlu0 %v1223_v63, 256  ;;  %v1421_v63 = vrot.slane %v4295_v20, %v4357_v28 }
 0x15d   :  { %v4427_v9 = vpop.permute.xlu1 %536  ;;  %v4429_v5 = vpop.permute.xlu0 %532 }
 0x15f   :  { %1405 = vbcast.lane.b32.xlu1 %v1399_v8, 264  ;;  %1401 = vbcast.lane.b32.xlu0 %v1399_v8, 256 }
 0x161   :  { %v4433_v14 = vpop.permute.xlu1 %712  ;;  %v4435_v15 = vpop.permute.xlu0 %708 }
 0x163   :  { %1570 = vbcast.lane.b32.xlu1 %v1564_v10, 264  ;;  %1566 = vbcast.lane.b32.xlu0 %v1564_v10, 256  ;;  %v1586_v10 = vrot.slane %v4280_v2, %v4386_v46 }
 0x165   :  { %v4439_v32 = vpop.permute.xlu1 %877  ;;  %v4441_v23 = vpop.permute.xlu0 %873 }
 0x167   :  { %1746 = vbcast.lane.b32.xlu1 %v1740_v16, 264  ;;  %1742 = vbcast.lane.b32.xlu0 %v1740_v16, 256 }
 0x169   :  { %v4445_v40 = vpop.permute.xlu1 %1053  ;;  %v4447_v27 = vpop.permute.xlu0 %1049 }
 0x16a   :  { %5492 = vst [vmem:[#allocation30_spill] sm:$0xff] %v4445_v40  ;;  %5493 = vst [vmem:[#allocation31_spill] sm:$0xff] %v4447_v27 }
 0x16b   :  { %1240 = vbcast.lane.b32.xlu1 %v1234_v24, 264  ;;  %1236 = vbcast.lane.b32.xlu0 %v1234_v24, 256 }
 0x16d   :  { %v4451_v33 = vpop.permute.xlu1 %547  ;;  %v4453_v22 = vpop.permute.xlu0 %543 }
 0x16f   :  { %1416 = vbcast.lane.b32.xlu1 %v1410_v29, 264  ;;  %1412 = vbcast.lane.b32.xlu0 %v1410_v29, 256  ;;  %v1762_v29 = vrot.slane %v4280_v2, %v4401_v55  ;;  %v1597_v2 = vrot.slane %v4295_v20, %v4386_v46 }
 0x171   :  { %v4457_v38 = vpop.permute.xlu1 %723  ;;  %v4459_v17 = vpop.permute.xlu0 %719 }
 0x173   :  { %1581 = vbcast.lane.b32.xlu1 %v1575_v34, 264  ;;  %1577 = vbcast.lane.b32.xlu0 %v1575_v34, 256 }
 0x175   :  { %v4463_v45 = vpop.permute.xlu1 %888  ;;  %v4465_v49 = vpop.permute.xlu0 %884 }
 0x176   :  { %5494 = vst [vmem:[#allocation32_spill] sm:$0xff] %v4463_v45 }
 0x177   :  { %1757 = vbcast.lane.b32.xlu1 %v1751_v42, 264  ;;  %1753 = vbcast.lane.b32.xlu0 %v1751_v42, 256 }
 0x179   :  { %v4469_v58 = vpop.permute.xlu1 %1064  ;;  %v4471_v61 = vpop.permute.xlu0 %1060 }
 0x17a   :  { %5495 = vst [vmem:[#allocation33_spill] sm:$0xff] %v4469_v58  ;;  %5496 = vst [vmem:[#allocation34_spill] sm:$0xff] %v4471_v61  ;;  %v1773_v58 = vrot.slane %v4295_v20, %v4401_v55 }
 0x17b   :  { %1251 = vbcast.lane.b32.xlu1 %v1245_v54, 264  ;;  %1247 = vbcast.lane.b32.xlu0 %v1245_v54, 256  ;;  %v1256_v54 = vrot.slane %v4309_v37, %v4342_v18 }
 0x17d   :  { %v4475_v8 = vpop.permute.xlu1 %558  ;;  %v4477_v50 = vpop.permute.xlu0 %554 }
 0x17f   :  { %1427 = vbcast.lane.b32.xlu1 %v1421_v63, 264  ;;  %1423 = vbcast.lane.b32.xlu0 %v1421_v63, 256 }
 0x181   :  { %v4481_v16 = vpop.permute.xlu1 %734  ;;  %v4483_v24 = vpop.permute.xlu0 %730 }
 0x183   :  { %1592 = vbcast.lane.b32.xlu1 %v1586_v10, 264  ;;  %1588 = vbcast.lane.b32.xlu0 %v1586_v10, 256  ;;  %v1432_v10 = vrot.slane %v4309_v37, %v4357_v28 }
 0x185   :  { %v4487_v34 = vpop.permute.xlu1 %899  ;;  %v4489_v42 = vpop.permute.xlu0 %895 }
 0x186   :  { %5497 = vst [vmem:[#allocation35_spill] sm:$0xff] %v4487_v34  ;;  %5498 = vst [vmem:[#allocation36_spill] sm:$0xff] %v4489_v42 }
 0x187   :  { %1768 = vbcast.lane.b32.xlu1 %v1762_v29, 264  ;;  %1764 = vbcast.lane.b32.xlu0 %v1762_v29, 256  ;;  %v3458_v13 = vpop.f32.mrb[0].mxu0 }
 0x188   :  { %v4503_v29 = vmax.f32 %v3458_v13, 0.0  ;;  %v307_v61 = vpop.f32.mrb[1].mxu0  ;;  %v4525_v13 = vrot.slane %v4309_v37, %v4401_v55 }
 0x189   :  { %v4493_v63 = vpop.permute.xlu1 %1075  ;;  %v4495_v3 = vpop.permute.xlu0 %1071  ;;  %v4521_v20 = vmax.f32 %v307_v61, 0.0 }
 0x18a   :  { %5499 = vst [vmem:[#allocation37_spill] sm:$0xff] %v4493_v63  ;;  %5500 = vst [vmem:[#allocation38_spill] sm:$0xff] %v4495_v3  ;;  %v4507_v63 = vrot.slane %v4319_v52, %v4342_v18  ;;  %v4515_v3 = vrot.slane %v4309_v37, %v4386_v46  ;;  %v4529_v18 = vrot.slane %v4319_v52, %v4386_v46  ;;  %v3459_v0 = vpop.f32.mrb[2].mxu0 }
 0x18b   :  { %1262 = vbcast.lane.b32.xlu1 %v1256_v54, 264  ;;  %1258 = vbcast.lane.b32.xlu0 %v1256_v54, 256  ;;  %v4511_v54 = vrot.slane %v4319_v52, %v4357_v28  ;;  %v4533_v28 = vrot.slane %v4319_v52, %v4401_v55  ;;  %v573_v6 = vmul.f32 %v4329_v4, %v4503_v29  ;;  %v4545_v46 = vmax.f32 %v3459_v0, 0.0  ;;  %v310_v52 = vpop.f32.mrb[3].mxu0 }
 0x18c   :  { %v749_v61 = vmul.f32 %v4352_v26, %v4503_v29  ;;  %v925_v51 = vmul.f32 %v4381_v44, %v4503_v29  ;;  %v4543_v37 = vmul.f32 %v4396_v53, %v4503_v29  ;;  %v571_v55 = vmul.f32 %v4331_v7, %v4521_v20 }
 0x18d   :  { %v4517_v40 = vpop.permute.xlu1 %569  ;;  %v4519_v27 = vpop.permute.xlu0 %565  ;;  %v747_v4 = vmul.f32 %v4346_v21, %v4521_v20  ;;  %v923_v26 = vmul.f32 %v4375_v41, %v4521_v20  ;;  %v4553_v47 = vmax.f32 %v310_v52, 0.0  ;;  %v596_v44 = vsel %vm248_vm0, %v573_v6, 0.0 }
 0x18e   :  { %5501 = vst [vmem:[#allocation39_spill] sm:$0xff] %v4543_v37  ;;  %v772_v53 = vsel %vm248_vm0, %v749_v61, 0.0  ;;  %v4558_v0 = vsel %vm248_vm0, %v925_v51, 0.0  ;;  %v574_v7 = vmul.f32 %v4335_v11, %v4545_v46  ;;  %v587_v21 = vsel %vm248_vm0, %v571_v55, 0.0 }
 0x18f   :  { %1438 = vbcast.lane.b32.xlu1 %v1432_v10, 264  ;;  %1434 = vbcast.lane.b32.xlu0 %v1432_v10, 256  ;;  %5502 = vst [vmem:[#allocation40_spill] sm:$0xff] %v4558_v0  ;;  %v750_v41 = vmul.f32 %v4350_v25, %v4545_v46  ;;  %v763_v52 = vsel %vm248_vm0, %v747_v4, 0.0  ;;  %v572_v6 = vmul.f32 %v4337_v12, %v4553_v47  ;;  %v3462_v55 = vpop.f32.mrb[4].mxu0  ;;  %v4585_v12 = vsel %vm248_vm0, %v923_v26, 0.0 }
 0x190   :  { %v748_v51 = vmul.f32 %v4344_v19, %v4553_v47  ;;  %v4576_v61 = vmul.f32 %v4373_v39, %v4553_v47  ;;  %v4580_v11 = vmul.f32 %v4379_v43, %v4545_v46  ;;  %v597_v25 = vsel %vm248_vm0, %v574_v7, 0.0  ;;  %5505 = vst [vmem:[#allocation43_spill] sm:$0xff] %v4585_v12  ;;  %v323_v0 = vpop.f32.mrb[5].mxu0 }
 0x191   :  { %v4560_v10 = vpop.permute.xlu1 %745  ;;  %v4562_v37 = vpop.permute.xlu0 %741  ;;  %v773_v4 = vsel %vm248_vm0, %v750_v41, 0.0  ;;  %v4589_v19 = vmul.f32 %v4390_v48, %v4521_v20  ;;  %v4591_v39 = vmax.f32 %v3462_v55, 0.0  ;;  %v588_v43 = vsel %vm248_vm0, %v572_v6, 0.0 }
 0x192   :  { %5503 = vst [vmem:[#allocation41_spill] sm:$0xff] %v4576_v61  ;;  %5504 = vst [vmem:[#allocation42_spill] sm:$0xff] %v4580_v11  ;;  %v598_v11 = vadd.f32 %v597_v25, %v596_v44  ;;  %v4599_v41 = vmax.f32 %v323_v0, 0.0  ;;  %v589_v26 = vadd.f32 %v588_v43, %v587_v21  ;;  %v4601_v34 = vadd.f32 %v773_v4, %v772_v53  ;;  %v3463_v48 = vpop.f32.mrb[6].mxu0 }
 0x193   :  { %1603 = vbcast.lane.b32.xlu1 %v1597_v2, 264  ;;  %1599 = vbcast.lane.b32.xlu0 %v1597_v2, 256  ;;  %5506 = vst [vmem:[#allocation44_spill] sm:$0xff] %v4589_v19  ;;  %5507 = vst [vmem:[#allocation45_spill] sm:$0xff] %v4591_v39  ;;  %v764_v2 = vsel %vm248_vm0, %v748_v51, 0.0  ;;  %v577_v55 = vmul.f32 %v4405_v57, %v4591_v39  ;;  %v4607_v44 = vmul.f32 %v4411_v60, %v4591_v39  ;;  %v326_v0 = vpop.f32.mrb[7].mxu0 }
 0x194   :  { %v765_v12 = vadd.f32 %v764_v2, %v763_v52  ;;  %v599_v19 = vrot.slane %v598_v11, 4  ;;  %v4611_v6 = vmul.f32 %v4441_v23, %v4591_v39  ;;  %v4613_v51 = vmax.f32 %v3463_v48, 0.0 }
 0x195   :  { %v4595_v61 = vpop.permute.xlu1 %910  ;;  %v4597_v7 = vpop.permute.xlu0 %906  ;;  %v575_v53 = vmul.f32 %v4363_v31, %v4599_v41  ;;  %v590_v21 = vrot.slane %v589_v26, 4  ;;  %v4619_v57 = vmul.f32 %v4369_v36, %v4599_v41  ;;  %v4621_v52 = vmax.f32 %v326_v0, 0.0 }
 0x196   :  { %5508 = vst [vmem:[#allocation46_spill] sm:$0xff] %v4595_v61  ;;  %5509 = vst [vmem:[#allocation47_spill] sm:$0xff] %v4597_v7  ;;  %v600_v60 = vadd.f32 %v599_v19, %v598_v11  ;;  %v614_v25 = vsel %vm248_vm0, %v577_v55, 0.0  ;;  %v766_v23 = vrot.slane %v765_v12, 4  ;;  %v4633_v36 = vmul.f32 %v4409_v59, %v4613_v51 }
 0x197   :  { %5510 = vst [vmem:[#allocation48_spill] sm:$0xff] %v4611_v6  ;;  %1779 = vbcast.lane.b32.xlu1 %v1773_v58, 264  ;;  %1775 = vbcast.lane.b32.xlu0 %v1773_v58, 256  ;;  %v578_v58 = vmul.f32 %v4403_v56, %v4613_v51  ;;  %v591_v2 = vadd.f32 %v590_v21, %v589_v26  ;;  %v605_v31 = vsel %vm248_vm0, %v575_v53, 0.0  ;;  %v3466_v56 = vpop.f32.mrb[8].mxu0 }
 0x198   :  { %v576_v11 = vmul.f32 %v4361_v30, %v4621_v52  ;;  %v601_v19 = vrot.slane %v600_v60, 2  ;;  %v4639_v48 = vmul.f32 %v4367_v35, %v4621_v52  ;;  %v767_v55 = vadd.f32 %v766_v23, %v765_v12  ;;  %v339_v21 = vpop.f32.mrb[9].mxu0 }
 0x199   :  { %v4624_v4 = vpop.permute.xlu1 %1086  ;;  %v4626_v43 = vpop.permute.xlu0 %1082  ;;  %v592_v26 = vrot.slane %v591_v2, 2  ;;  %v615_v0 = vsel %vm248_vm0, %v578_v58, 0.0  ;;  %v4647_v53 = vmul.f32 %v4417_v62, %v4599_v41  ;;  %v4649_v30 = vmax.f32 %v3466_v56, 0.0 }
 0x19a   :  { %5511 = vst [vmem:[#allocation49_spill] sm:$0xff] %v4624_v4  ;;  %5512 = vst [vmem:[#allocation50_spill] sm:$0xff] %v4626_v43  ;;  %v602_v35 = vadd.f32 %v601_v19, %v600_v60  ;;  %v606_v12 = vsel %vm248_vm0, %v576_v11, 0.0  ;;  %v616_v23 = vadd.f32 %v615_v0, %v614_v25  ;;  %v4656_v43 = vmax.f32 %v339_v21, 0.0  ;;  %v3467_v6 = vpop.f32.mrb[10].mxu0 }
 0x19b   :  { %1273 = vbcast.lane.b32.xlu1 %v4507_v63, 264  ;;  %1269 = vbcast.lane.b32.xlu0 %v4507_v63, 256  ;;  %5513 = vst [vmem:[#allocation51_spill] sm:$0xff] %v4647_v53  ;;  %5514 = vst [vmem:[#allocation52_spill] sm:$0xff] %v4649_v30  ;;  %v593_v58 = vadd.f32 %v592_v26, %v591_v2  ;;  %v607_v39 = vadd.f32 %v606_v12, %v605_v31  ;;  %v768_v59 = vrot.slane %v767_v55, 2  ;;  %v342_v11 = vpop.f32.mrb[11].mxu0 }
 0x19c   :  { %5517 = vst [vmem:[#allocation55_spill] sm:$0xff] %v4656_v43  ;;  %v581_v62 = vmul.f32 %v4453_v22, %v4649_v30  ;;  %v603_v56 = vrot.slane %v602_v35, 1  ;;  %v617_v53 = vrot.slane %v616_v23, 4  ;;  %v4662_v60 = vmul.f32 %v4459_v17, %v4649_v30 }
 0x19d   :  { %v4652_v4 = vpop.permute.xlu1 %921  ;;  %v4654_v63 = vpop.permute.xlu0 %917  ;;  %v4664_v25 = vmax.f32 %v3467_v6, 0.0  ;;  %v579_v2 = vmul.f32 %v4429_v5, %v4656_v43  ;;  %v594_v31 = vrot.slane %v593_v58, 1  ;;  %v608_v19 = vrot.slane %v607_v39, 4 }
 0x19e   :  { %5515 = vst [vmem:[#allocation53_spill] sm:$0xff] %v4652_v4  ;;  %5516 = vst [vmem:[#allocation54_spill] sm:$0xff] %v4654_v63  ;;  %v4670_v26 = vmax.f32 %v342_v11, 0.0  ;;  %v4672_v22 = vadd.f32 %v603_v56, %v602_v35  ;;  %v618_v0 = vadd.f32 %v617_v53, %v616_v23  ;;  %v632_v17 = vsel %vm248_vm0, %v581_v62, 0.0 }
 0x19f   :  { %5518 = vst [vmem:[#allocation56_spill] sm:$0xff] %v4664_v25  ;;  %1449 = vbcast.lane.b32.xlu1 %v4511_v54, 264  ;;  %1445 = vbcast.lane.b32.xlu0 %v4511_v54, 256  ;;  %v582_v54 = vmul.f32 %v4451_v33, %v4664_v25  ;;  %v4681_v12 = vadd.f32 %v594_v31, %v593_v58  ;;  %v623_v5 = vsel %vm248_vm0, %v579_v2, 0.0  ;;  %v3470_v33 = vpop.f32.mrb[12].mxu0 }
 0x1a0   :  { %5519 = vst [vmem:[#allocation57_spill] sm:$0xff] %v4670_v26  ;;  %v609_v4 = vadd.f32 %v608_v19, %v607_v39  ;;  %v580_v11 = vmul.f32 %v4427_v9, %v4670_v26  ;;  %v619_v35 = vrot.slane %v618_v0, 2  ;;  %v4688_v53 = vmul.f32 %v4435_v15, %v4656_v43  ;;  %v355_v56 = vpop.f32.mrb[13].mxu0 }
 0x1a1   :  { %v4675_v21 = vpop.permute.xlu1 %1097  ;;  %v4677_v6 = vpop.permute.xlu0 %1093  ;;  %v4692_v23 = vmul.f32 %v4433_v14, %v4670_v26  ;;  %v633_v58 = vsel %vm248_vm0, %v582_v54, 0.0  ;;  %v4699_v9 = vmul.f32 %v4457_v38, %v4664_v25  ;;  %v4701_v62 = vadd.f32 %v768_v59, %v767_v55 }
 0x1a2   :  { %5520 = vst [vmem:[#allocation58_spill] sm:$0xff] %v4675_v21  ;;  %5521 = vst [vmem:[#allocation59_spill] sm:$0xff] %v4677_v6  ;;  %v610_v39 = vrot.slane %v609_v4, 2  ;;  %v4703_v15 = vmax.f32 %v3470_v33, 0.0  ;;  %v620_v2 = vadd.f32 %v619_v35, %v618_v0  ;;  %v624_v14 = vsel %vm248_vm0, %v580_v11, 0.0  ;;  %v3471_v59 = vpop.f32.mrb[14].mxu0 }
 0x1a3   :  { %1614 = vbcast.lane.b32.xlu1 %v4515_v3, 264  ;;  %1610 = vbcast.lane.b32.xlu0 %v4515_v3, 256  ;;  %v634_v31 = vadd.f32 %v633_v58, %v632_v17  ;;  %v4706_v3 = vmax.f32 %v355_v56, 0.0  ;;  %v625_v63 = vadd.f32 %v624_v14, %v623_v5  ;;  %v4713_v35 = vmax.f32 %v3471_v59, 0.0  ;;  %v358_v17 = vpop.f32.mrb[15].mxu0 }
 0x1a4   :  { %5522 = vst [vmem:[#allocation60_spill] sm:$0xff] %v4703_v15  ;;  %v611_v6 = vadd.f32 %v610_v39, %v609_v4  ;;  %v585_v33 = vmul.f32 %v4519_v27, %v4703_v15  ;;  %v621_v0 = vrot.slane %v620_v2, 1  ;;  %v4721_v58 = vmax.f32 %v358_v17, 0.0 }
 0x1a5   :  { %v1197_v19 = vpop.permute.xlu1 %1196  ;;  %v1193_v21 = vpop.permute.xlu0 %1192  ;;  %5523 = vst [vmem:[#allocation61_spill] sm:$0xff] %v4706_v3  ;;  %5524 = vst [vmem:[#allocation62_spill] sm:$0xff] %v4713_v35  ;;  %v583_v4 = vmul.f32 %v4477_v50, %v4706_v3  ;;  %v626_v11 = vrot.slane %v625_v63, 4 }
 0x1a6   :  { %v1276_v38 = vmul.f32 %v1197_v19, %v4553_v47  ;;  %v1275_v55 = vmul.f32 %v1193_v21, %v4521_v20  ;;  %v612_v5 = vrot.slane %v611_v6, 1  ;;  %5525 = vst [vmem:[#allocation63_spill] sm:$0xff] %v4721_v58  ;;  %v4723_v27 = vadd.f32 %v621_v0, %v620_v2 }
 0x1a7   :  { %1790 = vbcast.lane.b32.xlu1 %v4525_v13, 264  ;;  %1786 = vbcast.lane.b32.xlu0 %v4525_v13, 256  ;;  %v586_v13 = vmul.f32 %v4517_v40, %v4713_v35  ;;  %v627_v54 = vadd.f32 %v626_v11, %v625_v63  ;;  %v641_v0 = vsel %vm248_vm0, %v583_v4, 0.0  ;;  %v650_v40 = vsel %vm248_vm0, %v585_v33, 0.0 }
 0x1a8   :  { %v1292_v39 = vsel %vm248_vm0, %v1276_v38, 0.0  ;;  %v1291_v21 = vsel %vm248_vm0, %v1275_v55, 0.0  ;;  %v4727_v59 = vadd.f32 %v612_v5, %v611_v6  ;;  %v584_v38 = vmul.f32 %v4475_v8, %v4721_v58 }
 0x1a9   :  { %v1293_v56 = vadd.f32 %v1292_v39, %v1291_v21  ;;  %v1208_v14 = vpop.permute.xlu1 %1207  ;;  %v1204_v19 = vpop.permute.xlu0 %1203  ;;  %v635_v55 = vrot.slane %v634_v31, 4  ;;  %v628_v2 = vrot.slane %v627_v54, 2  ;;  %v651_v33 = vsel %vm248_vm0, %v586_v13, 0.0 }
 0x1aa   :  { %v1278_v50 = vmul.f32 %v1208_v14, %v4545_v46  ;;  %v1277_v61 = vmul.f32 %v1204_v19, %v4503_v29  ;;  %v642_v11 = vsel %vm248_vm0, %v584_v38, 0.0 }
 0x1ab   :  { %v1294_v17 = vrot.slane %v1293_v56, 4  ;;  %1625 = vbcast.lane.b32.xlu1 %v4529_v18, 264  ;;  %1621 = vbcast.lane.b32.xlu0 %v4529_v18, 256  ;;  %v636_v5 = vadd.f32 %v635_v55, %v634_v31  ;;  %v629_v19 = vadd.f32 %v628_v2, %v627_v54  ;;  %v643_v7 = vadd.f32 %v642_v11, %v641_v0 }
 0x1ac   :  { %v1301_v63 = vsel %vm248_vm0, %v1278_v50, 0.0  ;;  %v1300_v6 = vsel %vm248_vm0, %v1277_v61, 0.0  ;;  %v652_v55 = vadd.f32 %v651_v33, %v650_v40 }
 0x1ad   :  { %v1295_v39 = vadd.f32 %v1294_v17, %v1293_v56  ;;  %v1302_v8 = vadd.f32 %v1301_v63, %v1300_v6  ;;  %v1373_v21 = vpop.permute.xlu1 %1372  ;;  %v1369_v14 = vpop.permute.xlu0 %1368  ;;  %v637_v4 = vrot.slane %v636_v5, 2  ;;  %v630_v61 = vrot.slane %v629_v19, 1 }
 0x1ae   :  { %v1452_v18 = vmul.f32 %v1373_v21, %v4553_v47  ;;  %v1451_v25 = vmul.f32 %v1369_v14, %v4521_v20  ;;  %v644_v31 = vrot.slane %v643_v7, 4 }
 0x1af   :  { %v1296_v42 = vrot.slane %v1295_v39, 2  ;;  %v1303_v50 = vrot.slane %v1302_v8, 4  ;;  %1801 = vbcast.lane.b32.xlu1 %v4533_v28, 264  ;;  %1797 = vbcast.lane.b32.xlu0 %v4533_v28, 256  ;;  %v638_v38 = vadd.f32 %v637_v4, %v636_v5  ;;  %v4747_v13 = vadd.f32 %v630_v61, %v629_v19 }
 0x1b0   :  { %v1468_v56 = vsel %vm248_vm0, %v1452_v18, 0.0  ;;  %v1467_v54 = vsel %vm248_vm0, %v1451_v25, 0.0  ;;  %v645_v14 = vadd.f32 %v644_v31, %v643_v7  ;;  %v653_v25 = vrot.slane %v652_v55, 4 }
 0x1b1   :  { %v1297_v17 = vadd.f32 %v1296_v42, %v1295_v39  ;;  %v1304_v2 = vadd.f32 %v1303_v50, %v1302_v8  ;;  %v1469_v0 = vadd.f32 %v1468_v56, %v1467_v54  ;;  %v1384_v63 = vpop.permute.xlu1 %1383  ;;  %v1380_v6 = vpop.permute.xlu0 %1379  ;;  %v639_v21 = vrot.slane %v638_v38, 1 }
 0x1b2   :  { %v1454_v11 = vmul.f32 %v1384_v63, %v4545_v46  ;;  %v1453_v28 = vmul.f32 %v1380_v6, %v4503_v29  ;;  %v646_v39 = vrot.slane %v645_v14, 2  ;;  %v654_v54 = vadd.f32 %v653_v25, %v652_v55 }
 0x1b3   :  { %v1298_v30 = vrot.slane %v1297_v17, 1  ;;  %v1305_v18 = vrot.slane %v1304_v2, 2  ;;  %v1470_v45 = vrot.slane %v1469_v0, 4  ;;  %v4753_v5 = vadd.f32 %v639_v21, %v638_v38 }
 0x1b4   :  { %v1477_v40 = vsel %vm248_vm0, %v1454_v11, 0.0  ;;  %v1476_v42 = vsel %vm248_vm0, %v1453_v28, 0.0  ;;  %v647_v31 = vadd.f32 %v646_v39, %v645_v14  ;;  %v4759_v38 = vmul.f32 %v4483_v24, %v4706_v3 }
 0x1b5   :  { %v1299_v8 = vadd.f32 %v1298_v30, %v1297_v17  ;;  %v1306_v19 = vadd.f32 %v1305_v18, %v1304_v2  ;;  %v1471_v4 = vadd.f32 %v1470_v45, %v1469_v0  ;;  %v1478_v33 = vadd.f32 %v1477_v40, %v1476_v42  ;;  %v1219_v50 = vpop.permute.xlu1 %1218  ;;  %v1215_v61 = vpop.permute.xlu0 %1214 }
 0x1b6   :  { %v1280_v56 = vmul.f32 %v1219_v50, %v4621_v52  ;;  %v1279_v7 = vmul.f32 %v1215_v61, %v4599_v41  ;;  %v648_v17 = vrot.slane %v647_v31, 1  ;;  %v655_v2 = vrot.slane %v654_v54, 2 }
 0x1b7   :  { %v1307_v63 = vrot.slane %v1306_v19, 1  ;;  %v1472_v6 = vrot.slane %v1471_v4, 2  ;;  %v1479_v11 = vrot.slane %v1478_v33, 4 }
 0x1b8   :  { %v1310_v30 = vsel %vm248_vm0, %v1280_v56, 0.0  ;;  %v1309_v45 = vsel %vm248_vm0, %v1279_v7, 0.0  ;;  %v4765_v42 = vadd.f32 %v648_v17, %v647_v31  ;;  %v656_v24 = vadd.f32 %v655_v2, %v654_v54 }
 0x1b9   :  { %v1308_v0 = vadd.f32 %v1307_v63, %v1306_v19  ;;  %v1473_v28 = vadd.f32 %v1472_v6, %v1471_v4  ;;  %v1480_v21 = vadd.f32 %v1479_v11, %v1478_v33  ;;  %v1311_v18 = vadd.f32 %v1310_v30, %v1309_v45  ;;  %v1395_v40 = vpop.permute.xlu1 %1394  ;;  %v1391_v14 = vpop.permute.xlu0 %1390 }
 0x1ba   :  { %v1456_v55 = vmul.f32 %v1395_v40, %v4621_v52  ;;  %v1455_v25 = vmul.f32 %v1391_v14, %v4599_v41  ;;  %v657_v4 = vrot.slane %v656_v24, 1  ;;  %v4772_v33 = vmul.f32 %v4481_v16, %v4721_v58 }
 0x1bb   :  { %v1970_v39 = vsel %vm1899_vm1, %v1308_v0, %v1299_v8  ;;  %v1474_v50 = vrot.slane %v1473_v28, 1  ;;  %v1481_v61 = vrot.slane %v1480_v21, 2  ;;  %v1312_v56 = vrot.slane %v1311_v18, 4 }
 0x1bc   :  { %v1486_v7 = vsel %vm248_vm0, %v1456_v55, 0.0  ;;  %v1485_v19 = vsel %vm248_vm0, %v1455_v25, 0.0  ;;  %v4776_v17 = vadd.f32 %v657_v4, %v656_v24  ;;  %v4780_v2 = vmul.f32 %v4562_v37, %v4703_v15 }
 0x1bd   :  { %v1475_v63 = vadd.f32 %v1474_v50, %v1473_v28  ;;  %v1482_v6 = vadd.f32 %v1481_v61, %v1480_v21  ;;  %v1313_v11 = vadd.f32 %v1312_v56, %v1311_v18  ;;  %v1487_v31 = vadd.f32 %v1486_v7, %v1485_v19  ;;  %v1549_v30 = vpop.permute.xlu1 %1548  ;;  %v1545_v54 = vpop.permute.xlu0 %1544 }
 0x1be   :  { %v1628_v8 = vmul.f32 %v1549_v30, %v4553_v47  ;;  %v1627_v45 = vmul.f32 %v1545_v54, %v4521_v20  ;;  %v4784_v28 = vmul.f32 %v4560_v10, %v4713_v35  ;;  %v5526_v14 = vrot.slane %v4701_v62, 1 }
 0x1bf   :  { %v1483_v0 = vrot.slane %v1482_v6, 1  ;;  %v1314_v16 = vrot.slane %v1313_v11, 2  ;;  %v1488_v40 = vrot.slane %v1487_v31, 4  ;;  %v5527_v37 = vrot.slane %v4601_v34, 4 }
 0x1c0   :  { %v1644_v21 = vsel %vm248_vm0, %v1628_v8, 0.0  ;;  %v1643_v18 = vsel %vm248_vm0, %v1627_v45, 0.0  ;;  %v4791_v55 = vadd.f32 %v5526_v14, %v4701_v62  ;;  %v781_v4 = vsel %vm248_vm0, %v4619_v57, 0.0 }
 0x1c1   :  { %v776_v25 = vadd.f32 %v5527_v37, %v4601_v34  ;;  %v1484_v24 = vadd.f32 %v1483_v0, %v1482_v6  ;;  %v1315_v50 = vadd.f32 %v1314_v16, %v1313_v11  ;;  %v1489_v61 = vadd.f32 %v1488_v40, %v1487_v31  ;;  %v4796_v7 = vpop.permute.xlu1 %1559  ;;  %v4798_v10 = vpop.permute.xlu0 %1555 }
 0x1c2   :  { %v1645_v56 = vadd.f32 %v1644_v21, %v1643_v18  ;;  %v782_v62 = vsel %vm248_vm0, %v4639_v48, 0.0  ;;  %v790_v30 = vsel %vm248_vm0, %v4607_v44, 0.0  ;;  %v791_v45 = vsel %vm248_vm0, %v4633_v36, 0.0 }
 0x1c3   :  { %v777_v19 = vrot.slane %v776_v25, 2  ;;  %v1986_v34 = vsel %vm1899_vm1, %v1484_v24, %v1475_v63  ;;  %v1316_v6 = vrot.slane %v1315_v50, 1  ;;  %v1490_v11 = vrot.slane %v1489_v61, 2 }
 0x1c4   :  { %v1646_v31 = vrot.slane %v1645_v56, 4  ;;  %v783_v8 = vadd.f32 %v782_v62, %v781_v4  ;;  %v799_v0 = vsel %vm248_vm0, %v4688_v53, 0.0  ;;  %v792_v48 = vadd.f32 %v791_v45, %v790_v30 }
 0x1c5   :  { %v778_v54 = vadd.f32 %v777_v19, %v776_v25  ;;  %v1317_v57 = vadd.f32 %v1316_v6, %v1315_v50  ;;  %v1491_v16 = vadd.f32 %v1490_v11, %v1489_v61  ;;  %v4811_v21 = vpop.permute.xlu1 %1724  ;;  %v4813_v44 = vpop.permute.xlu0 %1720  ;;  %v800_v14 = vsel %vm248_vm0, %v4692_v23, 0.0 }
 0x1c6   :  { %v1647_v40 = vadd.f32 %v1646_v31, %v1645_v56  ;;  %v784_v18 = vrot.slane %v783_v8, 4  ;;  %v808_v37 = vsel %vm248_vm0, %v4662_v60, 0.0  ;;  %v793_v24 = vrot.slane %v792_v48, 4 }
 0x1c7   :  { %v779_v63 = vrot.slane %v778_v54, 1  ;;  %v4820_v36 = vsel %vm1901_vm2, %v1317_v57, %v1970_v39  ;;  %v1492_v53 = vrot.slane %v1491_v16, 1  ;;  %v801_v56 = vadd.f32 %v800_v14, %v799_v0 }
 0x1c8   :  { %5528 = vst [vmem:[#allocation64_spill] sm:$0xff] %v4820_v36  ;;  %v1648_v25 = vrot.slane %v1647_v40, 2  ;;  %v785_v61 = vadd.f32 %v784_v18, %v783_v8  ;;  %v809_v19 = vsel %vm248_vm0, %v4699_v9, 0.0  ;;  %v794_v23 = vadd.f32 %v793_v24, %v792_v48 }
 0x1c9   :  { %v780_v50 = vadd.f32 %v779_v63, %v778_v54  ;;  %v1493_v4 = vadd.f32 %v1492_v53, %v1491_v16  ;;  %v810_v30 = vadd.f32 %v809_v19, %v808_v37  ;;  %v4824_v60 = vpop.permute.xlu1 %1735  ;;  %v4826_v39 = vpop.permute.xlu0 %1731  ;;  %v802_v11 = vrot.slane %v801_v56, 4 }
 0x1ca   :  { %v1649_v62 = vadd.f32 %v1648_v25, %v1647_v40  ;;  %v786_v6 = vrot.slane %v785_v61, 2  ;;  %v817_v31 = vsel %vm248_vm0, %v4759_v38, 0.0  ;;  %v818_v54 = vsel %vm248_vm0, %v4772_v33, 0.0 }
 0x1cb   :  { %v4833_v9 = vsel %vm1901_vm2, %v1493_v4, %v1986_v34  ;;  %v795_v45 = vrot.slane %v794_v23, 2  ;;  %v811_v0 = vrot.slane %v810_v30, 4  ;;  %v803_v16 = vadd.f32 %v802_v11, %v801_v56 }
 0x1cc   :  { %5529 = vst [vmem:[#allocation65_spill] sm:$0xff] %v4833_v9  ;;  %v1650_v8 = vrot.slane %v1649_v62, 1  ;;  %v787_v57 = vadd.f32 %v786_v6, %v785_v61  ;;  %v819_v40 = vadd.f32 %v818_v54, %v817_v31  ;;  %v826_v48 = vsel %vm248_vm0, %v4780_v2, 0.0 }
 0x1cd   :  { %v796_v38 = vadd.f32 %v795_v45, %v794_v23  ;;  %v812_v18 = vadd.f32 %v811_v0, %v810_v30  ;;  %v827_v33 = vsel %vm248_vm0, %v4784_v28, 0.0  ;;  %v4841_v14 = vpop.permute.xlu1 %1229  ;;  %v4843_v34 = vpop.permute.xlu0 %1225  ;;  %v804_v53 = vrot.slane %v803_v16, 2 }
 0x1ce   :  { %v4837_v63 = vadd.f32 %v1650_v8, %v1649_v62  ;;  %v788_v37 = vrot.slane %v787_v57, 1  ;;  %v820_v25 = vrot.slane %v819_v40, 4  ;;  %v828_v24 = vadd.f32 %v827_v33, %v826_v48 }
 0x1cf   :  { %v797_v61 = vrot.slane %v796_v38, 1  ;;  %v813_v56 = vrot.slane %v812_v18, 2  ;;  %v1900_v2 = vsel %vm1899_vm1, %v4672_v22, %v4681_v12  ;;  %v1922_v19 = vsel %vm1899_vm1, %v780_v50, %v4791_v55 }
 0x1d0   :  { %5530 = vst [vmem:[#allocation66_spill] sm:$0xff] %v4837_v63  ;;  %v789_v4 = vadd.f32 %v788_v37, %v787_v57  ;;  %v805_v62 = vadd.f32 %v804_v53, %v803_v16  ;;  %v821_v28 = vadd.f32 %v820_v25, %v819_v40  ;;  %v829_v23 = vrot.slane %v828_v24, 4 }
 0x1d1   :  { %v798_v30 = vadd.f32 %v797_v61, %v796_v38  ;;  %v814_v6 = vadd.f32 %v813_v56, %v812_v18  ;;  %v1902_v11 = vsel %vm1901_vm2, %v4727_v59, %v1900_v2  ;;  %v928_v31 = vmul.f32 %v4415_v1, %v4621_v52  ;;  %v4854_v54 = vpop.permute.xlu1 %1405  ;;  %v4856_v8 = vpop.permute.xlu0 %1401  ;;  %v3670_v38 = vld [vmem:[#allocation11 + $0x40] sm:$0xff]   ;;  %v5532_v2 = vld [vmem:[#allocation52_spill] sm:$0xff] }
 0x1d2   :  { %v806_v22 = vrot.slane %v805_v62, 1  ;;  %v822_v12 = vrot.slane %v821_v28, 2  ;;  %v830_v45 = vadd.f32 %v829_v23, %v828_v24  ;;  %v1904_v55 = vsel %vm1903_vm3, %v4723_v27, %v1902_v11  ;;  %3409 = vmatprep.subr.bf16.mxu1 %v3670_v38 }
 0x1d3   :  { %v815_v50 = vrot.slane %v814_v6, 1  ;;  %v1906_v0 = vsel %vm1905_vm4, %v4747_v13, %v1904_v55  ;;  %v1923_v57 = vsel %vm1901_vm2, %v789_v4, %v1922_v19  ;;  %v930_v59 = vmul.f32 %v4439_v32, %v4613_v51  ;;  %v5533_v19 = vld [vmem:[#allocation36_spill] sm:$0xff]  ;;  %v5539_v55 = vld [vmem:[#allocation53_spill] sm:$0xff] }
 0x1d4   :  { %v807_v1 = vadd.f32 %v806_v22, %v805_v62  ;;  %v823_v16 = vadd.f32 %v822_v12, %v821_v28  ;;  %v831_v40 = vrot.slane %v830_v45, 2  ;;  %v1908_v48 = vsel %vm1907_vm5, %v4753_v5, %v1906_v0  ;;  %v5534_v4 = vld [vmem:[#allocation56_spill] sm:$0xff]  ;;  %v5535_v62 = vld [vmem:[#allocation35_spill] sm:$0xff]  ;;  %v5538_v12 = vld [vmem:[#allocation54_spill] sm:$0xff] }
 0x1d5   :  { %v816_v18 = vadd.f32 %v815_v50, %v814_v6  ;;  %v1910_v27 = vsel %vm1909_vm6, %v4765_v42, %v1908_v48  ;;  %v1924_v33 = vsel %vm1903_vm3, %v798_v30, %v1923_v57  ;;  %v931_v13 = vmul.f32 %v4465_v49, %v4656_v43  ;;  %v4872_v37 = vpop.permute.xlu1 %1570  ;;  %v4874_v53 = vpop.permute.xlu0 %1566  ;;  %v5531_v42 = vld [vmem:[#allocation32_spill] sm:$0xff]  ;;  %v5536_v6 = vld [vmem:[#allocation47_spill] sm:$0xff]  ;;  %v5540_v0 = vld [vmem:[#allocation41_spill] sm:$0xff] }
 0x1d6   :  { %v824_v32 = vrot.slane %v823_v16, 1  ;;  %v832_v25 = vadd.f32 %v831_v40, %v830_v45  ;;  %v1912_v24 = vsel %vm1911_vm7, %v4776_v17, %v1910_v27  ;;  %v1925_v5 = vsel %vm1905_vm4, %v807_v1, %v1924_v33  ;;  %v5537_v17 = vld [vmem:[#allocation46_spill] sm:$0xff]  ;;  %v5542_v27 = vld [vmem:[#allocation43_spill] sm:$0xff] }
 0x1d7   :  { %v1926_v61 = vsel %vm1907_vm5, %v816_v18, %v1925_v5  ;;  %v932_v56 = vmul.f32 %v5531_v42, %v4670_v26  ;;  %v933_v49 = vmul.f32 %v5533_v19, %v5532_v2  ;;  %v934_v28 = vmul.f32 %v5535_v62, %v5534_v4  ;;  %v5541_v1 = vld [vmem:[#allocation42_spill] sm:$0xff]  ;;  %v5544_v42 = vld [vmem:[#allocation51_spill] sm:$0xff] }
 0x1d8   :  { %v825_v23 = vadd.f32 %v824_v32, %v823_v16  ;;  %v833_v30 = vrot.slane %v832_v25, 1  ;;  %v935_v11 = vmul.f32 %v5536_v6, %v4706_v3  ;;  %v936_v22 = vmul.f32 %v5537_v17, %v4721_v58  ;;  %v5543_v32 = vld [vmem:[#allocation40_spill] sm:$0xff] }
 0x1d9   :  { %v937_v45 = vmul.f32 %v5538_v12, %v4703_v15  ;;  %v938_v50 = vmul.f32 %v5539_v55, %v4713_v35  ;;  %v940_v57 = vsel %vm248_vm0, %v5540_v0, 0.0  ;;  %v949_v40 = vsel %vm248_vm0, %v5541_v1, 0.0  ;;  %v4898_v16 = vpop.permute.xlu1 %1746  ;;  %v4900_v48 = vpop.permute.xlu0 %1742  ;;  %v5545_v6 = vld [vmem:[#allocation48_spill] sm:$0xff] }
 0x1da   :  { %v834_v38 = vadd.f32 %v833_v30, %v832_v25  ;;  %v1927_v18 = vsel %vm1909_vm6, %v825_v23, %v1926_v61  ;;  %v941_v33 = vadd.f32 %v940_v57, %v5542_v27  ;;  %v950_v5 = vadd.f32 %v949_v40, %v5543_v32 }
 0x1db   :  { %v957_v19 = vsel %vm248_vm0, %v5544_v42, 0.0  ;;  %v958_v62 = vsel %vm248_vm0, %v928_v31, 0.0  ;;  %v966_v17 = vsel %vm248_vm0, %v5545_v6, 0.0  ;;  %v967_v12 = vsel %vm248_vm0, %v930_v59, 0.0 }
 0x1dc   :  { %v1928_v55 = vsel %vm1911_vm7, %v834_v38, %v1927_v18  ;;  %v942_v0 = vrot.slane %v941_v33, 4  ;;  %v951_v25 = vrot.slane %v950_v5, 4  ;;  %v959_v30 = vadd.f32 %v958_v62, %v957_v19 }
 0x1dd   :  { %v2026_v61 = vpack.c.bf16 %v1928_v55, %v1912_v24  ;;  %v968_v23 = vadd.f32 %v967_v12, %v966_v17  ;;  %v975_v57 = vsel %vm248_vm0, %v931_v13, 0.0  ;;  %v976_v1 = vsel %vm248_vm0, %v932_v56, 0.0  ;;  %v4914_v40 = vpop.permute.xlu1 %1240  ;;  %v4916_v27 = vpop.permute.xlu0 %1236 }
 0x1de   :  { %5546 = vst [vmem:[#allocation32_spill] sm:$0xff] %v4914_v40  ;;  %5547 = vst [vmem:[#allocation36_spill] sm:$0xff] %v4916_v27  ;;  %v943_v31 = vadd.f32 %v942_v0, %v941_v33  ;;  %v952_v32 = vadd.f32 %v951_v25, %v950_v5  ;;  %v960_v42 = vrot.slane %v959_v30, 4  ;;  %v977_v6 = vadd.f32 %v976_v1, %v975_v57 }
 0x1df   :  { %3476 = vmatprep.mubr.msk.bf16.mxu1 %vm248_vm0, %v2026_v61  ;;  %v969_v59 = vrot.slane %v968_v23, 4  ;;  %v984_v38 = vsel %vm248_vm0, %v933_v49, 0.0  ;;  %v985_v24 = vsel %vm248_vm0, %v934_v28, 0.0  ;;  %v993_v18 = vsel %vm248_vm0, %v935_v11, 0.0 }
 0x1e0   :  { %v944_v13 = vrot.slane %v943_v31, 2  ;;  %v953_v19 = vrot.slane %v952_v32, 2  ;;  %v961_v56 = vadd.f32 %v960_v42, %v959_v30  ;;  %v978_v62 = vrot.slane %v977_v6, 4 }
 0x1e1   :  { %v970_v17 = vadd.f32 %v969_v59, %v968_v23  ;;  %v986_v12 = vadd.f32 %v985_v24, %v984_v38  ;;  %v994_v33 = vsel %vm248_vm0, %v936_v22, 0.0  ;;  %v1002_v5 = vsel %vm248_vm0, %v937_v45, 0.0  ;;  %v4925_v11 = vpop.permute.xlu1 %1416  ;;  %v4927_v9 = vpop.permute.xlu0 %1412 }
 0x1e2   :  { %v945_v55 = vadd.f32 %v944_v13, %v943_v31  ;;  %v954_v0 = vadd.f32 %v953_v19, %v952_v32  ;;  %v962_v25 = vrot.slane %v961_v56, 2  ;;  %v979_v61 = vadd.f32 %v978_v62, %v977_v6  ;;  %5548 = vst [vmem:[#allocation35_spill] sm:$0xff] %v4925_v11  ;;  %5549 = vst [vmem:[#allocation47_spill] sm:$0xff] %v4927_v9 }
 0x1e3   :  { %v971_v57 = vrot.slane %v970_v17, 2  ;;  %v987_v49 = vrot.slane %v986_v12, 4  ;;  %v995_v1 = vadd.f32 %v994_v33, %v993_v18  ;;  %v1003_v28 = vsel %vm248_vm0, %v938_v50, 0.0 }
 0x1e4   :  { %v946_v30 = vrot.slane %v945_v55, 1  ;;  %v955_v23 = vrot.slane %v954_v0, 1  ;;  %v963_v42 = vadd.f32 %v962_v25, %v961_v56  ;;  %v980_v59 = vrot.slane %v979_v61, 2  ;;  %v5550_v56 = vld [vmem:[#allocation26_spill] sm:$0xff] }
 0x1e5   :  { %v972_v22 = vadd.f32 %v971_v57, %v970_v17  ;;  %v988_v38 = vadd.f32 %v987_v49, %v986_v12  ;;  %v996_v45 = vrot.slane %v995_v1, 4  ;;  %v1004_v31 = vadd.f32 %v1003_v28, %v1002_v5  ;;  %v5551_v17 = vld [vmem:[#allocation27_spill] sm:$0xff]  ;;  %v4941_v49 = vpop.permute.xlu1 %1581  ;;  %v5554_v28 = vld [vmem:[#allocation29_spill] sm:$0xff] }
 0x1e6   :  { %v4929_v32 = vadd.f32 %v946_v30, %v945_v55  ;;  %v4931_v6 = vadd.f32 %v955_v23, %v954_v0  ;;  %v964_v24 = vrot.slane %v963_v42, 1  ;;  %v981_v18 = vadd.f32 %v980_v59, %v979_v61  ;;  %5552 = vst [vmem:[#allocation46_spill] sm:$0xff] %v4941_v49  ;;  %v4943_v61 = vpop.permute.xlu0 %1577  ;;  %v5555_v23 = vld [vmem:[#allocation28_spill] sm:$0xff]  ;;  %v5556_v59 = vld [vmem:[#allocation45_spill] sm:$0xff] }
 0x1e7   :  { %v973_v13 = vrot.slane %v972_v22, 1  ;;  %v989_v50 = vrot.slane %v988_v38, 2  ;;  %v997_v19 = vadd.f32 %v996_v45, %v995_v1  ;;  %v1005_v62 = vrot.slane %v1004_v31, 4  ;;  %5553 = vst [vmem:[#allocation54_spill] sm:$0xff] %v4943_v61  ;;  %v5557_v45 = vld [vmem:[#allocation31_spill] sm:$0xff] }
 0x1e8   :  { %v4933_v33 = vadd.f32 %v964_v24, %v963_v42  ;;  %v982_v36 = vrot.slane %v981_v18, 1  ;;  %v1100_v25 = vmul.f32 %v5550_v56, %v4553_v47  ;;  %v1102_v12 = vmul.f32 %v5551_v17, %v4545_v46  ;;  %v5561_v17 = vld [vmem:[#allocation38_spill] sm:$0xff] }
 0x1e9   :  { %v4939_v5 = vadd.f32 %v973_v13, %v972_v22  ;;  %v990_v55 = vadd.f32 %v989_v50, %v988_v38  ;;  %v998_v0 = vrot.slane %v997_v19, 2  ;;  %v1006_v57 = vadd.f32 %v1005_v62, %v1004_v31  ;;  %v5558_v31 = vld [vmem:[#allocation30_spill] sm:$0xff] }
 0x1ea   :  { %v4945_v1 = vadd.f32 %v982_v36, %v981_v18  ;;  %v1103_v30 = vmul.f32 %v5554_v28, %v4599_v41  ;;  %v1104_v42 = vmul.f32 %v5555_v23, %v4621_v52  ;;  %v1105_v24 = vmul.f32 %v5557_v45, %v5556_v59  ;;  %v5559_v62 = vld [vmem:[#allocation34_spill] sm:$0xff]  ;;  %v5560_v36 = vld [vmem:[#allocation33_spill] sm:$0xff] }
 0x1eb   :  { %v991_v22 = vrot.slane %v990_v55, 1  ;;  %v999_v13 = vadd.f32 %v998_v0, %v997_v19  ;;  %v1007_v38 = vrot.slane %v1006_v57, 2  ;;  %v1106_v50 = vmul.f32 %v5558_v31, %v4613_v51  ;;  %v5562_v23 = vld [vmem:[#allocation37_spill] sm:$0xff]  ;;  %v5563_v0 = vld [vmem:[#allocation50_spill] sm:$0xff] }
 0x1ec   :  { %v1107_v56 = vmul.f32 %v5559_v62, %v4656_v43  ;;  %v1108_v18 = vmul.f32 %v5560_v36, %v4670_v26  ;;  %v1109_v28 = vmul.f32 %v5561_v17, %v5532_v2  ;;  %v1110_v61 = vmul.f32 %v5562_v23, %v5534_v4  ;;  %v5564_v31 = vld [vmem:[#allocation49_spill] sm:$0xff]  ;;  %v5565_v62 = vld [vmem:[#allocation59_spill] sm:$0xff]  ;;  %v5566_v36 = vld [vmem:[#allocation58_spill] sm:$0xff] }
 0x1ed   :  { %v4963_v49 = vadd.f32 %v991_v22, %v990_v55  ;;  %v1000_v45 = vrot.slane %v999_v13, 1  ;;  %v1008_v19 = vadd.f32 %v1007_v38, %v1006_v57  ;;  %v1111_v9 = vmul.f32 %v5563_v0, %v4706_v3  ;;  %v5567_v17 = vld [vmem:[#allocation44_spill] sm:$0xff]  ;;  %v5568_v22 = vld [vmem:[#allocation39_spill] sm:$0xff]  ;;  %v4980_v0 = vpop.permute.xlu1 %1757 }
 0x1ee   :  { %v1112_v11 = vmul.f32 %v5564_v31, %v4721_v58  ;;  %v1113_v27 = vmul.f32 %v5565_v62, %v4703_v15  ;;  %v1114_v43 = vmul.f32 %v5566_v36, %v4713_v35  ;;  %v1115_v2 = vsel %vm248_vm0, %v5567_v17, 0.0  ;;  %5569 = vst [vmem:[#allocation53_spill] sm:$0xff] %v4980_v0  ;;  %v4982_v31 = vpop.permute.xlu0 %1753 }
 0x1ef   :  { %v4975_v23 = vadd.f32 %v1000_v45, %v999_v13  ;;  %v1009_v55 = vrot.slane %v1008_v19, 1  ;;  %v1116_v57 = vsel %vm248_vm0, %v1100_v25, 0.0  ;;  %v1124_v38 = vsel %vm248_vm0, %v5568_v22, 0.0  ;;  %5570 = vst [vmem:[#allocation41_spill] sm:$0xff] %v4982_v31 }
 0x1f0   :  { %v1117_v3 = vadd.f32 %v1116_v57, %v1115_v2  ;;  %v1125_v62 = vsel %vm248_vm0, %v1102_v12, 0.0  ;;  %v1133_v36 = vsel %vm248_vm0, %v1103_v30, 0.0  ;;  %v1134_v15 = vsel %vm248_vm0, %v1104_v42, 0.0 }
 0x1f1   :  { %v4987_v17 = vadd.f32 %v1009_v55, %v1008_v19  ;;  %v1126_v13 = vadd.f32 %v1125_v62, %v1124_v38  ;;  %v1135_v45 = vadd.f32 %v1134_v15, %v1133_v36  ;;  %v1142_v25 = vsel %vm248_vm0, %v1105_v24, 0.0 }
 0x1f2   :  { %v1118_v35 = vrot.slane %v1117_v3, 4  ;;  %v1143_v22 = vsel %vm248_vm0, %v1106_v50, 0.0  ;;  %v1151_v58 = vsel %vm248_vm0, %v1107_v56, 0.0  ;;  %v1152_v4 = vsel %vm248_vm0, %v1108_v18, 0.0  ;;  %v4996_v50 = vpop.permute.xlu1 %1251  ;;  %v4998_v56 = vpop.permute.xlu0 %1247 }
 0x1f3   :  { %v1127_v2 = vrot.slane %v1126_v13, 4  ;;  %v1136_v57 = vrot.slane %v1135_v45, 4  ;;  %v1144_v12 = vadd.f32 %v1143_v22, %v1142_v25  ;;  %v1153_v31 = vadd.f32 %v1152_v4, %v1151_v58  ;;  %5571 = vst [vmem:[#allocation42_spill] sm:$0xff] %v4996_v50  ;;  %5572 = vst [vmem:[#allocation43_spill] sm:$0xff] %v4998_v56 }
 0x1f4   :  { %v1119_v30 = vadd.f32 %v1118_v35, %v1117_v3  ;;  %v1160_v42 = vsel %vm248_vm0, %v1109_v28, 0.0  ;;  %v1161_v19 = vsel %vm248_vm0, %v1110_v61, 0.0  ;;  %v1169_v15 = vsel %vm248_vm0, %v1111_v9, 0.0 }
 0x1f5   :  { %v1128_v55 = vadd.f32 %v1127_v2, %v1126_v13  ;;  %v1137_v24 = vadd.f32 %v1136_v57, %v1135_v45  ;;  %v1145_v38 = vrot.slane %v1144_v12, 4  ;;  %v1154_v62 = vrot.slane %v1153_v31, 4 }
 0x1f6   :  { %v1120_v18 = vrot.slane %v1119_v30, 2  ;;  %v1162_v36 = vadd.f32 %v1161_v19, %v1160_v42  ;;  %v1170_v25 = vsel %vm248_vm0, %v1112_v11, 0.0  ;;  %v1178_v3 = vsel %vm248_vm0, %v1113_v27, 0.0  ;;  %v5003_v26 = vpop.permute.xlu1 %1427 }
 0x1f7   :  { %v1129_v35 = vrot.slane %v1128_v55, 2  ;;  %v1138_v58 = vrot.slane %v1137_v24, 2  ;;  %v1146_v4 = vadd.f32 %v1145_v38, %v1144_v12  ;;  %v1155_v61 = vadd.f32 %v1154_v62, %v1153_v31  ;;  %v5005_v31 = vpop.permute.xlu0 %1423 }
 0x1f8   :  { %v1121_v28 = vadd.f32 %v1120_v18, %v1119_v30  ;;  %v1163_v9 = vrot.slane %v1162_v36, 4  ;;  %v1171_v13 = vadd.f32 %v1170_v25, %v1169_v15  ;;  %v1179_v45 = vsel %vm248_vm0, %v1114_v43, 0.0 }
 0x1f9   :  { %v1130_v22 = vadd.f32 %v1129_v35, %v1128_v55  ;;  %v1139_v2 = vadd.f32 %v1138_v58, %v1137_v24  ;;  %v1147_v57 = vrot.slane %v1146_v4, 2  ;;  %v1156_v50 = vrot.slane %v1155_v61, 2 }
 0x1fa   :  { %v1122_v56 = vrot.slane %v1121_v28, 1  ;;  %v1164_v0 = vadd.f32 %v1163_v9, %v1162_v36  ;;  %v1172_v42 = vrot.slane %v1171_v13, 4  ;;  %v1180_v19 = vadd.f32 %v1179_v45, %v1178_v3 }
 0x1fb   :  { %v1131_v11 = vrot.slane %v1130_v22, 1  ;;  %v1140_v63 = vrot.slane %v1139_v2, 1  ;;  %v1148_v27 = vadd.f32 %v1147_v57, %v1146_v4  ;;  %v1157_v40 = vadd.f32 %v1156_v50, %v1155_v61 }
 0x1fc   :  { %v1123_v12 = vadd.f32 %v1122_v56, %v1121_v28  ;;  %v1165_v30 = vrot.slane %v1164_v0, 2  ;;  %v1173_v15 = vadd.f32 %v1172_v42, %v1171_v13  ;;  %v1181_v43 = vrot.slane %v1180_v19, 4 }
 0x1fd   :  { %v1132_v55 = vadd.f32 %v1131_v11, %v1130_v22  ;;  %v1141_v24 = vadd.f32 %v1140_v63, %v1139_v2  ;;  %v1149_v38 = vrot.slane %v1148_v27, 1  ;;  %v1158_v62 = vrot.slane %v1157_v40, 1 }
 0x1fe   :  { %v1166_v18 = vadd.f32 %v1165_v30, %v1164_v0  ;;  %v1174_v36 = vrot.slane %v1173_v15, 2  ;;  %v1182_v25 = vadd.f32 %v1181_v43, %v1180_v19  ;;  %v1938_v3 = vsel %vm1899_vm1, %v4931_v6, %v4929_v32  ;;  %v5022_v6 = vpop.permute.xlu1 %1592 }
 0x1ff   :  { %v1150_v50 = vadd.f32 %v1149_v38, %v1148_v27  ;;  %v1159_v35 = vadd.f32 %v1158_v62, %v1157_v40  ;;  %v1939_v58 = vsel %vm1901_vm2, %v4933_v33, %v1938_v3  ;;  %v1954_v56 = vsel %vm1899_vm1, %v1132_v55, %v1123_v12  ;;  %v5024_v33 = vpop.permute.xlu0 %1588 }
 0x200   :  { %v1167_v4 = vrot.slane %v1166_v18, 1  ;;  %v1175_v61 = vadd.f32 %v1174_v36, %v1173_v15  ;;  %v1183_v28 = vrot.slane %v1182_v25, 2  ;;  %v1940_v63 = vsel %vm1903_vm3, %v4939_v5, %v1939_v58 }
 0x201   :  { %v1941_v0 = vsel %vm1905_vm4, %v4945_v1, %v1940_v63  ;;  %v1955_v9 = vsel %vm1901_vm2, %v1141_v24, %v1954_v56  ;;  %v1630_v32 = vmul.f32 %v4796_v7, %v4545_v46  ;;  %v1629_v40 = vmul.f32 %v4798_v10, %v4503_v29  ;;  %v3672_v56 = vld [vmem:[#allocation11 + $0x48] sm:$0xff]  }
 0x202   :  { %v1168_v13 = vadd.f32 %v1167_v4, %v1166_v18  ;;  %v1176_v45 = vrot.slane %v1175_v61, 1  ;;  %v1184_v22 = vadd.f32 %v1183_v28, %v1182_v25  ;;  %v1942_v5 = vsel %vm1907_vm5, %v4963_v49, %v1941_v0  ;;  %v5050_v62 = vpop.permute.xlu1 %1768 }
 0x203   :  { %v1943_v1 = vsel %vm1909_vm6, %v4975_v23, %v1942_v5  ;;  %v1956_v2 = vsel %vm1903_vm3, %v1150_v50, %v1955_v9  ;;  %v1653_v7 = vsel %vm248_vm0, %v1630_v32, 0.0  ;;  %v1652_v57 = vsel %vm248_vm0, %v1629_v40, 0.0 }
 0x204   :  { %v1177_v10 = vadd.f32 %v1176_v45, %v1175_v61  ;;  %v1185_v42 = vrot.slane %v1184_v22, 1  ;;  %v1944_v19 = vsel %vm1911_vm7, %v4987_v17, %v1943_v1  ;;  %v1957_v11 = vsel %vm1905_vm4, %v1159_v35, %v1956_v2 }
 0x205   :  { %v1958_v27 = vsel %vm1907_vm5, %v1168_v13, %v1957_v11  ;;  %v1654_v12 = vadd.f32 %v1653_v7, %v1652_v57  ;;  %v1804_v49 = vmul.f32 %v4811_v21, %v4553_v47  ;;  %v1803_v23 = vmul.f32 %v4813_v44, %v4521_v20  ;;  %v5052_v44 = vpop.permute.xlu0 %1764  ;;  %v3674_v57 = vld [vmem:[#allocation11 + $0x50] sm:$0xff]  }
 0x206   :  { %v1186_v30 = vadd.f32 %v1185_v42, %v1184_v22  ;;  %v1959_v15 = vsel %vm1909_vm6, %v1177_v10, %v1958_v27  ;;  %v1806_v43 = vmul.f32 %v4824_v60, %v4545_v46  ;;  %v1805_v17 = vmul.f32 %v4826_v39, %v4503_v29  ;;  %v3671_v39 = vld [vmem:[#allocation11] sm:$0xff]   ;;  %v3673_v22 = vld [vmem:[#allocation11 + $0x8] sm:$0xff]   ;;  %v5076_v7 = vpop.permute.xlu1 %1262 }
 0x207   :  { %v1655_v55 = vrot.slane %v1654_v12, 4  ;;  %v1820_v24 = vsel %vm248_vm0, %v1804_v49, 0.0  ;;  %v1819_v38 = vsel %vm248_vm0, %v1803_v23, 0.0  ;;  %v1282_v21 = vmul.f32 %v4841_v14, %v4613_v51  ;;  %v5069_v40 = vpop.f32.mrb[16].mxu0 }
 0x208   :  { %v1960_v18 = vsel %vm1911_vm7, %v1186_v30, %v1959_v15  ;;  %v1821_v36 = vadd.f32 %v1820_v24, %v1819_v38  ;;  %v1829_v60 = vsel %vm248_vm0, %v1806_v43, 0.0  ;;  %v1828_v25 = vsel %vm248_vm0, %v1805_v17, 0.0  ;;  %v3675_v38 = vld [vmem:[#allocation11 + $0x10] sm:$0xff]  }
 0x209   :  { %v2027_v3 = vpack.c.bf16 %v1960_v18, %v1944_v19  ;;  %v1656_v50 = vadd.f32 %v1655_v55, %v1654_v12  ;;  %v1830_v35 = vadd.f32 %v1829_v60, %v1828_v25  ;;  %v1319_v58 = vsel %vm248_vm0, %v1282_v21, 0.0 }
 0x20a   :  { %v1822_v4 = vrot.slane %v1821_v36, 4  ;;  %v1281_v14 = vmul.f32 %v4843_v34, %v5556_v59  ;;  %v1458_v61 = vmul.f32 %v4854_v54, %v4613_v51  ;;  %v1457_v28 = vmul.f32 %v4856_v8, %v5556_v59  ;;  %v5074_v8 = vpop.f32.mrb[17].mxu0 }
 0x20b   :  { %3477 = vmatmul.mubr.msk.bf16.vlgmr.msra.gmra.mrb[0].mxu1 %vm248_vm0, %v2027_v3  ;;  %v1657_v63 = vrot.slane %v1656_v50, 2  ;;  %v1831_v0 = vrot.slane %v1830_v35, 4  ;;  %v1632_v9 = vmul.f32 %v4872_v37, %v4621_v52  ;;  %v1631_v32 = vmul.f32 %v4874_v53, %v4599_v41  ;;  %v5078_v53 = vpop.permute.xlu0 %1258  ;;  %v2639_v27 = vpop.f32.mrb[18].mxu0 }
 0x20c   :  { %v1823_v13 = vadd.f32 %v1822_v4, %v1821_v36  ;;  %v1318_v34 = vsel %vm248_vm0, %v1281_v14, 0.0  ;;  %v1495_v54 = vsel %vm248_vm0, %v1458_v61, 0.0  ;;  %v1494_v45 = vsel %vm248_vm0, %v1457_v28, 0.0  ;;  %3410 = vmatpush3.bf16.msra.mxu1 %v3671_v39  ;;  %v2640_v15 = vpop.f32.mrb[19].mxu0  ;;  %v5092_v28 = vpop.permute.xlu1 %1438 }
 0x20d   :  { %v1658_v5 = vadd.f32 %v1657_v63, %v1656_v50  ;;  %v1832_v1 = vadd.f32 %v1831_v0, %v1830_v35  ;;  %v1320_v2 = vadd.f32 %v1319_v58, %v1318_v34  ;;  %v1496_v37 = vadd.f32 %v1495_v54, %v1494_v45  ;;  %3411 = vmatprep.subr.bf16.mxu1 %v3672_v56  ;;  %v5573_v50 = vld [vmem:[#allocation57_spill] sm:$0xff]  ;;  %v5574_v35 = vld [vmem:[#allocation32_spill] sm:$0xff]  ;;  %v5575_v56 = vld [vmem:[#allocation66_spill] sm:$0xff] }
 0x20e   :  { %v1824_v10 = vrot.slane %v1823_v13, 2  ;;  %v1662_v42 = vsel %vm248_vm0, %v1632_v9, 0.0  ;;  %v1661_v19 = vsel %vm248_vm0, %v1631_v32, 0.0  ;;  %v1808_v11 = vmul.f32 %v4898_v16, %v4621_v52  ;;  %v3676_v16 = vld [vmem:[#allocation11 + $0x58] sm:$0xff]  }
 0x20f   :  { %v1659_v12 = vrot.slane %v1658_v5, 1  ;;  %v1833_v49 = vrot.slane %v1832_v1, 2  ;;  %v1321_v23 = vrot.slane %v1320_v2, 4  ;;  %v1497_v30 = vrot.slane %v1496_v37, 4  ;;  %v5094_v63 = vpop.permute.xlu0 %1434  ;;  %v3677_v34 = vld [vmem:[#allocation11 + $0x18] sm:$0xff]  }
 0x210   :  { %v1825_v43 = vadd.f32 %v1824_v10, %v1823_v13  ;;  %v1663_v17 = vadd.f32 %v1662_v42, %v1661_v19  ;;  %v1838_v55 = vsel %vm248_vm0, %v1808_v11, 0.0  ;;  %v1807_v24 = vmul.f32 %v4900_v48, %v4599_v41  ;;  %3412 = vmatpush3.bf16.msra.mxu1 %v3673_v22  ;;  %v5578_v42 = vld [vmem:[#allocation35_spill] sm:$0xff] }
 0x211   :  { %v1660_v21 = vadd.f32 %v1659_v12, %v1658_v5  ;;  %v1834_v18 = vadd.f32 %v1833_v49, %v1832_v1  ;;  %v1322_v36 = vadd.f32 %v1321_v23, %v1320_v2  ;;  %v1498_v60 = vadd.f32 %v1497_v30, %v1496_v37  ;;  %3413 = vmatprep.subr.bf16.mxu1 %v3674_v57  ;;  %v5576_v5 = vld [vmem:[#allocation55_spill] sm:$0xff]  ;;  %v5577_v1 = vld [vmem:[#allocation36_spill] sm:$0xff] }
 0x212   :  { %v1826_v25 = vrot.slane %v1825_v43, 1  ;;  %v1664_v39 = vrot.slane %v1663_v17, 4  ;;  %v1837_v3 = vsel %vm248_vm0, %v1807_v24, 0.0  ;;  %v1284_v58 = vmul.f32 %v5574_v35, %v5573_v50  ;;  %v3678_v37 = vld [vmem:[#allocation11 + $0x60] sm:$0xff]  }
 0x213   :  { %v2002_v4 = vsel %vm1899_vm1, %v1660_v21, %v5575_v56  ;;  %v1835_v14 = vrot.slane %v1834_v18, 1  ;;  %v1323_v48 = vrot.slane %v1322_v36, 2  ;;  %v1499_v61 = vrot.slane %v1498_v60, 2  ;;  %v5579_v11 = vld [vmem:[#allocation47_spill] sm:$0xff] }
 0x214   :  { %v1827_v0 = vadd.f32 %v1826_v25, %v1825_v43  ;;  %v1665_v9 = vadd.f32 %v1664_v39, %v1663_v17  ;;  %v1839_v32 = vadd.f32 %v1838_v55, %v1837_v3  ;;  %v1328_v13 = vsel %vm248_vm0, %v1284_v58, 0.0  ;;  %3414 = vmatpush3.bf16.msra.mxu1 %v3675_v38  ;;  %v3679_v24 = vld [vmem:[#allocation11 + $0x20] sm:$0xff]   ;;  %v5111_v25 = vpop.permute.xlu0 %1599  ;;  %v3680_v39 = vld [vmem:[#allocation11 + $0x68] sm:$0xff]  }
 0x215   :  { %v1836_v54 = vadd.f32 %v1835_v14, %v1834_v18  ;;  %v1324_v45 = vadd.f32 %v1323_v48, %v1322_v36  ;;  %v1500_v22 = vadd.f32 %v1499_v61, %v1498_v60  ;;  %v1283_v2 = vmul.f32 %v5577_v1, %v5576_v5  ;;  %3415 = vmatprep.subr.bf16.mxu1 %v3676_v16  ;;  %v5580_v36 = vld [vmem:[#allocation46_spill] sm:$0xff]  ;;  %v5109_v16 = vpop.permute.xlu1 %1603  ;;  %v5581_v14 = vld [vmem:[#allocation64_spill] sm:$0xff]  ;;  %v5582_v61 = vld [vmem:[#allocation65_spill] sm:$0xff] }
 0x216   :  { %v1666_v57 = vrot.slane %v1665_v9, 2  ;;  %v1840_v10 = vrot.slane %v1839_v32, 4  ;;  %v1460_v19 = vmul.f32 %v5578_v42, %v5573_v50  ;;  %v1459_v27 = vmul.f32 %v5579_v11, %v5576_v5  ;;  %v5586_v42 = vld [vmem:[#allocation56_spill] sm:$0xff] }
 0x217   :  { %v2018_v12 = vsel %vm1899_vm1, %v1836_v54, %v1827_v0  ;;  %v1325_v49 = vrot.slane %v1324_v45, 1  ;;  %v1501_v23 = vrot.slane %v1500_v22, 1  ;;  %v1327_v30 = vsel %vm248_vm0, %v1283_v2, 0.0  ;;  %v5584_v2 = vld [vmem:[#allocation53_spill] sm:$0xff] }
 0x218   :  { %v1667_v15 = vadd.f32 %v1666_v57, %v1665_v9  ;;  %v1841_v43 = vadd.f32 %v1840_v10, %v1839_v32  ;;  %v1329_v17 = vadd.f32 %v1328_v13, %v1327_v30  ;;  %v1504_v55 = vsel %vm248_vm0, %v1460_v19, 0.0  ;;  %3416 = vmatpush3.bf16.msra.mxu1 %v3677_v34  ;;  %v5583_v9 = vld [vmem:[#allocation54_spill] sm:$0xff]  ;;  %v5585_v57 = vld [vmem:[#allocation41_spill] sm:$0xff] }
 0x219   :  { %v1326_v38 = vadd.f32 %v1325_v49, %v1324_v45  ;;  %v1502_v21 = vadd.f32 %v1501_v23, %v1500_v22  ;;  %v1503_v18 = vsel %vm248_vm0, %v1459_v27, 0.0  ;;  %v1634_v60 = vmul.f32 %v5580_v36, %v4613_v51  ;;  %3417 = vmatprep.subr.bf16.mxu1 %v3678_v37  ;;  %v3681_v22 = vld [vmem:[#allocation11 + $0x28] sm:$0xff]   ;;  %v5587_v19 = vld [vmem:[#allocation42_spill] sm:$0xff]  ;;  %v3682_v27 = vld [vmem:[#allocation11 + $0x70] sm:$0xff]  }
 0x21a   :  { %v1668_v3 = vrot.slane %v1667_v15, 1  ;;  %v1842_v35 = vrot.slane %v1841_v43, 2  ;;  %v1330_v58 = vrot.slane %v1329_v17, 4  ;;  %v1505_v56 = vadd.f32 %v1504_v55, %v1503_v18  ;;  %v3683_v18 = vld [vmem:[#allocation11 + $0x30] sm:$0xff]  }
 0x21b   :  { %v5115_v48 = vsel %vm1903_vm3, %v1326_v38, %v5581_v14  ;;  %v5119_v0 = vsel %vm1903_vm3, %v1502_v21, %v5582_v61  ;;  %v1633_v32 = vmul.f32 %v5583_v9, %v5556_v59  ;;  %v1671_v45 = vsel %vm248_vm0, %v1634_v60, 0.0  ;;  %v5588_v60 = vld [vmem:[#allocation52_spill] sm:$0xff] }
 0x21c   :  { %v1669_v13 = vadd.f32 %v1668_v3, %v1667_v15  ;;  %v1843_v34 = vadd.f32 %v1842_v35, %v1841_v43  ;;  %v1331_v54 = vadd.f32 %v1330_v58, %v1329_v17  ;;  %3418 = vmatpush3.bf16.msra.mxu1 %v3679_v24  ;;  %v1810_v37 = vmul.f32 %v5584_v2, %v4613_v51  ;;  %v5134_v43 = vpop.permute.xlu1 %1779  ;;  %v5136_v17 = vpop.permute.xlu0 %1775  ;;  %v3684_v58 = vld [vmem:[#allocation11 + $0x78] sm:$0xff]  }
 0x21d   :  { %v1670_v1 = vsel %vm248_vm0, %v1633_v32, 0.0  ;;  %v1809_v10 = vmul.f32 %v5585_v57, %v5556_v59  ;;  %v1286_v11 = vmul.f32 %v5587_v19, %v5586_v42  ;;  %3419 = vmatprep.subr.bf16.mxu1 %v3680_v39  ;;  %v1506_v30 = vrot.slane %v1505_v56, 4 }
 0x21e   :  { %v5132_v49 = vsel %vm1901_vm2, %v1669_v13, %v2002_v4  ;;  %v1844_v23 = vrot.slane %v1843_v34, 1  ;;  %v1332_v15 = vrot.slane %v1331_v54, 2  ;;  %v1672_v24 = vadd.f32 %v1671_v45, %v1670_v1  ;;  %v5589_v4 = vld [vmem:[#allocation43_spill] sm:$0xff] }
 0x21f   :  { %v1847_v38 = vsel %vm248_vm0, %v1810_v37, 0.0  ;;  %v1846_v21 = vsel %vm248_vm0, %v1809_v10, 0.0  ;;  %v1337_v36 = vsel %vm248_vm0, %v1286_v11, 0.0  ;;  %v1285_v39 = vmul.f32 %v5589_v4, %v5588_v60 }
 0x220   :  { %v1845_v55 = vadd.f32 %v1844_v23, %v1843_v34  ;;  %3420 = vmatpush3.bf16.msra.mxu1 %v3681_v22  ;;  %v1462_v3 = vmul.f32 %v5003_v26, %v5586_v42  ;;  %v1461_v35 = vmul.f32 %v5005_v31, %v5588_v60  ;;  %v1507_v61 = vadd.f32 %v1506_v30, %v1505_v56  ;;  %v3685_v26 = vld [vmem:[#allocation11 + $0x38] sm:$0xff]   ;;  %v5157_v2 = vpop.permute.xlu1 %1273  ;;  %v5159_v56 = vpop.permute.xlu0 %1269 }
 0x221   :  { %3421 = vmatprep.subr.bf16.mxu1 %v3682_v27  ;;  %v1336_v9 = vsel %vm248_vm0, %v1285_v39, 0.0  ;;  %v1333_v34 = vadd.f32 %v1332_v15, %v1331_v54  ;;  %v1848_v45 = vadd.f32 %v1847_v38, %v1846_v21  ;;  %v1673_v1 = vrot.slane %v1672_v24, 4  ;;  %v5590_v38 = vld [vmem:[#allocation63_spill] sm:$0xff] }
 0x222   :  { %v5148_v14 = vsel %vm1901_vm2, %v1845_v55, %v2018_v12  ;;  %v1513_v32 = vsel %vm248_vm0, %v1462_v3, 0.0  ;;  %v1512_v13 = vsel %vm248_vm0, %v1461_v35, 0.0  ;;  %v1338_v22 = vadd.f32 %v1337_v36, %v1336_v9 }
 0x223   :  { %v1636_v31 = vmul.f32 %v5022_v6, %v5573_v50  ;;  %v1635_v12 = vmul.f32 %v5024_v33, %v5576_v5  ;;  %v1508_v37 = vrot.slane %v1507_v61, 2  ;;  %v1514_v57 = vadd.f32 %v1513_v32, %v1512_v13 }
 0x224   :  { %3422 = vmatpush3.bf16.msra.mxu1 %v3683_v18  ;;  %v1339_v10 = vrot.slane %v1338_v22, 4  ;;  %v1334_v11 = vrot.slane %v1333_v34, 1  ;;  %v1849_v27 = vrot.slane %v1848_v45, 4  ;;  %v1674_v23 = vadd.f32 %v1673_v1, %v1672_v24  ;;  %v5171_v39 = vpop.permute.xlu1 %1449  ;;  %v5173_v24 = vpop.permute.xlu0 %1445 }
 0x225   :  { %3423 = vmatprep.subr.bf16.mxu1 %v3684_v58  ;;  %v1680_v54 = vsel %vm248_vm0, %v1636_v31, 0.0  ;;  %v1679_v19 = vsel %vm248_vm0, %v1635_v12, 0.0  ;;  %v1812_v6 = vmul.f32 %v5050_v62, %v5573_v50  ;;  %v1811_v33 = vmul.f32 %v5052_v44, %v5576_v5 }
 0x226   :  { %v1509_v30 = vadd.f32 %v1508_v37, %v1507_v61  ;;  %v1515_v15 = vrot.slane %v1514_v57, 4  ;;  %v1681_v55 = vadd.f32 %v1680_v54, %v1679_v19  ;;  %v1288_v21 = vmul.f32 %v5076_v7, %v5590_v38  ;;  %v5591_v61 = vld [vmem:[#allocation61_spill] sm:$0xff] }
 0x227   :  { %v1340_v18 = vadd.f32 %v1339_v10, %v1338_v22  ;;  %v1856_v36 = vsel %vm248_vm0, %v1812_v6, 0.0  ;;  %v1855_v4 = vsel %vm248_vm0, %v1811_v33, 0.0  ;;  %v1335_v3 = vadd.f32 %v1334_v11, %v1333_v34 }
 0x228   :  { %3424 = vmatpush3.bf16.msra.mxu1 %v3685_v26  ;;  %v1850_v62 = vadd.f32 %v1849_v27, %v1848_v45  ;;  %v1857_v35 = vadd.f32 %v1856_v36, %v1855_v4  ;;  %v1675_v58 = vrot.slane %v1674_v23, 2  ;;  %v1346_v44 = vsel %vm248_vm0, %v1288_v21, 0.0  ;;  %v1615_v19 = vpop.permute.xlu1 %1614 }
 0x229   :  { %v1287_v9 = vmul.f32 %v5078_v53, %v5591_v61  ;;  %v1510_v32 = vrot.slane %v1509_v30, 1  ;;  %v1516_v7 = vadd.f32 %v1515_v15, %v1514_v57  ;;  %v1682_v13 = vrot.slane %v1681_v55, 4 }
 0x22a   :  { %v1341_v22 = vrot.slane %v1340_v18, 2  ;;  %v1464_v1 = vmul.f32 %v5092_v28, %v5590_v38  ;;  %v1463_v34 = vmul.f32 %v5094_v63, %v5591_v61  ;;  %v5185_v45 = vsel %vm1905_vm4, %v1335_v3, %v5115_v48  ;;  %v5191_v28 = vpop.permute.xlu0 %1610 }
 0x22b   :  { %v1345_v26 = vsel %vm248_vm0, %v1287_v9, 0.0  ;;  %v1851_v31 = vrot.slane %v1850_v62, 2  ;;  %v1858_v12 = vrot.slane %v1857_v35, 4  ;;  %v1676_v53 = vadd.f32 %v1675_v58, %v1674_v23 }
 0x22c   :  { %v1347_v37 = vadd.f32 %v1346_v44, %v1345_v26  ;;  %v1522_v57 = vsel %vm248_vm0, %v1464_v1, 0.0  ;;  %v1521_v10 = vsel %vm248_vm0, %v1463_v34, 0.0  ;;  %v1638_v54 = vmul.f32 %v5109_v16, %v5586_v42  ;;  %v1791_v1 = vpop.permute.xlu1 %1790 }
 0x22d   :  { %v1517_v11 = vrot.slane %v1516_v7, 2  ;;  %v1683_v63 = vadd.f32 %v1682_v13, %v1681_v55  ;;  %v1523_v6 = vadd.f32 %v1522_v57, %v1521_v10  ;;  %v1342_v48 = vadd.f32 %v1341_v22, %v1340_v18 }
 0x22e   :  { %v1348_v27 = vrot.slane %v1347_v37, 4  ;;  %v1637_v33 = vmul.f32 %v5111_v25, %v5588_v60  ;;  %v1814_v23 = vmul.f32 %v5134_v43, %v5586_v42  ;;  %v1813_v15 = vmul.f32 %v5136_v17, %v5588_v60  ;;  %v1787_v34 = vpop.permute.xlu0 %1786 }
 0x22f   :  { %v1859_v21 = vadd.f32 %v1858_v12, %v1857_v35  ;;  %v1524_v16 = vrot.slane %v1523_v6, 4  ;;  %v1689_v4 = vsel %vm248_vm0, %v1638_v54, 0.0  ;;  %v1511_v3 = vadd.f32 %v1510_v32, %v1509_v30  ;;  %v5592_v35 = vld [vmem:[#allocation62_spill] sm:$0xff] }
 0x230   :  { %v1349_v36 = vadd.f32 %v1348_v27, %v1347_v37  ;;  %v1688_v55 = vsel %vm248_vm0, %v1637_v33, 0.0  ;;  %v1865_v58 = vsel %vm248_vm0, %v1814_v23, 0.0  ;;  %v1864_v18 = vsel %vm248_vm0, %v1813_v15, 0.0  ;;  %v5593_v37 = vld [vmem:[#allocation60_spill] sm:$0xff] }
 0x231   :  { %v1518_v44 = vadd.f32 %v1517_v11, %v1516_v7  ;;  %v1684_v25 = vrot.slane %v1683_v63, 2  ;;  %v1525_v13 = vadd.f32 %v1524_v16, %v1523_v6  ;;  %v5203_v43 = vadd.f32 %v1851_v31, %v1850_v62 }
 0x232   :  { %v1350_v9 = vrot.slane %v1349_v36, 2  ;;  %v1690_v22 = vadd.f32 %v1689_v4, %v1688_v55  ;;  %v1866_v17 = vadd.f32 %v1865_v58, %v1864_v18  ;;  %v1290_v26 = vmul.f32 %v5157_v2, %v5592_v35  ;;  %v1626_v58 = vpop.permute.xlu1 %1625  ;;  %v1622_v18 = vpop.permute.xlu0 %1621 }
 0x233   :  { %v1677_v30 = vrot.slane %v1676_v53, 1  ;;  %v1343_v32 = vrot.slane %v1342_v48, 1  ;;  %v1860_v12 = vrot.slane %v1859_v21, 2  ;;  %v1289_v57 = vmul.f32 %v5159_v56, %v5593_v37 }
 0x234   :  { %v1351_v10 = vadd.f32 %v1350_v9, %v1349_v36  ;;  %v1526_v7 = vrot.slane %v1525_v13, 2  ;;  %v1691_v54 = vrot.slane %v1690_v22, 4  ;;  %v1355_v11 = vsel %vm248_vm0, %v1290_v26, 0.0  ;;  %v5233_v26 = vld [vmem:[#allocation10] sm:$0x3] }
 0x235   :  { %v5212_v62 = vsel %vm1905_vm4, %v1511_v3, %v5119_v0  ;;  %v1519_v31 = vrot.slane %v1518_v44, 1  ;;  %v5214_v27 = vadd.f32 %v1684_v25, %v1683_v63  ;;  %v1354_v2 = vsel %vm248_vm0, %v1289_v57, 0.0 }
 0x236   :  { %v1692_v33 = vadd.f32 %v1691_v54, %v1690_v22  ;;  %v1867_v23 = vrot.slane %v1866_v17, 4  ;;  %v1356_v15 = vadd.f32 %v1355_v11, %v1354_v2  ;;  %v5218_v56 = vadd.f32 %v1677_v30, %v1676_v53  ;;  %v5594_v54 = vld [vmem:[#allocation25_spill] sm:$0xff] }
 0x237   :  { %v5220_v36 = vadd.f32 %v1343_v32, %v1342_v48  ;;  %v5222_v16 = vadd.f32 %v1860_v12, %v1859_v21  ;;  %v1466_v0 = vmul.f32 %v5171_v39, %v5592_v35  ;;  %v1352_v4 = vrot.slane %v1351_v10, 1 }
 0x238   :  { %v1527_v3 = vadd.f32 %v1526_v7, %v1525_v13  ;;  %v1357_v63 = vrot.slane %v1356_v15, 4  ;;  %v1465_v55 = vmul.f32 %v5173_v24, %v5593_v37  ;;  %v5228_v25 = vadd.f32 %v1519_v31, %v1518_v44 }
 0x239   :  { %v1531_v48 = vsel %vm248_vm0, %v1466_v0, 0.0  ;;  %v1640_v21 = vmul.f32 %v1615_v19, %v5590_v38  ;;  %v1693_v9 = vrot.slane %v1692_v33, 2  ;;  %v1868_v22 = vadd.f32 %v1867_v23, %v1866_v17 }
 0x23a   :  { %v1358_v39 = vadd.f32 %v1357_v63, %v1356_v15  ;;  %v1530_v13 = vsel %vm248_vm0, %v1465_v55, 0.0  ;;  %v1639_v44 = vmul.f32 %v5191_v28, %v5591_v61  ;;  %v1353_v12 = vadd.f32 %v1352_v4, %v1351_v10  ;;  %v1802_v55 = vpop.permute.xlu1 %1801 }
 0x23b   :  { %v1532_v24 = vadd.f32 %v1531_v48, %v1530_v13  ;;  %v1698_v32 = vsel %vm248_vm0, %v1640_v21, 0.0  ;;  %v1528_v57 = vrot.slane %v1527_v3, 1  ;;  %v1816_v19 = vmul.f32 %v1791_v1, %v5590_v38  ;;  %v1798_v48 = vpop.permute.xlu0 %1797 }
 0x23c   :  { %v1359_v7 = vrot.slane %v1358_v39, 2  ;;  %v1697_v31 = vsel %vm248_vm0, %v1639_v44, 0.0  ;;  %v1815_v2 = vmul.f32 %v1787_v34, %v5591_v61  ;;  %v1694_v23 = vadd.f32 %v1693_v9, %v1692_v33 }
 0x23d   :  { %v1533_v11 = vrot.slane %v1532_v24, 4  ;;  %v1869_v15 = vrot.slane %v1868_v22, 2  ;;  %v1699_v63 = vadd.f32 %v1698_v32, %v1697_v31  ;;  %v1874_v10 = vsel %vm248_vm0, %v1816_v19, 0.0 }
 0x23e   :  { %v1360_v0 = vadd.f32 %v1359_v7, %v1358_v39  ;;  %v1873_v4 = vsel %vm248_vm0, %v1815_v2, 0.0  ;;  %v1642_v1 = vmul.f32 %v1626_v58, %v5592_v35  ;;  %v1641_v44 = vmul.f32 %v1622_v18, %v5593_v37 }
 0x23f   :  { %v1534_v28 = vadd.f32 %v1533_v11, %v1532_v24  ;;  %v1700_v13 = vrot.slane %v1699_v63, 4  ;;  %v1875_v17 = vadd.f32 %v1874_v10, %v1873_v4  ;;  %v1818_v33 = vmul.f32 %v1802_v55, %v5592_v35 }
 0x240   :  { %v1361_v21 = vrot.slane %v1360_v0, 1  ;;  %v1707_v34 = vsel %vm248_vm0, %v1642_v1, 0.0  ;;  %v1817_v9 = vmul.f32 %v1798_v48, %v5593_v37  ;;  %v1870_v39 = vadd.f32 %v1869_v15, %v1868_v22 }
 0x241   :  { %v1535_v30 = vrot.slane %v1534_v28, 2  ;;  %v1701_v24 = vadd.f32 %v1700_v13, %v1699_v63  ;;  %v1876_v32 = vrot.slane %v1875_v17, 4  ;;  %v1706_v7 = vsel %vm248_vm0, %v1641_v44, 0.0 }
 0x242   :  { %v1708_v11 = vadd.f32 %v1707_v34, %v1706_v7  ;;  %v1883_v58 = vsel %vm248_vm0, %v1818_v33, 0.0  ;;  %v1882_v31 = vsel %vm248_vm0, %v1817_v9, 0.0  ;;  %v1529_v2 = vadd.f32 %v1528_v57, %v1527_v3 }
 0x243   :  { %v1536_v19 = vadd.f32 %v1535_v30, %v1534_v28  ;;  %v1702_v18 = vrot.slane %v1701_v24, 2  ;;  %v1877_v10 = vadd.f32 %v1876_v32, %v1875_v17  ;;  %v1884_v4 = vadd.f32 %v1883_v58, %v1882_v31 }
 0x244   :  { %v1695_v1 = vrot.slane %v1694_v23, 1  ;;  %v1362_v53 = vadd.f32 %v1361_v21, %v1360_v0  ;;  %v1709_v6 = vrot.slane %v1708_v11, 4  ;;  %v1871_v48 = vrot.slane %v1870_v39, 1 }
 0x245   :  { %v1537_v55 = vrot.slane %v1536_v19, 1  ;;  %v1703_v22 = vadd.f32 %v1702_v18, %v1701_v24  ;;  %v1878_v15 = vrot.slane %v1877_v10, 2  ;;  %v1885_v63 = vrot.slane %v1884_v4, 4 }
 0x246   :  { %v1710_v44 = vadd.f32 %v1709_v6, %v1708_v11  ;;  %v1974_v30 = vsel %vm1907_vm5, %v5220_v36, %v5185_v45  ;;  %v1990_v3 = vsel %vm1907_vm5, %v5228_v25, %v5212_v62  ;;  %v5595_v9 = vrot.slane %v5203_v43, 1 }
 0x247   :  { %v1538_v13 = vadd.f32 %v1537_v55, %v1536_v19  ;;  %v1879_v57 = vadd.f32 %v1878_v15, %v1877_v10  ;;  %v1886_v17 = vadd.f32 %v1885_v63, %v1884_v4  ;;  %v1975_v0 = vsel %vm1909_vm6, %v1353_v12, %v1974_v30  ;;  %v5599_v4 = vld [vmem:[#allocation24_spill] sm:$0xff] }
 0x248   :  { %v1991_v28 = vsel %vm1909_vm6, %v1529_v2, %v1990_v3  ;;  %v1704_v21 = vrot.slane %v1703_v22, 1  ;;  %v1711_v34 = vrot.slane %v1710_v44, 2  ;;  %v1976_v33 = vsel %vm1911_vm7, %v1362_v53, %v1975_v0  ;;  %v3688_v0 = vld [vmem:[%s5442_s9 + $0x10] sm:$0xff]  }
 0x249   :  { %v1992_v6 = vsel %vm1911_vm7, %v1538_v13, %v1991_v28  ;;  %v1854_v45 = vadd.f32 %v5595_v9, %v5203_v43  ;;  %v1880_v36 = vrot.slane %v1879_v57, 1  ;;  %v1887_v24 = vrot.slane %v1886_v17, 2  ;;  %v3689_v28 = vld [vmem:[%s5442_s9 + $0x18] sm:$0xff]  }
 0x24a   :  { %v2028_v32 = vpack.c.bf16 %v1992_v6, %v1976_v33  ;;  %v5596_v62 = vrot.slane %v5214_v27, 1  ;;  %v5597_v12 = vrot.slane %v5222_v16, 1  ;;  %v1712_v19 = vadd.f32 %v1711_v34, %v1710_v44  ;;  %v3691_v34 = vld [vmem:[%s5442_s9 + $0x28] sm:$0xff]   ;;  %v3692_v33 = vld [vmem:[%s5442_s9 + $0x30] sm:$0xff]   ;;  %v3693_v6 = vld [vmem:[%s5442_s9 + $0x38] sm:$0xff]  }
 0x24b   :  { %v1696_v11 = vadd.f32 %v1695_v1, %v1694_v23  ;;  %v1872_v53 = vadd.f32 %v1871_v48, %v1870_v39  ;;  %v5598_v58 = vrot.slane %v5233_v26, %v5594_v54  ;;  %v1888_v43 = vadd.f32 %v1887_v24, %v1886_v17 }
 0x24c   :  { %v1687_v25 = vadd.f32 %v5596_v62, %v5214_v27  ;;  %v1863_v7 = vadd.f32 %v5597_v12, %v5222_v16  ;;  %3480 = vmatprep.mubr.msk.bf16.mxu1 %vm248_vm0, %v2028_v32  ;;  %v1705_v2 = vadd.f32 %v1704_v21, %v1703_v22  ;;  %v1881_v18 = vadd.f32 %v1880_v36, %v1879_v57  ;;  %v3686_v57 = vld [vmem:[%s5442_s9] sm:$0xff]  }
 0x24d   :  { %v3537_v31 = vadd.f32 %v5074_v8, %v5598_v58  ;;  %v1713_v10 = vrot.slane %v1712_v19, 1  ;;  %v2004_v27 = vsel %vm1903_vm3, %v5218_v56, %v5132_v49  ;;  %v2020_v16 = vsel %vm1903_vm3, %v1854_v45, %v5148_v14  ;;  %v3690_v21 = vld [vmem:[%s5442_s9 + $0x20] sm:$0xff]  }
 0x24e   :  { %v1889_v23 = vrot.slane %v1888_v43, 1  ;;  %v2005_v39 = vsel %vm1905_vm4, %v1687_v25, %v2004_v27  ;;  %v2021_v54 = vsel %vm1905_vm4, %v1863_v7, %v2020_v16  ;;  %v2219_v8 = vrot.slane %v5233_v26, %v5599_v4 }
 0x24f   :  { %v1714_v1 = vadd.f32 %v1713_v10, %v1712_v19  ;;  %v2643_v55 = vmax.f32 %v3537_v31, 0.0  ;;  %v2006_v22 = vsel %vm1907_vm5, %v1696_v11, %v2005_v39  ;;  %v2022_v15 = vsel %vm1907_vm5, %v1872_v53, %v2021_v54 }
 0x250   :  { %v1890_v48 = vadd.f32 %v1889_v23, %v1888_v43  ;;  %v2007_v49 = vsel %vm1909_vm6, %v1705_v2, %v2006_v22  ;;  %v2023_v56 = vsel %vm1909_vm6, %v1881_v18, %v2022_v15  ;;  %v3536_v13 = vadd.f32 %v5069_v40, %v2219_v8  ;;  %v3687_v40 = vld [vmem:[%s5442_s9 + $0x8] sm:$0xff]  }
 0x251   :  { %v2008_v14 = vsel %vm1911_vm7, %v1714_v1, %v2007_v49  ;;  %v2645_v30 = vpack.c.bf16 %v2643_v55, %v2643_v55  ;;  %v3947_v17 = vmov 0.0   ;;  %v386_v2 = vsel %vm248_vm0, %v4521_v20, 0.0 }
 0x252   :  { %v2024_v63 = vsel %vm1911_vm7, %v1890_v48, %v2023_v56  ;;  %v2642_v26 = vmax.f32 %v3536_v13, 0.0  ;;  %3484 = vmatprep.subr.bf16.mxu1 %v3947_v17  ;;  %v387_v18 = vsel %vm248_vm0, %v4553_v47, 0.0  ;;  %v395_v10 = vsel %vm248_vm0, %v4503_v29, 0.0 }
 0x253   :  { %v2029_v44 = vpack.c.bf16 %v2024_v63, %v2008_v14  ;;  %v396_v27 = vsel %vm248_vm0, %v4545_v46, 0.0  ;;  %v388_v16 = vadd.f32 %v387_v18, %v386_v2  ;;  %v404_v39 = vsel %vm248_vm0, %v4599_v41, 0.0 }
 0x254   :  { %v2644_v3 = vpack.c.bf16 %v2642_v26, %v2642_v26  ;;  %v397_v23 = vadd.f32 %v396_v27, %v395_v10  ;;  %v405_v54 = vsel %vm248_vm0, %v4621_v52, 0.0  ;;  %v413_v20 = vsel %vm248_vm0, %v5556_v59, 0.0 }
 0x255   :  { %3481 = vmatmul.mubr.msk.bf16.gmra.mrb[4].mxu1 %vm248_vm0, %v2029_v44  ;;  %v389_v4 = vrot.slane %v388_v16, 4  ;;  %v406_v8 = vadd.f32 %v405_v54, %v404_v39  ;;  %v414_v47 = vsel %vm248_vm0, %v4613_v51, 0.0  ;;  %v422_v46 = vsel %vm248_vm0, %v5576_v5, 0.0 }
 0x256   :  { %2813 = vmatprep.mubr.bf16.mxu1 %v2645_v30  ;;  %v398_v29 = vrot.slane %v397_v23, 4  ;;  %v415_v1 = vadd.f32 %v414_v47, %v413_v20  ;;  %v423_v55 = vsel %vm248_vm0, %v5573_v50, 0.0  ;;  %v431_v15 = vsel %vm248_vm0, %v5588_v60, 0.0 }
 0x257   :  { %v390_v41 = vadd.f32 %v389_v4, %v388_v16  ;;  %v407_v48 = vrot.slane %v406_v8, 4  ;;  %v424_v52 = vadd.f32 %v423_v55, %v422_v46  ;;  %v432_v59 = vsel %vm248_vm0, %v5586_v42, 0.0 }
 0x258   :  { %v399_v22 = vadd.f32 %v398_v29, %v397_v23  ;;  %v416_v49 = vrot.slane %v415_v1, 4  ;;  %v433_v63 = vadd.f32 %v432_v59, %v431_v15  ;;  %v440_v5 = vsel %vm248_vm0, %v5591_v61, 0.0 }
 0x259   :  { %v391_v51 = vrot.slane %v390_v41, 2  ;;  %v408_v56 = vadd.f32 %v407_v48, %v406_v8  ;;  %v441_v50 = vsel %vm248_vm0, %v5590_v38, 0.0  ;;  %v425_v13 = vrot.slane %v424_v52, 4 }
 0x25a   :  { %v400_v14 = vrot.slane %v399_v22, 2  ;;  %v417_v44 = vadd.f32 %v416_v49, %v415_v1  ;;  %v442_v26 = vadd.f32 %v441_v50, %v440_v5  ;;  %v449_v60 = vsel %vm248_vm0, %v5593_v37, 0.0 }
 0x25b   :  { %v409_v30 = vrot.slane %v408_v56, 2  ;;  %v450_v42 = vsel %vm248_vm0, %v5592_v35, 0.0 }
 0x25d   :  { %2814 = vmatmul.mubr.bf16.vlgmr.msra.gmra.mrb[8].mxu1 %v2644_v3  ;;  %v392_v3 = vadd.f32 %v391_v51, %v390_v41  ;;  %v410_v61 = vadd.f32 %v409_v30, %v408_v56 }
 0x25e   :  { %3485 = vmatpush3.bf16.msra.mxu1 %v3686_v57  ;;  %3500 = vmatprep.mubr.msk.bf16.mxu1 %vm3948_vm8, %v3947_v17  ;;  %v401_v57 = vadd.f32 %v400_v14, %v399_v22 }
 0x25f   :  { %3486 = vmatprep.subr.bf16.mxu1 %v3947_v17 }
 0x260   :  { %v402_v38 = vrot.slane %v401_v57, 1 }
 0x262   :  { %3487 = vmatpush3.bf16.msra.mxu1 %v3687_v40  ;;  %v434_v40 = vrot.slane %v433_v63, 4 }
 0x263   :  { %3488 = vmatprep.subr.bf16.mxu1 %v3947_v17 }
 0x266   :  { %3489 = vmatpush3.bf16.msra.mxu1 %v3688_v0  ;;  %v426_v0 = vadd.f32 %v425_v13, %v424_v52 }
 0x267   :  { %3490 = vmatprep.subr.bf16.mxu1 %v3947_v17 }
 0x26a   :  { %3491 = vmatpush3.bf16.msra.mxu1 %v3689_v28  ;;  %v418_v28 = vrot.slane %v417_v44, 2 }
 0x26b   :  { %3492 = vmatprep.subr.bf16.mxu1 %v3947_v17 }
 0x26e   :  { %3493 = vmatpush3.bf16.msra.mxu1 %v3690_v21  ;;  %v451_v21 = vadd.f32 %v450_v42, %v449_v60 }
 0x26f   :  { %3494 = vmatprep.subr.bf16.mxu1 %v3947_v17 }
 0x272   :  { %3495 = vmatpush3.bf16.msra.mxu1 %v3691_v34  ;;  %v443_v34 = vrot.slane %v442_v26, 4 }
 0x273   :  { %3496 = vmatprep.subr.bf16.mxu1 %v3947_v17 }
 0x276   :  { %3497 = vmatpush3.bf16.msra.mxu1 %v3692_v33  ;;  %v393_v33 = vrot.slane %v392_v3, 1 }
 0x277   :  { %3498 = vmatprep.subr.bf16.mxu1 %v3947_v17 }
 0x278   :  { %v394_v37 = vadd.f32 %v393_v33, %v392_v3 }
 0x27a   :  { %3499 = vmatpush3.bf16.msra.mxu1 %v3693_v6  ;;  %v435_v6 = vadd.f32 %v434_v40, %v433_v63 }
 0x27b   :  { %3504 = vmatprep.subr.bf16.mxu1 %v3947_v17 }
 0x2de   :  { %v3478_v9 = vpop.f32.mrb[0].mxu1 }
 0x2df   :  { %v2092_v45 = vpop.f32.mrb[1].mxu1  ;;  %v2125_v62 = vmax.f32 %v3478_v9, 0.0  ;;  %v427_v9 = vrot.slane %v426_v0, 2 }
 0x2e0   :  { %v2123_v36 = vmax.f32 %v2092_v45, 0.0  ;;  %v3479_v24 = vpop.f32.mrb[2].mxu1  ;;  %v419_v45 = vadd.f32 %v418_v28, %v417_v44 }
 0x2e1   :  { %v2095_v32 = vpop.f32.mrb[3].mxu1  ;;  %v2126_v7 = vmax.f32 %v3479_v24, 0.0  ;;  %v2134_v53 = vsel %vm248_vm0, %v2125_v62, 0.0  ;;  %v411_v24 = vrot.slane %v410_v61, 1  ;;  %v403_v62 = vadd.f32 %v402_v38, %v401_v57 }
 0x2e2   :  { %v2124_v25 = vmax.f32 %v2095_v32, 0.0  ;;  %v2131_v12 = vsel %vm248_vm0, %v2123_v36, 0.0  ;;  %v452_v36 = vrot.slane %v451_v21, 4  ;;  %v444_v32 = vadd.f32 %v443_v34, %v442_v26 }
 0x2e3   :  { %v2136_v31 = vsel %vm248_vm0, %v2126_v7, 0.0  ;;  %v428_v35 = vadd.f32 %v427_v9, %v426_v0 }
 0x2e4   :  { %v2132_v19 = vsel %vm248_vm0, %v2124_v25, 0.0  ;;  %v436_v25 = vrot.slane %v435_v6, 2  ;;  %v453_v7 = vadd.f32 %v452_v36, %v451_v21 }
 0x2e5   :  { %v2133_v11 = vadd.f32 %v2132_v19, %v2131_v12  ;;  %v420_v12 = vrot.slane %v419_v45, 1  ;;  %v412_v19 = vadd.f32 %v411_v24, %v410_v61  ;;  %v429_v2 = vrot.slane %v428_v35, 1 }
 0x2e6   :  { %v454_v10 = vrot.slane %v453_v7, 2 }
 0x2e7   :  { %v2135_v58 = vadd.f32 %v2134_v53, %v2133_v11  ;;  %v445_v11 = vrot.slane %v444_v32, 2  ;;  %v437_v53 = vadd.f32 %v436_v25, %v435_v6  ;;  %v421_v18 = vadd.f32 %v420_v12, %v419_v45  ;;  %v3334_v6 = vld [vmem:[%s5441_s8] ss:$0 sm:$0xff] }
 0x2e8   :  { %v461_v16 = vmul.f32 0.0625, %v412_v19  ;;  %v430_v4 = vadd.f32 %v429_v2, %v428_v35  ;;  %v455_v8 = vadd.f32 %v454_v10, %v453_v7 }
 0x2e9   :  { %v5335_v43 = vadd.f32 %v2136_v31, %v2135_v58  ;;  %v459_v58 = vmul.f32 0.0625, %v394_v37  ;;  %v460_v31 = vmul.f32 0.0625, %v403_v62  ;;  %v446_v27 = vadd.f32 %v445_v11, %v444_v32 }
 0x2ea   :  { %v438_v23 = vrot.slane %v437_v53, 1  ;;  %v462_v20 = vmul.f32 0.0625, %v421_v18  ;;  %v2941_v29 = vpack.c.bf16 %v461_v16, %v461_v16  ;;  %v463_v48 = vmul.f32 0.0625, %v430_v4 }
 0x2eb   :  { %v2939_v39 = vpack.c.bf16 %v459_v58, %v459_v58  ;;  %v2940_v54 = vpack.c.bf16 %v460_v31, %v460_v31  ;;  %v447_v47 = vrot.slane %v446_v27, 1  ;;  %v456_v52 = vrot.slane %v455_v8, 1  ;;  %v3694_v58 = vld [vmem:[#allocation14] sm:$0xff]  }
 0x2ec   :  { %v439_v1 = vadd.f32 %v438_v23, %v437_v53  ;;  %v2942_v15 = vpack.c.bf16 %v462_v20, %v462_v20  ;;  %v2961_v56 = vunpack.c.l.b16 %v2941_v29  ;;  %v2943_v30 = vpack.c.bf16 %v463_v48, %v463_v48  ;;  %v3696_v23 = vld [vmem:[%s5444_s11] sm:$0xff]  }
 0x2ed   :  { %v2959_v46 = vunpack.c.l.b16 %v2939_v39  ;;  %v2960_v55 = vunpack.c.l.b16 %v2940_v54  ;;  %v448_v51 = vadd.f32 %v447_v47, %v446_v27  ;;  %v457_v60 = vadd.f32 %v456_v52, %v455_v8  ;;  %v3695_v27 = vld [vmem:[#allocation14 + $0x8] sm:$0xff]   ;;  %v3698_v8 = vld [vmem:[%s5446_s13] sm:$0xff]  }
 0x2ee   :  { %v464_v63 = vmul.f32 0.0625, %v439_v1  ;;  %v2962_v42 = vunpack.c.l.b16 %v2942_v15  ;;  %v2963_v33 = vunpack.c.l.b16 %v2943_v30  ;;  %v3697_v54 = vld [vmem:[%s5444_s11 + $0x8] sm:$0xff]   ;;  %v3351_v29 = vld [vmem:[#allocation13] ss:$0 sm:$0xff]  ;;  %v3369_v30 = vld [vmem:[%s5447_s14] ss:$0 sm:$0xff] }
 0x2ef   :  { %v2967_v5 = vsel %vm1899_vm1, %v2960_v55, %v2959_v46  ;;  %v465_v40 = vmul.f32 0.0625, %v448_v51  ;;  %v466_v9 = vmul.f32 0.0625, %v457_v60  ;;  %v3699_v47 = vld [vmem:[%s5446_s13 + $0x8] sm:$0xff]   ;;  %s3900_s14 = scalar_lea.vmem %s3230_s15, 128 }
 0x2f0   :  { %v2968_v0 = vsel %vm1901_vm2, %v2961_v56, %v2967_v5  ;;  %v2944_v21 = vpack.c.bf16 %v464_v63, %v464_v63  ;;  %p3901_p2 = scmp.ne.s32.totalorder %s3230_s15, %s3900_s14  ;;  %p3906_p4 = scmp.lt.s32.totalorder %s3900_s14, %s3900_s14 }
 0x2f1   :  { %v2969_v45 = vsel %vm1903_vm3, %v2962_v42, %v2968_v0  ;;  %v2945_v37 = vpack.c.bf16 %v465_v40, %v465_v40  ;;  %v2946_v19 = vpack.c.bf16 %v466_v9, %v466_v9 }
 0x2f2   :  { %v2964_v35 = vunpack.c.l.b16 %v2944_v21  ;;  %v2970_v7 = vsel %vm1905_vm4, %v2963_v33, %v2969_v45  ;;  %p3907_p5 = por %p3906_p4, %p3905_p3 }
 0x2f3   :  { %v2965_v53 = vunpack.c.l.b16 %v2945_v37  ;;  %v2966_v18 = vunpack.c.l.b16 %v2946_v19 }
 0x2f4   :  { %v2971_v31 = vsel %vm1907_vm5, %v2964_v35, %v2970_v7  ;;  %p3908_p6 = pnand %p3907_p5, %p3901_p2 }
 0x2f5   :  { %v2972_v10 = vsel %vm1909_vm6, %v2965_v53, %v2971_v31 }
 0x2f6   :  { %v2973_v16 = vsel %vm1911_vm7, %v2966_v18, %v2972_v10 }
 0x2f7   :  { %v2974_v39 = vpack.c.b16 %v2973_v16, %v2973_v16 }
 0x328   :  { %v3482_v41 = vpop.f32.mrb[4].mxu1 }
 0x329   :  { %v2108_v22 = vpop.f32.mrb[5].mxu1  ;;  %v2129_v50 = vmax.f32 %v3482_v41, 0.0 }
 0x32a   :  { %v2127_v59 = vmax.f32 %v2108_v22, 0.0  ;;  %v3483_v49 = vpop.f32.mrb[6].mxu1 }
 0x32b   :  { %v2111_v14 = vpop.f32.mrb[7].mxu1  ;;  %v2130_v3 = vmax.f32 %v3483_v49, 0.0  ;;  %v2142_v61 = vsel %vm248_vm0, %v2129_v50, 0.0  ;;  %v3700_v50 = vld [vmem:[#allocation16] sm:$0xff]  }
 0x32c   :  { %v2138_v13 = vsel %vm248_vm0, %v2127_v59, 0.0  ;;  %v2128_v44 = vmax.f32 %v2111_v14, 0.0 }
 0x32d   :  { %v2139_v26 = vadd.f32 %v2138_v13, %v5335_v43  ;;  %v2144_v36 = vsel %vm248_vm0, %v2130_v3, 0.0  ;;  %v3701_v13 = vld [vmem:[#allocation16 + $0x8] sm:$0xff]  }
 0x32e   :  { %v2140_v57 = vsel %vm248_vm0, %v2128_v44, 0.0 }
 0x32f   :  { %v2141_v28 = vadd.f32 %v2140_v57, %v2139_v26 }
 0x330   :  { %v3425_v34 = vpop.f32.mrb[8].mxu1 }
 0x331   :  { %v2143_v38 = vadd.f32 %v2142_v61, %v2141_v28  ;;  %v3426_v43 = vpop.f32.mrb[9].mxu1  ;;  %v3370_v28 = vld [vmem:[%s5449_s16] ss:$0 sm:$0xff] }
 0x332   :  { %v3427_v24 = vadd.f32 %v3426_v43, %v3425_v34  ;;  %v3428_v32 = vpop.f32.mrb[10].mxu1 }
 0x333   :  { %v2145_v62 = vadd.f32 %v2144_v36, %v2143_v38  ;;  %v3429_v25 = vpop.f32.mrb[11].mxu1 }
 0x334   :  { %v2816_v12 = vadd.f32 %v3427_v24, %v3334_v6 }
 0x335   :  { %v2147_v4 = vmul.f32 0.125, %v2145_v62 }
 0x336   :  { %v2821_v11 = vmax.f32 %v2816_v12, 0.0 }
 0x337   :  { %v2934_v20 = vpack.c.bf16 %v2147_v4, %v2147_v4 }
 0x338   :  { %v2822_v2 = vpack.c.bf16 %v2821_v11, %v2821_v11 }
 0x33a   :  { %3501 = vmatmul.mubr.bf16.vlgmr.msra.gmra.mrb[12].mxu1 %v2822_v2 }
 0x33b   :  { %3505 = vmatpush3.bf16.msra.mxu1 %v3694_v58  ;;  %3508 = vmatprep.mubr.msk.bf16.mxu1 %vm3948_vm8, %v3947_v17 }
 0x33c   :  { %3506 = vmatprep.subr.bf16.mxu1 %v3947_v17 }
 0x33f   :  { %3507 = vmatpush3.bf16.msra.mxu1 %v3695_v27 }
 0x340   :  { %3512 = vmatprep.subr.bf16.mxu1 %v3947_v17 }
 0x342   :  { %3509 = vmatmul.mubr.msk.bf16.vlgmr.msra.gmra.mrb[16].mxu1 %vm248_vm0, %v2974_v39 }
 0x343   :  { %3513 = vmatpush3.bf16.msra.mxu1 %v3696_v23  ;;  %3516 = vmatprep.mubr.msk.bf16.mxu1 %vm3948_vm8, %v3947_v17 }
 0x344   :  { %3514 = vmatprep.subr.bf16.mxu1 %v3947_v17 }
 0x347   :  { %3515 = vmatpush3.bf16.msra.mxu1 %v3697_v54 }
 0x348   :  { %3520 = vmatprep.subr.bf16.mxu1 %v3947_v17 }
 0x34a   :  { %3517 = vmatmul.mubr.msk.bf16.vlgmr.msra.gmra.mrb[20].mxu1 %vm248_vm0, %v2934_v20 }
 0x34b   :  { %3521 = vmatpush3.bf16.msra.mxu1 %v3698_v8  ;;  %3524 = vmatprep.mubr.msk.bf16.mxu1 %vm3948_vm8, %v3947_v17 }
 0x34c   :  { %3522 = vmatprep.subr.bf16.mxu1 %v3947_v17 }
 0x34f   :  { %3523 = vmatpush3.bf16.msra.mxu1 %v3699_v47 }
 0x350   :  { %3528 = vmatprep.subr.bf16.mxu1 %v3947_v17 }
 0x40d   :  { %v2928_v1 = vpop.f32.mrb[12].mxu1 }
 0x40e   :  { %v2929_v46 = vadd.f32 %v3351_v29, %v2928_v1  ;;  %v3502_v55 = vpop.f32.mrb[13].mxu1 }
 0x40f   :  { %v2931_v41 = vpop.f32.mrb[14].mxu1 }
 0x410   :  { %v3085_v48 = vpack.c.bf16 %v2929_v46, %v2929_v46  ;;  %v3503_v22 = vpop.f32.mrb[15].mxu1 }
 0x412   :  { %3525 = vmatmul.mubr.msk.bf16.vlgmr.msra.gmra.mrb[24].mxu1 %vm248_vm0, %v3085_v48 }
 0x413   :  { %3532 = vmatprep.mubr.msk.bf16.mxu1 %vm3948_vm8, %v3947_v17  ;;  %3529 = vmatpush3.bf16.msra.mxu1 %v3700_v50 }
 0x414   :  { %3530 = vmatprep.subr.bf16.mxu1 %v3947_v17 }
 0x415   :  { %v3024_v52 = vpop.f32.mrb[16].mxu1 }
 0x416   :  { %v3510_v15 = vpop.f32.mrb[17].mxu1 }
 0x417   :  { %v3027_v59 = vpop.f32.mrb[18].mxu1  ;;  %3531 = vmatpush3.bf16.msra.mxu1 %v3701_v13 }
 0x418   :  { %v3511_v49 = vpop.f32.mrb[19].mxu1 }
 0x41d   :  { %v3079_v51 = vpop.f32.mrb[20].mxu1 }
 0x41e   :  { %v3080_v56 = vadd.f32 %v3079_v51, %v3024_v52  ;;  %v3518_v14 = vpop.f32.mrb[21].mxu1 }
 0x41f   :  { %v3082_v63 = vpop.f32.mrb[22].mxu1 }
 0x420   :  { %v3519_v5 = vpop.f32.mrb[23].mxu1 }
 0x4e5   :  { %v3139_v44 = vpop.f32.mrb[24].mxu1 }
 0x4e6   :  { %v3145_v26 = vadd.f32 %v3139_v44, %v3080_v56  ;;  %v3526_v60 = vpop.f32.mrb[25].mxu1 }
 0x4e7   :  { %v3142_v42 = vpop.f32.mrb[26].mxu1 }
 0x4e8   :  { %v3153_v3 = vadd.f32 %v3369_v30, %v3145_v26  ;;  %v3527_v57 = vpop.f32.mrb[27].mxu1 }
 0x4ea   :  { %v3154_v40 = vmax.f32 %v3153_v3, 0.0 }
 0x4ec   :  { %v3155_v0 = vpack.c.bf16 %v3154_v40, %v3154_v40 }
 0x4ee   :  { %3533 = vmatmul.mubr.msk.bf16.vlgmr.msra.gmra.mrb[28].mxu1 %vm248_vm0, %v3155_v0 }
 0x5c1   :  { %v3216_v17 = vpop.f32.mrb[28].mxu1 }
 0x5c2   :  { %v3217_v21 = vadd.f32 %v3370_v28, %v3216_v17  ;;  %v3534_v61 = vpop.f32.mrb[29].mxu1 }
 0x5c3   :  { %v3219_v34 = vpop.f32.mrb[30].mxu1 }
 0x5c4   :  { %3222 = vst [vmem:[#allocation17] sm:$0xff] %v3217_v21  ;;  %v3535_v33 = vpop.f32.mrb[31].mxu1 }
 0x5c5   :  { %3911 = shalt.err (!%p3908_p6)
}
 0x5c6   :  { %s3912_s16 = scalar_lea.hbm %s5450_s17, 128 }
 0x5c7   :  { %p3913_p7 = scmp.ne.s32.totalorder %s5450_s17, %s3912_s16  ;;  %p3916_p8 = scmp.lt.u32.totalorder %s3912_s16, %s5450_s17 }
 0x5c9   :  { %p3918_p9 = pnand %p3916_p8, %p3913_p7 }
 0x5cb   :  { %3921 = shalt.err (!%p3918_p9)
}
 0x5cc   :  { %3232 = dma.vmem_to_hbm [thread:$0]  %s3230_s15, 128, %s5450_s17, [#allocation4]  }
 0x5cd   :  { %3932 = dma.done.wait [#allocation4], 128  }
 0x5ce   :  { %3933 = vsyncadd [#allocation4], 4294967168 }
 0x5cf   :  { %3236 = vsyncpa [#allocation3], 1 }
 0x5d0   :  { %3237 = vsyncpa [#allocation6], 1 }
 0x5d1   :  { %3238 = vsyncpa [#allocation9], 1 }
 0x5d2   :  { %3239 = vsyncpa [#allocation12], 1 }
 0x5d3   :  { %3240 = vsyncpa [#allocation15], 1 }
 0x5d4   :  { %3241 = vsyncpa [#allocation4], 1 }

</bundles_post_ra>
